<compile_context>
chip_gen: v7x
topology: tpu7x:2x2x1
jax: 0.10.0
libtpu: 0.0.40
codegen_flags: <defaults>
</compile_context>

<pallas_src>
import functools

import numpy as np
import jax
import jax.numpy as jnp
from jax import lax
from jax.experimental import pallas as pl
from jax.experimental.pallas import tpu as pltpu

LEAKY_SLOPE = 0.01   # nn.LeakyReLU() default negative_slope
IN_EPS = 1e-5        # nn.InstanceNorm2d default eps (affine=False, biased var)

C_PAD = 128          # every channel / reduction dim padded to one lane width
NB = 2               # samples folded per grid step -> M = NB * 64 = 128
HO = WO = 8          # spatial size after the stride-2 first conv (16x16 in)
P = HO * WO          # 64 spatial positions per sample

# (cin, cout, stride, apply_instance_norm_and_leaky_relu)
CONV_CFG = [
    (2, 96, 2, True),
    (96, 64, 1, True),
    (64, 32, 1, True),
    (32, 16, 1, True),
    (16, 2, 1, False),
]


# --------------------------------------------------------------------------
# fused kernel
# --------------------------------------------------------------------------
def _inorm_lrelu(y, nb):
    """InstanceNorm2d(affine=False) per 64-row per-sample slab + LeakyReLU.

    y: (nb*P, C_PAD) f32.  One-pass mean / sum-of-squares, rsqrt on the EUP.
    Zero-padded channels stay exactly zero (mean=var=0 -> 0 * rsqrt(eps) = 0).
    """
    y3 = y.reshape(nb, P, C_PAD)
    s = jnp.sum(y3, axis=1, keepdims=True)
    ss = jnp.sum(y3 * y3, axis=1, keepdims=True)
    mean = s * (1.0 / P)
    var = ss * (1.0 / P) - mean * mean
    y3 = (y3 - mean) * lax.rsqrt(var + IN_EPS)
    y3 = jnp.maximum(y3, LEAKY_SLOPE * y3)          # LeakyReLU(0.01)
    return y3.reshape(nb * P, C_PAD)


def _fused_kernel(p1_ref, w1_ref, s_ref, wl_ref, b_ref, o_ref, *, nb):
    # p1_ref: (nb*P, 128)       layer-1 im2col patches (K=18 zero-padded to 128)
    # w1_ref: (128, 128)        layer-1 weights, (9*cin, cout) zero-padded
    # s_ref : (9*nb*P, nb*P)    9 stacked block-diagonal spatial shift matrices
    # wl_ref: (4, 9, 128, 128)  layers 2..5 per-tap weights, channel-padded
    # b_ref : (8, 128)          biases for layers 1..5 (rows 5..7 zero)
    # o_ref : (nb*P, 128)       layer-5 output (lanes 0..1 are the real channels)
    m = nb * P
    b = b_ref[...]

    # ---- layer 1: stride-2 conv == one (M, 128) x (128, 128) matmul --------
    y = jnp.dot(p1_ref[...], w1_ref[...], preferred_element_type=jnp.float32)
    y = y + b[0:1, :]
    y = _inorm_lrelu(y, nb)

    # ---- layers 2..5: 3x3 / stride-1 conv, in-kernel im2col ----------------
    # z = S_all @ y builds all 9 spatially-shifted (zero-boundary) copies of
    # the activation as plain MXU work; then accumulate the 9 tap matmuls.
    s_all = s_ref[...]
    for l in range(4):
        z = jnp.dot(s_all, y, preferred_element_type=jnp.float32)   # (9*M, 128)
        acc = None
        for k in range(9):
            zk = z[k * m:(k + 1) * m, :]                             # aligned slice
            part = jnp.dot(zk, wl_ref[l, k],
                           preferred_element_type=jnp.float32)
            acc = part if acc is None else acc + part
        y = acc + b[l + 1:l + 2, :]
        if l < 3:                                     # last conv: no norm / act
            y = _inorm_lrelu(y, nb)

    o_ref[...] = y.astype(o_ref.dtype)


def _fused_forward(p1, w1p, s_all, wlp, bp, n):
    kernel = functools.partial(_fused_kernel, nb=NB)
    return pl.pallas_call(
        kernel,
        out_shape=jax.ShapeDtypeStruct((n * P, C_PAD), jnp.float32),
        grid_spec=pltpu.PrefetchScalarGridSpec(
            num_scalar_prefetch=0,
            grid=(n // NB,),
            in_specs=[
                pl.BlockSpec((NB * P, C_PAD), lambda i: (i, 0)),
                pl.BlockSpec((C_PAD, C_PAD), lambda i: (0, 0)),
                pl.BlockSpec((9 * NB * P, NB * P), lambda i: (0, 0)),
                pl.BlockSpec((4, 9, C_PAD, C_PAD), lambda i: (0, 0, 0, 0)),
                pl.BlockSpec((8, C_PAD), lambda i: (0, 0)),
            ],
            out_specs=pl.BlockSpec((NB * P, C_PAD), lambda i: (i, 0)),
        ),
        compiler_params=pltpu.CompilerParams(
            dimension_semantics=("parallel",)),
    )(p1, w1p, s_all, wlp, bp)


# --------------------------------------------------------------------------
# host-side parameter / constant preparation
# --------------------------------------------------------------------------
def _make_shift_mats(nb):
    """(9*nb*P, nb*P) stacked block-diagonal shift matrices for 3x3/pad-1."""
    idx = np.arange(P)
    h, w = idx // WO, idx % WO
    eye = np.eye(nb, dtype=np.float32)
    mats = []
    for dh in (-1, 0, 1):            # tap order matches w.reshape(9, cin, cout)
        for dw in (-1, 0, 1):
            hh, ww = h + dh, w + dw
            valid = (hh >= 0) & (hh < HO) & (ww >= 0) & (ww < WO)
            s = np.zeros((P, P), np.float32)
            s[idx[valid], (hh * WO + ww)[valid]] = 1.0
            mats.append(np.kron(eye, s))    # block-diag over folded samples
    return jnp.asarray(np.concatenate(mats, axis=0))


def init_params(key):
    """Deterministic synthetic init, PyTorch-style uniform bound.

    Weights laid out (kh, kw, cin, cout).
    NOTE: real nn.Conv2d weights are (cout, cin, kh, kw) and must be permuted
    with w.transpose(2, 3, 1, 0) before pack_params, or results will be wrong.
    """
    params = []
    for i, (cin, cout, _, _) in enumerate(CONV_CFG):
        kw_, kb_ = jax.random.split(jax.random.fold_in(key, i))
        bound = 1.0 / ((cin * 9) ** 0.5)
        w = jax.random.uniform(kw_, (3, 3, cin, cout), jnp.float32, -bound, bound)
        b = jax.random.uniform(kb_, (cout,), jnp.float32, -bound, bound)
        params.append((w, b))
    return params


def pack_params(params):
    """Zero-pad channels to 128 lanes and stack into the 3 kernel weight args."""
    w1, b1 = params[0]
    cin0, cout0 = CONV_CFG[0][0], CONV_CFG[0][1]
    w1p = jnp.zeros((C_PAD, C_PAD), jnp.float32)
    w1p = w1p.at[: 9 * cin0, :cout0].set(w1.reshape(9 * cin0, cout0))

    wlp = jnp.zeros((4, 9, C_PAD, C_PAD), jnp.float32)
    bp = jnp.zeros((8, C_PAD), jnp.float32)
    bp = bp.at[0, :cout0].set(b1)
    for l in range(1, 5):
        w, b = params[l]
        cin, cout = CONV_CFG[l][0], CONV_CFG[l][1]
        wlp = wlp.at[l - 1, :, :cin, :cout].set(w.reshape(9, cin, cout))
        bp = bp.at[l, :cout].set(b)

    s_all = _make_shift_mats(NB)
    return w1p, s_all, wlp, bp


def _im2col_stride2(x_nhwc):
    """3x3 / stride-2 / pad-1 patches for layer 1 -> (N*64, 18).  Tiny JAX glue."""
    n, h, w, c = x_nhwc.shape
    xp = jnp.pad(x_nhwc, ((0, 0), (1, 1), (1, 1), (0, 0)))
    ho, wo = h // 2, w // 2
    cols = []
    for dh in range(3):
        for dw in range(3):
            cols.append(xp[:, dh:dh + 2 * ho:2, dw:dw + 2 * wo:2, :])
    patches = jnp.concatenate(cols, axis=-1)        # (n, ho, wo, 9*c)
    return patches.reshape(n * ho * wo, 9 * c)


# --------------------------------------------------------------------------
# forward
# --------------------------------------------------------------------------
@jax.jit
def global_discriminator1_forward(x_nchw, packed):
    w1p, s_all, wlp, bp = packed
    n = x_nchw.shape[0]
    assert n % NB == 0, "batch must be a multiple of NB"

    # cheap one-time glue: NCHW->NHWC, layer-1 im2col, pad K=18 -> 128 lanes
    x = jnp.transpose(x_nchw, (0, 2, 3, 1)).astype(jnp.float32)
    p1 = _im2col_stride2(x)                                   # (n*64, 18)
    p1 = jnp.pad(p1, ((0, 0), (0, C_PAD - p1.shape[1])))      # (n*64, 128)

    y = _fused_forward(p1, w1p, s_all, wlp, bp, n)            # (n*64, 128)

    # PyTorch convs.view(N, -1) flattens NCHW: (n, P, 2) -> (n, 2, P) -> (n, 2*64)
    y = y.reshape(n, P, C_PAD)[:, :, :2]
    return jnp.transpose(y, (0, 2, 1)).reshape(n, 2 * P)


# --------------------------------------------------------------------------
# pure-JAX reference (for correctness check only)
# --------------------------------------------------------------------------
def _reference_forward(x_nchw, params):
    x = jnp.transpose(x_nchw, (0, 2, 3, 1)).astype(jnp.float32)
    for (w, b), (cin, cout, stride, norm_act) in zip(params, CONV_CFG):
        x = lax.conv_general_dilated(
            x, w, window_strides=(stride, stride), padding=((1, 1), (1, 1)),
            dimension_numbers=("NHWC", "HWIO", "NHWC")) + b
        if norm_act:
            mean = jnp.mean(x, axis=(1, 2), keepdims=True)
            var = jnp.mean((x - mean) ** 2, axis=(1, 2), keepdims=True)
            x = (x - mean) * lax.rsqrt(var + IN_EPS)
            x = jnp.where(x >= 0, x, LEAKY_SLOPE * x)
    return jnp.transpose(x, (0, 3, 1, 2)).reshape(x.shape[0], -1)


if __name__ == "__main__":
    key = jax.random.PRNGKey(0)
    pkey, xkey = jax.random.split(key)
    params = init_params(pkey)
    packed = pack_params(params)

    # Input per the module: Conv2d(2, ...) -> 2 input channels; 16x16 spatial.
    x = jax.random.normal(xkey, (2, 2, 16, 16), dtype=jnp.float32)

    out = global_discriminator1_forward(x, packed)
    out = jax.block_until_ready(out)

    assert out.shape == (2, 2 * HO * WO), out.shape
    assert bool(jnp.all(jnp.isfinite(out)))

    ref = _reference_forward(x, params)
    assert jnp.allclose(out, ref, rtol=2e-3, atol=2e-3), (
        "max abs diff vs reference: %g" % float(jnp.max(jnp.abs(out - ref))))

    print("KERNEL_OK")
</pallas_src>

<mosaic_0001>
module attributes {stable_mosaic.version = 11 : i64} {
  func.func @_fused_kernel(%arg0: i32, %arg1: memref<128x128xf32, #tpu.memory_space<vmem>>, %arg2: memref<128x128xf32, #tpu.memory_space<vmem>>, %arg3: memref<1152x128xf32, #tpu.memory_space<vmem>>, %arg4: memref<4x9x128x128xf32, #tpu.memory_space<vmem>>, %arg5: memref<8x128xf32, #tpu.memory_space<vmem>>, %arg6: memref<128x128xf32, #tpu.memory_space<vmem>>) attributes {dimension_semantics = [#tpu.dimension_semantics<parallel>], iteration_bounds = array<i64: 1>, scalar_prefetch = 0 : i64, scratch_operands = 0 : i64, tpu.core_type = #tpu.core_type<tc>, window_params = [{transform_indices = @transform_0, window_bounds = array<i64: 128, 128>}, {pipeline_mode = #tpu.pipeline_mode<synchronous>, transform_indices = @transform_1, window_bounds = array<i64: 128, 128>}, {pipeline_mode = #tpu.pipeline_mode<synchronous>, transform_indices = @transform_2, window_bounds = array<i64: 1152, 128>}, {pipeline_mode = #tpu.pipeline_mode<synchronous>, transform_indices = @transform_3, window_bounds = array<i64: 4, 9, 128, 128>}, {pipeline_mode = #tpu.pipeline_mode<synchronous>, transform_indices = @transform_4, window_bounds = array<i64: 8, 128>}, {transform_indices = @transform_5, window_bounds = array<i64: 128, 128>}]} {
    %c0 = arith.constant 0 : index
    %c0_0 = arith.constant 0 : index
    %0 = vector.load %arg5[%c0, %c0_0] : memref<8x128xf32, #tpu.memory_space<vmem>>, vector<8x128xf32>
    %c0_1 = arith.constant 0 : index
    %c0_2 = arith.constant 0 : index
    %1 = vector.load %arg1[%c0_1, %c0_2] : memref<128x128xf32, #tpu.memory_space<vmem>>, vector<128x128xf32>
    %c0_3 = arith.constant 0 : index
    %c0_4 = arith.constant 0 : index
    %2 = vector.load %arg2[%c0_3, %c0_4] : memref<128x128xf32, #tpu.memory_space<vmem>>, vector<128x128xf32>
    %cst = arith.constant dense<0.000000e+00> : vector<128x128xf32>
    %3 = tpu.matmul %1, %2, %cst {dimension_numbers = #tpu.dot_dimension_numbers<[1], [0], [0], [1], [0, 0, 1, 1], [], []>} : vector<128x128xf32>, vector<128x128xf32>, vector<128x128xf32> -> vector<128x128xf32>
    %4 = vector.extract_strided_slice %0 {offsets = [0, 0], sizes = [1, 128], strides = [1, 1]} : vector<8x128xf32> to vector<1x128xf32>
    %5 = vector.broadcast %4 : vector<1x128xf32> to vector<128x128xf32>
    %6 = arith.addf %3, %5 : vector<128x128xf32>
    %7 = vector.shape_cast %6 : vector<128x128xf32> to vector<2x64x128xf32>
    %cst_5 = arith.constant dense<0.000000e+00> : vector<2x128xf32>
    %8 = vector.multi_reduction <add>, %7, %cst_5 [1] : vector<2x64x128xf32> to vector<2x128xf32>
    %9 = vector.shape_cast %8 : vector<2x128xf32> to vector<2x1x128xf32>
    %10 = arith.mulf %7, %7 : vector<2x64x128xf32>
    %cst_6 = arith.constant dense<0.000000e+00> : vector<2x128xf32>
    %11 = vector.multi_reduction <add>, %10, %cst_6 [1] : vector<2x64x128xf32> to vector<2x128xf32>
    %12 = vector.shape_cast %11 : vector<2x128xf32> to vector<2x1x128xf32>
    %cst_7 = arith.constant 1.562500e-02 : f32
    %13 = vector.broadcast %cst_7 : f32 to vector<2x1x128xf32>
    %14 = arith.mulf %9, %13 : vector<2x1x128xf32>
    %cst_8 = arith.constant 1.562500e-02 : f32
    %15 = vector.broadcast %cst_8 : f32 to vector<2x1x128xf32>
    %16 = arith.mulf %12, %15 : vector<2x1x128xf32>
    %17 = arith.mulf %14, %14 : vector<2x1x128xf32>
    %18 = arith.subf %16, %17 : vector<2x1x128xf32>
    %19 = vector.broadcast %14 : vector<2x1x128xf32> to vector<2x64x128xf32>
    %20 = arith.subf %7, %19 : vector<2x64x128xf32>
    %cst_9 = arith.constant 9.99999974E-6 : f32
    %21 = vector.broadcast %cst_9 : f32 to vector<2x1x128xf32>
    %22 = arith.addf %18, %21 : vector<2x1x128xf32>
    %23 = math.rsqrt %22 : vector<2x1x128xf32>
    %24 = vector.broadcast %23 : vector<2x1x128xf32> to vector<2x64x128xf32>
    %25 = arith.mulf %20, %24 : vector<2x64x128xf32>
    %cst_10 = arith.constant 0.00999999977 : f32
    %26 = vector.broadcast %cst_10 : f32 to vector<2x64x128xf32>
    %27 = arith.mulf %26, %25 : vector<2x64x128xf32>
    %28 = arith.maximumf %25, %27 : vector<2x64x128xf32>
    %29 = vector.shape_cast %28 : vector<2x64x128xf32> to vector<128x128xf32>
    %c0_11 = arith.constant 0 : index
    %c0_12 = arith.constant 0 : index
    %30 = vector.load %arg3[%c0_11, %c0_12] : memref<1152x128xf32, #tpu.memory_space<vmem>>, vector<1152x128xf32>
    %cst_13 = arith.constant dense<0.000000e+00> : vector<1152x128xf32>
    %31 = tpu.matmul %30, %29, %cst_13 {dimension_numbers = #tpu.dot_dimension_numbers<[1], [0], [0], [1], [0, 0, 1, 1], [], []>} : vector<1152x128xf32>, vector<128x128xf32>, vector<1152x128xf32> -> vector<1152x128xf32>
    %32 = vector.extract_strided_slice %31 {offsets = [0, 0], sizes = [128, 128], strides = [1, 1]} : vector<1152x128xf32> to vector<128x128xf32>
    %c0_14 = arith.constant 0 : index
    %c0_15 = arith.constant 0 : index
    %c0_16 = arith.constant 0 : index
    %c0_17 = arith.constant 0 : index
    %33 = vector.load %arg4[%c0_14, %c0_15, %c0_16, %c0_17] : memref<4x9x128x128xf32, #tpu.memory_space<vmem>>, vector<1x1x128x128xf32>
    %34 = vector.shape_cast %33 : vector<1x1x128x128xf32> to vector<128x128xf32>
    %cst_18 = arith.constant dense<0.000000e+00> : vector<128x128xf32>
    %35 = tpu.matmul %32, %34, %cst_18 {dimension_numbers = #tpu.dot_dimension_numbers<[1], [0], [0], [1], [0, 0, 1, 1], [], []>} : vector<128x128xf32>, vector<128x128xf32>, vector<128x128xf32> -> vector<128x128xf32>
    %36 = vector.extract_strided_slice %31 {offsets = [128, 0], sizes = [128, 128], strides = [1, 1]} : vector<1152x128xf32> to vector<128x128xf32>
    %c0_19 = arith.constant 0 : index
    %c1 = arith.constant 1 : index
    %c0_20 = arith.constant 0 : index
    %c0_21 = arith.constant 0 : index
    %37 = vector.load %arg4[%c0_19, %c1, %c0_20, %c0_21] : memref<4x9x128x128xf32, #tpu.memory_space<vmem>>, vector<1x1x128x128xf32>
    %38 = vector.shape_cast %37 : vector<1x1x128x128xf32> to vector<128x128xf32>
    %cst_22 = arith.constant dense<0.000000e+00> : vector<128x128xf32>
    %39 = tpu.matmul %36, %38, %cst_22 {dimension_numbers = #tpu.dot_dimension_numbers<[1], [0], [0], [1], [0, 0, 1, 1], [], []>} : vector<128x128xf32>, vector<128x128xf32>, vector<128x128xf32> -> vector<128x128xf32>
    %40 = arith.addf %35, %39 : vector<128x128xf32>
    %41 = vector.extract_strided_slice %31 {offsets = [256, 0], sizes = [128, 128], strides = [1, 1]} : vector<1152x128xf32> to vector<128x128xf32>
    %c0_23 = arith.constant 0 : index
    %c2 = arith.constant 2 : index
    %c0_24 = arith.constant 0 : index
    %c0_25 = arith.constant 0 : index
    %42 = vector.load %arg4[%c0_23, %c2, %c0_24, %c0_25] : memref<4x9x128x128xf32, #tpu.memory_space<vmem>>, vector<1x1x128x128xf32>
    %43 = vector.shape_cast %42 : vector<1x1x128x128xf32> to vector<128x128xf32>
    %cst_26 = arith.constant dense<0.000000e+00> : vector<128x128xf32>
    %44 = tpu.matmul %41, %43, %cst_26 {dimension_numbers = #tpu.dot_dimension_numbers<[1], [0], [0], [1], [0, 0, 1, 1], [], []>} : vector<128x128xf32>, vector<128x128xf32>, vector<128x128xf32> -> vector<128x128xf32>
    %45 = arith.addf %40, %44 : vector<128x128xf32>
    %46 = vector.extract_strided_slice %31 {offsets = [384, 0], sizes = [128, 128], strides = [1, 1]} : vector<1152x128xf32> to vector<128x128xf32>
    %c0_27 = arith.constant 0 : index
    %c3 = arith.constant 3 : index
    %c0_28 = arith.constant 0 : index
    %c0_29 = arith.constant 0 : index
    %47 = vector.load %arg4[%c0_27, %c3, %c0_28, %c0_29] : memref<4x9x128x128xf32, #tpu.memory_space<vmem>>, vector<1x1x128x128xf32>
    %48 = vector.shape_cast %47 : vector<1x1x128x128xf32> to vector<128x128xf32>
    %cst_30 = arith.constant dense<0.000000e+00> : vector<128x128xf32>
    %49 = tpu.matmul %46, %48, %cst_30 {dimension_numbers = #tpu.dot_dimension_numbers<[1], [0], [0], [1], [0, 0, 1, 1], [], []>} : vector<128x128xf32>, vector<128x128xf32>, vector<128x128xf32> -> vector<128x128xf32>
    %50 = arith.addf %45, %49 : vector<128x128xf32>
    %51 = vector.extract_strided_slice %31 {offsets = [512, 0], sizes = [128, 128], strides = [1, 1]} : vector<1152x128xf32> to vector<128x128xf32>
    %c0_31 = arith.constant 0 : index
    %c4 = arith.constant 4 : index
    %c0_32 = arith.constant 0 : index
    %c0_33 = arith.constant 0 : index
    %52 = vector.load %arg4[%c0_31, %c4, %c0_32, %c0_33] : memref<4x9x128x128xf32, #tpu.memory_space<vmem>>, vector<1x1x128x128xf32>
    %53 = vector.shape_cast %52 : vector<1x1x128x128xf32> to vector<128x128xf32>
    %cst_34 = arith.constant dense<0.000000e+00> : vector<128x128xf32>
    %54 = tpu.matmul %51, %53, %cst_34 {dimension_numbers = #tpu.dot_dimension_numbers<[1], [0], [0], [1], [0, 0, 1, 1], [], []>} : vector<128x128xf32>, vector<128x128xf32>, vector<128x128xf32> -> vector<128x128xf32>
    %55 = arith.addf %50, %54 : vector<128x128xf32>
    %56 = vector.extract_strided_slice %31 {offsets = [640, 0], sizes = [128, 128], strides = [1, 1]} : vector<1152x128xf32> to vector<128x128xf32>
    %c0_35 = arith.constant 0 : index
    %c5 = arith.constant 5 : index
    %c0_36 = arith.constant 0 : index
    %c0_37 = arith.constant 0 : index
    %57 = vector.load %arg4[%c0_35, %c5, %c0_36, %c0_37] : memref<4x9x128x128xf32, #tpu.memory_space<vmem>>, vector<1x1x128x128xf32>
    %58 = vector.shape_cast %57 : vector<1x1x128x128xf32> to vector<128x128xf32>
    %cst_38 = arith.constant dense<0.000000e+00> : vector<128x128xf32>
    %59 = tpu.matmul %56, %58, %cst_38 {dimension_numbers = #tpu.dot_dimension_numbers<[1], [0], [0], [1], [0, 0, 1, 1], [], []>} : vector<128x128xf32>, vector<128x128xf32>, vector<128x128xf32> -> vector<128x128xf32>
    %60 = arith.addf %55, %59 : vector<128x128xf32>
    %61 = vector.extract_strided_slice %31 {offsets = [768, 0], sizes = [128, 128], strides = [1, 1]} : vector<1152x128xf32> to vector<128x128xf32>
    %c0_39 = arith.constant 0 : index
    %c6 = arith.constant 6 : index
    %c0_40 = arith.constant 0 : index
    %c0_41 = arith.constant 0 : index
    %62 = vector.load %arg4[%c0_39, %c6, %c0_40, %c0_41] : memref<4x9x128x128xf32, #tpu.memory_space<vmem>>, vector<1x1x128x128xf32>
    %63 = vector.shape_cast %62 : vector<1x1x128x128xf32> to vector<128x128xf32>
    %cst_42 = arith.constant dense<0.000000e+00> : vector<128x128xf32>
    %64 = tpu.matmul %61, %63, %cst_42 {dimension_numbers = #tpu.dot_dimension_numbers<[1], [0], [0], [1], [0, 0, 1, 1], [], []>} : vector<128x128xf32>, vector<128x128xf32>, vector<128x128xf32> -> vector<128x128xf32>
    %65 = arith.addf %60, %64 : vector<128x128xf32>
    %66 = vector.extract_strided_slice %31 {offsets = [896, 0], sizes = [128, 128], strides = [1, 1]} : vector<1152x128xf32> to vector<128x128xf32>
    %c0_43 = arith.constant 0 : index
    %c7 = arith.constant 7 : index
    %c0_44 = arith.constant 0 : index
    %c0_45 = arith.constant 0 : index
    %67 = vector.load %arg4[%c0_43, %c7, %c0_44, %c0_45] : memref<4x9x128x128xf32, #tpu.memory_space<vmem>>, vector<1x1x128x128xf32>
    %68 = vector.shape_cast %67 : vector<1x1x128x128xf32> to vector<128x128xf32>
    %cst_46 = arith.constant dense<0.000000e+00> : vector<128x128xf32>
    %69 = tpu.matmul %66, %68, %cst_46 {dimension_numbers = #tpu.dot_dimension_numbers<[1], [0], [0], [1], [0, 0, 1, 1], [], []>} : vector<128x128xf32>, vector<128x128xf32>, vector<128x128xf32> -> vector<128x128xf32>
    %70 = arith.addf %65, %69 : vector<128x128xf32>
    %71 = vector.extract_strided_slice %31 {offsets = [1024, 0], sizes = [128, 128], strides = [1, 1]} : vector<1152x128xf32> to vector<128x128xf32>
    %c0_47 = arith.constant 0 : index
    %c8 = arith.constant 8 : index
    %c0_48 = arith.constant 0 : index
    %c0_49 = arith.constant 0 : index
    %72 = vector.load %arg4[%c0_47, %c8, %c0_48, %c0_49] : memref<4x9x128x128xf32, #tpu.memory_space<vmem>>, vector<1x1x128x128xf32>
    %73 = vector.shape_cast %72 : vector<1x1x128x128xf32> to vector<128x128xf32>
    %cst_50 = arith.constant dense<0.000000e+00> : vector<128x128xf32>
    %74 = tpu.matmul %71, %73, %cst_50 {dimension_numbers = #tpu.dot_dimension_numbers<[1], [0], [0], [1], [0, 0, 1, 1], [], []>} : vector<128x128xf32>, vector<128x128xf32>, vector<128x128xf32> -> vector<128x128xf32>
    %75 = arith.addf %70, %74 : vector<128x128xf32>
    %76 = vector.extract_strided_slice %0 {offsets = [1, 0], sizes = [1, 128], strides = [1, 1]} : vector<8x128xf32> to vector<1x128xf32>
    %77 = vector.broadcast %76 : vector<1x128xf32> to vector<128x128xf32>
    %78 = arith.addf %75, %77 : vector<128x128xf32>
    %79 = vector.shape_cast %78 : vector<128x128xf32> to vector<2x64x128xf32>
    %cst_51 = arith.constant dense<0.000000e+00> : vector<2x128xf32>
    %80 = vector.multi_reduction <add>, %79, %cst_51 [1] : vector<2x64x128xf32> to vector<2x128xf32>
    %81 = vector.shape_cast %80 : vector<2x128xf32> to vector<2x1x128xf32>
    %82 = arith.mulf %79, %79 : vector<2x64x128xf32>
    %cst_52 = arith.constant dense<0.000000e+00> : vector<2x128xf32>
    %83 = vector.multi_reduction <add>, %82, %cst_52 [1] : vector<2x64x128xf32> to vector<2x128xf32>
    %84 = vector.shape_cast %83 : vector<2x128xf32> to vector<2x1x128xf32>
    %cst_53 = arith.constant 1.562500e-02 : f32
    %85 = vector.broadcast %cst_53 : f32 to vector<2x1x128xf32>
    %86 = arith.mulf %81, %85 : vector<2x1x128xf32>
    %cst_54 = arith.constant 1.562500e-02 : f32
    %87 = vector.broadcast %cst_54 : f32 to vector<2x1x128xf32>
    %88 = arith.mulf %84, %87 : vector<2x1x128xf32>
    %89 = arith.mulf %86, %86 : vector<2x1x128xf32>
    %90 = arith.subf %88, %89 : vector<2x1x128xf32>
    %91 = vector.broadcast %86 : vector<2x1x128xf32> to vector<2x64x128xf32>
    %92 = arith.subf %79, %91 : vector<2x64x128xf32>
    %cst_55 = arith.constant 9.99999974E-6 : f32
    %93 = vector.broadcast %cst_55 : f32 to vector<2x1x128xf32>
    %94 = arith.addf %90, %93 : vector<2x1x128xf32>
    %95 = math.rsqrt %94 : vector<2x1x128xf32>
    %96 = vector.broadcast %95 : vector<2x1x128xf32> to vector<2x64x128xf32>
    %97 = arith.mulf %92, %96 : vector<2x64x128xf32>
    %cst_56 = arith.constant 0.00999999977 : f32
    %98 = vector.broadcast %cst_56 : f32 to vector<2x64x128xf32>
    %99 = arith.mulf %98, %97 : vector<2x64x128xf32>
    %100 = arith.maximumf %97, %99 : vector<2x64x128xf32>
    %101 = vector.shape_cast %100 : vector<2x64x128xf32> to vector<128x128xf32>
    %cst_57 = arith.constant dense<0.000000e+00> : vector<1152x128xf32>
    %102 = tpu.matmul %30, %101, %cst_57 {dimension_numbers = #tpu.dot_dimension_numbers<[1], [0], [0], [1], [0, 0, 1, 1], [], []>} : vector<1152x128xf32>, vector<128x128xf32>, vector<1152x128xf32> -> vector<1152x128xf32>
    %103 = vector.extract_strided_slice %102 {offsets = [0, 0], sizes = [128, 128], strides = [1, 1]} : vector<1152x128xf32> to vector<128x128xf32>
    %c1_58 = arith.constant 1 : index
    %c0_59 = arith.constant 0 : index
    %c0_60 = arith.constant 0 : index
    %c0_61 = arith.constant 0 : index
    %104 = vector.load %arg4[%c1_58, %c0_59, %c0_60, %c0_61] : memref<4x9x128x128xf32, #tpu.memory_space<vmem>>, vector<1x1x128x128xf32>
    %105 = vector.shape_cast %104 : vector<1x1x128x128xf32> to vector<128x128xf32>
    %cst_62 = arith.constant dense<0.000000e+00> : vector<128x128xf32>
    %106 = tpu.matmul %103, %105, %cst_62 {dimension_numbers = #tpu.dot_dimension_numbers<[1], [0], [0], [1], [0, 0, 1, 1], [], []>} : vector<128x128xf32>, vector<128x128xf32>, vector<128x128xf32> -> vector<128x128xf32>
    %107 = vector.extract_strided_slice %102 {offsets = [128, 0], sizes = [128, 128], strides = [1, 1]} : vector<1152x128xf32> to vector<128x128xf32>
    %c1_63 = arith.constant 1 : index
    %c1_64 = arith.constant 1 : index
    %c0_65 = arith.constant 0 : index
    %c0_66 = arith.constant 0 : index
    %108 = vector.load %arg4[%c1_63, %c1_64, %c0_65, %c0_66] : memref<4x9x128x128xf32, #tpu.memory_space<vmem>>, vector<1x1x128x128xf32>
    %109 = vector.shape_cast %108 : vector<1x1x128x128xf32> to vector<128x128xf32>
    %cst_67 = arith.constant dense<0.000000e+00> : vector<128x128xf32>
    %110 = tpu.matmul %107, %109, %cst_67 {dimension_numbers = #tpu.dot_dimension_numbers<[1], [0], [0], [1], [0, 0, 1, 1], [], []>} : vector<128x128xf32>, vector<128x128xf32>, vector<128x128xf32> -> vector<128x128xf32>
    %111 = arith.addf %106, %110 : vector<128x128xf32>
    %112 = vector.extract_strided_slice %102 {offsets = [256, 0], sizes = [128, 128], strides = [1, 1]} : vector<1152x128xf32> to vector<128x128xf32>
    %c1_68 = arith.constant 1 : index
    %c2_69 = arith.constant 2 : index
    %c0_70 = arith.constant 0 : index
    %c0_71 = arith.constant 0 : index
    %113 = vector.load %arg4[%c1_68, %c2_69, %c0_70, %c0_71] : memref<4x9x128x128xf32, #tpu.memory_space<vmem>>, vector<1x1x128x128xf32>
    %114 = vector.shape_cast %113 : vector<1x1x128x128xf32> to vector<128x128xf32>
    %cst_72 = arith.constant dense<0.000000e+00> : vector<128x128xf32>
    %115 = tpu.matmul %112, %114, %cst_72 {dimension_numbers = #tpu.dot_dimension_numbers<[1], [0], [0], [1], [0, 0, 1, 1], [], []>} : vector<128x128xf32>, vector<128x128xf32>, vector<128x128xf32> -> vector<128x128xf32>
    %116 = arith.addf %111, %115 : vector<128x128xf32>
    %117 = vector.extract_strided_slice %102 {offsets = [384, 0], sizes = [128, 128], strides = [1, 1]} : vector<1152x128xf32> to vector<128x128xf32>
    %c1_73 = arith.constant 1 : index
    %c3_74 = arith.constant 3 : index
    %c0_75 = arith.constant 0 : index
    %c0_76 = arith.constant 0 : index
    %118 = vector.load %arg4[%c1_73, %c3_74, %c0_75, %c0_76] : memref<4x9x128x128xf32, #tpu.memory_space<vmem>>, vector<1x1x128x128xf32>
    %119 = vector.shape_cast %118 : vector<1x1x128x128xf32> to vector<128x128xf32>
    %cst_77 = arith.constant dense<0.000000e+00> : vector<128x128xf32>
    %120 = tpu.matmul %117, %119, %cst_77 {dimension_numbers = #tpu.dot_dimension_numbers<[1], [0], [0], [1], [0, 0, 1, 1], [], []>} : vector<128x128xf32>, vector<128x128xf32>, vector<128x128xf32> -> vector<128x128xf32>
    %121 = arith.addf %116, %120 : vector<128x128xf32>
    %122 = vector.extract_strided_slice %102 {offsets = [512, 0], sizes = [128, 128], strides = [1, 1]} : vector<1152x128xf32> to vector<128x128xf32>
    %c1_78 = arith.constant 1 : index
    %c4_79 = arith.constant 4 : index
    %c0_80 = arith.constant 0 : index
    %c0_81 = arith.constant 0 : index
    %123 = vector.load %arg4[%c1_78, %c4_79, %c0_80, %c0_81] : memref<4x9x128x128xf32, #tpu.memory_space<vmem>>, vector<1x1x128x128xf32>
    %124 = vector.shape_cast %123 : vector<1x1x128x128xf32> to vector<128x128xf32>
    %cst_82 = arith.constant dense<0.000000e+00> : vector<128x128xf32>
    %125 = tpu.matmul %122, %124, %cst_82 {dimension_numbers = #tpu.dot_dimension_numbers<[1], [0], [0], [1], [0, 0, 1, 1], [], []>} : vector<128x128xf32>, vector<128x128xf32>, vector<128x128xf32> -> vector<128x128xf32>
    %126 = arith.addf %121, %125 : vector<128x128xf32>
    %127 = vector.extract_strided_slice %102 {offsets = [640, 0], sizes = [128, 128], strides = [1, 1]} : vector<1152x128xf32> to vector<128x128xf32>
    %c1_83 = arith.constant 1 : index
    %c5_84 = arith.constant 5 : index
    %c0_85 = arith.constant 0 : index
    %c0_86 = arith.constant 0 : index
    %128 = vector.load %arg4[%c1_83, %c5_84, %c0_85, %c0_86] : memref<4x9x128x128xf32, #tpu.memory_space<vmem>>, vector<1x1x128x128xf32>
    %129 = vector.shape_cast %128 : vector<1x1x128x128xf32> to vector<128x128xf32>
    %cst_87 = arith.constant dense<0.000000e+00> : vector<128x128xf32>
    %130 = tpu.matmul %127, %129, %cst_87 {dimension_numbers = #tpu.dot_dimension_numbers<[1], [0], [0], [1], [0, 0, 1, 1], [], []>} : vector<128x128xf32>, vector<128x128xf32>, vector<128x128xf32> -> vector<128x128xf32>
    %131 = arith.addf %126, %130 : vector<128x128xf32>
    %132 = vector.extract_strided_slice %102 {offsets = [768, 0], sizes = [128, 128], strides = [1, 1]} : vector<1152x128xf32> to vector<128x128xf32>
    %c1_88 = arith.constant 1 : index
    %c6_89 = arith.constant 6 : index
    %c0_90 = arith.constant 0 : index
    %c0_91 = arith.constant 0 : index
    %133 = vector.load %arg4[%c1_88, %c6_89, %c0_90, %c0_91] : memref<4x9x128x128xf32, #tpu.memory_space<vmem>>, vector<1x1x128x128xf32>
    %134 = vector.shape_cast %133 : vector<1x1x128x128xf32> to vector<128x128xf32>
    %cst_92 = arith.constant dense<0.000000e+00> : vector<128x128xf32>
    %135 = tpu.matmul %132, %134, %cst_92 {dimension_numbers = #tpu.dot_dimension_numbers<[1], [0], [0], [1], [0, 0, 1, 1], [], []>} : vector<128x128xf32>, vector<128x128xf32>, vector<128x128xf32> -> vector<128x128xf32>
    %136 = arith.addf %131, %135 : vector<128x128xf32>
    %137 = vector.extract_strided_slice %102 {offsets = [896, 0], sizes = [128, 128], strides = [1, 1]} : vector<1152x128xf32> to vector<128x128xf32>
    %c1_93 = arith.constant 1 : index
    %c7_94 = arith.constant 7 : index
    %c0_95 = arith.constant 0 : index
    %c0_96 = arith.constant 0 : index
    %138 = vector.load %arg4[%c1_93, %c7_94, %c0_95, %c0_96] : memref<4x9x128x128xf32, #tpu.memory_space<vmem>>, vector<1x1x128x128xf32>
    %139 = vector.shape_cast %138 : vector<1x1x128x128xf32> to vector<128x128xf32>
    %cst_97 = arith.constant dense<0.000000e+00> : vector<128x128xf32>
    %140 = tpu.matmul %137, %139, %cst_97 {dimension_numbers = #tpu.dot_dimension_numbers<[1], [0], [0], [1], [0, 0, 1, 1], [], []>} : vector<128x128xf32>, vector<128x128xf32>, vector<128x128xf32> -> vector<128x128xf32>
    %141 = arith.addf %136, %140 : vector<128x128xf32>
    %142 = vector.extract_strided_slice %102 {offsets = [1024, 0], sizes = [128, 128], strides = [1, 1]} : vector<1152x128xf32> to vector<128x128xf32>
    %c1_98 = arith.constant 1 : index
    %c8_99 = arith.constant 8 : index
    %c0_100 = arith.constant 0 : index
    %c0_101 = arith.constant 0 : index
    %143 = vector.load %arg4[%c1_98, %c8_99, %c0_100, %c0_101] : memref<4x9x128x128xf32, #tpu.memory_space<vmem>>, vector<1x1x128x128xf32>
    %144 = vector.shape_cast %143 : vector<1x1x128x128xf32> to vector<128x128xf32>
    %cst_102 = arith.constant dense<0.000000e+00> : vector<128x128xf32>
    %145 = tpu.matmul %142, %144, %cst_102 {dimension_numbers = #tpu.dot_dimension_numbers<[1], [0], [0], [1], [0, 0, 1, 1], [], []>} : vector<128x128xf32>, vector<128x128xf32>, vector<128x128xf32> -> vector<128x128xf32>
    %146 = arith.addf %141, %145 : vector<128x128xf32>
    %147 = vector.extract_strided_slice %0 {offsets = [2, 0], sizes = [1, 128], strides = [1, 1]} : vector<8x128xf32> to vector<1x128xf32>
    %148 = vector.broadcast %147 : vector<1x128xf32> to vector<128x128xf32>
    %149 = arith.addf %146, %148 : vector<128x128xf32>
    %150 = vector.shape_cast %149 : vector<128x128xf32> to vector<2x64x128xf32>
    %cst_103 = arith.constant dense<0.000000e+00> : vector<2x128xf32>
    %151 = vector.multi_reduction <add>, %150, %cst_103 [1] : vector<2x64x128xf32> to vector<2x128xf32>
    %152 = vector.shape_cast %151 : vector<2x128xf32> to vector<2x1x128xf32>
    %153 = arith.mulf %150, %150 : vector<2x64x128xf32>
    %cst_104 = arith.constant dense<0.000000e+00> : vector<2x128xf32>
    %154 = vector.multi_reduction <add>, %153, %cst_104 [1] : vector<2x64x128xf32> to vector<2x128xf32>
    %155 = vector.shape_cast %154 : vector<2x128xf32> to vector<2x1x128xf32>
    %cst_105 = arith.constant 1.562500e-02 : f32
    %156 = vector.broadcast %cst_105 : f32 to vector<2x1x128xf32>
    %157 = arith.mulf %152, %156 : vector<2x1x128xf32>
    %cst_106 = arith.constant 1.562500e-02 : f32
    %158 = vector.broadcast %cst_106 : f32 to vector<2x1x128xf32>
    %159 = arith.mulf %155, %158 : vector<2x1x128xf32>
    %160 = arith.mulf %157, %157 : vector<2x1x128xf32>
    %161 = arith.subf %159, %160 : vector<2x1x128xf32>
    %162 = vector.broadcast %157 : vector<2x1x128xf32> to vector<2x64x128xf32>
    %163 = arith.subf %150, %162 : vector<2x64x128xf32>
    %cst_107 = arith.constant 9.99999974E-6 : f32
    %164 = vector.broadcast %cst_107 : f32 to vector<2x1x128xf32>
    %165 = arith.addf %161, %164 : vector<2x1x128xf32>
    %166 = math.rsqrt %165 : vector<2x1x128xf32>
    %167 = vector.broadcast %166 : vector<2x1x128xf32> to vector<2x64x128xf32>
    %168 = arith.mulf %163, %167 : vector<2x64x128xf32>
    %cst_108 = arith.constant 0.00999999977 : f32
    %169 = vector.broadcast %cst_108 : f32 to vector<2x64x128xf32>
    %170 = arith.mulf %169, %168 : vector<2x64x128xf32>
    %171 = arith.maximumf %168, %170 : vector<2x64x128xf32>
    %172 = vector.shape_cast %171 : vector<2x64x128xf32> to vector<128x128xf32>
    %cst_109 = arith.constant dense<0.000000e+00> : vector<1152x128xf32>
    %173 = tpu.matmul %30, %172, %cst_109 {dimension_numbers = #tpu.dot_dimension_numbers<[1], [0], [0], [1], [0, 0, 1, 1], [], []>} : vector<1152x128xf32>, vector<128x128xf32>, vector<1152x128xf32> -> vector<1152x128xf32>
    %174 = vector.extract_strided_slice %173 {offsets = [0, 0], sizes = [128, 128], strides = [1, 1]} : vector<1152x128xf32> to vector<128x128xf32>
    %c2_110 = arith.constant 2 : index
    %c0_111 = arith.constant 0 : index
    %c0_112 = arith.constant 0 : index
    %c0_113 = arith.constant 0 : index
    %175 = vector.load %arg4[%c2_110, %c0_111, %c0_112, %c0_113] : memref<4x9x128x128xf32, #tpu.memory_space<vmem>>, vector<1x1x128x128xf32>
    %176 = vector.shape_cast %175 : vector<1x1x128x128xf32> to vector<128x128xf32>
    %cst_114 = arith.constant dense<0.000000e+00> : vector<128x128xf32>
    %177 = tpu.matmul %174, %176, %cst_114 {dimension_numbers = #tpu.dot_dimension_numbers<[1], [0], [0], [1], [0, 0, 1, 1], [], []>} : vector<128x128xf32>, vector<128x128xf32>, vector<128x128xf32> -> vector<128x128xf32>
    %178 = vector.extract_strided_slice %173 {offsets = [128, 0], sizes = [128, 128], strides = [1, 1]} : vector<1152x128xf32> to vector<128x128xf32>
    %c2_115 = arith.constant 2 : index
    %c1_116 = arith.constant 1 : index
    %c0_117 = arith.constant 0 : index
    %c0_118 = arith.constant 0 : index
    %179 = vector.load %arg4[%c2_115, %c1_116, %c0_117, %c0_118] : memref<4x9x128x128xf32, #tpu.memory_space<vmem>>, vector<1x1x128x128xf32>
    %180 = vector.shape_cast %179 : vector<1x1x128x128xf32> to vector<128x128xf32>
    %cst_119 = arith.constant dense<0.000000e+00> : vector<128x128xf32>
    %181 = tpu.matmul %178, %180, %cst_119 {dimension_numbers = #tpu.dot_dimension_numbers<[1], [0], [0], [1], [0, 0, 1, 1], [], []>} : vector<128x128xf32>, vector<128x128xf32>, vector<128x128xf32> -> vector<128x128xf32>
    %182 = arith.addf %177, %181 : vector<128x128xf32>
    %183 = vector.extract_strided_slice %173 {offsets = [256, 0], sizes = [128, 128], strides = [1, 1]} : vector<1152x128xf32> to vector<128x128xf32>
    %c2_120 = arith.constant 2 : index
    %c2_121 = arith.constant 2 : index
    %c0_122 = arith.constant 0 : index
    %c0_123 = arith.constant 0 : index
    %184 = vector.load %arg4[%c2_120, %c2_121, %c0_122, %c0_123] : memref<4x9x128x128xf32, #tpu.memory_space<vmem>>, vector<1x1x128x128xf32>
    %185 = vector.shape_cast %184 : vector<1x1x128x128xf32> to vector<128x128xf32>
    %cst_124 = arith.constant dense<0.000000e+00> : vector<128x128xf32>
    %186 = tpu.matmul %183, %185, %cst_124 {dimension_numbers = #tpu.dot_dimension_numbers<[1], [0], [0], [1], [0, 0, 1, 1], [], []>} : vector<128x128xf32>, vector<128x128xf32>, vector<128x128xf32> -> vector<128x128xf32>
    %187 = arith.addf %182, %186 : vector<128x128xf32>
    %188 = vector.extract_strided_slice %173 {offsets = [384, 0], sizes = [128, 128], strides = [1, 1]} : vector<1152x128xf32> to vector<128x128xf32>
    %c2_125 = arith.constant 2 : index
    %c3_126 = arith.constant 3 : index
    %c0_127 = arith.constant 0 : index
    %c0_128 = arith.constant 0 : index
    %189 = vector.load %arg4[%c2_125, %c3_126, %c0_127, %c0_128] : memref<4x9x128x128xf32, #tpu.memory_space<vmem>>, vector<1x1x128x128xf32>
    %190 = vector.shape_cast %189 : vector<1x1x128x128xf32> to vector<128x128xf32>
    %cst_129 = arith.constant dense<0.000000e+00> : vector<128x128xf32>
    %191 = tpu.matmul %188, %190, %cst_129 {dimension_numbers = #tpu.dot_dimension_numbers<[1], [0], [0], [1], [0, 0, 1, 1], [], []>} : vector<128x128xf32>, vector<128x128xf32>, vector<128x128xf32> -> vector<128x128xf32>
    %192 = arith.addf %187, %191 : vector<128x128xf32>
    %193 = vector.extract_strided_slice %173 {offsets = [512, 0], sizes = [128, 128], strides = [1, 1]} : vector<1152x128xf32> to vector<128x128xf32>
    %c2_130 = arith.constant 2 : index
    %c4_131 = arith.constant 4 : index
    %c0_132 = arith.constant 0 : index
    %c0_133 = arith.constant 0 : index
    %194 = vector.load %arg4[%c2_130, %c4_131, %c0_132, %c0_133] : memref<4x9x128x128xf32, #tpu.memory_space<vmem>>, vector<1x1x128x128xf32>
    %195 = vector.shape_cast %194 : vector<1x1x128x128xf32> to vector<128x128xf32>
    %cst_134 = arith.constant dense<0.000000e+00> : vector<128x128xf32>
    %196 = tpu.matmul %193, %195, %cst_134 {dimension_numbers = #tpu.dot_dimension_numbers<[1], [0], [0], [1], [0, 0, 1, 1], [], []>} : vector<128x128xf32>, vector<128x128xf32>, vector<128x128xf32> -> vector<128x128xf32>
    %197 = arith.addf %192, %196 : vector<128x128xf32>
    %198 = vector.extract_strided_slice %173 {offsets = [640, 0], sizes = [128, 128], strides = [1, 1]} : vector<1152x128xf32> to vector<128x128xf32>
    %c2_135 = arith.constant 2 : index
    %c5_136 = arith.constant 5 : index
    %c0_137 = arith.constant 0 : index
    %c0_138 = arith.constant 0 : index
    %199 = vector.load %arg4[%c2_135, %c5_136, %c0_137, %c0_138] : memref<4x9x128x128xf32, #tpu.memory_space<vmem>>, vector<1x1x128x128xf32>
    %200 = vector.shape_cast %199 : vector<1x1x128x128xf32> to vector<128x128xf32>
    %cst_139 = arith.constant dense<0.000000e+00> : vector<128x128xf32>
    %201 = tpu.matmul %198, %200, %cst_139 {dimension_numbers = #tpu.dot_dimension_numbers<[1], [0], [0], [1], [0, 0, 1, 1], [], []>} : vector<128x128xf32>, vector<128x128xf32>, vector<128x128xf32> -> vector<128x128xf32>
    %202 = arith.addf %197, %201 : vector<128x128xf32>
    %203 = vector.extract_strided_slice %173 {offsets = [768, 0], sizes = [128, 128], strides = [1, 1]} : vector<1152x128xf32> to vector<128x128xf32>
    %c2_140 = arith.constant 2 : index
    %c6_141 = arith.constant 6 : index
    %c0_142 = arith.constant 0 : index
    %c0_143 = arith.constant 0 : index
    %204 = vector.load %arg4[%c2_140, %c6_141, %c0_142, %c0_143] : memref<4x9x128x128xf32, #tpu.memory_space<vmem>>, vector<1x1x128x128xf32>
    %205 = vector.shape_cast %204 : vector<1x1x128x128xf32> to vector<128x128xf32>
    %cst_144 = arith.constant dense<0.000000e+00> : vector<128x128xf32>
    %206 = tpu.matmul %203, %205, %cst_144 {dimension_numbers = #tpu.dot_dimension_numbers<[1], [0], [0], [1], [0, 0, 1, 1], [], []>} : vector<128x128xf32>, vector<128x128xf32>, vector<128x128xf32> -> vector<128x128xf32>
    %207 = arith.addf %202, %206 : vector<128x128xf32>
    %208 = vector.extract_strided_slice %173 {offsets = [896, 0], sizes = [128, 128], strides = [1, 1]} : vector<1152x128xf32> to vector<128x128xf32>
    %c2_145 = arith.constant 2 : index
    %c7_146 = arith.constant 7 : index
    %c0_147 = arith.constant 0 : index
    %c0_148 = arith.constant 0 : index
    %209 = vector.load %arg4[%c2_145, %c7_146, %c0_147, %c0_148] : memref<4x9x128x128xf32, #tpu.memory_space<vmem>>, vector<1x1x128x128xf32>
    %210 = vector.shape_cast %209 : vector<1x1x128x128xf32> to vector<128x128xf32>
    %cst_149 = arith.constant dense<0.000000e+00> : vector<128x128xf32>
    %211 = tpu.matmul %208, %210, %cst_149 {dimension_numbers = #tpu.dot_dimension_numbers<[1], [0], [0], [1], [0, 0, 1, 1], [], []>} : vector<128x128xf32>, vector<128x128xf32>, vector<128x128xf32> -> vector<128x128xf32>
    %212 = arith.addf %207, %211 : vector<128x128xf32>
    %213 = vector.extract_strided_slice %173 {offsets = [1024, 0], sizes = [128, 128], strides = [1, 1]} : vector<1152x128xf32> to vector<128x128xf32>
    %c2_150 = arith.constant 2 : index
    %c8_151 = arith.constant 8 : index
    %c0_152 = arith.constant 0 : index
    %c0_153 = arith.constant 0 : index
    %214 = vector.load %arg4[%c2_150, %c8_151, %c0_152, %c0_153] : memref<4x9x128x128xf32, #tpu.memory_space<vmem>>, vector<1x1x128x128xf32>
    %215 = vector.shape_cast %214 : vector<1x1x128x128xf32> to vector<128x128xf32>
    %cst_154 = arith.constant dense<0.000000e+00> : vector<128x128xf32>
    %216 = tpu.matmul %213, %215, %cst_154 {dimension_numbers = #tpu.dot_dimension_numbers<[1], [0], [0], [1], [0, 0, 1, 1], [], []>} : vector<128x128xf32>, vector<128x128xf32>, vector<128x128xf32> -> vector<128x128xf32>
    %217 = arith.addf %212, %216 : vector<128x128xf32>
    %218 = vector.extract_strided_slice %0 {offsets = [3, 0], sizes = [1, 128], strides = [1, 1]} : vector<8x128xf32> to vector<1x128xf32>
    %219 = vector.broadcast %218 : vector<1x128xf32> to vector<128x128xf32>
    %220 = arith.addf %217, %219 : vector<128x128xf32>
    %221 = vector.shape_cast %220 : vector<128x128xf32> to vector<2x64x128xf32>
    %cst_155 = arith.constant dense<0.000000e+00> : vector<2x128xf32>
    %222 = vector.multi_reduction <add>, %221, %cst_155 [1] : vector<2x64x128xf32> to vector<2x128xf32>
    %223 = vector.shape_cast %222 : vector<2x128xf32> to vector<2x1x128xf32>
    %224 = arith.mulf %221, %221 : vector<2x64x128xf32>
    %cst_156 = arith.constant dense<0.000000e+00> : vector<2x128xf32>
    %225 = vector.multi_reduction <add>, %224, %cst_156 [1] : vector<2x64x128xf32> to vector<2x128xf32>
    %226 = vector.shape_cast %225 : vector<2x128xf32> to vector<2x1x128xf32>
    %cst_157 = arith.constant 1.562500e-02 : f32
    %227 = vector.broadcast %cst_157 : f32 to vector<2x1x128xf32>
    %228 = arith.mulf %223, %227 : vector<2x1x128xf32>
    %cst_158 = arith.constant 1.562500e-02 : f32
    %229 = vector.broadcast %cst_158 : f32 to vector<2x1x128xf32>
    %230 = arith.mulf %226, %229 : vector<2x1x128xf32>
    %231 = arith.mulf %228, %228 : vector<2x1x128xf32>
    %232 = arith.subf %230, %231 : vector<2x1x128xf32>
    %233 = vector.broadcast %228 : vector<2x1x128xf32> to vector<2x64x128xf32>
    %234 = arith.subf %221, %233 : vector<2x64x128xf32>
    %cst_159 = arith.constant 9.99999974E-6 : f32
    %235 = vector.broadcast %cst_159 : f32 to vector<2x1x128xf32>
    %236 = arith.addf %232, %235 : vector<2x1x128xf32>
    %237 = math.rsqrt %236 : vector<2x1x128xf32>
    %238 = vector.broadcast %237 : vector<2x1x128xf32> to vector<2x64x128xf32>
    %239 = arith.mulf %234, %238 : vector<2x64x128xf32>
    %cst_160 = arith.constant 0.00999999977 : f32
    %240 = vector.broadcast %cst_160 : f32 to vector<2x64x128xf32>
    %241 = arith.mulf %240, %239 : vector<2x64x128xf32>
    %242 = arith.maximumf %239, %241 : vector<2x64x128xf32>
    %243 = vector.shape_cast %242 : vector<2x64x128xf32> to vector<128x128xf32>
    %cst_161 = arith.constant dense<0.000000e+00> : vector<1152x128xf32>
    %244 = tpu.matmul %30, %243, %cst_161 {dimension_numbers = #tpu.dot_dimension_numbers<[1], [0], [0], [1], [0, 0, 1, 1], [], []>} : vector<1152x128xf32>, vector<128x128xf32>, vector<1152x128xf32> -> vector<1152x128xf32>
    %245 = vector.extract_strided_slice %244 {offsets = [0, 0], sizes = [128, 128], strides = [1, 1]} : vector<1152x128xf32> to vector<128x128xf32>
    %c3_162 = arith.constant 3 : index
    %c0_163 = arith.constant 0 : index
    %c0_164 = arith.constant 0 : index
    %c0_165 = arith.constant 0 : index
    %246 = vector.load %arg4[%c3_162, %c0_163, %c0_164, %c0_165] : memref<4x9x128x128xf32, #tpu.memory_space<vmem>>, vector<1x1x128x128xf32>
    %247 = vector.shape_cast %246 : vector<1x1x128x128xf32> to vector<128x128xf32>
    %cst_166 = arith.constant dense<0.000000e+00> : vector<128x128xf32>
    %248 = tpu.matmul %245, %247, %cst_166 {dimension_numbers = #tpu.dot_dimension_numbers<[1], [0], [0], [1], [0, 0, 1, 1], [], []>} : vector<128x128xf32>, vector<128x128xf32>, vector<128x128xf32> -> vector<128x128xf32>
    %249 = vector.extract_strided_slice %244 {offsets = [128, 0], sizes = [128, 128], strides = [1, 1]} : vector<1152x128xf32> to vector<128x128xf32>
    %c3_167 = arith.constant 3 : index
    %c1_168 = arith.constant 1 : index
    %c0_169 = arith.constant 0 : index
    %c0_170 = arith.constant 0 : index
    %250 = vector.load %arg4[%c3_167, %c1_168, %c0_169, %c0_170] : memref<4x9x128x128xf32, #tpu.memory_space<vmem>>, vector<1x1x128x128xf32>
    %251 = vector.shape_cast %250 : vector<1x1x128x128xf32> to vector<128x128xf32>
    %cst_171 = arith.constant dense<0.000000e+00> : vector<128x128xf32>
    %252 = tpu.matmul %249, %251, %cst_171 {dimension_numbers = #tpu.dot_dimension_numbers<[1], [0], [0], [1], [0, 0, 1, 1], [], []>} : vector<128x128xf32>, vector<128x128xf32>, vector<128x128xf32> -> vector<128x128xf32>
    %253 = arith.addf %248, %252 : vector<128x128xf32>
    %254 = vector.extract_strided_slice %244 {offsets = [256, 0], sizes = [128, 128], strides = [1, 1]} : vector<1152x128xf32> to vector<128x128xf32>
    %c3_172 = arith.constant 3 : index
    %c2_173 = arith.constant 2 : index
    %c0_174 = arith.constant 0 : index
    %c0_175 = arith.constant 0 : index
    %255 = vector.load %arg4[%c3_172, %c2_173, %c0_174, %c0_175] : memref<4x9x128x128xf32, #tpu.memory_space<vmem>>, vector<1x1x128x128xf32>
    %256 = vector.shape_cast %255 : vector<1x1x128x128xf32> to vector<128x128xf32>
    %cst_176 = arith.constant dense<0.000000e+00> : vector<128x128xf32>
    %257 = tpu.matmul %254, %256, %cst_176 {dimension_numbers = #tpu.dot_dimension_numbers<[1], [0], [0], [1], [0, 0, 1, 1], [], []>} : vector<128x128xf32>, vector<128x128xf32>, vector<128x128xf32> -> vector<128x128xf32>
    %258 = arith.addf %253, %257 : vector<128x128xf32>
    %259 = vector.extract_strided_slice %244 {offsets = [384, 0], sizes = [128, 128], strides = [1, 1]} : vector<1152x128xf32> to vector<128x128xf32>
    %c3_177 = arith.constant 3 : index
    %c3_178 = arith.constant 3 : index
    %c0_179 = arith.constant 0 : index
    %c0_180 = arith.constant 0 : index
    %260 = vector.load %arg4[%c3_177, %c3_178, %c0_179, %c0_180] : memref<4x9x128x128xf32, #tpu.memory_space<vmem>>, vector<1x1x128x128xf32>
    %261 = vector.shape_cast %260 : vector<1x1x128x128xf32> to vector<128x128xf32>
    %cst_181 = arith.constant dense<0.000000e+00> : vector<128x128xf32>
    %262 = tpu.matmul %259, %261, %cst_181 {dimension_numbers = #tpu.dot_dimension_numbers<[1], [0], [0], [1], [0, 0, 1, 1], [], []>} : vector<128x128xf32>, vector<128x128xf32>, vector<128x128xf32> -> vector<128x128xf32>
    %263 = arith.addf %258, %262 : vector<128x128xf32>
    %264 = vector.extract_strided_slice %244 {offsets = [512, 0], sizes = [128, 128], strides = [1, 1]} : vector<1152x128xf32> to vector<128x128xf32>
    %c3_182 = arith.constant 3 : index
    %c4_183 = arith.constant 4 : index
    %c0_184 = arith.constant 0 : index
    %c0_185 = arith.constant 0 : index
    %265 = vector.load %arg4[%c3_182, %c4_183, %c0_184, %c0_185] : memref<4x9x128x128xf32, #tpu.memory_space<vmem>>, vector<1x1x128x128xf32>
    %266 = vector.shape_cast %265 : vector<1x1x128x128xf32> to vector<128x128xf32>
    %cst_186 = arith.constant dense<0.000000e+00> : vector<128x128xf32>
    %267 = tpu.matmul %264, %266, %cst_186 {dimension_numbers = #tpu.dot_dimension_numbers<[1], [0], [0], [1], [0, 0, 1, 1], [], []>} : vector<128x128xf32>, vector<128x128xf32>, vector<128x128xf32> -> vector<128x128xf32>
    %268 = arith.addf %263, %267 : vector<128x128xf32>
    %269 = vector.extract_strided_slice %244 {offsets = [640, 0], sizes = [128, 128], strides = [1, 1]} : vector<1152x128xf32> to vector<128x128xf32>
    %c3_187 = arith.constant 3 : index
    %c5_188 = arith.constant 5 : index
    %c0_189 = arith.constant 0 : index
    %c0_190 = arith.constant 0 : index
    %270 = vector.load %arg4[%c3_187, %c5_188, %c0_189, %c0_190] : memref<4x9x128x128xf32, #tpu.memory_space<vmem>>, vector<1x1x128x128xf32>
    %271 = vector.shape_cast %270 : vector<1x1x128x128xf32> to vector<128x128xf32>
    %cst_191 = arith.constant dense<0.000000e+00> : vector<128x128xf32>
    %272 = tpu.matmul %269, %271, %cst_191 {dimension_numbers = #tpu.dot_dimension_numbers<[1], [0], [0], [1], [0, 0, 1, 1], [], []>} : vector<128x128xf32>, vector<128x128xf32>, vector<128x128xf32> -> vector<128x128xf32>
    %273 = arith.addf %268, %272 : vector<128x128xf32>
    %274 = vector.extract_strided_slice %244 {offsets = [768, 0], sizes = [128, 128], strides = [1, 1]} : vector<1152x128xf32> to vector<128x128xf32>
    %c3_192 = arith.constant 3 : index
    %c6_193 = arith.constant 6 : index
    %c0_194 = arith.constant 0 : index
    %c0_195 = arith.constant 0 : index
    %275 = vector.load %arg4[%c3_192, %c6_193, %c0_194, %c0_195] : memref<4x9x128x128xf32, #tpu.memory_space<vmem>>, vector<1x1x128x128xf32>
    %276 = vector.shape_cast %275 : vector<1x1x128x128xf32> to vector<128x128xf32>
    %cst_196 = arith.constant dense<0.000000e+00> : vector<128x128xf32>
    %277 = tpu.matmul %274, %276, %cst_196 {dimension_numbers = #tpu.dot_dimension_numbers<[1], [0], [0], [1], [0, 0, 1, 1], [], []>} : vector<128x128xf32>, vector<128x128xf32>, vector<128x128xf32> -> vector<128x128xf32>
    %278 = arith.addf %273, %277 : vector<128x128xf32>
    %279 = vector.extract_strided_slice %244 {offsets = [896, 0], sizes = [128, 128], strides = [1, 1]} : vector<1152x128xf32> to vector<128x128xf32>
    %c3_197 = arith.constant 3 : index
    %c7_198 = arith.constant 7 : index
    %c0_199 = arith.constant 0 : index
    %c0_200 = arith.constant 0 : index
    %280 = vector.load %arg4[%c3_197, %c7_198, %c0_199, %c0_200] : memref<4x9x128x128xf32, #tpu.memory_space<vmem>>, vector<1x1x128x128xf32>
    %281 = vector.shape_cast %280 : vector<1x1x128x128xf32> to vector<128x128xf32>
    %cst_201 = arith.constant dense<0.000000e+00> : vector<128x128xf32>
    %282 = tpu.matmul %279, %281, %cst_201 {dimension_numbers = #tpu.dot_dimension_numbers<[1], [0], [0], [1], [0, 0, 1, 1], [], []>} : vector<128x128xf32>, vector<128x128xf32>, vector<128x128xf32> -> vector<128x128xf32>
    %283 = arith.addf %278, %282 : vector<128x128xf32>
    %284 = vector.extract_strided_slice %244 {offsets = [1024, 0], sizes = [128, 128], strides = [1, 1]} : vector<1152x128xf32> to vector<128x128xf32>
    %c3_202 = arith.constant 3 : index
    %c8_203 = arith.constant 8 : index
    %c0_204 = arith.constant 0 : index
    %c0_205 = arith.constant 0 : index
    %285 = vector.load %arg4[%c3_202, %c8_203, %c0_204, %c0_205] : memref<4x9x128x128xf32, #tpu.memory_space<vmem>>, vector<1x1x128x128xf32>
    %286 = vector.shape_cast %285 : vector<1x1x128x128xf32> to vector<128x128xf32>
    %cst_206 = arith.constant dense<0.000000e+00> : vector<128x128xf32>
    %287 = tpu.matmul %284, %286, %cst_206 {dimension_numbers = #tpu.dot_dimension_numbers<[1], [0], [0], [1], [0, 0, 1, 1], [], []>} : vector<128x128xf32>, vector<128x128xf32>, vector<128x128xf32> -> vector<128x128xf32>
    %288 = arith.addf %283, %287 : vector<128x128xf32>
    %289 = vector.extract_strided_slice %0 {offsets = [4, 0], sizes = [1, 128], strides = [1, 1]} : vector<8x128xf32> to vector<1x128xf32>
    %290 = vector.broadcast %289 : vector<1x128xf32> to vector<128x128xf32>
    %291 = arith.addf %288, %290 : vector<128x128xf32>
    %c0_207 = arith.constant 0 : index
    %c0_208 = arith.constant 0 : index
    %292 = vector.load %arg6[%c0_207, %c0_208] : memref<128x128xf32, #tpu.memory_space<vmem>>, vector<128x128xf32>
    tpu.vector_store %arg6[%c0_207, %c0_208], %291 {strides = array<i32>} : memref<128x128xf32, #tpu.memory_space<vmem>>, vector<128x128xf32>,
    return
  }
  func.func @transform_0(%arg0: i32) -> (i32, i32) {
    %c0_i32 = arith.constant 0 : i32
    %c0_i32_0 = arith.constant 0 : i32
    return %arg0, %c0_i32 : i32, i32
  }
  func.func @transform_1(%arg0: i32) -> (i32, i32) {
    %c0_i32 = arith.constant 0 : i32
    %c0_i32_0 = arith.constant 0 : i32
    %c0_i32_1 = arith.constant 0 : i32
    return %c0_i32, %c0_i32_0 : i32, i32
  }
  func.func @transform_2(%arg0: i32) -> (i32, i32) {
    %c0_i32 = arith.constant 0 : i32
    %c0_i32_0 = arith.constant 0 : i32
    %c0_i32_1 = arith.constant 0 : i32
    return %c0_i32, %c0_i32_0 : i32, i32
  }
  func.func @transform_3(%arg0: i32) -> (i32, i32, i32, i32) {
    %c0_i32 = arith.constant 0 : i32
    %c0_i32_0 = arith.constant 0 : i32
    %c0_i32_1 = arith.constant 0 : i32
    %c0_i32_2 = arith.constant 0 : i32
    %c0_i32_3 = arith.constant 0 : i32
    return %c0_i32, %c0_i32_0, %c0_i32_1, %c0_i32_2 : i32, i32, i32, i32
  }
  func.func @transform_4(%arg0: i32) -> (i32, i32) {
    %c0_i32 = arith.constant 0 : i32
    %c0_i32_0 = arith.constant 0 : i32
    %c0_i32_1 = arith.constant 0 : i32
    return %c0_i32, %c0_i32_0 : i32, i32
  }
  func.func @transform_5(%arg0: i32) -> (i32, i32) {
    %c0_i32 = arith.constant 0 : i32
    %c0_i32_0 = arith.constant 0 : i32
    return %arg0, %c0_i32 : i32, i32
  }
}

</mosaic_0001>

<bundles_post_ra>
// kernel: global_discriminator1_forward.1
= control target key start
LH: loop header
LB: loop body
LE: loop exit
PB: predicated region body
PF: predicated region fallthrough
CT: control target
= control target key end

     0   :  { %10 = vsyncpa [#allocation3], 0  ;;  %s18223_s18 = smov [#allocation2]   ;;  %s23676_s0 = inlined_call_operand.vmem [shape: f32[128,128], index: 0, kind: input, shape index: {}]   ;;  %s23677_s1 = inlined_call_operand.hbm [shape: f32[128,128], index: 1, kind: input, shape index: {}]   ;;  %s23678_s2 = inlined_call_operand.vmem [shape: f32[1152,128], index: 2, kind: input, shape index: {}]   ;;  %s23679_s3 = inlined_call_operand.vmem [shape: f32[4,9,128,128], index: 3, kind: input, shape index: {}]   ;;  %s23680_s4 = inlined_call_operand.vmem [shape: f32[8,128], index: 4, kind: input, shape index: {}]   ;;  %s23681_s5 = inlined_call_operand.vmem [shape: f32[128,128], index: 5, kind: output, shape index: {}]  }
   0x1   :  { %s18_s19 = sshll.u32 %s18223_s18, 4  ;;  %s18199_s22 = scalar_lea.hbm %s23677_s1, 2048  ;;  %s19_s19 = int_to_ptr.vmem [resolvable:$true] %s18_s19 }
   0x2   :  { %p18200_p0 = scmp.ne.s32.totalorder %s23677_s1, %s18199_s22  ;;  %p18203_p1 = scmp.lt.u32.totalorder %s18199_s22, %s23677_s1 }
   0x4   :  { %p18205_p2 = pnand %p18203_p1, %p18200_p0 }
   0x6   :  { %18208 = shalt.err (!%p18205_p2)
}
   0x7   :  { %s18209_s27 = scalar_lea.vmem %s19_s19, 2048  ;;  %p18214_p4 = scmp.lt.s32.totalorder %s19_s19, %s19_s19 }
   0x8   :  { %p18210_p3 = scmp.ne.s32.totalorder %s19_s19, %s18209_s27  ;;  %p18215_p5 = scmp.lt.s32.totalorder %s18209_s27, %s18209_s27 }
   0xa   :  { %p18216_p6 = por %p18215_p5, %p18214_p4 }
   0xc   :  { %p18217_p7 = pnand %p18216_p6, %p18210_p3 }
   0xe   :  { %18220 = shalt.err (!%p18217_p7)
}
   0xf   :  { %s18224_s28 = smov 128   ;;  %s18225_s29 = smov 8  }
  0x10   :  { %24 = dma.hbm_to_vmem [thread:$0]  %s23677_s1, 2048, %s19_s19, [#allocation3], %s18224_s28, %s18224_s28, %s18225_s29  }
  0x11   :  { %18221 = dma.done.wait [#allocation3], 2048  }
  0x12   :  { %18222 = vsyncadd [#allocation3], 4294965248  ;;  %v51_v0 = vld [vmem:[#allocation2] sm:$0xff]  ;;  %v52_v1 = vld [vmem:[#allocation2 + $0x8] sm:$0xff]  ;;  %v67_v41 = vlaneseq }
  0x13   :  { %v53_v2 = vld [vmem:[#allocation2 + $0x10] sm:$0xff]  ;;  %v15904_v3 = vpack.c.bf16 %v52_v1, %v51_v0  ;;  %v54_v4 = vld [vmem:[#allocation2 + $0x18] sm:$0xff]  ;;  %v55_v6 = vld [vmem:[#allocation2 + $0x20] sm:$0xff] }
  0x14   :  { %v15908_v5 = vpack.c.bf16 %v54_v4, %v53_v2  ;;  %v56_v7 = vld [vmem:[#allocation2 + $0x28] sm:$0xff]  ;;  %v35_v9 = vld [vmem:[%s23676_s0] sm:$0xff]  ;;  %v57_v10 = vld [vmem:[#allocation2 + $0x30] sm:$0xff]  ;;  %v18319_v42 = vshrl.u32 %v67_v41, 7 }
  0x15   :  { %15905 = vmatprep.subr.bf16.mxu0 %v15904_v3  ;;  %v15912_v8 = vpack.c.bf16 %v56_v7, %v55_v6  ;;  %v58_v11 = vld [vmem:[#allocation2 + $0x38] sm:$0xff]  ;;  %12872 = vmatprep.mubr.f32.mxu0 %v35_v9  ;;  %v59_v13 = vld [vmem:[#allocation2 + $0x40] sm:$0xff]  ;;  %v60_v14 = vld [vmem:[#allocation2 + $0x48] sm:$0xff] }
  0x16   :  { %15907 = vmatpush3.bf16.msra.mxu0 %v15904_v3  ;;  %v15916_v12 = vpack.c.bf16 %v58_v11, %v57_v10  ;;  %v15920_v15 = vpack.c.bf16 %v60_v14, %v59_v13  ;;  %v61_v16 = vld [vmem:[#allocation2 + $0x50] sm:$0xff]  ;;  %v62_v17 = vld [vmem:[#allocation2 + $0x58] sm:$0xff]  ;;  %v63_v19 = vld [vmem:[#allocation2 + $0x60] sm:$0xff]  ;;  %v69_v43 = vsub.s32 0, %v18319_v42 }
  0x17   :  { %15909 = vmatprep.subr.bf16.mxu0 %v15908_v5  ;;  %v15924_v18 = vpack.c.bf16 %v62_v17, %v61_v16  ;;  %v64_v20 = vld [vmem:[#allocation2 + $0x68] sm:$0xff]  ;;  %v65_v22 = vld [vmem:[#allocation2 + $0x70] sm:$0xff]  ;;  %v66_v23 = vld [vmem:[#allocation2 + $0x78] sm:$0xff] }
  0x18   :  { %v15928_v21 = vpack.c.bf16 %v64_v20, %v63_v19  ;;  %v15932_v24 = vpack.c.bf16 %v66_v23, %v65_v22  ;;  %v36_v25 = vld [vmem:[%s23676_s0 + $0x8] sm:$0xff]  ;;  %v37_v26 = vld [vmem:[%s23676_s0 + $0x10] sm:$0xff]  ;;  %v38_v27 = vld [vmem:[%s23676_s0 + $0x18] sm:$0xff] }
  0x19   :  { %v39_v28 = vld [vmem:[%s23676_s0 + $0x20] sm:$0xff]  ;;  %v40_v29 = vld [vmem:[%s23676_s0 + $0x28] sm:$0xff]  ;;  %v41_v30 = vld [vmem:[%s23676_s0 + $0x30] sm:$0xff] }
  0x1a   :  { %15911 = vmatpush3.bf16.msra.mxu0 %v15908_v5  ;;  %v42_v31 = vld [vmem:[%s23676_s0 + $0x38] sm:$0xff]  ;;  %v43_v32 = vld [vmem:[%s23676_s0 + $0x40] sm:$0xff]  ;;  %v44_v33 = vld [vmem:[%s23676_s0 + $0x48] sm:$0xff] }
  0x1b   :  { %15913 = vmatprep.subr.bf16.mxu0 %v15912_v8  ;;  %v45_v34 = vld [vmem:[%s23676_s0 + $0x50] sm:$0xff]  ;;  %v46_v35 = vld [vmem:[%s23676_s0 + $0x58] sm:$0xff]  ;;  %v47_v36 = vld [vmem:[%s23676_s0 + $0x60] sm:$0xff] }
  0x1c   :  { %v48_v37 = vld [vmem:[%s23676_s0 + $0x68] sm:$0xff]  ;;  %v49_v38 = vld [vmem:[%s23676_s0 + $0x70] sm:$0xff]  ;;  %v50_v39 = vld [vmem:[%s23676_s0 + $0x78] sm:$0xff] }
  0x1d   :  { %v360_v40 = vld [vmem:[%s23678_s2] sm:$0xff] }
  0x1e   :  { %15915 = vmatpush3.bf16.msra.mxu0 %v15912_v8  ;;  %12928 = vmatprep.mubr.f32.mxu1 %v360_v40  ;;  %v34_v44 = vld [vmem:[%s23680_s4] sm:$0xff] }
  0x1f   :  { %15917 = vmatprep.subr.bf16.mxu0 %v15916_v12  ;;  %v18325_v45 = vrot.slane %v34_v44, %v69_v43 }
  0x22   :  { %15919 = vmatpush3.bf16.msra.mxu0 %v15916_v12 }
  0x23   :  { %15921 = vmatprep.subr.bf16.mxu0 %v15920_v15 }
  0x26   :  { %15923 = vmatpush3.bf16.msra.mxu0 %v15920_v15 }
  0x27   :  { %15925 = vmatprep.subr.bf16.mxu0 %v15924_v18 }
  0x2a   :  { %15927 = vmatpush3.bf16.msra.mxu0 %v15924_v18 }
  0x2b   :  { %15929 = vmatprep.subr.bf16.mxu0 %v15928_v21 }
  0x2e   :  { %15931 = vmatpush3.bf16.msra.mxu0 %v15928_v21 }
  0x2f   :  { %15933 = vmatprep.subr.bf16.mxu0 %v15932_v24 }
  0x32   :  { %15935 = vmatpush3.bf16.msra.mxu0 %v15932_v24 }
  0x35   :  { %12873 = vmatmul.mubr.f32.vlgmr.msra.gmra.mrb[0].mxu0 %v36_v25 }
  0x36   :  { %12875 = vmatprep.mubr.f32.mxu0 %v37_v26 }
  0x39   :  { %12876 = vmatmul.mubr.f32.gmra.mrb[2].mxu0 %v38_v27 }
  0x3a   :  { %12878 = vmatprep.mubr.f32.mxu0 %v39_v28 }
  0x3d   :  { %12879 = vmatmul.mubr.f32.gmra.mrb[4].mxu0 %v40_v29 }
  0x3e   :  { %12881 = vmatprep.mubr.f32.mxu0 %v41_v30 }
  0x41   :  { %12882 = vmatmul.mubr.f32.gmra.mrb[6].mxu0 %v42_v31 }
  0x42   :  { %12884 = vmatprep.mubr.f32.mxu0 %v43_v32 }
  0x45   :  { %12885 = vmatmul.mubr.f32.gmra.mrb[8].mxu0 %v44_v33 }
  0x46   :  { %12887 = vmatprep.mubr.f32.mxu0 %v45_v34 }
  0x49   :  { %12888 = vmatmul.mubr.f32.gmra.mrb[10].mxu0 %v46_v35 }
  0x4a   :  { %12890 = vmatprep.mubr.f32.mxu0 %v47_v36 }
  0x4d   :  { %12891 = vmatmul.mubr.f32.gmra.mrb[12].mxu0 %v48_v37 }
  0x4e   :  { %12893 = vmatprep.mubr.f32.mxu0 %v49_v38 }
  0x51   :  { %12894 = vmatmul.mubr.f32.gmra.mrb[14].mxu0 %v50_v39 }
 0x108   :  { %v12874_v46 = vpop.f32.mrb[0].mxu0 }
 0x109   :  { %v18328_v47 = vadd.f32 %v12874_v46, %v18325_v45  ;;  %v137_v48 = vpop.f32.mrb[1].mxu0 }
 0x10a   :  { %v18331_v49 = vadd.f32 %v137_v48, %v18325_v45 }
 0x10b   :  { %v243_v50 = vmul.f32 %v18328_v47, %v18328_v47 }
 0x10c   :  { %v216_v51 = vadd.f32 %v18328_v47, %v18331_v49  ;;  %v242_v52 = vmul.f32 %v18331_v49, %v18331_v49  ;;  %v12877_v53 = vpop.f32.mrb[2].mxu0 }
 0x10d   :  { %v147_v54 = vpop.f32.mrb[3].mxu0  ;;  %v18340_v56 = vadd.f32 %v12877_v53, %v18325_v45 }
 0x10e   :  { %v258_v55 = vadd.f32 %v243_v50, %v242_v52  ;;  %v18343_v57 = vadd.f32 %v147_v54, %v18325_v45 }
 0x10f   :  { %v245_v63 = vmul.f32 %v18340_v56, %v18340_v56 }
 0x110   :  { %v217_v58 = vadd.f32 %v216_v51, %v18343_v57  ;;  %v244_v59 = vmul.f32 %v18343_v57, %v18343_v57  ;;  %v12880_v60 = vpop.f32.mrb[4].mxu0 }
 0x111   :  { %v18349_v61 = vadd.f32 %v12880_v60, %v18325_v45  ;;  %v157_v62 = vpop.f32.mrb[5].mxu0 }
 0x112   :  { %v259_v0 = vadd.f32 %v258_v55, %v244_v59  ;;  %v18354_v1 = vadd.f32 %v157_v62, %v18325_v45  ;;  %v218_v2 = vadd.f32 %v217_v58, %v18340_v56 }
 0x113   :  { %v247_v7 = vmul.f32 %v18349_v61, %v18349_v61 }
 0x114   :  { %v219_v3 = vadd.f32 %v218_v2, %v18354_v1  ;;  %v246_v4 = vmul.f32 %v18354_v1, %v18354_v1  ;;  %v260_v5 = vadd.f32 %v259_v0, %v245_v63  ;;  %v12883_v6 = vpop.f32.mrb[6].mxu0 }
 0x115   :  { %v167_v8 = vpop.f32.mrb[7].mxu0  ;;  %v18363_v10 = vadd.f32 %v12883_v6, %v18325_v45 }
 0x116   :  { %v261_v9 = vadd.f32 %v260_v5, %v246_v4  ;;  %v18366_v11 = vadd.f32 %v167_v8, %v18325_v45  ;;  %v220_v12 = vadd.f32 %v219_v3, %v18349_v61 }
 0x117   :  { %v249_v19 = vmul.f32 %v18363_v10, %v18363_v10 }
 0x118   :  { %v221_v13 = vadd.f32 %v220_v12, %v18366_v11  ;;  %v248_v14 = vmul.f32 %v18366_v11, %v18366_v11  ;;  %v262_v15 = vadd.f32 %v261_v9, %v247_v7  ;;  %v12886_v16 = vpop.f32.mrb[8].mxu0 }
 0x119   :  { %v18373_v17 = vadd.f32 %v12886_v16, %v18325_v45  ;;  %v177_v18 = vpop.f32.mrb[9].mxu0 }
 0x11a   :  { %v222_v20 = vadd.f32 %v221_v13, %v18363_v10  ;;  %v263_v21 = vadd.f32 %v262_v15, %v248_v14  ;;  %v18379_v22 = vadd.f32 %v177_v18, %v18325_v45 }
 0x11b   :  { %v251_v23 = vmul.f32 %v18373_v17, %v18373_v17 }
 0x11c   :  { %v223_v24 = vrot.slane %v222_v20, 4  ;;  %v264_v25 = vadd.f32 %v263_v21, %v249_v19  ;;  %v229_v26 = vadd.f32 %v18373_v17, %v18379_v22  ;;  %v250_v27 = vmul.f32 %v18379_v22, %v18379_v22  ;;  %v12889_v28 = vpop.f32.mrb[10].mxu0 }
 0x11d   :  { %v18388_v29 = vadd.f32 %v12889_v28, %v18325_v45  ;;  %v187_v30 = vpop.f32.mrb[11].mxu0 }
 0x11e   :  { %v224_v31 = vadd.f32 %v223_v24, %v222_v20  ;;  %v265_v32 = vrot.slane %v264_v25, 4  ;;  %v271_v33 = vadd.f32 %v251_v23, %v250_v27  ;;  %v18391_v34 = vadd.f32 %v187_v30, %v18325_v45 }
 0x11f   :  { %v253_v40 = vmul.f32 %v18388_v29, %v18388_v29 }
 0x120   :  { %v225_v35 = vrot.slane %v224_v31, 2  ;;  %v266_v36 = vadd.f32 %v265_v32, %v264_v25  ;;  %v230_v37 = vadd.f32 %v229_v26, %v18391_v34  ;;  %v252_v38 = vmul.f32 %v18391_v34, %v18391_v34  ;;  %v12892_v39 = vpop.f32.mrb[12].mxu0 }
 0x121   :  { %v18399_v41 = vadd.f32 %v12892_v39, %v18325_v45  ;;  %v197_v43 = vpop.f32.mrb[13].mxu0 }
 0x122   :  { %v226_v44 = vadd.f32 %v225_v35, %v224_v31  ;;  %v267_v46 = vrot.slane %v266_v36, 2  ;;  %v272_v48 = vadd.f32 %v271_v33, %v252_v38  ;;  %v18402_v50 = vadd.f32 %v197_v43, %v18325_v45 }
 0x123   :  { %v231_v51 = vadd.f32 %v230_v37, %v18388_v29  ;;  %v255_v59 = vmul.f32 %v18399_v41, %v18399_v41 }
 0x124   :  { %v227_v52 = vrot.slane %v226_v44, 1  ;;  %v268_v53 = vadd.f32 %v267_v46, %v266_v36  ;;  %v254_v54 = vmul.f32 %v18402_v50, %v18402_v50  ;;  %v273_v55 = vadd.f32 %v272_v48, %v253_v40  ;;  %v12895_v58 = vpop.f32.mrb[14].mxu0 }
 0x125   :  { %v232_v60 = vadd.f32 %v231_v51, %v18402_v50  ;;  %v18411_v62 = vadd.f32 %v12895_v58, %v18325_v45  ;;  %v207_v63 = vpop.f32.mrb[15].mxu0 }
 0x126   :  { %v228_v0 = vadd.f32 %v227_v52, %v226_v44  ;;  %v269_v2 = vrot.slane %v268_v53, 1  ;;  %v274_v3 = vadd.f32 %v273_v55, %v254_v54  ;;  %v18414_v4 = vadd.f32 %v207_v63, %v18325_v45 }
 0x127   :  { %v233_v5 = vadd.f32 %v232_v60, %v18399_v41  ;;  %v257_v12 = vmul.f32 %v18411_v62, %v18411_v62 }
 0x128   :  { %v270_v6 = vadd.f32 %v269_v2, %v268_v53  ;;  %v284_v7 = vmul.f32 0.015625, %v228_v0  ;;  %v256_v8 = vmul.f32 %v18414_v4, %v18414_v4  ;;  %v275_v9 = vadd.f32 %v274_v3, %v255_v59 }
 0x129   :  { %v234_v13 = vadd.f32 %v233_v5, %v18414_v4 }
 0x12a   :  { %v286_v14 = vmul.f32 0.015625, %v270_v6  ;;  %v288_v15 = vmul.f32 %v284_v7, %v284_v7  ;;  %v298_v16 = vsub.f32 %v18366_v11, %v284_v7  ;;  %v276_v18 = vadd.f32 %v275_v9, %v256_v8 }
 0x12b   :  { %v235_v45 = vadd.f32 %v234_v13, %v18411_v62  ;;  %v292_v19 = vsub.f32 %v18331_v49, %v284_v7  ;;  %v293_v20 = vsub.f32 %v18328_v47, %v284_v7  ;;  %v294_v21 = vsub.f32 %v18343_v57, %v284_v7 }
 0x12c   :  { %v290_v23 = vsub.f32 %v286_v14, %v288_v15  ;;  %v277_v24 = vadd.f32 %v276_v18, %v257_v12  ;;  %v295_v25 = vsub.f32 %v18340_v56, %v284_v7  ;;  %v296_v26 = vsub.f32 %v18354_v1, %v284_v7 }
 0x12d   :  { %v236_v27 = vrot.slane %v235_v45, 4  ;;  %v297_v28 = vsub.f32 %v18349_v61, %v284_v7  ;;  %v299_v11 = vsub.f32 %v18363_v10, %v284_v7 }
 0x12e   :  { %v308_v30 = vadd.f32 1e-05, %v290_v23  ;;  %v278_v31 = vrot.slane %v277_v24, 4 }
 0x12f   :  { %v237_v32 = vadd.f32 %v236_v27, %v235_v45 }
 0x130   :  { %17747 = vrsqrt.f32 %v308_v30  ;;  %v279_v49 = vadd.f32 %v278_v31, %v277_v24 }
 0x131   :  { %v238_v33 = vrot.slane %v237_v32, 2 }
 0x132   :  { %v280_v47 = vrot.slane %v279_v49, 2 }
 0x133   :  { %v239_v35 = vadd.f32 %v238_v33, %v237_v32 }
 0x134   :  { %v281_v57 = vadd.f32 %v280_v47, %v279_v49 }
 0x135   :  { %v240_v36 = vrot.slane %v239_v35, 1 }
 0x136   :  { %v282_v37 = vrot.slane %v281_v57, 1 }
 0x137   :  { %v241_v38 = vadd.f32 %v240_v36, %v239_v35 }
 0x138   :  { %v283_v56 = vadd.f32 %v282_v37, %v281_v57 }
 0x139   :  { %v285_v39 = vmul.f32 0.015625, %v241_v38 }
 0x13a   :  { %v17748_v1 = vpop.eup %17747  ;;  %v287_v40 = vmul.f32 0.015625, %v283_v56 }
 0x13b   :  { %v318_v43 = vmul.f32 %v17748_v1, %v298_v16  ;;  %v289_v61 = vmul.f32 %v285_v39, %v285_v39  ;;  %v306_v10 = vsub.f32 %v18414_v4, %v285_v39  ;;  %v312_v44 = vmul.f32 %v17748_v1, %v292_v19 }
 0x13c   :  { %v313_v46 = vmul.f32 %v17748_v1, %v293_v20  ;;  %v314_v48 = vmul.f32 %v17748_v1, %v294_v21  ;;  %v315_v51 = vmul.f32 %v17748_v1, %v295_v25  ;;  %v316_v52 = vmul.f32 %v17748_v1, %v296_v26 }
 0x13d   :  { %v291_v53 = vsub.f32 %v287_v40, %v289_v61  ;;  %v328_v54 = vmul.f32 0.01, %v312_v44  ;;  %v317_v55 = vmul.f32 %v17748_v1, %v297_v28  ;;  %v319_v58 = vmul.f32 %v17748_v1, %v299_v11 }
 0x13e   :  { %v329_v59 = vmul.f32 0.01, %v313_v46  ;;  %v330_v60 = vmul.f32 0.01, %v314_v48  ;;  %v331_v63 = vmul.f32 0.01, %v315_v51  ;;  %v300_v0 = vsub.f32 %v18379_v22, %v285_v39 }
 0x13f   :  { %v309_v2 = vadd.f32 1e-05, %v291_v53  ;;  %v344_v3 = vmax.f32 %v312_v44, %v328_v54  ;;  %v332_v5 = vmul.f32 0.01, %v316_v52  ;;  %v333_v6 = vmul.f32 0.01, %v317_v55 }
 0x140   :  { %v345_v7 = vmax.f32 %v313_v46, %v329_v59  ;;  %v346_v4 = vmax.f32 %v314_v48, %v330_v60  ;;  %v347_v8 = vmax.f32 %v315_v51, %v331_v63  ;;  %v334_v9 = vmul.f32 0.01, %v318_v43  ;;  %v361_v48 = vld [vmem:[%s23678_s2 + $0x8] sm:$0xff]  ;;  %v362_v51 = vld [vmem:[%s23678_s2 + $0x10] sm:$0xff]  ;;  %v364_v53 = vld [vmem:[%s23678_s2 + $0x20] sm:$0xff] }
 0x141   :  { %17749 = vrsqrt.f32 %v309_v2  ;;  %v348_v12 = vmax.f32 %v316_v52, %v332_v5  ;;  %v349_v13 = vmax.f32 %v317_v55, %v333_v6  ;;  %v335_v14 = vmul.f32 0.01, %v319_v58  ;;  %v363_v52 = vld [vmem:[%s23678_s2 + $0x18] sm:$0xff]  ;;  %v365_v54 = vld [vmem:[%s23678_s2 + $0x28] sm:$0xff]  ;;  %v366_v55 = vld [vmem:[%s23678_s2 + $0x30] sm:$0xff] }
 0x142   :  { %v15936_v15 = vpack.c.bf16 %v345_v7, %v344_v3  ;;  %v15940_v16 = vpack.c.bf16 %v347_v8, %v346_v4  ;;  %v350_v18 = vmax.f32 %v318_v43, %v334_v9  ;;  %v301_v45 = vsub.f32 %v18373_v17, %v285_v39  ;;  %v368_v59 = vld [vmem:[%s23678_s2 + $0x40] sm:$0xff]  ;;  %v369_v60 = vld [vmem:[%s23678_s2 + $0x48] sm:$0xff]  ;;  %v370_v63 = vld [vmem:[%s23678_s2 + $0x50] sm:$0xff] }
 0x143   :  { %v15944_v19 = vpack.c.bf16 %v349_v13, %v348_v12  ;;  %v351_v20 = vmax.f32 %v319_v58, %v335_v14  ;;  %v302_v22 = vsub.f32 %v18391_v34, %v285_v39  ;;  %v303_v21 = vsub.f32 %v18388_v29, %v285_v39  ;;  %v367_v58 = vld [vmem:[%s23678_s2 + $0x38] sm:$0xff]  ;;  %v372_v2 = vld [vmem:[%s23678_s2 + $0x60] sm:$0xff]  ;;  %v373_v3 = vld [vmem:[%s23678_s2 + $0x68] sm:$0xff] }
 0x144   :  { %15937 = vmatprep.subr.bf16.mxu1 %v15936_v15  ;;  %v304_v23 = vsub.f32 %v18402_v50, %v285_v39  ;;  %v305_v24 = vsub.f32 %v18399_v41, %v285_v39  ;;  %v307_v25 = vsub.f32 %v18411_v62, %v285_v39  ;;  %v374_v5 = vld [vmem:[%s23678_s2 + $0x70] sm:$0xff]  ;;  %v375_v6 = vld [vmem:[%s23678_s2 + $0x78] sm:$0xff]  ;;  %v376_v7 = vld [vmem:[%s23678_s2 + $0x80] sm:$0xff] }
 0x145   :  { %15939 = vmatpush3.bf16.msra.mxu1 %v15936_v15  ;;  %v15948_v26 = vpack.c.bf16 %v351_v20, %v350_v18  ;;  %v377_v4 = vld [vmem:[%s23678_s2 + $0x88] sm:$0xff]  ;;  %v378_v8 = vld [vmem:[%s23678_s2 + $0x90] sm:$0xff]  ;;  %v379_v9 = vld [vmem:[%s23678_s2 + $0x98] sm:$0xff] }
 0x146   :  { %15941 = vmatprep.subr.bf16.mxu1 %v15940_v16  ;;  %v380_v12 = vld [vmem:[%s23678_s2 + $0xa0] sm:$0xff]  ;;  %v381_v13 = vld [vmem:[%s23678_s2 + $0xa8] sm:$0xff]  ;;  %v382_v14 = vld [vmem:[%s23678_s2 + $0xb0] sm:$0xff] }
 0x147   :  { %v383_v15 = vld [vmem:[%s23678_s2 + $0xb8] sm:$0xff]  ;;  %v385_v18 = vld [vmem:[%s23678_s2 + $0xc8] sm:$0xff]  ;;  %v388_v20 = vld [vmem:[%s23678_s2 + $0xe0] sm:$0xff] }
 0x149   :  { %15943 = vmatpush3.bf16.msra.mxu1 %v15940_v16  ;;  %v384_v16 = vld [vmem:[%s23678_s2 + $0xc0] sm:$0xff] }
 0x14a   :  { %15945 = vmatprep.subr.bf16.mxu1 %v15944_v19 }
 0x14b   :  { %v17750_v27 = vpop.eup %17749 }
 0x14c   :  { %v326_v17 = vmul.f32 %v17750_v27, %v306_v10  ;;  %v320_v28 = vmul.f32 %v17750_v27, %v300_v0  ;;  %v321_v11 = vmul.f32 %v17750_v27, %v301_v45  ;;  %v322_v30 = vmul.f32 %v17750_v27, %v302_v22  ;;  %v371_v0 = vld [vmem:[%s23678_s2 + $0x58] sm:$0xff]  ;;  %v386_v45 = vld [vmem:[%s23678_s2 + $0xd0] sm:$0xff]  ;;  %v389_v22 = vld [vmem:[%s23678_s2 + $0xe8] sm:$0xff] }
 0x14d   :  { %15947 = vmatpush3.bf16.msra.mxu1 %v15944_v19  ;;  %v323_v34 = vmul.f32 %v17750_v27, %v303_v21  ;;  %v324_v29 = vmul.f32 %v17750_v27, %v304_v23  ;;  %v325_v31 = vmul.f32 %v17750_v27, %v305_v24  ;;  %v327_v32 = vmul.f32 %v17750_v27, %v307_v25  ;;  %v387_v19 = vld [vmem:[%s23678_s2 + $0xd8] sm:$0xff]  ;;  %v390_v21 = vld [vmem:[%s23678_s2 + $0xf0] sm:$0xff]  ;;  %v392_v24 = vld [vmem:[%s23678_s2 + $0x100] sm:$0xff] }
 0x14e   :  { %15949 = vmatprep.subr.bf16.mxu1 %v15948_v26  ;;  %v336_v50 = vmul.f32 0.01, %v320_v28  ;;  %v337_v41 = vmul.f32 0.01, %v321_v11  ;;  %v338_v49 = vmul.f32 0.01, %v322_v30 }
 0x14f   :  { %v339_v62 = vmul.f32 0.01, %v323_v34  ;;  %v340_v33 = vmul.f32 0.01, %v324_v29  ;;  %v341_v47 = vmul.f32 0.01, %v325_v31 }
 0x150   :  { %v352_v35 = vmax.f32 %v320_v28, %v336_v50  ;;  %v353_v57 = vmax.f32 %v321_v11, %v337_v41  ;;  %v354_v36 = vmax.f32 %v322_v30, %v338_v49  ;;  %v342_v37 = vmul.f32 0.01, %v326_v17  ;;  %v391_v23 = vld [vmem:[%s23678_s2 + $0xf8] sm:$0xff]  ;;  %v393_v25 = vld [vmem:[%s23678_s2 + $0x108] sm:$0xff]  ;;  %v398_v11 = vld [vmem:[%s23678_s2 + $0x130] sm:$0xff] }
 0x151   :  { %15951 = vmatpush3.bf16.msra.mxu1 %v15948_v26  ;;  %v355_v38 = vmax.f32 %v323_v34, %v339_v62  ;;  %v356_v56 = vmax.f32 %v324_v29, %v340_v33  ;;  %v357_v39 = vmax.f32 %v325_v31, %v341_v47  ;;  %v343_v1 = vmul.f32 0.01, %v327_v32  ;;  %v394_v26 = vld [vmem:[%s23678_s2 + $0x110] sm:$0xff]  ;;  %v395_v27 = vld [vmem:[%s23678_s2 + $0x118] sm:$0xff]  ;;  %v397_v28 = vld [vmem:[%s23678_s2 + $0x128] sm:$0xff] }
 0x152   :  { %v15952_v40 = vpack.c.bf16 %v353_v57, %v352_v35  ;;  %v358_v43 = vmax.f32 %v326_v17, %v342_v37  ;;  %v396_v17 = vld [vmem:[%s23678_s2 + $0x120] sm:$0xff]  ;;  %v399_v30 = vld [vmem:[%s23678_s2 + $0x138] sm:$0xff]  ;;  %v401_v29 = vld [vmem:[%s23678_s2 + $0x148] sm:$0xff] }
 0x153   :  { %v15956_v61 = vpack.c.bf16 %v355_v38, %v354_v36  ;;  %v15960_v10 = vpack.c.bf16 %v357_v39, %v356_v56  ;;  %v359_v44 = vmax.f32 %v327_v32, %v343_v1  ;;  %v400_v34 = vld [vmem:[%s23678_s2 + $0x140] sm:$0xff]  ;;  %v402_v31 = vld [vmem:[%s23678_s2 + $0x150] sm:$0xff]  ;;  %v403_v32 = vld [vmem:[%s23678_s2 + $0x158] sm:$0xff] }
 0x154   :  { %15953 = vmatprep.subr.bf16.mxu1 %v15952_v40  ;;  %v404_v50 = vld [vmem:[%s23678_s2 + $0x160] sm:$0xff]  ;;  %v10457_v49 = vld [vmem:[%s23679_s3 + $0x88] sm:$0xff]  ;;  %v406_v47 = vld [vmem:[%s23678_s2 + $0x170] sm:$0xff] }
 0x155   :  { %15955 = vmatpush3.bf16.msra.mxu1 %v15952_v40  ;;  %v15964_v46 = vpack.c.bf16 %v359_v44, %v358_v43  ;;  %v10456_v41 = vld [vmem:[%s23679_s3 + $0x80] sm:$0xff]  ;;  %v405_v62 = vld [vmem:[%s23678_s2 + $0x168] sm:$0xff]  ;;  %v10458_v35 = vld [vmem:[%s23679_s3 + $0x90] sm:$0xff] }
 0x156   :  { %15957 = vmatprep.subr.bf16.mxu1 %v15956_v61  ;;  %v15968_v33 = vpack.c.bf16 %v10457_v49, %v10456_v41  ;;  %v10459_v57 = vld [vmem:[%s23679_s3 + $0x98] sm:$0xff]  ;;  %v408_v38 = vld [vmem:[%s23678_s2 + $0x180] sm:$0xff]  ;;  %v10461_v39 = vld [vmem:[%s23679_s3 + $0xa8] sm:$0xff] }
 0x157   :  { %v407_v36 = vld [vmem:[%s23678_s2 + $0x178] sm:$0xff]  ;;  %v15972_v37 = vpack.c.bf16 %v10459_v57, %v10458_v35  ;;  %v10460_v56 = vld [vmem:[%s23679_s3 + $0xa0] sm:$0xff]  ;;  %v409_v1 = vld [vmem:[%s23678_s2 + $0x188] sm:$0xff] }
 0x158   :  { %15969 = vmatprep.subr.bf16.mxu0 %v15968_v33  ;;  %v15976_v40 = vpack.c.bf16 %v10461_v39, %v10460_v56  ;;  %v410_v43 = vld [vmem:[%s23678_s2 + $0x190] sm:$0xff]  ;;  %v411_v44 = vld [vmem:[%s23678_s2 + $0x198] sm:$0xff]  ;;  %v441_v41 = vld [vmem:[%s23678_s2 + $0x288] sm:$0xff] }
 0x159   :  { %15959 = vmatpush3.bf16.msra.mxu1 %v15956_v61  ;;  %15971 = vmatpush3.bf16.msra.mxu0 %v15968_v33  ;;  %v10462_v61 = vld [vmem:[%s23679_s3 + $0xb0] sm:$0xff]  ;;  %v444_v33 = vld [vmem:[%s23678_s2 + $0x2a0] sm:$0xff]  ;;  %v447_v57 = vld [vmem:[%s23678_s2 + $0x2b8] sm:$0xff] }
 0x15a   :  { %15961 = vmatprep.subr.bf16.mxu1 %v15960_v10  ;;  %15973 = vmatprep.subr.bf16.mxu0 %v15972_v37  ;;  %v442_v49 = vld [vmem:[%s23678_s2 + $0x290] sm:$0xff]  ;;  %v451_v56 = vld [vmem:[%s23678_s2 + $0x2d8] sm:$0xff]  ;;  %v452_v39 = vld [vmem:[%s23678_s2 + $0x2e0] sm:$0xff] }
 0x15b   :  { %v446_v35 = vld [vmem:[%s23678_s2 + $0x2b0] sm:$0xff] }
 0x15d   :  { %15963 = vmatpush3.bf16.msra.mxu1 %v15960_v10  ;;  %15975 = vmatpush3.bf16.msra.mxu0 %v15972_v37  ;;  %v10463_v10 = vld [vmem:[%s23679_s3 + $0xb8] sm:$0xff]  ;;  %v449_v37 = vld [vmem:[%s23678_s2 + $0x2c8] sm:$0xff] }
 0x15e   :  { %15965 = vmatprep.subr.bf16.mxu1 %v15964_v46  ;;  %15977 = vmatprep.subr.bf16.mxu0 %v15976_v40 }
 0x161   :  { %15967 = vmatpush3.bf16.msra.mxu1 %v15964_v46  ;;  %15979 = vmatpush3.bf16.msra.mxu0 %v15976_v40  ;;  %v15980_v46 = vpack.c.bf16 %v10463_v10, %v10462_v61  ;;  %v454_v40 = vld [vmem:[%s23678_s2 + $0x2f0] sm:$0xff]  ;;  %v456_v61 = vld [vmem:[%s23678_s2 + $0x300] sm:$0xff]  ;;  %v457_v10 = vld [vmem:[%s23678_s2 + $0x308] sm:$0xff] }
 0x163   :  { %15981 = vmatprep.subr.bf16.mxu0 %v15980_v46 }
 0x164   :  { %12929 = vmatmul.mubr.f32.vlgmr.msra.gmra.mrb[0].mxu1 %v361_v48  ;;  %v412_v48 = vld [vmem:[%s23678_s2 + $0x1a0] sm:$0xff] }
 0x165   :  { %12931 = vmatprep.mubr.f32.mxu1 %v362_v51  ;;  %15983 = vmatpush3.bf16.msra.mxu0 %v15980_v46  ;;  %v10464_v51 = vld [vmem:[%s23679_s3 + $0xc0] sm:$0xff]  ;;  %v459_v46 = vld [vmem:[%s23678_s2 + $0x318] sm:$0xff] }
 0x168   :  { %12932 = vmatmul.mubr.f32.gmra.mrb[2].mxu1 %v363_v52  ;;  %v10465_v52 = vld [vmem:[%s23679_s3 + $0xc8] sm:$0xff] }
 0x169   :  { %12934 = vmatprep.mubr.f32.mxu1 %v364_v53  ;;  %v413_v53 = vld [vmem:[%s23678_s2 + $0x1a8] sm:$0xff] }
 0x16c   :  { %12935 = vmatmul.mubr.f32.gmra.mrb[4].mxu1 %v365_v54  ;;  %v15984_v54 = vpack.c.bf16 %v10465_v52, %v10464_v51  ;;  %v461_v51 = vld [vmem:[%s23678_s2 + $0x328] sm:$0xff]  ;;  %v462_v52 = vld [vmem:[%s23678_s2 + $0x330] sm:$0xff] }
 0x16d   :  { %12937 = vmatprep.mubr.f32.mxu1 %v366_v55  ;;  %v414_v55 = vld [vmem:[%s23678_s2 + $0x1b0] sm:$0xff] }
 0x16e   :  { %15985 = vmatprep.subr.bf16.mxu0 %v15984_v54 }
 0x16f   :  { %15987 = vmatpush3.bf16.msra.mxu0 %v15984_v54  ;;  %v464_v54 = vld [vmem:[%s23678_s2 + $0x340] sm:$0xff] }
 0x170   :  { %12938 = vmatmul.mubr.f32.gmra.mrb[6].mxu1 %v367_v58  ;;  %v10466_v58 = vld [vmem:[%s23679_s3 + $0xd0] sm:$0xff] }
 0x171   :  { %12940 = vmatprep.mubr.f32.mxu1 %v368_v59  ;;  %v10467_v59 = vld [vmem:[%s23679_s3 + $0xd8] sm:$0xff] }
 0x174   :  { %12941 = vmatmul.mubr.f32.gmra.mrb[8].mxu1 %v369_v60  ;;  %v415_v60 = vld [vmem:[%s23678_s2 + $0x1b8] sm:$0xff] }
 0x175   :  { %12943 = vmatprep.mubr.f32.mxu1 %v370_v63  ;;  %v15988_v63 = vpack.c.bf16 %v10467_v59, %v10466_v58  ;;  %v466_v58 = vld [vmem:[%s23678_s2 + $0x350] sm:$0xff]  ;;  %v467_v59 = vld [vmem:[%s23678_s2 + $0x358] sm:$0xff] }
 0x177   :  { %15989 = vmatprep.subr.bf16.mxu0 %v15988_v63 }
 0x178   :  { %12944 = vmatmul.mubr.f32.gmra.mrb[10].mxu1 %v371_v0  ;;  %v416_v0 = vld [vmem:[%s23678_s2 + $0x1c0] sm:$0xff]  ;;  %15991 = vmatpush3.bf16.msra.mxu0 %v15988_v63 }
 0x179   :  { %12946 = vmatprep.mubr.f32.mxu1 %v372_v2  ;;  %v10468_v2 = vld [vmem:[%s23679_s3 + $0xe0] sm:$0xff] }
 0x17c   :  { %12947 = vmatmul.mubr.f32.gmra.mrb[12].mxu1 %v373_v3  ;;  %v10469_v3 = vld [vmem:[%s23679_s3 + $0xe8] sm:$0xff] }
 0x17d   :  { %12949 = vmatprep.mubr.f32.mxu1 %v374_v5  ;;  %v417_v5 = vld [vmem:[%s23678_s2 + $0x1c8] sm:$0xff] }
 0x180   :  { %12950 = vmatmul.mubr.f32.gmra.mrb[14].mxu1 %v375_v6  ;;  %v15992_v6 = vpack.c.bf16 %v10469_v3, %v10468_v2  ;;  %v469_v2 = vld [vmem:[%s23678_s2 + $0x368] sm:$0xff]  ;;  %v470_v3 = vld [vmem:[%s23678_s2 + $0x370] sm:$0xff] }
 0x181   :  { %12952 = vmatprep.mubr.f32.mxu1 %v376_v7  ;;  %v418_v7 = vld [vmem:[%s23678_s2 + $0x1d0] sm:$0xff] }
 0x182   :  { %15993 = vmatprep.subr.bf16.mxu0 %v15992_v6 }
 0x183   :  { %15995 = vmatpush3.bf16.msra.mxu0 %v15992_v6 }
 0x184   :  { %12953 = vmatmul.mubr.f32.gmra.mrb[16].mxu1 %v377_v4  ;;  %v10470_v4 = vld [vmem:[%s23679_s3 + $0xf0] sm:$0xff] }
 0x185   :  { %12955 = vmatprep.mubr.f32.mxu1 %v378_v8  ;;  %v10471_v8 = vld [vmem:[%s23679_s3 + $0xf8] sm:$0xff] }
 0x188   :  { %12956 = vmatmul.mubr.f32.gmra.mrb[18].mxu1 %v379_v9  ;;  %v419_v9 = vld [vmem:[%s23678_s2 + $0x1d8] sm:$0xff] }
 0x189   :  { %12958 = vmatprep.mubr.f32.mxu1 %v380_v12  ;;  %v15996_v12 = vpack.c.bf16 %v10471_v8, %v10470_v4  ;;  %v472_v4 = vld [vmem:[%s23678_s2 + $0x380] sm:$0xff] }
 0x18b   :  { %15997 = vmatprep.subr.bf16.mxu0 %v15996_v12 }
 0x18c   :  { %12959 = vmatmul.mubr.f32.gmra.mrb[20].mxu1 %v381_v13  ;;  %v420_v13 = vld [vmem:[%s23678_s2 + $0x1e0] sm:$0xff]  ;;  %15999 = vmatpush3.bf16.msra.mxu0 %v15996_v12  ;;  %v473_v12 = vld [vmem:[%s23678_s2 + $0x388] sm:$0xff] }
 0x18d   :  { %12961 = vmatprep.mubr.f32.mxu1 %v382_v14  ;;  %v421_v14 = vld [vmem:[%s23678_s2 + $0x1e8] sm:$0xff] }
 0x190   :  { %12962 = vmatmul.mubr.f32.gmra.mrb[22].mxu1 %v383_v15  ;;  %v422_v15 = vld [vmem:[%s23678_s2 + $0x1f0] sm:$0xff] }
 0x191   :  { %12964 = vmatprep.mubr.f32.mxu1 %v384_v16  ;;  %v1289_v16 = vld [vmem:[%s23679_s3] sm:$0xff] }
 0x194   :  { %12965 = vmatmul.mubr.f32.gmra.mrb[24].mxu1 %v385_v18  ;;  %v1290_v18 = vld [vmem:[%s23679_s3 + $0x8] sm:$0xff] }
 0x195   :  { %12967 = vmatprep.mubr.f32.mxu1 %v386_v45  ;;  %v18679_v45 = vpack.c.bf16 %v1290_v18, %v1289_v16  ;;  %v475_v16 = vld [vmem:[%s23678_s2 + $0x398] sm:$0xff]  ;;  %v476_v18 = vld [vmem:[%s23678_s2 + $0x3a0] sm:$0xff] }
 0x197   :  { %16001 = vmatprep.subr.bf16.mxu0 %v18679_v45 }
 0x198   :  { %12968 = vmatmul.mubr.f32.gmra.mrb[26].mxu1 %v387_v19  ;;  %v423_v19 = vld [vmem:[%s23678_s2 + $0x1f8] sm:$0xff] }
 0x199   :  { %12970 = vmatprep.mubr.f32.mxu1 %v388_v20  ;;  %v424_v20 = vld [vmem:[%s23678_s2 + $0x200] sm:$0xff] }
 0x19c   :  { %12971 = vmatmul.mubr.f32.gmra.mrb[28].mxu1 %v389_v22  ;;  %v425_v22 = vld [vmem:[%s23678_s2 + $0x208] sm:$0xff] }
 0x19d   :  { %12973 = vmatprep.mubr.f32.mxu1 %v390_v21  ;;  %v426_v21 = vld [vmem:[%s23678_s2 + $0x210] sm:$0xff] }
 0x1a0   :  { %12974 = vmatmul.mubr.f32.gmra.mrb[30].mxu1 %v391_v23  ;;  %v427_v23 = vld [vmem:[%s23678_s2 + $0x218] sm:$0xff] }
 0x1a1   :  { %12976 = vmatprep.mubr.f32.mxu1 %v392_v24  ;;  %v428_v24 = vld [vmem:[%s23678_s2 + $0x220] sm:$0xff] }
 0x1a4   :  { %12977 = vmatmul.mubr.f32.gmra.mrb[32].mxu1 %v393_v25  ;;  %v429_v25 = vld [vmem:[%s23678_s2 + $0x228] sm:$0xff] }
 0x1a5   :  { %12979 = vmatprep.mubr.f32.mxu1 %v394_v26  ;;  %v430_v26 = vld [vmem:[%s23678_s2 + $0x230] sm:$0xff] }
 0x1a8   :  { %12980 = vmatmul.mubr.f32.gmra.mrb[34].mxu1 %v395_v27  ;;  %v431_v27 = vld [vmem:[%s23678_s2 + $0x238] sm:$0xff] }
 0x1a9   :  { %12982 = vmatprep.mubr.f32.mxu1 %v396_v17  ;;  %v432_v17 = vld [vmem:[%s23678_s2 + $0x240] sm:$0xff] }
 0x1ac   :  { %12983 = vmatmul.mubr.f32.gmra.mrb[36].mxu1 %v397_v28  ;;  %v433_v28 = vld [vmem:[%s23678_s2 + $0x248] sm:$0xff] }
 0x1ad   :  { %12985 = vmatprep.mubr.f32.mxu1 %v398_v11  ;;  %v434_v11 = vld [vmem:[%s23678_s2 + $0x250] sm:$0xff] }
 0x1b0   :  { %12986 = vmatmul.mubr.f32.gmra.mrb[38].mxu1 %v399_v30  ;;  %v435_v30 = vld [vmem:[%s23678_s2 + $0x258] sm:$0xff] }
 0x1b1   :  { %12988 = vmatprep.mubr.f32.mxu1 %v400_v34  ;;  %v436_v34 = vld [vmem:[%s23678_s2 + $0x260] sm:$0xff] }
 0x1b4   :  { %12989 = vmatmul.mubr.f32.gmra.mrb[40].mxu1 %v401_v29  ;;  %v437_v29 = vld [vmem:[%s23678_s2 + $0x268] sm:$0xff] }
 0x1b5   :  { %12991 = vmatprep.mubr.f32.mxu1 %v402_v31  ;;  %v438_v31 = vld [vmem:[%s23678_s2 + $0x270] sm:$0xff] }
 0x1b8   :  { %12992 = vmatmul.mubr.f32.gmra.mrb[42].mxu1 %v403_v32  ;;  %v439_v32 = vld [vmem:[%s23678_s2 + $0x278] sm:$0xff] }
 0x1b9   :  { %12994 = vmatprep.mubr.f32.mxu1 %v404_v50  ;;  %v440_v50 = vld [vmem:[%s23678_s2 + $0x280] sm:$0xff] }
 0x1bc   :  { %12995 = vmatmul.mubr.f32.gmra.mrb[44].mxu1 %v405_v62  ;;  %v443_v62 = vld [vmem:[%s23678_s2 + $0x298] sm:$0xff] }
 0x1bd   :  { %12997 = vmatprep.mubr.f32.mxu1 %v406_v47  ;;  %v445_v47 = vld [vmem:[%s23678_s2 + $0x2a8] sm:$0xff] }
 0x1c0   :  { %12998 = vmatmul.mubr.f32.gmra.mrb[46].mxu1 %v407_v36  ;;  %v448_v36 = vld [vmem:[%s23678_s2 + $0x2c0] sm:$0xff] }
 0x1c1   :  { %13000 = vmatprep.mubr.f32.mxu1 %v408_v38  ;;  %v450_v38 = vld [vmem:[%s23678_s2 + $0x2d0] sm:$0xff] }
 0x1c4   :  { %13001 = vmatmul.mubr.f32.gmra.mrb[48].mxu1 %v409_v1  ;;  %v453_v1 = vld [vmem:[%s23678_s2 + $0x2e8] sm:$0xff] }
 0x1c5   :  { %13003 = vmatprep.mubr.f32.mxu1 %v410_v43  ;;  %v455_v43 = vld [vmem:[%s23678_s2 + $0x2f8] sm:$0xff] }
 0x1c8   :  { %13004 = vmatmul.mubr.f32.gmra.mrb[50].mxu1 %v411_v44  ;;  %v458_v44 = vld [vmem:[%s23678_s2 + $0x310] sm:$0xff] }
 0x1c9   :  { %13006 = vmatprep.mubr.f32.mxu1 %v412_v48  ;;  %v460_v48 = vld [vmem:[%s23678_s2 + $0x320] sm:$0xff] }
 0x1cc   :  { %13007 = vmatmul.mubr.f32.gmra.mrb[52].mxu1 %v413_v53  ;;  %v463_v53 = vld [vmem:[%s23678_s2 + $0x338] sm:$0xff] }
 0x1cd   :  { %13009 = vmatprep.mubr.f32.mxu1 %v414_v55  ;;  %v465_v55 = vld [vmem:[%s23678_s2 + $0x348] sm:$0xff] }
 0x1d0   :  { %13010 = vmatmul.mubr.f32.gmra.mrb[54].mxu1 %v415_v60  ;;  %v468_v60 = vld [vmem:[%s23678_s2 + $0x360] sm:$0xff] }
 0x1d1   :  { %13012 = vmatprep.mubr.f32.mxu1 %v416_v0 }
 0x1d4   :  { %13013 = vmatmul.mubr.f32.gmra.mrb[56].mxu1 %v417_v5 }
 0x1d5   :  { %13015 = vmatprep.mubr.f32.mxu1 %v418_v7  ;;  %v471_v7 = vld [vmem:[%s23678_s2 + $0x378] sm:$0xff] }
 0x1d8   :  { %13016 = vmatmul.mubr.f32.gmra.mrb[58].mxu1 %v419_v9 }
 0x1d9   :  { %13018 = vmatprep.mubr.f32.mxu1 %v420_v13  ;;  %v474_v13 = vld [vmem:[%s23678_s2 + $0x390] sm:$0xff] }
 0x1dc   :  { %13019 = vmatmul.mubr.f32.gmra.mrb[60].mxu1 %v421_v14 }
 0x1dd   :  { %13021 = vmatprep.mubr.f32.mxu1 %v422_v15 }
 0x1e0   :  { %13022 = vmatmul.mubr.f32.gmra.mrb[62].mxu1 %v423_v19 }
 0x1e1   :  { %13024 = vmatprep.mubr.f32.mxu1 %v424_v20 }
 0x1e4   :  { %13025 = vmatmul.mubr.f32.gmra.mrb[64].mxu1 %v425_v22  ;;  %v477_v22 = vld [vmem:[%s23678_s2 + $0x3a8] sm:$0xff] }
 0x1e5   :  { %13027 = vmatprep.mubr.f32.mxu1 %v426_v21  ;;  %v478_v21 = vld [vmem:[%s23678_s2 + $0x3b0] sm:$0xff] }
 0x1e8   :  { %13028 = vmatmul.mubr.f32.gmra.mrb[66].mxu1 %v427_v23 }
 0x1e9   :  { %13030 = vmatprep.mubr.f32.mxu1 %v428_v24 }
 0x1ec   :  { %13031 = vmatmul.mubr.f32.gmra.mrb[68].mxu1 %v429_v25  ;;  %v479_v25 = vld [vmem:[%s23678_s2 + $0x3b8] sm:$0xff] }
 0x1ed   :  { %13033 = vmatprep.mubr.f32.mxu1 %v430_v26  ;;  %v480_v26 = vld [vmem:[%s23678_s2 + $0x3c0] sm:$0xff] }
 0x1f0   :  { %13034 = vmatmul.mubr.f32.gmra.mrb[70].mxu1 %v431_v27 }
 0x1f1   :  { %13036 = vmatprep.mubr.f32.mxu1 %v432_v17 }
 0x1f4   :  { %13037 = vmatmul.mubr.f32.gmra.mrb[72].mxu1 %v433_v28  ;;  %v481_v28 = vld [vmem:[%s23678_s2 + $0x3c8] sm:$0xff] }
 0x1f5   :  { %13039 = vmatprep.mubr.f32.mxu1 %v434_v11  ;;  %v482_v11 = vld [vmem:[%s23678_s2 + $0x3d0] sm:$0xff] }
 0x1f8   :  { %13040 = vmatmul.mubr.f32.gmra.mrb[74].mxu1 %v435_v30 }
 0x1f9   :  { %13042 = vmatprep.mubr.f32.mxu1 %v436_v34 }
 0x1fc   :  { %13043 = vmatmul.mubr.f32.gmra.mrb[76].mxu1 %v437_v29  ;;  %v1291_v29 = vld [vmem:[%s23679_s3 + $0x10] sm:$0xff] }
 0x1fd   :  { %13045 = vmatprep.mubr.f32.mxu1 %v438_v31  ;;  %v1292_v31 = vld [vmem:[%s23679_s3 + $0x18] sm:$0xff] }
 0x200   :  { %13046 = vmatmul.mubr.f32.gmra.mrb[78].mxu1 %v439_v32  ;;  %v483_v32 = vld [vmem:[%s23678_s2 + $0x3d8] sm:$0xff] }
 0x201   :  { %13048 = vmatprep.mubr.f32.mxu1 %v440_v50  ;;  %v484_v50 = vld [vmem:[%s23678_s2 + $0x3e0] sm:$0xff] }
 0x204   :  { %13049 = vmatmul.mubr.f32.gmra.mrb[80].mxu1 %v441_v41 }
 0x205   :  { %13051 = vmatprep.mubr.f32.mxu1 %v442_v49 }
 0x208   :  { %13052 = vmatmul.mubr.f32.gmra.mrb[82].mxu1 %v443_v62  ;;  %v16004_v62 = vpack.c.bf16 %v1292_v31, %v1291_v29 }
 0x209   :  { %13054 = vmatprep.mubr.f32.mxu1 %v444_v33  ;;  %v1293_v33 = vld [vmem:[%s23679_s3 + $0x20] sm:$0xff] }
 0x20c   :  { %13055 = vmatmul.mubr.f32.gmra.mrb[84].mxu1 %v445_v47  ;;  %v1294_v47 = vld [vmem:[%s23679_s3 + $0x28] sm:$0xff] }
 0x20d   :  { %13057 = vmatprep.mubr.f32.mxu1 %v446_v35  ;;  %v485_v35 = vld [vmem:[%s23678_s2 + $0x3e8] sm:$0xff] }
 0x210   :  { %13058 = vmatmul.mubr.f32.gmra.mrb[86].mxu1 %v447_v57  ;;  %v486_v57 = vld [vmem:[%s23678_s2 + $0x3f0] sm:$0xff] }
 0x211   :  { %13060 = vmatprep.mubr.f32.mxu1 %v448_v36 }
 0x214   :  { %13061 = vmatmul.mubr.f32.gmra.mrb[88].mxu1 %v449_v37 }
 0x215   :  { %13063 = vmatprep.mubr.f32.mxu1 %v450_v38  ;;  %v16008_v38 = vpack.c.bf16 %v1294_v47, %v1293_v33 }
 0x218   :  { %13064 = vmatmul.mubr.f32.gmra.mrb[90].mxu1 %v451_v56  ;;  %v1295_v56 = vld [vmem:[%s23679_s3 + $0x30] sm:$0xff] }
 0x219   :  { %13066 = vmatprep.mubr.f32.mxu1 %v452_v39  ;;  %v1296_v39 = vld [vmem:[%s23679_s3 + $0x38] sm:$0xff] }
 0x21c   :  { %13067 = vmatmul.mubr.f32.gmra.mrb[92].mxu1 %v453_v1  ;;  %v487_v1 = vld [vmem:[%s23678_s2 + $0x3f8] sm:$0xff] }
 0x21d   :  { %13069 = vmatprep.mubr.f32.mxu1 %v454_v40 }
 0x220   :  { %13070 = vmatmul.mubr.f32.gmra.mrb[94].mxu1 %v455_v43 }
 0x221   :  { %13072 = vmatprep.mubr.f32.mxu1 %v456_v61  ;;  %v16012_v61 = vpack.c.bf16 %v1296_v39, %v1295_v56 }
 0x224   :  { %13073 = vmatmul.mubr.f32.gmra.mrb[96].mxu1 %v457_v10  ;;  %v1297_v10 = vld [vmem:[%s23679_s3 + $0x40] sm:$0xff] }
 0x225   :  { %13075 = vmatprep.mubr.f32.mxu1 %v458_v44  ;;  %v1298_v44 = vld [vmem:[%s23679_s3 + $0x48] sm:$0xff] }
 0x228   :  { %13076 = vmatmul.mubr.f32.gmra.mrb[98].mxu1 %v459_v46  ;;  %v489_v46 = vld [vmem:[%s23678_s2 + $0x408] sm:$0xff] }
 0x229   :  { %13078 = vmatprep.mubr.f32.mxu1 %v460_v48  ;;  %v490_v48 = vld [vmem:[%s23678_s2 + $0x410] sm:$0xff] }
 0x22c   :  { %13079 = vmatmul.mubr.f32.gmra.mrb[100].mxu1 %v461_v51 }
 0x22d   :  { %13081 = vmatprep.mubr.f32.mxu1 %v462_v52 }
 0x230   :  { %13082 = vmatmul.mubr.f32.gmra.mrb[102].mxu1 %v463_v53  ;;  %v16016_v53 = vpack.c.bf16 %v1298_v44, %v1297_v10  ;;  %v10478_v44 = vld [vmem:[%s23679_s3 + $0x130] sm:$0xff] }
 0x231   :  { %13084 = vmatprep.mubr.f32.mxu1 %v464_v54  ;;  %v1299_v54 = vld [vmem:[%s23679_s3 + $0x50] sm:$0xff] }
 0x234   :  { %13085 = vmatmul.mubr.f32.gmra.mrb[104].mxu1 %v465_v55  ;;  %v1300_v55 = vld [vmem:[%s23679_s3 + $0x58] sm:$0xff] }
 0x235   :  { %13087 = vmatprep.mubr.f32.mxu1 %v466_v58  ;;  %v491_v58 = vld [vmem:[%s23678_s2 + $0x418] sm:$0xff] }
 0x237   :  { %v18820_v63 = vpop.f32.mrb[0].mxu1 }
 0x238   :  { %v18822_v0 = vpop.f32.mrb[1].mxu1  ;;  %13088 = vmatmul.mubr.f32.gmra.mrb[106].mxu1 %v467_v59  ;;  %v492_v59 = vld [vmem:[%s23678_s2 + $0x420] sm:$0xff] }
 0x239   :  { %13090 = vmatprep.mubr.f32.mxu1 %v468_v60 }
 0x23b   :  { %v18830_v5 = vpop.f32.mrb[2].mxu1 }
 0x23c   :  { %v18832_v6 = vpop.f32.mrb[3].mxu1  ;;  %13091 = vmatmul.mubr.f32.gmra.mrb[108].mxu1 %v469_v2 }
 0x23d   :  { %13093 = vmatprep.mubr.f32.mxu1 %v470_v3  ;;  %v16020_v3 = vpack.c.bf16 %v1300_v55, %v1299_v54 }
 0x23f   :  { %v18840_v8 = vpop.f32.mrb[4].mxu1 }
 0x240   :  { %v18842_v9 = vpop.f32.mrb[5].mxu1  ;;  %13094 = vmatmul.mubr.f32.gmra.mrb[110].mxu1 %v471_v7  ;;  %v1301_v7 = vld [vmem:[%s23679_s3 + $0x60] sm:$0xff] }
 0x241   :  { %13096 = vmatprep.mubr.f32.mxu1 %v472_v4  ;;  %v1302_v4 = vld [vmem:[%s23679_s3 + $0x68] sm:$0xff] }
 0x243   :  { %v18850_v14 = vpop.f32.mrb[6].mxu1 }
 0x244   :  { %v18852_v15 = vpop.f32.mrb[7].mxu1  ;;  %13097 = vmatmul.mubr.f32.gmra.mrb[112].mxu1 %v473_v12  ;;  %v493_v12 = vld [vmem:[%s23678_s2 + $0x428] sm:$0xff] }
 0x245   :  { %13099 = vmatprep.mubr.f32.mxu1 %v474_v13  ;;  %v494_v13 = vld [vmem:[%s23678_s2 + $0x430] sm:$0xff] }
 0x247   :  { %v18860_v19 = vpop.f32.mrb[8].mxu1 }
 0x248   :  { %v18862_v20 = vpop.f32.mrb[9].mxu1  ;;  %13100 = vmatmul.mubr.f32.gmra.mrb[114].mxu1 %v475_v16 }
 0x249   :  { %13102 = vmatprep.mubr.f32.mxu1 %v476_v18 }
 0x24b   :  { %v18870_v23 = vpop.f32.mrb[10].mxu1 }
 0x24c   :  { %v18872_v24 = vpop.f32.mrb[11].mxu1  ;;  %13103 = vmatmul.mubr.f32.gmra.mrb[116].mxu1 %v477_v22  ;;  %v16024_v22 = vpack.c.bf16 %v1302_v4, %v1301_v7  ;;  %v10486_v4 = vld [vmem:[%s23679_s3 + $0x170] sm:$0xff] }
 0x24d   :  { %13105 = vmatprep.mubr.f32.mxu1 %v478_v21  ;;  %v1303_v21 = vld [vmem:[%s23679_s3 + $0x70] sm:$0xff] }
 0x24f   :  { %v18880_v27 = vpop.f32.mrb[12].mxu1 }
 0x250   :  { %v18882_v17 = vpop.f32.mrb[13].mxu1  ;;  %13106 = vmatmul.mubr.f32.gmra.mrb[118].mxu1 %v479_v25  ;;  %v1304_v25 = vld [vmem:[%s23679_s3 + $0x78] sm:$0xff] }
 0x251   :  { %13108 = vmatprep.mubr.f32.mxu1 %v480_v26  ;;  %v495_v26 = vld [vmem:[%s23678_s2 + $0x438] sm:$0xff]  ;;  %v16028_v31 = vpack.c.bf16 %v1304_v25, %v1303_v21  ;;  %v10490_v21 = vld [vmem:[%s23679_s3 + $0x190] sm:$0xff] }
 0x252   :  { %v10491_v25 = vld [vmem:[%s23679_s3 + $0x198] sm:$0xff] }
 0x253   :  { %v18890_v30 = vpop.f32.mrb[14].mxu1 }
 0x254   :  { %v18892_v34 = vpop.f32.mrb[15].mxu1  ;;  %13109 = vmatmul.mubr.f32.gmra.mrb[120].mxu1 %v481_v28  ;;  %v496_v28 = vld [vmem:[%s23678_s2 + $0x440] sm:$0xff] }
 0x255   :  { %13111 = vmatprep.mubr.f32.mxu1 %v482_v11 }
 0x257   :  { %v12954_v41 = vpop.f32.mrb[16].mxu1 }
 0x258   :  { %v650_v49 = vpop.f32.mrb[17].mxu1  ;;  %13112 = vmatmul.mubr.f32.gmra.mrb[122].mxu1 %v483_v32  ;;  %v10472_v32 = vld [vmem:[%s23679_s3 + $0x100] sm:$0xff] }
 0x259   :  { %13176 = vmatprep.mubr.f32.mxu0 %v650_v49  ;;  %13114 = vmatprep.mubr.f32.mxu1 %v484_v50  ;;  %v10473_v50 = vld [vmem:[%s23679_s3 + $0x108] sm:$0xff]  ;;  %v498_v49 = vld [vmem:[%s23678_s2 + $0x450] sm:$0xff] }
 0x25a   :  { %13177 = vmatmul.mubr.f32.vlgmr.msra.gmra.mrb[16].mxu0 %v12954_v41  ;;  %v497_v41 = vld [vmem:[%s23678_s2 + $0x448] sm:$0xff]  ;;  %v16032_v47 = vpack.c.bf16 %v10473_v50, %v10472_v32  ;;  %v10494_v32 = vld [vmem:[%s23679_s3 + $0x1b0] sm:$0xff]  ;;  %v10495_v50 = vld [vmem:[%s23679_s3 + $0x1b8] sm:$0xff] }
 0x25b   :  { %v12957_v36 = vpop.f32.mrb[18].mxu1  ;;  %16003 = vmatpush3.bf16.msra.mxu0 %v18679_v45  ;;  %v488_v45 = vld [vmem:[%s23678_s2 + $0x400] sm:$0xff] }
 0x25c   :  { %v660_v37 = vpop.f32.mrb[19].mxu1  ;;  %16005 = vmatprep.subr.bf16.mxu0 %v16004_v62  ;;  %13115 = vmatmul.mubr.f32.gmra.mrb[124].mxu1 %v485_v35  ;;  %v10474_v35 = vld [vmem:[%s23679_s3 + $0x110] sm:$0xff] }
 0x25d   :  { %13179 = vmatprep.mubr.f32.mxu0 %v660_v37  ;;  %13117 = vmatprep.mubr.f32.mxu1 %v486_v57  ;;  %v10475_v57 = vld [vmem:[%s23679_s3 + $0x118] sm:$0xff]  ;;  %v500_v37 = vld [vmem:[%s23678_s2 + $0x460] sm:$0xff] }
 0x25e   :  { %13180 = vmatmul.mubr.f32.gmra.mrb[18].mxu0 %v12957_v36  ;;  %v499_v36 = vld [vmem:[%s23678_s2 + $0x458] sm:$0xff]  ;;  %v16036_v56 = vpack.c.bf16 %v10475_v57, %v10474_v35 }
 0x25f   :  { %v12960_v40 = vpop.f32.mrb[20].mxu1  ;;  %16007 = vmatpush3.bf16.msra.mxu0 %v16004_v62 }
 0x260   :  { %v670_v43 = vpop.f32.mrb[21].mxu1  ;;  %16009 = vmatprep.subr.bf16.mxu0 %v16008_v38  ;;  %13118 = vmatmul.mubr.f32.gmra.mrb[126].mxu1 %v487_v1  ;;  %v10476_v1 = vld [vmem:[%s23679_s3 + $0x120] sm:$0xff] }
 0x261   :  { %13182 = vmatprep.mubr.f32.mxu0 %v670_v43  ;;  %13120 = vmatprep.mubr.f32.mxu1 %v488_v45  ;;  %v10477_v45 = vld [vmem:[%s23679_s3 + $0x128] sm:$0xff] }
 0x262   :  { %13183 = vmatmul.mubr.f32.gmra.mrb[20].mxu0 %v12960_v40  ;;  %v502_v40 = vld [vmem:[%s23678_s2 + $0x470] sm:$0xff] }
 0x263   :  { %v12963_v51 = vpop.f32.mrb[22].mxu1  ;;  %16011 = vmatpush3.bf16.msra.mxu0 %v16008_v38 }
 0x264   :  { %v680_v52 = vpop.f32.mrb[23].mxu1  ;;  %16013 = vmatprep.subr.bf16.mxu0 %v16012_v61  ;;  %13121 = vmatmul.mubr.f32.gmra.mrb[128].mxu1 %v489_v46 }
 0x265   :  { %13185 = vmatprep.mubr.f32.mxu0 %v680_v52  ;;  %13123 = vmatprep.mubr.f32.mxu1 %v490_v48  ;;  %v10480_v52 = vld [vmem:[%s23679_s3 + $0x140] sm:$0xff] }
 0x266   :  { %13186 = vmatmul.mubr.f32.gmra.mrb[22].mxu0 %v12963_v51 }
 0x267   :  { %v12966_v60 = vpop.f32.mrb[24].mxu1  ;;  %16015 = vmatpush3.bf16.msra.mxu0 %v16012_v61  ;;  %v16040_v61 = vpack.c.bf16 %v10477_v45, %v10476_v1  ;;  %v10500_v45 = vld [vmem:[%s23679_s3 + $0x1e0] sm:$0xff] }
 0x268   :  { %v690_v2 = vpop.f32.mrb[25].mxu1  ;;  %16017 = vmatprep.subr.bf16.mxu0 %v16016_v53  ;;  %13124 = vmatmul.mubr.f32.gmra.mrb[130].mxu1 %v491_v58  ;;  %v10482_v58 = vld [vmem:[%s23679_s3 + $0x150] sm:$0xff] }
 0x269   :  { %13188 = vmatprep.mubr.f32.mxu0 %v690_v2  ;;  %13126 = vmatprep.mubr.f32.mxu1 %v492_v59  ;;  %v10483_v59 = vld [vmem:[%s23679_s3 + $0x158] sm:$0xff]  ;;  %v10484_v2 = vld [vmem:[%s23679_s3 + $0x160] sm:$0xff] }
 0x26a   :  { %13189 = vmatmul.mubr.f32.gmra.mrb[24].mxu0 %v12966_v60 }
 0x26b   :  { %v12969_v16 = vpop.f32.mrb[26].mxu1  ;;  %16019 = vmatpush3.bf16.msra.mxu0 %v16016_v53  ;;  %v10481_v53 = vld [vmem:[%s23679_s3 + $0x148] sm:$0xff] }
 0x26c   :  { %v700_v18 = vpop.f32.mrb[27].mxu1  ;;  %16021 = vmatprep.subr.bf16.mxu0 %v16020_v3  ;;  %13127 = vmatmul.mubr.f32.gmra.mrb[132].mxu1 %v493_v12  ;;  %v16048_v54 = vpack.c.bf16 %v10481_v53, %v10480_v52  ;;  %v10487_v12 = vld [vmem:[%s23679_s3 + $0x178] sm:$0xff] }
 0x26d   :  { %13191 = vmatprep.mubr.f32.mxu0 %v700_v18  ;;  %13129 = vmatprep.mubr.f32.mxu1 %v494_v13  ;;  %v10489_v18 = vld [vmem:[%s23679_s3 + $0x188] sm:$0xff] }
 0x26e   :  { %13192 = vmatmul.mubr.f32.gmra.mrb[26].mxu0 %v12969_v16  ;;  %v10488_v16 = vld [vmem:[%s23679_s3 + $0x180] sm:$0xff] }
 0x26f   :  { %v12972_v11 = vpop.f32.mrb[28].mxu1  ;;  %16023 = vmatpush3.bf16.msra.mxu0 %v16020_v3  ;;  %v10485_v3 = vld [vmem:[%s23679_s3 + $0x168] sm:$0xff] }
 0x270   :  { %v710_v29 = vpop.f32.mrb[29].mxu1  ;;  %16025 = vmatprep.subr.bf16.mxu0 %v16024_v22  ;;  %13130 = vmatmul.mubr.f32.gmra.mrb[134].mxu1 %v495_v26 }
 0x271   :  { %13194 = vmatprep.mubr.f32.mxu0 %v710_v29  ;;  %13132 = vmatprep.mubr.f32.mxu1 %v496_v28  ;;  %v10492_v28 = vld [vmem:[%s23679_s3 + $0x1a0] sm:$0xff] }
 0x272   :  { %13195 = vmatmul.mubr.f32.gmra.mrb[28].mxu0 %v12972_v11  ;;  %v10493_v11 = vld [vmem:[%s23679_s3 + $0x1a8] sm:$0xff] }
 0x273   :  { %v12975_v62 = vpop.f32.mrb[30].mxu1  ;;  %16027 = vmatpush3.bf16.msra.mxu0 %v16024_v22  ;;  %v16072_v29 = vpack.c.bf16 %v10493_v11, %v10492_v28 }
 0x274   :  { %v720_v33 = vpop.f32.mrb[31].mxu1  ;;  %16029 = vmatprep.subr.bf16.mxu0 %v16028_v31  ;;  %13133 = vmatmul.mubr.f32.gmra.mrb[136].mxu1 %v497_v41 }
 0x275   :  { %13197 = vmatprep.mubr.f32.mxu0 %v720_v33  ;;  %13135 = vmatprep.mubr.f32.mxu1 %v498_v49  ;;  %v16076_v49 = vpack.c.bf16 %v10495_v50, %v10494_v32  ;;  %v10496_v33 = vld [vmem:[%s23679_s3 + $0x1c0] sm:$0xff] }
 0x276   :  { %13198 = vmatmul.mubr.f32.gmra.mrb[30].mxu0 %v12975_v62 }
 0x277   :  { %16031 = vmatpush3.bf16.msra.mxu0 %v16028_v31  ;;  %13232 = vmatprep.mubr.f32.mxu0 %v18822_v0  ;;  %v19004_v38 = vpop.f32.mrb[32].mxu1  ;;  %v501_v0 = vld [vmem:[%s23678_s2 + $0x468] sm:$0xff] }
 0x278   :  { %16033 = vmatprep.subr.bf16.mxu0 %v16032_v47  ;;  %v19006_v39 = vpop.f32.mrb[33].mxu1  ;;  %13136 = vmatmul.mubr.f32.gmra.mrb[138].mxu1 %v499_v36 }
 0x279   :  { %13138 = vmatprep.mubr.f32.mxu1 %v500_v37  ;;  %v10498_v37 = vld [vmem:[%s23679_s3 + $0x1d0] sm:$0xff] }
 0x27a   :  { %13233 = vmatmul.mubr.f32.vlgmr.msra.gmra.mrb[16].mxu0 %v18820_v63  ;;  %v10479_v63 = vld [vmem:[%s23679_s3 + $0x138] sm:$0xff] }
 0x27b   :  { %13235 = vmatprep.mubr.f32.mxu0 %v18832_v6  ;;  %16035 = vmatpush3.bf16.msra.mxu0 %v16032_v47  ;;  %v19022_v43 = vpop.f32.mrb[34].mxu1  ;;  %v503_v6 = vld [vmem:[%s23678_s2 + $0x478] sm:$0xff]  ;;  %v16044_v48 = vpack.c.bf16 %v10479_v63, %v10478_v44  ;;  %v10497_v47 = vld [vmem:[%s23679_s3 + $0x1c8] sm:$0xff] }
 0x27c   :  { %16037 = vmatprep.subr.bf16.mxu0 %v16036_v56  ;;  %v19024_v10 = vpop.f32.mrb[35].mxu1  ;;  %13139 = vmatmul.mubr.f32.gmra.mrb[140].mxu1 %v501_v0  ;;  %v16080_v57 = vpack.c.bf16 %v10497_v47, %v10496_v33  ;;  %v10501_v0 = vld [vmem:[%s23679_s3 + $0x1e8] sm:$0xff]  ;;  %v10503_v44 = vld [vmem:[%s23679_s3 + $0x1f8] sm:$0xff] }
 0x27d   :  { %13141 = vmatprep.mubr.f32.mxu1 %v502_v40 }
 0x27e   :  { %13236 = vmatmul.mubr.f32.gmra.mrb[18].mxu0 %v18830_v5  ;;  %v17763_v5 = vld [vmem:[%s23678_s2] sm:$0xff] }
 0x27f   :  { %13238 = vmatprep.mubr.f32.mxu0 %v18842_v9  ;;  %16039 = vmatpush3.bf16.msra.mxu0 %v16036_v56  ;;  %v19037_v46 = vpop.f32.mrb[36].mxu1 }
 0x280   :  { %16041 = vmatprep.subr.bf16.mxu0 %v16040_v61  ;;  %v19039_v51 = vpop.f32.mrb[37].mxu1  ;;  %13142 = vmatmul.mubr.f32.gmra.mrb[142].mxu1 %v503_v6 }
 0x281   :  { %13680 = vmatprep.mubr.f32.mxu1 %v17763_v5 }
 0x282   :  { %13239 = vmatmul.mubr.f32.gmra.mrb[20].mxu0 %v18840_v8 }
 0x283   :  { %13241 = vmatprep.mubr.f32.mxu0 %v18852_v15  ;;  %16043 = vmatpush3.bf16.msra.mxu0 %v16040_v61  ;;  %v19052_v9 = vpop.f32.mrb[38].mxu1  ;;  %v16052_v15 = vpack.c.bf16 %v10483_v59, %v10482_v58 }
 0x284   :  { %16045 = vmatprep.subr.bf16.mxu0 %v16044_v48  ;;  %v19054_v55 = vpop.f32.mrb[39].mxu1 }
 0x286   :  { %13242 = vmatmul.mubr.f32.gmra.mrb[22].mxu0 %v18850_v14 }
 0x287   :  { %13244 = vmatprep.mubr.f32.mxu0 %v18862_v20  ;;  %16047 = vmatpush3.bf16.msra.mxu0 %v16044_v48  ;;  %v19064_v8 = vpop.f32.mrb[40].mxu1  ;;  %v16056_v20 = vpack.c.bf16 %v10485_v3, %v10484_v2  ;;  %v10504_v48 = vld [vmem:[%s23679_s3 + $0x200] sm:$0xff] }
 0x288   :  { %16049 = vmatprep.subr.bf16.mxu0 %v16048_v54  ;;  %v19066_v60 = vpop.f32.mrb[41].mxu1 }
 0x28a   :  { %13245 = vmatmul.mubr.f32.gmra.mrb[24].mxu0 %v18860_v19 }
 0x28b   :  { %13247 = vmatprep.mubr.f32.mxu0 %v18872_v24  ;;  %16051 = vmatpush3.bf16.msra.mxu0 %v16048_v54  ;;  %v19076_v14 = vpop.f32.mrb[42].mxu1  ;;  %v16060_v24 = vpack.c.bf16 %v10487_v12, %v10486_v4  ;;  %v10507_v54 = vld [vmem:[%s23679_s3 + $0x218] sm:$0xff] }
 0x28c   :  { %16053 = vmatprep.subr.bf16.mxu0 %v16052_v15  ;;  %v19078_v7 = vpop.f32.mrb[43].mxu1 }
 0x28e   :  { %13248 = vmatmul.mubr.f32.gmra.mrb[26].mxu0 %v18870_v23 }
 0x28f   :  { %13250 = vmatprep.mubr.f32.mxu0 %v18882_v17  ;;  %16055 = vmatpush3.bf16.msra.mxu0 %v16052_v15  ;;  %v19088_v19 = vpop.f32.mrb[44].mxu1  ;;  %v16064_v17 = vpack.c.bf16 %v10489_v18, %v10488_v16  ;;  %v10509_v15 = vld [vmem:[%s23679_s3 + $0x228] sm:$0xff] }
 0x290   :  { %16057 = vmatprep.subr.bf16.mxu0 %v16056_v20  ;;  %v19090_v13 = vpop.f32.mrb[45].mxu1 }
 0x292   :  { %13251 = vmatmul.mubr.f32.gmra.mrb[28].mxu0 %v18880_v27 }
 0x293   :  { %13253 = vmatprep.mubr.f32.mxu0 %v18892_v34  ;;  %16059 = vmatpush3.bf16.msra.mxu0 %v16056_v20  ;;  %v19100_v23 = vpop.f32.mrb[46].mxu1  ;;  %v16068_v34 = vpack.c.bf16 %v10491_v25, %v10490_v21  ;;  %v10511_v20 = vld [vmem:[%s23679_s3 + $0x238] sm:$0xff] }
 0x294   :  { %16061 = vmatprep.subr.bf16.mxu0 %v16060_v24  ;;  %v19102_v22 = vpop.f32.mrb[47].mxu1 }
 0x296   :  { %13254 = vmatmul.mubr.f32.gmra.mrb[30].mxu0 %v18890_v30 }
 0x297   :  { %16063 = vmatpush3.bf16.msra.mxu0 %v16060_v24  ;;  %13288 = vmatprep.mubr.f32.mxu0 %v19006_v39  ;;  %v19112_v27 = vpop.f32.mrb[48].mxu1  ;;  %v10513_v24 = vld [vmem:[%s23679_s3 + $0x248] sm:$0xff] }
 0x298   :  { %16065 = vmatprep.subr.bf16.mxu0 %v16064_v17  ;;  %v19114_v26 = vpop.f32.mrb[49].mxu1 }
 0x29a   :  { %13289 = vmatmul.mubr.f32.vlgmr.msra.gmra.mrb[16].mxu0 %v19004_v38  ;;  %v10499_v38 = vld [vmem:[%s23679_s3 + $0x1d8] sm:$0xff] }
 0x29b   :  { %16067 = vmatpush3.bf16.msra.mxu0 %v16064_v17  ;;  %13291 = vmatprep.mubr.f32.mxu0 %v19024_v10  ;;  %v19124_v30 = vpop.f32.mrb[50].mxu1  ;;  %v16084_v39 = vpack.c.bf16 %v10499_v38, %v10498_v37  ;;  %v10502_v10 = vld [vmem:[%s23679_s3 + $0x1f0] sm:$0xff]  ;;  %v10515_v17 = vld [vmem:[%s23679_s3 + $0x258] sm:$0xff] }
 0x29c   :  { %16069 = vmatprep.subr.bf16.mxu0 %v16068_v34  ;;  %v19126_v31 = vpop.f32.mrb[51].mxu1  ;;  %v16092_v6 = vpack.c.bf16 %v10503_v44, %v10502_v10 }
 0x29e   :  { %13292 = vmatmul.mubr.f32.gmra.mrb[18].mxu0 %v19022_v43  ;;  %v16088_v43 = vpack.c.bf16 %v10501_v0, %v10500_v45 }
 0x29f   :  { %16071 = vmatpush3.bf16.msra.mxu0 %v16068_v34  ;;  %13294 = vmatprep.mubr.f32.mxu0 %v19039_v51  ;;  %v19136_v41 = vpop.f32.mrb[52].mxu1  ;;  %v10505_v51 = vld [vmem:[%s23679_s3 + $0x208] sm:$0xff] }
 0x2a0   :  { %16073 = vmatprep.subr.bf16.mxu0 %v16072_v29  ;;  %v19138_v62 = vpop.f32.mrb[53].mxu1  ;;  %v16096_v53 = vpack.c.bf16 %v10505_v51, %v10504_v48  ;;  %v10517_v34 = vld [vmem:[%s23679_s3 + $0x268] sm:$0xff] }
 0x2a2   :  { %13295 = vmatmul.mubr.f32.gmra.mrb[20].mxu0 %v19037_v46 }
 0x2a3   :  { %16075 = vmatpush3.bf16.msra.mxu0 %v16072_v29  ;;  %13297 = vmatprep.mubr.f32.mxu0 %v19054_v55  ;;  %v19148_v35 = vpop.f32.mrb[54].mxu1  ;;  %v10519_v29 = vld [vmem:[%s23679_s3 + $0x278] sm:$0xff] }
 0x2a4   :  { %16077 = vmatprep.subr.bf16.mxu0 %v16076_v49  ;;  %v19150_v36 = vpop.f32.mrb[55].mxu1 }
 0x2a6   :  { %13298 = vmatmul.mubr.f32.gmra.mrb[22].mxu0 %v19052_v9  ;;  %v10506_v9 = vld [vmem:[%s23679_s3 + $0x210] sm:$0xff] }
 0x2a7   :  { %16079 = vmatpush3.bf16.msra.mxu0 %v16076_v49  ;;  %13300 = vmatprep.mubr.f32.mxu0 %v19066_v60  ;;  %v19160_v56 = vpop.f32.mrb[56].mxu1  ;;  %v16100_v58 = vpack.c.bf16 %v10507_v54, %v10506_v9  ;;  %v10521_v49 = vld [vmem:[%s23679_s3 + $0x288] sm:$0xff] }
 0x2a8   :  { %16081 = vmatprep.subr.bf16.mxu0 %v16080_v57  ;;  %v19162_v1 = vpop.f32.mrb[57].mxu1 }
 0x2aa   :  { %13301 = vmatmul.mubr.f32.gmra.mrb[24].mxu0 %v19064_v8  ;;  %v10508_v8 = vld [vmem:[%s23679_s3 + $0x220] sm:$0xff] }
 0x2ab   :  { %16083 = vmatpush3.bf16.msra.mxu0 %v16080_v57  ;;  %13303 = vmatprep.mubr.f32.mxu0 %v19078_v7  ;;  %v19172_v40 = vpop.f32.mrb[58].mxu1  ;;  %v16104_v2 = vpack.c.bf16 %v10509_v15, %v10508_v8  ;;  %v10523_v57 = vld [vmem:[%s23679_s3 + $0x298] sm:$0xff] }
 0x2ac   :  { %16085 = vmatprep.subr.bf16.mxu0 %v16084_v39  ;;  %v19174_v61 = vpop.f32.mrb[59].mxu1 }
 0x2ae   :  { %13304 = vmatmul.mubr.f32.gmra.mrb[26].mxu0 %v19076_v14  ;;  %v10510_v14 = vld [vmem:[%s23679_s3 + $0x230] sm:$0xff] }
 0x2af   :  { %16087 = vmatpush3.bf16.msra.mxu0 %v16084_v39  ;;  %13306 = vmatprep.mubr.f32.mxu0 %v19090_v13  ;;  %v19184_v63 = vpop.f32.mrb[60].mxu1  ;;  %v16108_v4 = vpack.c.bf16 %v10511_v20, %v10510_v14  ;;  %v10525_v39 = vld [vmem:[%s23679_s3 + $0x2a8] sm:$0xff] }
 0x2b0   :  { %16089 = vmatprep.subr.bf16.mxu0 %v16088_v43  ;;  %v19186_v46 = vpop.f32.mrb[61].mxu1 }
 0x2b2   :  { %13307 = vmatmul.mubr.f32.gmra.mrb[28].mxu0 %v19088_v19  ;;  %v10512_v19 = vld [vmem:[%s23679_s3 + $0x240] sm:$0xff] }
 0x2b3   :  { %16091 = vmatpush3.bf16.msra.mxu0 %v16088_v43  ;;  %13309 = vmatprep.mubr.f32.mxu0 %v19102_v22  ;;  %v19196_v52 = vpop.f32.mrb[62].mxu1  ;;  %v16112_v16 = vpack.c.bf16 %v10513_v24, %v10512_v19  ;;  %v10527_v43 = vld [vmem:[%s23679_s3 + $0x2b8] sm:$0xff] }
 0x2b4   :  { %16093 = vmatprep.subr.bf16.mxu0 %v16092_v6  ;;  %v19198_v5 = vpop.f32.mrb[63].mxu1 }
 0x2b6   :  { %13310 = vmatmul.mubr.f32.gmra.mrb[30].mxu0 %v19100_v23  ;;  %v10514_v23 = vld [vmem:[%s23679_s3 + $0x250] sm:$0xff] }
 0x2b7   :  { %16095 = vmatpush3.bf16.msra.mxu0 %v16092_v6  ;;  %13344 = vmatprep.mubr.f32.mxu0 %v19114_v26  ;;  %v19208_v55 = vpop.f32.mrb[64].mxu1  ;;  %v16116_v21 = vpack.c.bf16 %v10515_v17, %v10514_v23  ;;  %v10529_v6 = vld [vmem:[%s23679_s3 + $0x2c8] sm:$0xff] }
 0x2b8   :  { %16097 = vmatprep.subr.bf16.mxu0 %v16096_v53  ;;  %v19210_v59 = vpop.f32.mrb[65].mxu1 }
 0x2ba   :  { %13345 = vmatmul.mubr.f32.vlgmr.msra.gmra.mrb[16].mxu0 %v19112_v27  ;;  %v10516_v27 = vld [vmem:[%s23679_s3 + $0x260] sm:$0xff] }
 0x2bb   :  { %16099 = vmatpush3.bf16.msra.mxu0 %v16096_v53  ;;  %13347 = vmatprep.mubr.f32.mxu0 %v19126_v31  ;;  %v19220_v60 = vpop.f32.mrb[66].mxu1  ;;  %v16120_v28 = vpack.c.bf16 %v10517_v34, %v10516_v27  ;;  %v10531_v53 = vld [vmem:[%s23679_s3 + $0x2d8] sm:$0xff] }
 0x2bc   :  { %16101 = vmatprep.subr.bf16.mxu0 %v16100_v58  ;;  %v19222_v3 = vpop.f32.mrb[67].mxu1 }
 0x2be   :  { %13348 = vmatmul.mubr.f32.gmra.mrb[18].mxu0 %v19124_v30  ;;  %v10518_v30 = vld [vmem:[%s23679_s3 + $0x270] sm:$0xff] }
 0x2bf   :  { %16103 = vmatpush3.bf16.msra.mxu0 %v16100_v58  ;;  %13350 = vmatprep.mubr.f32.mxu0 %v19138_v62  ;;  %v19232_v7 = vpop.f32.mrb[68].mxu1  ;;  %v16124_v32 = vpack.c.bf16 %v10519_v29, %v10518_v30  ;;  %v10533_v58 = vld [vmem:[%s23679_s3 + $0x2e8] sm:$0xff] }
 0x2c0   :  { %16105 = vmatprep.subr.bf16.mxu0 %v16104_v2  ;;  %v19234_v12 = vpop.f32.mrb[69].mxu1 }
 0x2c2   :  { %13351 = vmatmul.mubr.f32.gmra.mrb[20].mxu0 %v19136_v41  ;;  %v10520_v41 = vld [vmem:[%s23679_s3 + $0x280] sm:$0xff] }
 0x2c3   :  { %16107 = vmatpush3.bf16.msra.mxu0 %v16104_v2  ;;  %13353 = vmatprep.mubr.f32.mxu0 %v19150_v36  ;;  %v19244_v13 = vpop.f32.mrb[70].mxu1  ;;  %v16128_v33 = vpack.c.bf16 %v10521_v49, %v10520_v41  ;;  %v10535_v2 = vld [vmem:[%s23679_s3 + $0x2f8] sm:$0xff] }
 0x2c4   :  { %16109 = vmatprep.subr.bf16.mxu0 %v16108_v4  ;;  %v19246_v18 = vpop.f32.mrb[71].mxu1 }
 0x2c6   :  { %13354 = vmatmul.mubr.f32.gmra.mrb[22].mxu0 %v19148_v35  ;;  %v10522_v35 = vld [vmem:[%s23679_s3 + $0x290] sm:$0xff] }
 0x2c7   :  { %16111 = vmatpush3.bf16.msra.mxu0 %v16108_v4  ;;  %13356 = vmatprep.mubr.f32.mxu0 %v19162_v1  ;;  %v19256_v22 = vpop.f32.mrb[72].mxu1  ;;  %v16132_v37 = vpack.c.bf16 %v10523_v57, %v10522_v35  ;;  %v10537_v4 = vld [vmem:[%s23679_s3 + $0x308] sm:$0xff] }
 0x2c8   :  { %16113 = vmatprep.subr.bf16.mxu0 %v16112_v16  ;;  %v19258_v25 = vpop.f32.mrb[73].mxu1 }
 0x2ca   :  { %13357 = vmatmul.mubr.f32.gmra.mrb[24].mxu0 %v19160_v56  ;;  %v10524_v56 = vld [vmem:[%s23679_s3 + $0x2a0] sm:$0xff] }
 0x2cb   :  { %16115 = vmatpush3.bf16.msra.mxu0 %v16112_v16  ;;  %13359 = vmatprep.mubr.f32.mxu0 %v19174_v61  ;;  %v19268_v26 = vpop.f32.mrb[74].mxu1  ;;  %v16136_v45 = vpack.c.bf16 %v10525_v39, %v10524_v56  ;;  %v10539_v16 = vld [vmem:[%s23679_s3 + $0x318] sm:$0xff] }
 0x2cc   :  { %16117 = vmatprep.subr.bf16.mxu0 %v16116_v21  ;;  %v19270_v11 = vpop.f32.mrb[75].mxu1 }
 0x2ce   :  { %13360 = vmatmul.mubr.f32.gmra.mrb[26].mxu0 %v19172_v40  ;;  %v10526_v40 = vld [vmem:[%s23679_s3 + $0x2b0] sm:$0xff] }
 0x2cf   :  { %16119 = vmatpush3.bf16.msra.mxu0 %v16116_v21  ;;  %13362 = vmatprep.mubr.f32.mxu0 %v19186_v46  ;;  %v19280_v31 = vpop.f32.mrb[76].mxu1  ;;  %v16140_v10 = vpack.c.bf16 %v10527_v43, %v10526_v40  ;;  %v10541_v21 = vld [vmem:[%s23679_s3 + $0x328] sm:$0xff] }
 0x2d0   :  { %16121 = vmatprep.subr.bf16.mxu0 %v16120_v28  ;;  %v19282_v50 = vpop.f32.mrb[77].mxu1 }
 0x2d2   :  { %13363 = vmatmul.mubr.f32.gmra.mrb[28].mxu0 %v19184_v63  ;;  %v10528_v63 = vld [vmem:[%s23679_s3 + $0x2c0] sm:$0xff] }
 0x2d3   :  { %16123 = vmatpush3.bf16.msra.mxu0 %v16120_v28  ;;  %13365 = vmatprep.mubr.f32.mxu0 %v19198_v5  ;;  %v19292_v62 = vpop.f32.mrb[78].mxu1  ;;  %v16144_v48 = vpack.c.bf16 %v10529_v6, %v10528_v63  ;;  %v10543_v28 = vld [vmem:[%s23679_s3 + $0x338] sm:$0xff] }
 0x2d4   :  { %16125 = vmatprep.subr.bf16.mxu0 %v16124_v32  ;;  %v19294_v47 = vpop.f32.mrb[79].mxu1 }
 0x2d6   :  { %13366 = vmatmul.mubr.f32.gmra.mrb[30].mxu0 %v19196_v52  ;;  %v10530_v52 = vld [vmem:[%s23679_s3 + $0x2d0] sm:$0xff] }
 0x2d7   :  { %16127 = vmatpush3.bf16.msra.mxu0 %v16124_v32  ;;  %13400 = vmatprep.mubr.f32.mxu0 %v19210_v59  ;;  %v19304_v36 = vpop.f32.mrb[80].mxu1  ;;  %v16148_v9 = vpack.c.bf16 %v10531_v53, %v10530_v52  ;;  %v10545_v32 = vld [vmem:[%s23679_s3 + $0x348] sm:$0xff] }
 0x2d8   :  { %16129 = vmatprep.subr.bf16.mxu0 %v16128_v33  ;;  %v19306_v38 = vpop.f32.mrb[81].mxu1 }
 0x2da   :  { %13401 = vmatmul.mubr.f32.vlgmr.msra.gmra.mrb[16].mxu0 %v19208_v55  ;;  %v10532_v55 = vld [vmem:[%s23679_s3 + $0x2e0] sm:$0xff] }
 0x2db   :  { %16131 = vmatpush3.bf16.msra.mxu0 %v16128_v33  ;;  %13403 = vmatprep.mubr.f32.mxu0 %v19222_v3  ;;  %v19316_v1 = vpop.f32.mrb[82].mxu1  ;;  %v16152_v8 = vpack.c.bf16 %v10533_v58, %v10532_v55  ;;  %v10547_v33 = vld [vmem:[%s23679_s3 + $0x358] sm:$0xff] }
 0x2dc   :  { %16133 = vmatprep.subr.bf16.mxu0 %v16132_v37  ;;  %v19318_v0 = vpop.f32.mrb[83].mxu1 }
 0x2de   :  { %13404 = vmatmul.mubr.f32.gmra.mrb[18].mxu0 %v19220_v60  ;;  %v10534_v60 = vld [vmem:[%s23679_s3 + $0x2f0] sm:$0xff] }
 0x2df   :  { %16135 = vmatpush3.bf16.msra.mxu0 %v16132_v37  ;;  %13406 = vmatprep.mubr.f32.mxu0 %v19234_v12  ;;  %v19328_v61 = vpop.f32.mrb[84].mxu1  ;;  %v16156_v14 = vpack.c.bf16 %v10535_v2, %v10534_v60  ;;  %v10549_v37 = vld [vmem:[%s23679_s3 + $0x368] sm:$0xff] }
 0x2e0   :  { %16137 = vmatprep.subr.bf16.mxu0 %v16136_v45  ;;  %v19330_v44 = vpop.f32.mrb[85].mxu1 }
 0x2e2   :  { %13407 = vmatmul.mubr.f32.gmra.mrb[20].mxu0 %v19232_v7  ;;  %v10536_v7 = vld [vmem:[%s23679_s3 + $0x300] sm:$0xff] }
 0x2e3   :  { %16139 = vmatpush3.bf16.msra.mxu0 %v16136_v45  ;;  %13409 = vmatprep.mubr.f32.mxu0 %v19246_v18  ;;  %v19340_v46 = vpop.f32.mrb[86].mxu1  ;;  %v16160_v19 = vpack.c.bf16 %v10537_v4, %v10536_v7  ;;  %v10551_v45 = vld [vmem:[%s23679_s3 + $0x378] sm:$0xff] }
 0x2e4   :  { %16141 = vmatprep.subr.bf16.mxu0 %v16140_v10  ;;  %v19342_v51 = vpop.f32.mrb[87].mxu1 }
 0x2e6   :  { %13410 = vmatmul.mubr.f32.gmra.mrb[22].mxu0 %v19244_v13  ;;  %v10538_v13 = vld [vmem:[%s23679_s3 + $0x310] sm:$0xff] }
 0x2e7   :  { %16143 = vmatpush3.bf16.msra.mxu0 %v16140_v10  ;;  %13412 = vmatprep.mubr.f32.mxu0 %v19258_v25  ;;  %v19352_v5 = vpop.f32.mrb[88].mxu1  ;;  %v16164_v23 = vpack.c.bf16 %v10539_v16, %v10538_v13  ;;  %v10553_v10 = vld [vmem:[%s23679_s3 + $0x388] sm:$0xff] }
 0x2e8   :  { %16145 = vmatprep.subr.bf16.mxu0 %v16144_v48  ;;  %v19354_v54 = vpop.f32.mrb[89].mxu1 }
 0x2ea   :  { %13413 = vmatmul.mubr.f32.gmra.mrb[24].mxu0 %v19256_v22  ;;  %v10540_v22 = vld [vmem:[%s23679_s3 + $0x320] sm:$0xff] }
 0x2eb   :  { %16147 = vmatpush3.bf16.msra.mxu0 %v16144_v48  ;;  %13415 = vmatprep.mubr.f32.mxu0 %v19270_v11  ;;  %v19364_v59 = vpop.f32.mrb[90].mxu1  ;;  %v16168_v27 = vpack.c.bf16 %v10541_v21, %v10540_v22  ;;  %v10555_v48 = vld [vmem:[%s23679_s3 + $0x398] sm:$0xff] }
 0x2ec   :  { %16149 = vmatprep.subr.bf16.mxu0 %v16148_v9  ;;  %v19366_v15 = vpop.f32.mrb[91].mxu1 }
 0x2ee   :  { %13416 = vmatmul.mubr.f32.gmra.mrb[26].mxu0 %v19268_v26  ;;  %v10542_v26 = vld [vmem:[%s23679_s3 + $0x330] sm:$0xff] }
 0x2ef   :  { %16151 = vmatpush3.bf16.msra.mxu0 %v16148_v9  ;;  %13418 = vmatprep.mubr.f32.mxu0 %v19282_v50  ;;  %v19376_v3 = vpop.f32.mrb[92].mxu1  ;;  %v16172_v30 = vpack.c.bf16 %v10543_v28, %v10542_v26  ;;  %v10557_v9 = vld [vmem:[%s23679_s3 + $0x3a8] sm:$0xff] }
 0x2f0   :  { %16153 = vmatprep.subr.bf16.mxu0 %v16152_v8  ;;  %v19378_v20 = vpop.f32.mrb[93].mxu1 }
 0x2f2   :  { %13419 = vmatmul.mubr.f32.gmra.mrb[28].mxu0 %v19280_v31  ;;  %v10544_v31 = vld [vmem:[%s23679_s3 + $0x340] sm:$0xff] }
 0x2f3   :  { %16155 = vmatpush3.bf16.msra.mxu0 %v16152_v8  ;;  %13421 = vmatprep.mubr.f32.mxu0 %v19294_v47  ;;  %v19388_v12 = vpop.f32.mrb[94].mxu1  ;;  %v16176_v41 = vpack.c.bf16 %v10545_v32, %v10544_v31  ;;  %v10559_v8 = vld [vmem:[%s23679_s3 + $0x3b8] sm:$0xff] }
 0x2f4   :  { %16157 = vmatprep.subr.bf16.mxu0 %v16156_v14  ;;  %v19390_v24 = vpop.f32.mrb[95].mxu1 }
 0x2f6   :  { %13422 = vmatmul.mubr.f32.gmra.mrb[30].mxu0 %v19292_v62  ;;  %v10546_v62 = vld [vmem:[%s23679_s3 + $0x350] sm:$0xff] }
 0x2f7   :  { %16159 = vmatpush3.bf16.msra.mxu0 %v16156_v14  ;;  %13456 = vmatprep.mubr.f32.mxu0 %v19306_v38  ;;  %v19400_v18 = vpop.f32.mrb[96].mxu1  ;;  %v16180_v35 = vpack.c.bf16 %v10547_v33, %v10546_v62  ;;  %v10561_v14 = vld [vmem:[%s23679_s3 + $0x3c8] sm:$0xff] }
 0x2f8   :  { %16161 = vmatprep.subr.bf16.mxu0 %v16160_v19  ;;  %v19402_v17 = vpop.f32.mrb[97].mxu1 }
 0x2fa   :  { %13457 = vmatmul.mubr.f32.vlgmr.msra.gmra.mrb[16].mxu0 %v19304_v36  ;;  %v10548_v36 = vld [vmem:[%s23679_s3 + $0x360] sm:$0xff] }
 0x2fb   :  { %16163 = vmatpush3.bf16.msra.mxu0 %v16160_v19  ;;  %13459 = vmatprep.mubr.f32.mxu0 %v19318_v0  ;;  %v19412_v25 = vpop.f32.mrb[98].mxu1  ;;  %v16184_v56 = vpack.c.bf16 %v10549_v37, %v10548_v36  ;;  %v10563_v19 = vld [vmem:[%s23679_s3 + $0x3d8] sm:$0xff] }
 0x2fc   :  { %16165 = vmatprep.subr.bf16.mxu0 %v16164_v23  ;;  %v19414_v34 = vpop.f32.mrb[99].mxu1 }
 0x2fe   :  { %13460 = vmatmul.mubr.f32.gmra.mrb[18].mxu0 %v19316_v1  ;;  %v10550_v1 = vld [vmem:[%s23679_s3 + $0x370] sm:$0xff] }
 0x2ff   :  { %16167 = vmatpush3.bf16.msra.mxu0 %v16164_v23  ;;  %13462 = vmatprep.mubr.f32.mxu0 %v19330_v44  ;;  %v19424_v11 = vpop.f32.mrb[100].mxu1  ;;  %v16188_v40 = vpack.c.bf16 %v10551_v45, %v10550_v1  ;;  %v10565_v23 = vld [vmem:[%s23679_s3 + $0x3e8] sm:$0xff] }
 0x300   :  { %16169 = vmatprep.subr.bf16.mxu0 %v16168_v27  ;;  %v19426_v29 = vpop.f32.mrb[101].mxu1 }
 0x302   :  { %13463 = vmatmul.mubr.f32.gmra.mrb[20].mxu0 %v19328_v61  ;;  %v10552_v61 = vld [vmem:[%s23679_s3 + $0x380] sm:$0xff] }
 0x303   :  { %16171 = vmatpush3.bf16.msra.mxu0 %v16168_v27  ;;  %13465 = vmatprep.mubr.f32.mxu0 %v19342_v51  ;;  %v19436_v50 = vpop.f32.mrb[102].mxu1  ;;  %v16192_v63 = vpack.c.bf16 %v10553_v10, %v10552_v61  ;;  %v10567_v27 = vld [vmem:[%s23679_s3 + $0x3f8] sm:$0xff] }
 0x304   :  { %16173 = vmatprep.subr.bf16.mxu0 %v16172_v30  ;;  %v19438_v49 = vpop.f32.mrb[103].mxu1 }
 0x306   :  { %13466 = vmatmul.mubr.f32.gmra.mrb[22].mxu0 %v19340_v46  ;;  %v10554_v46 = vld [vmem:[%s23679_s3 + $0x390] sm:$0xff] }
 0x307   :  { %16175 = vmatpush3.bf16.msra.mxu0 %v16172_v30  ;;  %13468 = vmatprep.mubr.f32.mxu0 %v19354_v54  ;;  %v19448_v47 = vpop.f32.mrb[104].mxu1  ;;  %v16196_v52 = vpack.c.bf16 %v10555_v48, %v10554_v46  ;;  %v10569_v30 = vld [vmem:[%s23679_s3 + $0x408] sm:$0xff] }
 0x308   :  { %16177 = vmatprep.subr.bf16.mxu0 %v16176_v41  ;;  %v19450_v57 = vpop.f32.mrb[105].mxu1 }
 0x30a   :  { %13469 = vmatmul.mubr.f32.gmra.mrb[24].mxu0 %v19352_v5  ;;  %v10556_v5 = vld [vmem:[%s23679_s3 + $0x3a0] sm:$0xff] }
 0x30b   :  { %16179 = vmatpush3.bf16.msra.mxu0 %v16176_v41  ;;  %13471 = vmatprep.mubr.f32.mxu0 %v19366_v15  ;;  %v19460_v38 = vpop.f32.mrb[106].mxu1  ;;  %v16200_v55 = vpack.c.bf16 %v10557_v9, %v10556_v5  ;;  %v10571_v41 = vld [vmem:[%s23679_s3 + $0x418] sm:$0xff] }
 0x30c   :  { %16181 = vmatprep.subr.bf16.mxu0 %v16180_v35  ;;  %v19462_v39 = vpop.f32.mrb[107].mxu1 }
 0x30e   :  { %13472 = vmatmul.mubr.f32.gmra.mrb[26].mxu0 %v19364_v59  ;;  %v10558_v59 = vld [vmem:[%s23679_s3 + $0x3b0] sm:$0xff] }
 0x30f   :  { %16183 = vmatpush3.bf16.msra.mxu0 %v16180_v35  ;;  %13474 = vmatprep.mubr.f32.mxu0 %v19378_v20  ;;  %v19472_v0 = vpop.f32.mrb[108].mxu1  ;;  %v16204_v60 = vpack.c.bf16 %v10559_v8, %v10558_v59  ;;  %v10573_v35 = vld [vmem:[%s23679_s3 + $0x428] sm:$0xff] }
 0x310   :  { %16185 = vmatprep.subr.bf16.mxu0 %v16184_v56  ;;  %v19474_v43 = vpop.f32.mrb[109].mxu1 }
 0x312   :  { %13475 = vmatmul.mubr.f32.gmra.mrb[28].mxu0 %v19376_v3  ;;  %v10560_v3 = vld [vmem:[%s23679_s3 + $0x3c0] sm:$0xff] }
 0x313   :  { %16187 = vmatpush3.bf16.msra.mxu0 %v16184_v56  ;;  %13477 = vmatprep.mubr.f32.mxu0 %v19390_v24  ;;  %v19484_v44 = vpop.f32.mrb[110].mxu1  ;;  %v16208_v7 = vpack.c.bf16 %v10561_v14, %v10560_v3  ;;  %v10575_v56 = vld [vmem:[%s23679_s3 + $0x438] sm:$0xff]  ;;  %v17764_v3 = vld [vmem:[%s23680_s4] sm:$0xff] }
 0x314   :  { %16189 = vmatprep.subr.bf16.mxu0 %v16188_v40  ;;  %v19486_v6 = vpop.f32.mrb[111].mxu1 }
 0x316   :  { %13478 = vmatmul.mubr.f32.gmra.mrb[30].mxu0 %v19388_v12  ;;  %v10562_v12 = vld [vmem:[%s23679_s3 + $0x3d0] sm:$0xff] }
 0x317   :  { %16191 = vmatpush3.bf16.msra.mxu0 %v16188_v40  ;;  %13512 = vmatprep.mubr.f32.mxu0 %v19402_v17  ;;  %v19496_v51 = vpop.f32.mrb[112].mxu1  ;;  %v16212_v13 = vpack.c.bf16 %v10563_v19, %v10562_v12  ;;  %v10577_v40 = vld [vmem:[%s23679_s3 + $0x448] sm:$0xff] }
 0x318   :  { %16193 = vmatprep.subr.bf16.mxu0 %v16192_v63  ;;  %v19498_v53 = vpop.f32.mrb[113].mxu1 }
 0x31a   :  { %13513 = vmatmul.mubr.f32.vlgmr.msra.gmra.mrb[16].mxu0 %v19400_v18  ;;  %v10564_v18 = vld [vmem:[%s23679_s3 + $0x3e0] sm:$0xff] }
 0x31b   :  { %16195 = vmatpush3.bf16.msra.mxu0 %v16192_v63  ;;  %13515 = vmatprep.mubr.f32.mxu0 %v19414_v34  ;;  %v19508_v54 = vpop.f32.mrb[114].mxu1  ;;  %v16216_v22 = vpack.c.bf16 %v10565_v23, %v10564_v18  ;;  %v10579_v63 = vld [vmem:[%s23679_s3 + $0x458] sm:$0xff] }
 0x31c   :  { %16197 = vmatprep.subr.bf16.mxu0 %v16196_v52  ;;  %v19510_v58 = vpop.f32.mrb[115].mxu1 }
 0x31e   :  { %13516 = vmatmul.mubr.f32.gmra.mrb[18].mxu0 %v19412_v25  ;;  %v10566_v25 = vld [vmem:[%s23679_s3 + $0x3f0] sm:$0xff] }
 0x31f   :  { %16199 = vmatpush3.bf16.msra.mxu0 %v16196_v52  ;;  %13518 = vmatprep.mubr.f32.mxu0 %v19426_v29  ;;  %v19520_v15 = vpop.f32.mrb[116].mxu1  ;;  %v16220_v26 = vpack.c.bf16 %v10567_v27, %v10566_v25  ;;  %v10581_v52 = vld [vmem:[%s23679_s3 + $0x468] sm:$0xff] }
 0x320   :  { %16201 = vmatprep.subr.bf16.mxu0 %v16200_v55  ;;  %v19522_v2 = vpop.f32.mrb[117].mxu1 }
 0x322   :  { %13519 = vmatmul.mubr.f32.gmra.mrb[20].mxu0 %v19424_v11  ;;  %v10568_v11 = vld [vmem:[%s23679_s3 + $0x400] sm:$0xff] }
 0x323   :  { %16203 = vmatpush3.bf16.msra.mxu0 %v16200_v55  ;;  %13521 = vmatprep.mubr.f32.mxu0 %v19438_v49  ;;  %v19532_v20 = vpop.f32.mrb[118].mxu1  ;;  %v16224_v31 = vpack.c.bf16 %v10569_v30, %v10568_v11  ;;  %v10583_v55 = vld [vmem:[%s23679_s3 + $0x478] sm:$0xff] }
 0x324   :  { %16205 = vmatprep.subr.bf16.mxu0 %v16204_v60  ;;  %v19534_v4 = vpop.f32.mrb[119].mxu1 }
 0x326   :  { %13522 = vmatmul.mubr.f32.gmra.mrb[22].mxu0 %v19436_v50  ;;  %v10570_v50 = vld [vmem:[%s23679_s3 + $0x410] sm:$0xff] }
 0x327   :  { %16207 = vmatpush3.bf16.msra.mxu0 %v16204_v60  ;;  %13524 = vmatprep.mubr.f32.mxu0 %v19450_v57  ;;  %v19544_v24 = vpop.f32.mrb[120].mxu1  ;;  %v16228_v62 = vpack.c.bf16 %v10571_v41, %v10570_v50 }
 0x328   :  { %16209 = vmatprep.subr.bf16.mxu0 %v16208_v7  ;;  %v19546_v16 = vpop.f32.mrb[121].mxu1 }
 0x32a   :  { %13525 = vmatmul.mubr.f32.gmra.mrb[24].mxu0 %v19448_v47  ;;  %v10572_v47 = vld [vmem:[%s23679_s3 + $0x420] sm:$0xff] }
 0x32b   :  { %16211 = vmatpush3.bf16.msra.mxu0 %v16208_v7  ;;  %13527 = vmatprep.mubr.f32.mxu0 %v19462_v39  ;;  %v19556_v17 = vpop.f32.mrb[122].mxu1  ;;  %v16232_v36 = vpack.c.bf16 %v10573_v35, %v10572_v47 }
 0x32c   :  { %16213 = vmatprep.subr.bf16.mxu0 %v16212_v13  ;;  %v19558_v21 = vpop.f32.mrb[123].mxu1 }
 0x32e   :  { %13528 = vmatmul.mubr.f32.gmra.mrb[26].mxu0 %v19460_v38  ;;  %v10574_v38 = vld [vmem:[%s23679_s3 + $0x430] sm:$0xff] }
 0x32f   :  { %16215 = vmatpush3.bf16.msra.mxu0 %v16212_v13  ;;  %13530 = vmatprep.mubr.f32.mxu0 %v19474_v43  ;;  %v19568_v34 = vpop.f32.mrb[124].mxu1  ;;  %v16236_v1 = vpack.c.bf16 %v10575_v56, %v10574_v38 }
 0x330   :  { %16217 = vmatprep.subr.bf16.mxu0 %v16216_v22  ;;  %v19570_v28 = vpop.f32.mrb[125].mxu1 }
 0x332   :  { %13531 = vmatmul.mubr.f32.gmra.mrb[28].mxu0 %v19472_v0  ;;  %v10576_v0 = vld [vmem:[%s23679_s3 + $0x440] sm:$0xff] }
 0x333   :  { %16219 = vmatpush3.bf16.msra.mxu0 %v16216_v22  ;;  %13533 = vmatprep.mubr.f32.mxu0 %v19486_v6  ;;  %v19580_v29 = vpop.f32.mrb[126].mxu1  ;;  %v16240_v61 = vpack.c.bf16 %v10577_v40, %v10576_v0 }
 0x334   :  { %16221 = vmatprep.subr.bf16.mxu0 %v16220_v26  ;;  %v19582_v32 = vpop.f32.mrb[127].mxu1 }
 0x336   :  { %13534 = vmatmul.mubr.f32.gmra.mrb[30].mxu0 %v19484_v44  ;;  %v10578_v44 = vld [vmem:[%s23679_s3 + $0x450] sm:$0xff] }
 0x337   :  { %16223 = vmatpush3.bf16.msra.mxu0 %v16220_v26  ;;  %13568 = vmatprep.mubr.f32.mxu0 %v19498_v53  ;;  %v19592_v49 = vpop.f32.mrb[128].mxu1  ;;  %v16244_v46 = vpack.c.bf16 %v10579_v63, %v10578_v44 }
 0x338   :  { %16225 = vmatprep.subr.bf16.mxu0 %v16224_v31  ;;  %v1210_v33 = vpop.f32.mrb[129].mxu1 }
 0x33a   :  { %13569 = vmatmul.mubr.f32.vlgmr.msra.gmra.mrb[16].mxu0 %v19496_v51  ;;  %v10580_v51 = vld [vmem:[%s23679_s3 + $0x460] sm:$0xff] }
 0x33b   :  { %16227 = vmatpush3.bf16.msra.mxu0 %v16224_v31  ;;  %13571 = vmatprep.mubr.f32.mxu0 %v19510_v58  ;;  %v13125_v57 = vpop.f32.mrb[130].mxu1  ;;  %v16248_v5 = vpack.c.bf16 %v10581_v52, %v10580_v51 }
 0x33c   :  { %16229 = vmatprep.subr.bf16.mxu0 %v16228_v62  ;;  %v1220_v37 = vpop.f32.mrb[131].mxu1 }
 0x33e   :  { %13572 = vmatmul.mubr.f32.gmra.mrb[18].mxu0 %v19508_v54  ;;  %v10582_v54 = vld [vmem:[%s23679_s3 + $0x470] sm:$0xff] }
 0x33f   :  { %16231 = vmatpush3.bf16.msra.mxu0 %v16228_v62  ;;  %13574 = vmatprep.mubr.f32.mxu0 %v19522_v2  ;;  %v13128_v39 = vpop.f32.mrb[132].mxu1  ;;  %v16252_v59 = vpack.c.bf16 %v10583_v55, %v10582_v54  ;;  %v2860_v2 = vsub.s32 1, %v18319_v42 }
 0x340   :  { %16233 = vmatprep.subr.bf16.mxu0 %v16232_v36  ;;  %v1230_v45 = vpop.f32.mrb[133].mxu1 }
 0x341   :  { %v19650_v14 = vrot.slane %v17764_v3, %v2860_v2 }
 0x342   :  { %13575 = vmatmul.mubr.f32.gmra.mrb[20].mxu0 %v19520_v15 }
 0x343   :  { %16235 = vmatpush3.bf16.msra.mxu0 %v16232_v36  ;;  %13577 = vmatprep.mubr.f32.mxu0 %v19534_v4  ;;  %v13131_v43 = vpop.f32.mrb[134].mxu1 }
 0x344   :  { %16237 = vmatprep.subr.bf16.mxu0 %v16236_v1  ;;  %v1240_v10 = vpop.f32.mrb[135].mxu1 }
 0x346   :  { %13578 = vmatmul.mubr.f32.gmra.mrb[22].mxu0 %v19532_v20 }
 0x347   :  { %16239 = vmatpush3.bf16.msra.mxu0 %v16236_v1  ;;  %13580 = vmatprep.mubr.f32.mxu0 %v19546_v16  ;;  %v13134_v6 = vpop.f32.mrb[136].mxu1 }
 0x348   :  { %16241 = vmatprep.subr.bf16.mxu0 %v16240_v61  ;;  %v1250_v48 = vpop.f32.mrb[137].mxu1 }
 0x34a   :  { %13581 = vmatmul.mubr.f32.gmra.mrb[24].mxu0 %v19544_v24 }
 0x34b   :  { %16243 = vmatpush3.bf16.msra.mxu0 %v16240_v61  ;;  %13583 = vmatprep.mubr.f32.mxu0 %v19558_v21  ;;  %v13137_v53 = vpop.f32.mrb[138].mxu1 }
 0x34c   :  { %16245 = vmatprep.subr.bf16.mxu0 %v16244_v46  ;;  %v1260_v9 = vpop.f32.mrb[139].mxu1 }
 0x34e   :  { %13584 = vmatmul.mubr.f32.gmra.mrb[26].mxu0 %v19556_v17 }
 0x34f   :  { %16247 = vmatpush3.bf16.msra.mxu0 %v16244_v46  ;;  %13586 = vmatprep.mubr.f32.mxu0 %v19570_v28  ;;  %v13140_v58 = vpop.f32.mrb[140].mxu1 }
 0x350   :  { %16249 = vmatprep.subr.bf16.mxu0 %v16248_v5  ;;  %v1270_v8 = vpop.f32.mrb[141].mxu1 }
 0x352   :  { %13587 = vmatmul.mubr.f32.gmra.mrb[28].mxu0 %v19568_v34 }
 0x353   :  { %16251 = vmatpush3.bf16.msra.mxu0 %v16248_v5  ;;  %13589 = vmatprep.mubr.f32.mxu0 %v19582_v32  ;;  %v13143_v15 = vpop.f32.mrb[142].mxu1 }
 0x354   :  { %16253 = vmatprep.subr.bf16.mxu0 %v16252_v59  ;;  %v1280_v60 = vpop.f32.mrb[143].mxu1 }
 0x356   :  { %13590 = vmatmul.mubr.f32.gmra.mrb[30].mxu0 %v19580_v29 }
 0x357   :  { %16255 = vmatpush3.bf16.msra.mxu0 %v16252_v59  ;;  %13624 = vmatprep.mubr.f32.mxu0 %v1210_v33 }
 0x35a   :  { %13625 = vmatmul.mubr.f32.vlgmr.msra.gmra.mrb[16].mxu0 %v19592_v49 }
 0x35b   :  { %13627 = vmatprep.mubr.f32.mxu0 %v1220_v37 }
 0x35e   :  { %13628 = vmatmul.mubr.f32.gmra.mrb[18].mxu0 %v13125_v57 }
 0x35f   :  { %13630 = vmatprep.mubr.f32.mxu0 %v1230_v45 }
 0x362   :  { %13631 = vmatmul.mubr.f32.gmra.mrb[20].mxu0 %v13128_v39 }
 0x363   :  { %13633 = vmatprep.mubr.f32.mxu0 %v1240_v10 }
 0x366   :  { %13634 = vmatmul.mubr.f32.gmra.mrb[22].mxu0 %v13131_v43 }
 0x367   :  { %13636 = vmatprep.mubr.f32.mxu0 %v1250_v48 }
 0x36a   :  { %13637 = vmatmul.mubr.f32.gmra.mrb[24].mxu0 %v13134_v6 }
 0x36b   :  { %13639 = vmatprep.mubr.f32.mxu0 %v1260_v9 }
 0x36e   :  { %13640 = vmatmul.mubr.f32.gmra.mrb[26].mxu0 %v13137_v53 }
 0x36f   :  { %13642 = vmatprep.mubr.f32.mxu0 %v1270_v8 }
 0x372   :  { %13643 = vmatmul.mubr.f32.gmra.mrb[28].mxu0 %v13140_v58 }
 0x373   :  { %13645 = vmatprep.mubr.f32.mxu0 %v1280_v60 }
 0x376   :  { %13646 = vmatmul.mubr.f32.gmra.mrb[30].mxu0 %v13143_v15 }
 0x42d   :  { %v13626_v20 = vpop.f32.mrb[16].mxu0 }
 0x42e   :  { %v19653_v7 = vadd.f32 %v13626_v20, %v19650_v14  ;;  %v2763_v4 = vpop.f32.mrb[17].mxu0 }
 0x42f   :  { %v19656_v12 = vadd.f32 %v19650_v14, %v2763_v4 }
 0x430   :  { %v2905_v19 = vmul.f32 %v19653_v7, %v19653_v7 }
 0x431   :  { %v2878_v24 = vadd.f32 %v19653_v7, %v19656_v12  ;;  %v2904_v13 = vmul.f32 %v19656_v12, %v19656_v12  ;;  %v13629_v16 = vpop.f32.mrb[18].mxu0 }
 0x432   :  { %v2773_v18 = vpop.f32.mrb[19].mxu0  ;;  %v19665_v17 = vadd.f32 %v13629_v16, %v19650_v14 }
 0x433   :  { %v2920_v23 = vadd.f32 %v2905_v19, %v2904_v13  ;;  %v19668_v22 = vadd.f32 %v19650_v14, %v2773_v18 }
 0x434   :  { %v2907_v28 = vmul.f32 %v19665_v17, %v19665_v17 }
 0x435   :  { %v2879_v21 = vadd.f32 %v2878_v24, %v19668_v22  ;;  %v2906_v25 = vmul.f32 %v19668_v22, %v19668_v22  ;;  %v13632_v27 = vpop.f32.mrb[20].mxu0 }
 0x436   :  { %v19674_v34 = vadd.f32 %v13632_v27, %v19650_v14  ;;  %v2783_v26 = vpop.f32.mrb[21].mxu0 }
 0x437   :  { %v2921_v11 = vadd.f32 %v2920_v23, %v2906_v25  ;;  %v19679_v30 = vadd.f32 %v19650_v14, %v2783_v26  ;;  %v2880_v29 = vadd.f32 %v2879_v21, %v19665_v17 }
 0x438   :  { %v2909_v49 = vmul.f32 %v19674_v34, %v19674_v34 }
 0x439   :  { %v2881_v31 = vadd.f32 %v2880_v29, %v19679_v30  ;;  %v2908_v32 = vmul.f32 %v19679_v30, %v19679_v30  ;;  %v2922_v50 = vadd.f32 %v2921_v11, %v2907_v28  ;;  %v13635_v41 = vpop.f32.mrb[22].mxu0 }
 0x43a   :  { %v2793_v62 = vpop.f32.mrb[23].mxu0  ;;  %v19688_v47 = vadd.f32 %v13635_v41, %v19650_v14 }
 0x43b   :  { %v2923_v33 = vadd.f32 %v2922_v50, %v2908_v32  ;;  %v19691_v35 = vadd.f32 %v19650_v14, %v2793_v62  ;;  %v2882_v57 = vadd.f32 %v2881_v31, %v19674_v34 }
 0x43c   :  { %v2911_v45 = vmul.f32 %v19688_v47, %v19688_v47 }
 0x43d   :  { %v2883_v36 = vadd.f32 %v2882_v57, %v19691_v35  ;;  %v2910_v37 = vmul.f32 %v19691_v35, %v19691_v35  ;;  %v2924_v38 = vadd.f32 %v2923_v33, %v2909_v49  ;;  %v13638_v56 = vpop.f32.mrb[24].mxu0 }
 0x43e   :  { %v19698_v39 = vadd.f32 %v13638_v56, %v19650_v14  ;;  %v2803_v1 = vpop.f32.mrb[25].mxu0 }
 0x43f   :  { %v2884_v0 = vadd.f32 %v2883_v36, %v19688_v47  ;;  %v2925_v40 = vadd.f32 %v2924_v38, %v2910_v37  ;;  %v19704_v43 = vadd.f32 %v19650_v14, %v2803_v1 }
 0x440   :  { %v2913_v61 = vmul.f32 %v19698_v39, %v19698_v39 }
 0x441   :  { %v2885_v10 = vrot.slane %v2884_v0, 4  ;;  %v2926_v44 = vadd.f32 %v2925_v40, %v2911_v45  ;;  %v2891_v63 = vadd.f32 %v19698_v39, %v19704_v43  ;;  %v2912_v6 = vmul.f32 %v19704_v43, %v19704_v43  ;;  %v13641_v46 = vpop.f32.mrb[26].mxu0 }
 0x442   :  { %v19713_v48 = vadd.f32 %v13641_v46, %v19650_v14  ;;  %v2813_v51 = vpop.f32.mrb[27].mxu0 }
 0x443   :  { %v2886_v52 = vadd.f32 %v2885_v10, %v2884_v0  ;;  %v2927_v53 = vrot.slane %v2926_v44, 4  ;;  %v2933_v5 = vadd.f32 %v2913_v61, %v2912_v6  ;;  %v19716_v9 = vadd.f32 %v19650_v14, %v2813_v51 }
 0x444   :  { %v2915_v15 = vmul.f32 %v19713_v48, %v19713_v48 }
 0x445   :  { %v2887_v54 = vrot.slane %v2886_v52, 2  ;;  %v2928_v55 = vadd.f32 %v2927_v53, %v2926_v44  ;;  %v2892_v58 = vadd.f32 %v2891_v63, %v19716_v9  ;;  %v2914_v59 = vmul.f32 %v19716_v9, %v19716_v9  ;;  %v13644_v8 = vpop.f32.mrb[28].mxu0 }
 0x446   :  { %v19724_v60 = vadd.f32 %v13644_v8, %v19650_v14  ;;  %v2823_v2 = vpop.f32.mrb[29].mxu0 }
 0x447   :  { %v2888_v3 = vadd.f32 %v2887_v54, %v2886_v52  ;;  %v2929_v20 = vrot.slane %v2928_v55, 2  ;;  %v2934_v4 = vadd.f32 %v2933_v5, %v2914_v59  ;;  %v19727_v19 = vadd.f32 %v19650_v14, %v2823_v2 }
 0x448   :  { %v2893_v24 = vadd.f32 %v2892_v58, %v19713_v48  ;;  %v2917_v25 = vmul.f32 %v19724_v60, %v19724_v60 }
 0x449   :  { %v2889_v13 = vrot.slane %v2888_v3, 1  ;;  %v2930_v16 = vadd.f32 %v2929_v20, %v2928_v55  ;;  %v2916_v18 = vmul.f32 %v19727_v19, %v19727_v19  ;;  %v2935_v23 = vadd.f32 %v2934_v4, %v2915_v15  ;;  %v13647_v21 = vpop.f32.mrb[30].mxu0 }
 0x44a   :  { %v2894_v27 = vadd.f32 %v2893_v24, %v19727_v19  ;;  %v19736_v26 = vadd.f32 %v13647_v21, %v19650_v14  ;;  %v2833_v28 = vpop.f32.mrb[31].mxu0 }
 0x44b   :  { %v2890_v11 = vadd.f32 %v2889_v13, %v2888_v3  ;;  %v2931_v29 = vrot.slane %v2930_v16, 1  ;;  %v2936_v31 = vadd.f32 %v2935_v23, %v2916_v18  ;;  %v19739_v32 = vadd.f32 %v19650_v14, %v2833_v28 }
 0x44c   :  { %v2895_v50 = vadd.f32 %v2894_v27, %v19724_v60  ;;  %v2919_v57 = vmul.f32 %v19736_v26, %v19736_v26 }
 0x44d   :  { %v2932_v41 = vadd.f32 %v2931_v29, %v2930_v16  ;;  %v2946_v49 = vmul.f32 0.015625, %v2890_v11  ;;  %v2918_v62 = vmul.f32 %v19739_v32, %v19739_v32  ;;  %v2937_v33 = vadd.f32 %v2936_v31, %v2917_v25 }
 0x44e   :  { %v2896_v36 = vadd.f32 %v2895_v50, %v19739_v32 }
 0x44f   :  { %v2948_v37 = vmul.f32 0.015625, %v2932_v41  ;;  %v2950_v38 = vmul.f32 %v2946_v49, %v2946_v49  ;;  %v2960_v56 = vsub.f32 %v19691_v35, %v2946_v49  ;;  %v2938_v1 = vadd.f32 %v2937_v33, %v2918_v62 }
 0x450   :  { %v2897_v14 = vadd.f32 %v2896_v36, %v19736_v26  ;;  %v2954_v45 = vsub.f32 %v19656_v12, %v2946_v49  ;;  %v2955_v0 = vsub.f32 %v19653_v7, %v2946_v49  ;;  %v2956_v40 = vsub.f32 %v19668_v22, %v2946_v49 }
 0x451   :  { %v2952_v61 = vsub.f32 %v2948_v37, %v2950_v38  ;;  %v2939_v10 = vadd.f32 %v2938_v1, %v2919_v57  ;;  %v2957_v44 = vsub.f32 %v19665_v17, %v2946_v49  ;;  %v2958_v63 = vsub.f32 %v19679_v30, %v2946_v49 }
 0x452   :  { %v2898_v6 = vrot.slane %v2897_v14, 4  ;;  %v2959_v46 = vsub.f32 %v19674_v34, %v2946_v49  ;;  %v2961_v35 = vsub.f32 %v19688_v47, %v2946_v49 }
 0x453   :  { %v2970_v51 = vadd.f32 1e-05, %v2952_v61  ;;  %v2940_v52 = vrot.slane %v2939_v10, 4 }
 0x454   :  { %v2899_v53 = vadd.f32 %v2898_v6, %v2897_v14 }
 0x455   :  { %17751 = vrsqrt.f32 %v2970_v51  ;;  %v2941_v12 = vadd.f32 %v2940_v52, %v2939_v10 }
 0x456   :  { %v2900_v5 = vrot.slane %v2899_v53, 2 }
 0x457   :  { %v2942_v7 = vrot.slane %v2941_v12, 2 }
 0x458   :  { %v2901_v54 = vadd.f32 %v2900_v5, %v2899_v53 }
 0x459   :  { %v2943_v22 = vadd.f32 %v2942_v7, %v2941_v12 }
 0x45a   :  { %v2902_v55 = vrot.slane %v2901_v54, 1 }
 0x45b   :  { %v2944_v58 = vrot.slane %v2943_v22, 1 }
 0x45c   :  { %v2903_v59 = vadd.f32 %v2902_v55, %v2901_v54 }
 0x45d   :  { %v2945_v17 = vadd.f32 %v2944_v58, %v2943_v22 }
 0x45e   :  { %v2947_v8 = vmul.f32 0.015625, %v2903_v59 }
 0x45f   :  { %v17752_v30 = vpop.eup %17751  ;;  %v2949_v15 = vmul.f32 0.015625, %v2945_v17 }
 0x460   :  { %v2980_v2 = vmul.f32 %v17752_v30, %v2960_v56  ;;  %v2951_v34 = vmul.f32 %v2947_v8, %v2947_v8  ;;  %v2968_v47 = vsub.f32 %v19739_v32, %v2947_v8  ;;  %v2974_v3 = vmul.f32 %v17752_v30, %v2954_v45 }
 0x461   :  { %v2975_v20 = vmul.f32 %v17752_v30, %v2955_v0  ;;  %v2976_v4 = vmul.f32 %v17752_v30, %v2956_v40  ;;  %v2977_v24 = vmul.f32 %v17752_v30, %v2957_v44  ;;  %v2978_v13 = vmul.f32 %v17752_v30, %v2958_v63 }
 0x462   :  { %v2953_v16 = vsub.f32 %v2949_v15, %v2951_v34  ;;  %v2990_v18 = vmul.f32 0.01, %v2974_v3  ;;  %v2979_v23 = vmul.f32 %v17752_v30, %v2959_v46  ;;  %v2981_v21 = vmul.f32 %v17752_v30, %v2961_v35 }
 0x463   :  { %v2991_v25 = vmul.f32 0.01, %v2975_v20  ;;  %v2992_v27 = vmul.f32 0.01, %v2976_v4  ;;  %v2993_v28 = vmul.f32 0.01, %v2977_v24  ;;  %v2962_v11 = vsub.f32 %v19704_v43, %v2947_v8 }
 0x464   :  { %v2971_v29 = vadd.f32 1e-05, %v2953_v16  ;;  %v3006_v31 = vmax.f32 %v2974_v3, %v2990_v18  ;;  %v2994_v50 = vmul.f32 0.01, %v2978_v13  ;;  %v2995_v41 = vmul.f32 0.01, %v2979_v23 }
 0x465   :  { %v3007_v49 = vmax.f32 %v2975_v20, %v2991_v25  ;;  %v3008_v32 = vmax.f32 %v2976_v4, %v2992_v27  ;;  %v3009_v62 = vmax.f32 %v2977_v24, %v2993_v28  ;;  %v2996_v33 = vmul.f32 0.01, %v2980_v2  ;;  %v17765_v4 = vld [vmem:[%s23678_s2 + $0x8] sm:$0xff]  ;;  %v17766_v24 = vld [vmem:[%s23678_s2 + $0x10] sm:$0xff]  ;;  %v17768_v16 = vld [vmem:[%s23678_s2 + $0x20] sm:$0xff] }
 0x466   :  { %17753 = vrsqrt.f32 %v2971_v29  ;;  %v3010_v57 = vmax.f32 %v2978_v13, %v2994_v50  ;;  %v3011_v36 = vmax.f32 %v2979_v23, %v2995_v41  ;;  %v2997_v37 = vmul.f32 0.01, %v2981_v21  ;;  %v17767_v13 = vld [vmem:[%s23678_s2 + $0x18] sm:$0xff]  ;;  %v17769_v18 = vld [vmem:[%s23678_s2 + $0x28] sm:$0xff]  ;;  %v17770_v23 = vld [vmem:[%s23678_s2 + $0x30] sm:$0xff] }
 0x467   :  { %v16256_v38 = vpack.c.bf16 %v3007_v49, %v3006_v31  ;;  %v16260_v56 = vpack.c.bf16 %v3009_v62, %v3008_v32  ;;  %v3012_v1 = vmax.f32 %v2980_v2, %v2996_v33  ;;  %v2963_v14 = vsub.f32 %v19698_v39, %v2947_v8  ;;  %v17772_v25 = vld [vmem:[%s23678_s2 + $0x40] sm:$0xff]  ;;  %v17773_v27 = vld [vmem:[%s23678_s2 + $0x48] sm:$0xff]  ;;  %v17774_v28 = vld [vmem:[%s23678_s2 + $0x50] sm:$0xff] }
 0x468   :  { %v16264_v45 = vpack.c.bf16 %v3011_v36, %v3010_v57  ;;  %v3013_v0 = vmax.f32 %v2981_v21, %v2997_v37  ;;  %v2964_v43 = vsub.f32 %v19716_v9, %v2947_v8  ;;  %v2965_v40 = vsub.f32 %v19713_v48, %v2947_v8  ;;  %v17771_v21 = vld [vmem:[%s23678_s2 + $0x38] sm:$0xff]  ;;  %v17776_v29 = vld [vmem:[%s23678_s2 + $0x60] sm:$0xff]  ;;  %v17777_v31 = vld [vmem:[%s23678_s2 + $0x68] sm:$0xff] }
 0x469   :  { %16257 = vmatprep.subr.bf16.mxu1 %v16256_v38  ;;  %v2966_v61 = vsub.f32 %v19727_v19, %v2947_v8  ;;  %v2967_v10 = vsub.f32 %v19724_v60, %v2947_v8  ;;  %v2969_v44 = vsub.f32 %v19736_v26, %v2947_v8  ;;  %v17778_v50 = vld [vmem:[%s23678_s2 + $0x70] sm:$0xff]  ;;  %v17779_v41 = vld [vmem:[%s23678_s2 + $0x78] sm:$0xff]  ;;  %v17780_v49 = vld [vmem:[%s23678_s2 + $0x80] sm:$0xff] }
 0x46a   :  { %16259 = vmatpush3.bf16.msra.mxu1 %v16256_v38  ;;  %v16268_v63 = vpack.c.bf16 %v3013_v0, %v3012_v1  ;;  %v17781_v32 = vld [vmem:[%s23678_s2 + $0x88] sm:$0xff]  ;;  %v17782_v62 = vld [vmem:[%s23678_s2 + $0x90] sm:$0xff]  ;;  %v17783_v33 = vld [vmem:[%s23678_s2 + $0x98] sm:$0xff] }
 0x46b   :  { %16261 = vmatprep.subr.bf16.mxu1 %v16260_v56  ;;  %v17784_v57 = vld [vmem:[%s23678_s2 + $0xa0] sm:$0xff]  ;;  %v17785_v36 = vld [vmem:[%s23678_s2 + $0xa8] sm:$0xff]  ;;  %v17786_v37 = vld [vmem:[%s23678_s2 + $0xb0] sm:$0xff] }
 0x46c   :  { %v17787_v38 = vld [vmem:[%s23678_s2 + $0xb8] sm:$0xff]  ;;  %v17789_v1 = vld [vmem:[%s23678_s2 + $0xc8] sm:$0xff]  ;;  %v17792_v0 = vld [vmem:[%s23678_s2 + $0xe0] sm:$0xff] }
 0x46e   :  { %16263 = vmatpush3.bf16.msra.mxu1 %v16260_v56  ;;  %v17788_v56 = vld [vmem:[%s23678_s2 + $0xc0] sm:$0xff] }
 0x46f   :  { %16265 = vmatprep.subr.bf16.mxu1 %v16264_v45 }
 0x470   :  { %v17754_v6 = vpop.eup %17753 }
 0x471   :  { %v2988_v39 = vmul.f32 %v17754_v6, %v2968_v47  ;;  %v2982_v46 = vmul.f32 %v17754_v6, %v2962_v11  ;;  %v2983_v35 = vmul.f32 %v17754_v6, %v2963_v14  ;;  %v2984_v51 = vmul.f32 %v17754_v6, %v2964_v43  ;;  %v17775_v11 = vld [vmem:[%s23678_s2 + $0x58] sm:$0xff]  ;;  %v17790_v14 = vld [vmem:[%s23678_s2 + $0xd0] sm:$0xff]  ;;  %v17793_v43 = vld [vmem:[%s23678_s2 + $0xe8] sm:$0xff] }
 0x472   :  { %16267 = vmatpush3.bf16.msra.mxu1 %v16264_v45  ;;  %v2985_v9 = vmul.f32 %v17754_v6, %v2965_v40  ;;  %v2986_v48 = vmul.f32 %v17754_v6, %v2966_v61  ;;  %v2987_v52 = vmul.f32 %v17754_v6, %v2967_v10  ;;  %v2989_v53 = vmul.f32 %v17754_v6, %v2969_v44  ;;  %v17791_v45 = vld [vmem:[%s23678_s2 + $0xd8] sm:$0xff]  ;;  %v17794_v40 = vld [vmem:[%s23678_s2 + $0xf0] sm:$0xff]  ;;  %v17796_v10 = vld [vmem:[%s23678_s2 + $0x100] sm:$0xff] }
 0x473   :  { %16269 = vmatprep.subr.bf16.mxu1 %v16268_v63  ;;  %v2998_v19 = vmul.f32 0.01, %v2982_v46  ;;  %v2999_v60 = vmul.f32 0.01, %v2983_v35  ;;  %v3000_v12 = vmul.f32 0.01, %v2984_v51 }
 0x474   :  { %v3001_v26 = vmul.f32 0.01, %v2985_v9  ;;  %v3002_v5 = vmul.f32 0.01, %v2986_v48  ;;  %v3003_v7 = vmul.f32 0.01, %v2987_v52 }
 0x475   :  { %v3014_v54 = vmax.f32 %v2982_v46, %v2998_v19  ;;  %v3015_v22 = vmax.f32 %v2983_v35, %v2999_v60  ;;  %v3016_v55 = vmax.f32 %v2984_v51, %v3000_v12  ;;  %v3004_v58 = vmul.f32 0.01, %v2988_v39  ;;  %v17795_v61 = vld [vmem:[%s23678_s2 + $0xf8] sm:$0xff]  ;;  %v17797_v44 = vld [vmem:[%s23678_s2 + $0x108] sm:$0xff]  ;;  %v17802_v35 = vld [vmem:[%s23678_s2 + $0x130] sm:$0xff] }
 0x476   :  { %16271 = vmatpush3.bf16.msra.mxu1 %v16268_v63  ;;  %v3017_v59 = vmax.f32 %v2985_v9, %v3001_v26  ;;  %v3018_v17 = vmax.f32 %v2986_v48, %v3002_v5  ;;  %v3019_v8 = vmax.f32 %v2987_v52, %v3003_v7  ;;  %v3005_v30 = vmul.f32 0.01, %v2989_v53  ;;  %v17798_v63 = vld [vmem:[%s23678_s2 + $0x110] sm:$0xff]  ;;  %v17799_v6 = vld [vmem:[%s23678_s2 + $0x118] sm:$0xff]  ;;  %v17801_v46 = vld [vmem:[%s23678_s2 + $0x128] sm:$0xff] }
 0x477   :  { %v16272_v15 = vpack.c.bf16 %v3015_v22, %v3014_v54  ;;  %v3020_v2 = vmax.f32 %v2988_v39, %v3004_v58  ;;  %v17800_v39 = vld [vmem:[%s23678_s2 + $0x120] sm:$0xff]  ;;  %v17803_v51 = vld [vmem:[%s23678_s2 + $0x138] sm:$0xff]  ;;  %v17805_v48 = vld [vmem:[%s23678_s2 + $0x148] sm:$0xff] }
 0x478   :  { %v16276_v34 = vpack.c.bf16 %v3017_v59, %v3016_v55  ;;  %v16280_v47 = vpack.c.bf16 %v3019_v8, %v3018_v17  ;;  %v3021_v3 = vmax.f32 %v2989_v53, %v3005_v30  ;;  %v17804_v9 = vld [vmem:[%s23678_s2 + $0x140] sm:$0xff]  ;;  %v17806_v52 = vld [vmem:[%s23678_s2 + $0x150] sm:$0xff]  ;;  %v17807_v53 = vld [vmem:[%s23678_s2 + $0x158] sm:$0xff] }
 0x479   :  { %16273 = vmatprep.subr.bf16.mxu1 %v16272_v15  ;;  %v10600_v19 = vld [vmem:[%s23679_s3 + $0x500] sm:$0xff]  ;;  %v10601_v60 = vld [vmem:[%s23679_s3 + $0x508] sm:$0xff]  ;;  %v10602_v7 = vld [vmem:[%s23679_s3 + $0x510] sm:$0xff] }
 0x47a   :  { %16275 = vmatpush3.bf16.msra.mxu1 %v16272_v15  ;;  %v16284_v20 = vpack.c.bf16 %v3021_v3, %v3020_v2  ;;  %v17808_v12 = vld [vmem:[%s23678_s2 + $0x160] sm:$0xff]  ;;  %v16288_v26 = vpack.c.bf16 %v10601_v60, %v10600_v19  ;;  %v17809_v5 = vld [vmem:[%s23678_s2 + $0x168] sm:$0xff]  ;;  %v10603_v54 = vld [vmem:[%s23679_s3 + $0x518] sm:$0xff] }
 0x47b   :  { %16277 = vmatprep.subr.bf16.mxu1 %v16276_v34  ;;  %v17810_v22 = vld [vmem:[%s23678_s2 + $0x170] sm:$0xff]  ;;  %v16292_v55 = vpack.c.bf16 %v10603_v54, %v10602_v7  ;;  %v17811_v58 = vld [vmem:[%s23678_s2 + $0x178] sm:$0xff]  ;;  %v10604_v59 = vld [vmem:[%s23679_s3 + $0x520] sm:$0xff] }
 0x47c   :  { %16289 = vmatprep.subr.bf16.mxu0 %v16288_v26  ;;  %v10605_v17 = vld [vmem:[%s23679_s3 + $0x528] sm:$0xff]  ;;  %v17812_v8 = vld [vmem:[%s23678_s2 + $0x180] sm:$0xff]  ;;  %v10606_v2 = vld [vmem:[%s23679_s3 + $0x530] sm:$0xff] }
 0x47d   :  { %16291 = vmatpush3.bf16.msra.mxu0 %v16288_v26  ;;  %v16296_v30 = vpack.c.bf16 %v10605_v17, %v10604_v59  ;;  %v17813_v15 = vld [vmem:[%s23678_s2 + $0x188] sm:$0xff]  ;;  %v17844_v19 = vld [vmem:[%s23678_s2 + $0x280] sm:$0xff]  ;;  %v17847_v26 = vld [vmem:[%s23678_s2 + $0x298] sm:$0xff] }
 0x47e   :  { %16279 = vmatpush3.bf16.msra.mxu1 %v16276_v34  ;;  %16293 = vmatprep.subr.bf16.mxu0 %v16292_v55  ;;  %v10607_v34 = vld [vmem:[%s23679_s3 + $0x538] sm:$0xff]  ;;  %v17845_v60 = vld [vmem:[%s23678_s2 + $0x288] sm:$0xff]  ;;  %v17850_v54 = vld [vmem:[%s23678_s2 + $0x2b0] sm:$0xff] }
 0x47f   :  { %16281 = vmatprep.subr.bf16.mxu1 %v16280_v47  ;;  %v16300_v3 = vpack.c.bf16 %v10607_v34, %v10606_v2  ;;  %v17849_v7 = vld [vmem:[%s23678_s2 + $0x2a8] sm:$0xff]  ;;  %v17854_v59 = vld [vmem:[%s23678_s2 + $0x2d0] sm:$0xff]  ;;  %v17855_v17 = vld [vmem:[%s23678_s2 + $0x2d8] sm:$0xff] }
 0x480   :  { %v17859_v2 = vld [vmem:[%s23678_s2 + $0x2f8] sm:$0xff]  ;;  %v17860_v34 = vld [vmem:[%s23678_s2 + $0x300] sm:$0xff] }
 0x481   :  { %16295 = vmatpush3.bf16.msra.mxu0 %v16292_v55  ;;  %v17852_v55 = vld [vmem:[%s23678_s2 + $0x2c0] sm:$0xff] }
 0x482   :  { %16283 = vmatpush3.bf16.msra.mxu1 %v16280_v47  ;;  %16297 = vmatprep.subr.bf16.mxu0 %v16296_v30  ;;  %v17814_v47 = vld [vmem:[%s23678_s2 + $0x190] sm:$0xff] }
 0x483   :  { %16285 = vmatprep.subr.bf16.mxu1 %v16284_v20 }
 0x485   :  { %16299 = vmatpush3.bf16.msra.mxu0 %v16296_v30  ;;  %v17857_v30 = vld [vmem:[%s23678_s2 + $0x2e8] sm:$0xff] }
 0x486   :  { %16287 = vmatpush3.bf16.msra.mxu1 %v16284_v20  ;;  %16301 = vmatprep.subr.bf16.mxu0 %v16300_v3  ;;  %v17815_v20 = vld [vmem:[%s23678_s2 + $0x198] sm:$0xff] }
 0x489   :  { %13681 = vmatmul.mubr.f32.vlgmr.msra.gmra.mrb[144].mxu1 %v17765_v4  ;;  %16303 = vmatpush3.bf16.msra.mxu0 %v16300_v3  ;;  %v10608_v4 = vld [vmem:[%s23679_s3 + $0x540] sm:$0xff]  ;;  %v17862_v3 = vld [vmem:[%s23678_s2 + $0x310] sm:$0xff] }
 0x48a   :  { %13683 = vmatprep.mubr.f32.mxu1 %v17766_v24  ;;  %v10609_v24 = vld [vmem:[%s23679_s3 + $0x548] sm:$0xff] }
 0x48d   :  { %13684 = vmatmul.mubr.f32.gmra.mrb[146].mxu1 %v17767_v13  ;;  %v17816_v13 = vld [vmem:[%s23678_s2 + $0x1a0] sm:$0xff] }
 0x48e   :  { %13686 = vmatprep.mubr.f32.mxu1 %v17768_v16  ;;  %v16304_v16 = vpack.c.bf16 %v10609_v24, %v10608_v4  ;;  %v17864_v4 = vld [vmem:[%s23678_s2 + $0x320] sm:$0xff]  ;;  %v17865_v24 = vld [vmem:[%s23678_s2 + $0x328] sm:$0xff] }
 0x490   :  { %16305 = vmatprep.subr.bf16.mxu0 %v16304_v16 }
 0x491   :  { %13687 = vmatmul.mubr.f32.gmra.mrb[148].mxu1 %v17769_v18  ;;  %v17817_v18 = vld [vmem:[%s23678_s2 + $0x1a8] sm:$0xff]  ;;  %16307 = vmatpush3.bf16.msra.mxu0 %v16304_v16  ;;  %v17867_v16 = vld [vmem:[%s23678_s2 + $0x338] sm:$0xff] }
 0x492   :  { %13689 = vmatprep.mubr.f32.mxu1 %v17770_v23  ;;  %v10610_v23 = vld [vmem:[%s23679_s3 + $0x550] sm:$0xff] }
 0x495   :  { %13690 = vmatmul.mubr.f32.gmra.mrb[150].mxu1 %v17771_v21  ;;  %v10611_v21 = vld [vmem:[%s23679_s3 + $0x558] sm:$0xff] }
 0x496   :  { %13692 = vmatprep.mubr.f32.mxu1 %v17772_v25  ;;  %v17818_v25 = vld [vmem:[%s23678_s2 + $0x1b0] sm:$0xff] }
 0x499   :  { %13693 = vmatmul.mubr.f32.gmra.mrb[152].mxu1 %v17773_v27  ;;  %v16308_v27 = vpack.c.bf16 %v10611_v21, %v10610_v23  ;;  %v17869_v23 = vld [vmem:[%s23678_s2 + $0x348] sm:$0xff]  ;;  %v17870_v21 = vld [vmem:[%s23678_s2 + $0x350] sm:$0xff] }
 0x49a   :  { %13695 = vmatprep.mubr.f32.mxu1 %v17774_v28  ;;  %v17819_v28 = vld [vmem:[%s23678_s2 + $0x1b8] sm:$0xff] }
 0x49b   :  { %16309 = vmatprep.subr.bf16.mxu0 %v16308_v27 }
 0x49c   :  { %16311 = vmatpush3.bf16.msra.mxu0 %v16308_v27 }
 0x49d   :  { %13696 = vmatmul.mubr.f32.gmra.mrb[154].mxu1 %v17775_v11  ;;  %v10612_v11 = vld [vmem:[%s23679_s3 + $0x560] sm:$0xff] }
 0x49e   :  { %13698 = vmatprep.mubr.f32.mxu1 %v17776_v29  ;;  %v10613_v29 = vld [vmem:[%s23679_s3 + $0x568] sm:$0xff] }
 0x4a1   :  { %13699 = vmatmul.mubr.f32.gmra.mrb[156].mxu1 %v17777_v31  ;;  %v17820_v31 = vld [vmem:[%s23678_s2 + $0x1c0] sm:$0xff] }
 0x4a2   :  { %13701 = vmatprep.mubr.f32.mxu1 %v17778_v50  ;;  %v16312_v50 = vpack.c.bf16 %v10613_v29, %v10612_v11  ;;  %v17872_v11 = vld [vmem:[%s23678_s2 + $0x360] sm:$0xff] }
 0x4a4   :  { %16313 = vmatprep.subr.bf16.mxu0 %v16312_v50 }
 0x4a5   :  { %13702 = vmatmul.mubr.f32.gmra.mrb[158].mxu1 %v17779_v41  ;;  %v17821_v41 = vld [vmem:[%s23678_s2 + $0x1c8] sm:$0xff]  ;;  %16315 = vmatpush3.bf16.msra.mxu0 %v16312_v50 }
 0x4a6   :  { %13704 = vmatprep.mubr.f32.mxu1 %v17780_v49  ;;  %v10614_v49 = vld [vmem:[%s23679_s3 + $0x570] sm:$0xff]  ;;  %v17873_v50 = vld [vmem:[%s23678_s2 + $0x368] sm:$0xff] }
 0x4a9   :  { %13705 = vmatmul.mubr.f32.gmra.mrb[160].mxu1 %v17781_v32  ;;  %v10615_v32 = vld [vmem:[%s23679_s3 + $0x578] sm:$0xff] }
 0x4aa   :  { %13707 = vmatprep.mubr.f32.mxu1 %v17782_v62  ;;  %v17822_v62 = vld [vmem:[%s23678_s2 + $0x1d0] sm:$0xff] }
 0x4ad   :  { %13708 = vmatmul.mubr.f32.gmra.mrb[162].mxu1 %v17783_v33  ;;  %v16316_v33 = vpack.c.bf16 %v10615_v32, %v10614_v49 }
 0x4ae   :  { %13710 = vmatprep.mubr.f32.mxu1 %v17784_v57  ;;  %v17823_v57 = vld [vmem:[%s23678_s2 + $0x1d8] sm:$0xff] }
 0x4af   :  { %16317 = vmatprep.subr.bf16.mxu0 %v16316_v33 }
 0x4b0   :  { %16319 = vmatpush3.bf16.msra.mxu0 %v16316_v33  ;;  %v17876_v33 = vld [vmem:[%s23678_s2 + $0x380] sm:$0xff] }
 0x4b1   :  { %13711 = vmatmul.mubr.f32.gmra.mrb[164].mxu1 %v17785_v36  ;;  %v17824_v36 = vld [vmem:[%s23678_s2 + $0x1e0] sm:$0xff] }
 0x4b2   :  { %13713 = vmatprep.mubr.f32.mxu1 %v17786_v37  ;;  %v10584_v37 = vld [vmem:[%s23679_s3 + $0x480] sm:$0xff] }
 0x4b5   :  { %13714 = vmatmul.mubr.f32.gmra.mrb[166].mxu1 %v17787_v38  ;;  %v10585_v38 = vld [vmem:[%s23679_s3 + $0x488] sm:$0xff] }
 0x4b6   :  { %13716 = vmatprep.mubr.f32.mxu1 %v17788_v56  ;;  %v19998_v56 = vpack.c.bf16 %v10585_v38, %v10584_v37  ;;  %v17877_v37 = vld [vmem:[%s23678_s2 + $0x388] sm:$0xff]  ;;  %v17878_v38 = vld [vmem:[%s23678_s2 + $0x390] sm:$0xff] }
 0x4b8   :  { %16321 = vmatprep.subr.bf16.mxu0 %v19998_v56 }
 0x4b9   :  { %13717 = vmatmul.mubr.f32.gmra.mrb[168].mxu1 %v17789_v1  ;;  %v17825_v1 = vld [vmem:[%s23678_s2 + $0x1e8] sm:$0xff] }
 0x4ba   :  { %13719 = vmatprep.mubr.f32.mxu1 %v17790_v14  ;;  %v17826_v14 = vld [vmem:[%s23678_s2 + $0x1f0] sm:$0xff] }
 0x4bd   :  { %13720 = vmatmul.mubr.f32.gmra.mrb[170].mxu1 %v17791_v45  ;;  %v17827_v45 = vld [vmem:[%s23678_s2 + $0x1f8] sm:$0xff] }
 0x4be   :  { %13722 = vmatprep.mubr.f32.mxu1 %v17792_v0  ;;  %v17828_v0 = vld [vmem:[%s23678_s2 + $0x200] sm:$0xff] }
 0x4c1   :  { %13723 = vmatmul.mubr.f32.gmra.mrb[172].mxu1 %v17793_v43  ;;  %v17829_v43 = vld [vmem:[%s23678_s2 + $0x208] sm:$0xff] }
 0x4c2   :  { %13725 = vmatprep.mubr.f32.mxu1 %v17794_v40  ;;  %v17830_v40 = vld [vmem:[%s23678_s2 + $0x210] sm:$0xff] }
 0x4c5   :  { %13726 = vmatmul.mubr.f32.gmra.mrb[174].mxu1 %v17795_v61  ;;  %v17831_v61 = vld [vmem:[%s23678_s2 + $0x218] sm:$0xff] }
 0x4c6   :  { %13728 = vmatprep.mubr.f32.mxu1 %v17796_v10  ;;  %v17832_v10 = vld [vmem:[%s23678_s2 + $0x220] sm:$0xff] }
 0x4c9   :  { %13729 = vmatmul.mubr.f32.gmra.mrb[176].mxu1 %v17797_v44  ;;  %v17833_v44 = vld [vmem:[%s23678_s2 + $0x228] sm:$0xff] }
 0x4ca   :  { %13731 = vmatprep.mubr.f32.mxu1 %v17798_v63  ;;  %v17834_v63 = vld [vmem:[%s23678_s2 + $0x230] sm:$0xff] }
 0x4cd   :  { %13732 = vmatmul.mubr.f32.gmra.mrb[178].mxu1 %v17799_v6  ;;  %v17835_v6 = vld [vmem:[%s23678_s2 + $0x238] sm:$0xff] }
 0x4ce   :  { %13734 = vmatprep.mubr.f32.mxu1 %v17800_v39  ;;  %v17836_v39 = vld [vmem:[%s23678_s2 + $0x240] sm:$0xff] }
 0x4d1   :  { %13735 = vmatmul.mubr.f32.gmra.mrb[180].mxu1 %v17801_v46  ;;  %v17837_v46 = vld [vmem:[%s23678_s2 + $0x248] sm:$0xff] }
 0x4d2   :  { %13737 = vmatprep.mubr.f32.mxu1 %v17802_v35  ;;  %v17838_v35 = vld [vmem:[%s23678_s2 + $0x250] sm:$0xff] }
 0x4d5   :  { %13738 = vmatmul.mubr.f32.gmra.mrb[182].mxu1 %v17803_v51  ;;  %v17839_v51 = vld [vmem:[%s23678_s2 + $0x258] sm:$0xff] }
 0x4d6   :  { %13740 = vmatprep.mubr.f32.mxu1 %v17804_v9  ;;  %v17840_v9 = vld [vmem:[%s23678_s2 + $0x260] sm:$0xff] }
 0x4d9   :  { %13741 = vmatmul.mubr.f32.gmra.mrb[184].mxu1 %v17805_v48  ;;  %v17841_v48 = vld [vmem:[%s23678_s2 + $0x268] sm:$0xff] }
 0x4da   :  { %13743 = vmatprep.mubr.f32.mxu1 %v17806_v52  ;;  %v17842_v52 = vld [vmem:[%s23678_s2 + $0x270] sm:$0xff] }
 0x4dd   :  { %13744 = vmatmul.mubr.f32.gmra.mrb[186].mxu1 %v17807_v53  ;;  %v17843_v53 = vld [vmem:[%s23678_s2 + $0x278] sm:$0xff] }
 0x4de   :  { %13746 = vmatprep.mubr.f32.mxu1 %v17808_v12  ;;  %v17846_v12 = vld [vmem:[%s23678_s2 + $0x290] sm:$0xff] }
 0x4e1   :  { %13747 = vmatmul.mubr.f32.gmra.mrb[188].mxu1 %v17809_v5  ;;  %v17848_v5 = vld [vmem:[%s23678_s2 + $0x2a0] sm:$0xff] }
 0x4e2   :  { %13749 = vmatprep.mubr.f32.mxu1 %v17810_v22  ;;  %v17851_v22 = vld [vmem:[%s23678_s2 + $0x2b8] sm:$0xff] }
 0x4e5   :  { %13750 = vmatmul.mubr.f32.gmra.mrb[190].mxu1 %v17811_v58  ;;  %v17853_v58 = vld [vmem:[%s23678_s2 + $0x2c8] sm:$0xff] }
 0x4e6   :  { %13752 = vmatprep.mubr.f32.mxu1 %v17812_v8  ;;  %v17856_v8 = vld [vmem:[%s23678_s2 + $0x2e0] sm:$0xff] }
 0x4e9   :  { %13753 = vmatmul.mubr.f32.gmra.mrb[192].mxu1 %v17813_v15  ;;  %v17858_v15 = vld [vmem:[%s23678_s2 + $0x2f0] sm:$0xff] }
 0x4ea   :  { %13755 = vmatprep.mubr.f32.mxu1 %v17814_v47  ;;  %v17861_v47 = vld [vmem:[%s23678_s2 + $0x308] sm:$0xff] }
 0x4ed   :  { %13756 = vmatmul.mubr.f32.gmra.mrb[194].mxu1 %v17815_v20  ;;  %v17863_v20 = vld [vmem:[%s23678_s2 + $0x318] sm:$0xff] }
 0x4ee   :  { %13758 = vmatprep.mubr.f32.mxu1 %v17816_v13  ;;  %v17866_v13 = vld [vmem:[%s23678_s2 + $0x330] sm:$0xff] }
 0x4f1   :  { %13759 = vmatmul.mubr.f32.gmra.mrb[196].mxu1 %v17817_v18  ;;  %v17868_v18 = vld [vmem:[%s23678_s2 + $0x340] sm:$0xff] }
 0x4f2   :  { %13761 = vmatprep.mubr.f32.mxu1 %v17818_v25 }
 0x4f5   :  { %13762 = vmatmul.mubr.f32.gmra.mrb[198].mxu1 %v17819_v28  ;;  %v17871_v28 = vld [vmem:[%s23678_s2 + $0x358] sm:$0xff] }
 0x4f6   :  { %13764 = vmatprep.mubr.f32.mxu1 %v17820_v31 }
 0x4f9   :  { %13765 = vmatmul.mubr.f32.gmra.mrb[200].mxu1 %v17821_v41  ;;  %v17874_v41 = vld [vmem:[%s23678_s2 + $0x370] sm:$0xff] }
 0x4fa   :  { %13767 = vmatprep.mubr.f32.mxu1 %v17822_v62  ;;  %v17875_v62 = vld [vmem:[%s23678_s2 + $0x378] sm:$0xff] }
 0x4fd   :  { %13768 = vmatmul.mubr.f32.gmra.mrb[202].mxu1 %v17823_v57 }
 0x4fe   :  { %13770 = vmatprep.mubr.f32.mxu1 %v17824_v36 }
 0x501   :  { %13771 = vmatmul.mubr.f32.gmra.mrb[204].mxu1 %v17825_v1 }
 0x502   :  { %13773 = vmatprep.mubr.f32.mxu1 %v17826_v14 }
 0x505   :  { %13774 = vmatmul.mubr.f32.gmra.mrb[206].mxu1 %v17827_v45  ;;  %v17879_v45 = vld [vmem:[%s23678_s2 + $0x398] sm:$0xff] }
 0x506   :  { %13776 = vmatprep.mubr.f32.mxu1 %v17828_v0  ;;  %v17880_v0 = vld [vmem:[%s23678_s2 + $0x3a0] sm:$0xff] }
 0x509   :  { %13777 = vmatmul.mubr.f32.gmra.mrb[208].mxu1 %v17829_v43 }
 0x50a   :  { %13779 = vmatprep.mubr.f32.mxu1 %v17830_v40 }
 0x50d   :  { %13780 = vmatmul.mubr.f32.gmra.mrb[210].mxu1 %v17831_v61  ;;  %v17881_v61 = vld [vmem:[%s23678_s2 + $0x3a8] sm:$0xff] }
 0x50e   :  { %13782 = vmatprep.mubr.f32.mxu1 %v17832_v10  ;;  %v17882_v10 = vld [vmem:[%s23678_s2 + $0x3b0] sm:$0xff] }
 0x511   :  { %13783 = vmatmul.mubr.f32.gmra.mrb[212].mxu1 %v17833_v44 }
 0x512   :  { %13785 = vmatprep.mubr.f32.mxu1 %v17834_v63 }
 0x515   :  { %13786 = vmatmul.mubr.f32.gmra.mrb[214].mxu1 %v17835_v6  ;;  %v17883_v6 = vld [vmem:[%s23678_s2 + $0x3b8] sm:$0xff] }
 0x516   :  { %13788 = vmatprep.mubr.f32.mxu1 %v17836_v39  ;;  %v17884_v39 = vld [vmem:[%s23678_s2 + $0x3c0] sm:$0xff] }
 0x519   :  { %13789 = vmatmul.mubr.f32.gmra.mrb[216].mxu1 %v17837_v46 }
 0x51a   :  { %13791 = vmatprep.mubr.f32.mxu1 %v17838_v35 }
 0x51d   :  { %13792 = vmatmul.mubr.f32.gmra.mrb[218].mxu1 %v17839_v51  ;;  %v17885_v51 = vld [vmem:[%s23678_s2 + $0x3c8] sm:$0xff] }
 0x51e   :  { %13794 = vmatprep.mubr.f32.mxu1 %v17840_v9  ;;  %v10586_v9 = vld [vmem:[%s23679_s3 + $0x490] sm:$0xff] }
 0x521   :  { %13795 = vmatmul.mubr.f32.gmra.mrb[220].mxu1 %v17841_v48  ;;  %v10587_v48 = vld [vmem:[%s23679_s3 + $0x498] sm:$0xff] }
 0x522   :  { %13797 = vmatprep.mubr.f32.mxu1 %v17842_v52  ;;  %v17886_v52 = vld [vmem:[%s23678_s2 + $0x3d0] sm:$0xff] }
 0x525   :  { %13798 = vmatmul.mubr.f32.gmra.mrb[222].mxu1 %v17843_v53 }
 0x526   :  { %13800 = vmatprep.mubr.f32.mxu1 %v17844_v19 }
 0x529   :  { %13801 = vmatmul.mubr.f32.gmra.mrb[224].mxu1 %v17845_v60  ;;  %v16324_v60 = vpack.c.bf16 %v10587_v48, %v10586_v9  ;;  %v17899_v48 = vld [vmem:[%s23678_s2 + $0x438] sm:$0xff] }
 0x52a   :  { %13803 = vmatprep.mubr.f32.mxu1 %v17846_v12  ;;  %v17887_v12 = vld [vmem:[%s23678_s2 + $0x3d8] sm:$0xff] }
 0x52d   :  { %13804 = vmatmul.mubr.f32.gmra.mrb[226].mxu1 %v17847_v26  ;;  %v10588_v26 = vld [vmem:[%s23679_s3 + $0x4a0] sm:$0xff] }
 0x52e   :  { %13806 = vmatprep.mubr.f32.mxu1 %v17848_v5  ;;  %v10589_v5 = vld [vmem:[%s23679_s3 + $0x4a8] sm:$0xff] }
 0x531   :  { %13807 = vmatmul.mubr.f32.gmra.mrb[228].mxu1 %v17849_v7  ;;  %v17888_v7 = vld [vmem:[%s23678_s2 + $0x3e0] sm:$0xff] }
 0x532   :  { %13809 = vmatprep.mubr.f32.mxu1 %v17850_v54 }
 0x535   :  { %13810 = vmatmul.mubr.f32.gmra.mrb[230].mxu1 %v17851_v22 }
 0x536   :  { %13812 = vmatprep.mubr.f32.mxu1 %v17852_v55  ;;  %v16328_v55 = vpack.c.bf16 %v10589_v5, %v10588_v26  ;;  %v17901_v5 = vld [vmem:[%s23678_s2 + $0x448] sm:$0xff] }
 0x539   :  { %13813 = vmatmul.mubr.f32.gmra.mrb[232].mxu1 %v17853_v58  ;;  %v17889_v58 = vld [vmem:[%s23678_s2 + $0x3e8] sm:$0xff] }
 0x53a   :  { %13815 = vmatprep.mubr.f32.mxu1 %v17854_v59  ;;  %v10590_v59 = vld [vmem:[%s23679_s3 + $0x4b0] sm:$0xff] }
 0x53d   :  { %13816 = vmatmul.mubr.f32.gmra.mrb[234].mxu1 %v17855_v17  ;;  %v10591_v17 = vld [vmem:[%s23679_s3 + $0x4b8] sm:$0xff] }
 0x53e   :  { %13818 = vmatprep.mubr.f32.mxu1 %v17856_v8 }
 0x541   :  { %13819 = vmatmul.mubr.f32.gmra.mrb[236].mxu1 %v17857_v30 }
 0x542   :  { %13821 = vmatprep.mubr.f32.mxu1 %v17858_v15  ;;  %v16332_v15 = vpack.c.bf16 %v10591_v17, %v10590_v59  ;;  %v17903_v17 = vld [vmem:[%s23678_s2 + $0x458] sm:$0xff] }
 0x545   :  { %13822 = vmatmul.mubr.f32.gmra.mrb[238].mxu1 %v17859_v2  ;;  %v17891_v2 = vld [vmem:[%s23678_s2 + $0x3f8] sm:$0xff] }
 0x546   :  { %13824 = vmatprep.mubr.f32.mxu1 %v17860_v34  ;;  %v10592_v34 = vld [vmem:[%s23679_s3 + $0x4c0] sm:$0xff] }
 0x549   :  { %13825 = vmatmul.mubr.f32.gmra.mrb[240].mxu1 %v17861_v47  ;;  %v10593_v47 = vld [vmem:[%s23679_s3 + $0x4c8] sm:$0xff] }
 0x54a   :  { %13827 = vmatprep.mubr.f32.mxu1 %v17862_v3  ;;  %v17892_v3 = vld [vmem:[%s23678_s2 + $0x400] sm:$0xff] }
 0x54d   :  { %13828 = vmatmul.mubr.f32.gmra.mrb[242].mxu1 %v17863_v20 }
 0x54e   :  { %13830 = vmatprep.mubr.f32.mxu1 %v17864_v4 }
 0x551   :  { %13831 = vmatmul.mubr.f32.gmra.mrb[244].mxu1 %v17865_v24  ;;  %v16336_v24 = vpack.c.bf16 %v10593_v47, %v10592_v34  ;;  %v17905_v34 = vld [vmem:[%s23678_s2 + $0x468] sm:$0xff]  ;;  %v10622_v47 = vld [vmem:[%s23679_s3 + $0x5b0] sm:$0xff] }
 0x552   :  { %13833 = vmatprep.mubr.f32.mxu1 %v17866_v13  ;;  %v17893_v13 = vld [vmem:[%s23678_s2 + $0x408] sm:$0xff] }
 0x555   :  { %13834 = vmatmul.mubr.f32.gmra.mrb[246].mxu1 %v17867_v16  ;;  %v10594_v16 = vld [vmem:[%s23679_s3 + $0x4d0] sm:$0xff] }
 0x556   :  { %13836 = vmatprep.mubr.f32.mxu1 %v17868_v18  ;;  %v10595_v18 = vld [vmem:[%s23679_s3 + $0x4d8] sm:$0xff] }
 0x559   :  { %13837 = vmatmul.mubr.f32.gmra.mrb[248].mxu1 %v17869_v23  ;;  %v17894_v23 = vld [vmem:[%s23678_s2 + $0x410] sm:$0xff] }
 0x55a   :  { %13839 = vmatprep.mubr.f32.mxu1 %v17870_v21 }
 0x55c   :  { %v20139_v25 = vpop.f32.mrb[144].mxu1 }
 0x55d   :  { %v20141_v27 = vpop.f32.mrb[145].mxu1  ;;  %13840 = vmatmul.mubr.f32.gmra.mrb[250].mxu1 %v17871_v28 }
 0x55e   :  { %13842 = vmatprep.mubr.f32.mxu1 %v17872_v11  ;;  %v16340_v11 = vpack.c.bf16 %v10595_v18, %v10594_v16 }
 0x560   :  { %v20149_v29 = vpop.f32.mrb[146].mxu1 }
 0x561   :  { %v20151_v31 = vpop.f32.mrb[147].mxu1  ;;  %13843 = vmatmul.mubr.f32.gmra.mrb[252].mxu1 %v17873_v50  ;;  %v17895_v50 = vld [vmem:[%s23678_s2 + $0x418] sm:$0xff] }
 0x562   :  { %13845 = vmatprep.mubr.f32.mxu1 %v17874_v41  ;;  %v10596_v41 = vld [vmem:[%s23679_s3 + $0x4e0] sm:$0xff] }
 0x564   :  { %v20159_v49 = vpop.f32.mrb[148].mxu1 }
 0x565   :  { %v20161_v32 = vpop.f32.mrb[149].mxu1  ;;  %13846 = vmatmul.mubr.f32.gmra.mrb[254].mxu1 %v17875_v62  ;;  %v10597_v62 = vld [vmem:[%s23679_s3 + $0x4e8] sm:$0xff] }
 0x566   :  { %13848 = vmatprep.mubr.f32.mxu1 %v17876_v33  ;;  %v17896_v33 = vld [vmem:[%s23678_s2 + $0x420] sm:$0xff] }
 0x568   :  { %v20169_v57 = vpop.f32.mrb[150].mxu1 }
 0x569   :  { %v20171_v36 = vpop.f32.mrb[151].mxu1  ;;  %13849 = vmatmul.mubr.f32.gmra.mrb[0].mxu1 %v17877_v37 }
 0x56a   :  { %13851 = vmatprep.mubr.f32.mxu1 %v17878_v38 }
 0x56c   :  { %v20179_v1 = vpop.f32.mrb[152].mxu1 }
 0x56d   :  { %v20181_v14 = vpop.f32.mrb[153].mxu1  ;;  %13852 = vmatmul.mubr.f32.gmra.mrb[2].mxu1 %v17879_v45  ;;  %v16344_v45 = vpack.c.bf16 %v10597_v62, %v10596_v41  ;;  %v10629_v41 = vld [vmem:[%s23679_s3 + $0x5e8] sm:$0xff] }
 0x56e   :  { %13854 = vmatprep.mubr.f32.mxu1 %v17880_v0  ;;  %v17897_v0 = vld [vmem:[%s23678_s2 + $0x428] sm:$0xff] }
 0x570   :  { %v20189_v43 = vpop.f32.mrb[154].mxu1 }
 0x571   :  { %v20191_v40 = vpop.f32.mrb[155].mxu1  ;;  %13855 = vmatmul.mubr.f32.gmra.mrb[4].mxu1 %v17881_v61  ;;  %v10598_v61 = vld [vmem:[%s23679_s3 + $0x4f0] sm:$0xff] }
 0x572   :  { %13857 = vmatprep.mubr.f32.mxu1 %v17882_v10  ;;  %v10599_v10 = vld [vmem:[%s23679_s3 + $0x4f8] sm:$0xff] }
 0x573   :  { %v16348_v9 = vpack.c.bf16 %v10599_v10, %v10598_v61  ;;  %v10634_v10 = vld [vmem:[%s23679_s3 + $0x610] sm:$0xff] }
 0x574   :  { %v20199_v44 = vpop.f32.mrb[156].mxu1 }
 0x575   :  { %v20201_v63 = vpop.f32.mrb[157].mxu1  ;;  %13858 = vmatmul.mubr.f32.gmra.mrb[6].mxu1 %v17883_v6  ;;  %v17898_v6 = vld [vmem:[%s23678_s2 + $0x430] sm:$0xff] }
 0x576   :  { %13860 = vmatprep.mubr.f32.mxu1 %v17884_v39 }
 0x578   :  { %v20209_v46 = vpop.f32.mrb[158].mxu1 }
 0x579   :  { %v20211_v35 = vpop.f32.mrb[159].mxu1  ;;  %13861 = vmatmul.mubr.f32.gmra.mrb[8].mxu1 %v17885_v51 }
 0x57a   :  { %13863 = vmatprep.mubr.f32.mxu1 %v17886_v52  ;;  %v10616_v52 = vld [vmem:[%s23679_s3 + $0x580] sm:$0xff] }
 0x57c   :  { %v13706_v53 = vpop.f32.mrb[160].mxu1 }
 0x57d   :  { %v3168_v19 = vpop.f32.mrb[161].mxu1  ;;  %13864 = vmatmul.mubr.f32.gmra.mrb[10].mxu1 %v17887_v12 }
 0x57e   :  { %13928 = vmatprep.mubr.f32.mxu0 %v3168_v19  ;;  %13866 = vmatprep.mubr.f32.mxu1 %v17888_v7  ;;  %v17900_v19 = vld [vmem:[%s23678_s2 + $0x440] sm:$0xff]  ;;  %v10618_v7 = vld [vmem:[%s23679_s3 + $0x590] sm:$0xff] }
 0x57f   :  { %13929 = vmatmul.mubr.f32.vlgmr.msra.gmra.mrb[32].mxu0 %v13706_v53  ;;  %v10617_v53 = vld [vmem:[%s23679_s3 + $0x588] sm:$0xff] }
 0x580   :  { %v13709_v54 = vpop.f32.mrb[162].mxu1  ;;  %16323 = vmatpush3.bf16.msra.mxu0 %v19998_v56  ;;  %v17890_v56 = vld [vmem:[%s23678_s2 + $0x3f0] sm:$0xff]  ;;  %v16352_v26 = vpack.c.bf16 %v10617_v53, %v10616_v52 }
 0x581   :  { %v3178_v22 = vpop.f32.mrb[163].mxu1  ;;  %16325 = vmatprep.subr.bf16.mxu0 %v16324_v60  ;;  %13867 = vmatmul.mubr.f32.gmra.mrb[12].mxu1 %v17889_v58  ;;  %v10638_v53 = vld [vmem:[%s23679_s3 + $0x630] sm:$0xff] }
 0x582   :  { %13931 = vmatprep.mubr.f32.mxu0 %v3178_v22  ;;  %13869 = vmatprep.mubr.f32.mxu1 %v17890_v56  ;;  %v17902_v22 = vld [vmem:[%s23678_s2 + $0x450] sm:$0xff]  ;;  %v10620_v56 = vld [vmem:[%s23679_s3 + $0x5a0] sm:$0xff] }
 0x583   :  { %13932 = vmatmul.mubr.f32.gmra.mrb[34].mxu0 %v13709_v54  ;;  %v10619_v54 = vld [vmem:[%s23679_s3 + $0x598] sm:$0xff] }
 0x584   :  { %v13712_v8 = vpop.f32.mrb[164].mxu1  ;;  %16327 = vmatpush3.bf16.msra.mxu0 %v16324_v60  ;;  %v16356_v58 = vpack.c.bf16 %v10619_v54, %v10618_v7  ;;  %v10641_v7 = vld [vmem:[%s23679_s3 + $0x648] sm:$0xff] }
 0x585   :  { %v3188_v30 = vpop.f32.mrb[165].mxu1  ;;  %16329 = vmatprep.subr.bf16.mxu0 %v16328_v55  ;;  %13870 = vmatmul.mubr.f32.gmra.mrb[14].mxu1 %v17891_v2 }
 0x586   :  { %13934 = vmatprep.mubr.f32.mxu0 %v3188_v30  ;;  %13872 = vmatprep.mubr.f32.mxu1 %v17892_v3 }
 0x587   :  { %13935 = vmatmul.mubr.f32.gmra.mrb[36].mxu0 %v13712_v8  ;;  %v10621_v8 = vld [vmem:[%s23679_s3 + $0x5a8] sm:$0xff] }
 0x588   :  { %v13715_v20 = vpop.f32.mrb[166].mxu1  ;;  %16331 = vmatpush3.bf16.msra.mxu0 %v16328_v55 }
 0x589   :  { %v3198_v4 = vpop.f32.mrb[167].mxu1  ;;  %16333 = vmatprep.subr.bf16.mxu0 %v16332_v15  ;;  %13873 = vmatmul.mubr.f32.gmra.mrb[16].mxu1 %v17893_v13  ;;  %v10624_v13 = vld [vmem:[%s23679_s3 + $0x5c0] sm:$0xff] }
 0x58a   :  { %13937 = vmatprep.mubr.f32.mxu0 %v3198_v4  ;;  %13875 = vmatprep.mubr.f32.mxu1 %v17894_v23 }
 0x58b   :  { %13938 = vmatmul.mubr.f32.gmra.mrb[38].mxu0 %v13715_v20 }
 0x58c   :  { %v13718_v21 = vpop.f32.mrb[168].mxu1  ;;  %16335 = vmatpush3.bf16.msra.mxu0 %v16332_v15  ;;  %v16360_v15 = vpack.c.bf16 %v10621_v8, %v10620_v56 }
 0x58d   :  { %v3208_v28 = vpop.f32.mrb[169].mxu1  ;;  %16337 = vmatprep.subr.bf16.mxu0 %v16336_v24  ;;  %13876 = vmatmul.mubr.f32.gmra.mrb[18].mxu1 %v17895_v50  ;;  %v10628_v50 = vld [vmem:[%s23679_s3 + $0x5e0] sm:$0xff] }
 0x58e   :  { %13940 = vmatprep.mubr.f32.mxu0 %v3208_v28  ;;  %13878 = vmatprep.mubr.f32.mxu1 %v17896_v33  ;;  %v10627_v28 = vld [vmem:[%s23679_s3 + $0x5d8] sm:$0xff]  ;;  %v10630_v33 = vld [vmem:[%s23679_s3 + $0x5f0] sm:$0xff] }
 0x58f   :  { %13941 = vmatmul.mubr.f32.gmra.mrb[40].mxu0 %v13718_v21  ;;  %v10626_v21 = vld [vmem:[%s23679_s3 + $0x5d0] sm:$0xff] }
 0x590   :  { %v13721_v37 = vpop.f32.mrb[170].mxu1  ;;  %16339 = vmatpush3.bf16.msra.mxu0 %v16336_v24  ;;  %v17907_v24 = vld [vmem:[%s23678_s2 + $0x478] sm:$0xff] }
 0x591   :  { %v3218_v38 = vpop.f32.mrb[171].mxu1  ;;  %16341 = vmatprep.subr.bf16.mxu0 %v16340_v11  ;;  %13879 = vmatmul.mubr.f32.gmra.mrb[20].mxu1 %v17897_v0  ;;  %v10633_v0 = vld [vmem:[%s23679_s3 + $0x608] sm:$0xff] }
 0x592   :  { %13943 = vmatprep.mubr.f32.mxu0 %v3218_v38  ;;  %13881 = vmatprep.mubr.f32.mxu1 %v17898_v6  ;;  %v10635_v6 = vld [vmem:[%s23679_s3 + $0x618] sm:$0xff] }
 0x593   :  { %13944 = vmatmul.mubr.f32.gmra.mrb[42].mxu0 %v13721_v37  ;;  %v10631_v37 = vld [vmem:[%s23679_s3 + $0x5f8] sm:$0xff] }
 0x594   :  { %v13724_v39 = vpop.f32.mrb[172].mxu1  ;;  %16343 = vmatpush3.bf16.msra.mxu0 %v16340_v11 }
 0x595   :  { %v3228_v51 = vpop.f32.mrb[173].mxu1  ;;  %16345 = vmatprep.subr.bf16.mxu0 %v16344_v45  ;;  %13882 = vmatmul.mubr.f32.gmra.mrb[22].mxu1 %v17899_v48 }
 0x596   :  { %13946 = vmatprep.mubr.f32.mxu0 %v3228_v51  ;;  %13884 = vmatprep.mubr.f32.mxu1 %v17900_v19  ;;  %v10636_v51 = vld [vmem:[%s23679_s3 + $0x620] sm:$0xff]  ;;  %v10639_v19 = vld [vmem:[%s23679_s3 + $0x638] sm:$0xff] }
 0x597   :  { %13947 = vmatmul.mubr.f32.gmra.mrb[44].mxu0 %v13724_v39 }
 0x598   :  { %v13727_v60 = vpop.f32.mrb[174].mxu1  ;;  %16347 = vmatpush3.bf16.msra.mxu0 %v16344_v45  ;;  %v10632_v45 = vld [vmem:[%s23679_s3 + $0x600] sm:$0xff] }
 0x599   :  { %v3238_v12 = vpop.f32.mrb[175].mxu1  ;;  %16349 = vmatprep.subr.bf16.mxu0 %v16348_v9  ;;  %13885 = vmatmul.mubr.f32.gmra.mrb[24].mxu1 %v17901_v5  ;;  %v10640_v5 = vld [vmem:[%s23679_s3 + $0x640] sm:$0xff] }
 0x59a   :  { %13949 = vmatprep.mubr.f32.mxu0 %v3238_v12  ;;  %13887 = vmatprep.mubr.f32.mxu1 %v17902_v22  ;;  %v16396_v12 = vpack.c.bf16 %v10639_v19, %v10638_v53  ;;  %v16400_v22 = vpack.c.bf16 %v10641_v7, %v10640_v5 }
 0x59b   :  { %13950 = vmatmul.mubr.f32.gmra.mrb[46].mxu0 %v13727_v60 }
 0x59c   :  { %16351 = vmatpush3.bf16.msra.mxu0 %v16348_v9  ;;  %13984 = vmatprep.mubr.f32.mxu0 %v20141_v27  ;;  %v20323_v55 = vpop.f32.mrb[176].mxu1  ;;  %v17904_v27 = vld [vmem:[%s23678_s2 + $0x460] sm:$0xff]  ;;  %v10637_v9 = vld [vmem:[%s23679_s3 + $0x628] sm:$0xff] }
 0x59d   :  { %16353 = vmatprep.subr.bf16.mxu0 %v16352_v26  ;;  %v20325_v59 = vpop.f32.mrb[177].mxu1  ;;  %13888 = vmatmul.mubr.f32.gmra.mrb[26].mxu1 %v17903_v17  ;;  %v16392_v48 = vpack.c.bf16 %v10637_v9, %v10636_v51 }
 0x59e   :  { %13890 = vmatprep.mubr.f32.mxu1 %v17904_v27  ;;  %v10644_v27 = vld [vmem:[%s23679_s3 + $0x660] sm:$0xff] }
 0x59f   :  { %13985 = vmatmul.mubr.f32.vlgmr.msra.gmra.mrb[32].mxu0 %v20139_v25  ;;  %v10623_v25 = vld [vmem:[%s23679_s3 + $0x5b8] sm:$0xff] }
 0x5a0   :  { %13987 = vmatprep.mubr.f32.mxu0 %v20151_v31  ;;  %16355 = vmatpush3.bf16.msra.mxu0 %v16352_v26  ;;  %v20341_v30 = vpop.f32.mrb[178].mxu1  ;;  %v17906_v31 = vld [vmem:[%s23678_s2 + $0x470] sm:$0xff]  ;;  %v16364_v20 = vpack.c.bf16 %v10623_v25, %v10622_v47  ;;  %v10647_v25 = vld [vmem:[%s23679_s3 + $0x678] sm:$0xff] }
 0x5a1   :  { %16357 = vmatprep.subr.bf16.mxu0 %v16356_v58  ;;  %v20343_v2 = vpop.f32.mrb[179].mxu1  ;;  %13891 = vmatmul.mubr.f32.gmra.mrb[28].mxu1 %v17905_v34  ;;  %v10646_v47 = vld [vmem:[%s23679_s3 + $0x670] sm:$0xff] }
 0x5a2   :  { %13893 = vmatprep.mubr.f32.mxu1 %v17906_v31 }
 0x5a3   :  { %13988 = vmatmul.mubr.f32.gmra.mrb[34].mxu0 %v20149_v29  ;;  %v10625_v29 = vld [vmem:[%s23679_s3 + $0x5c8] sm:$0xff] }
 0x5a4   :  { %13990 = vmatprep.mubr.f32.mxu0 %v20161_v32  ;;  %16359 = vmatpush3.bf16.msra.mxu0 %v16356_v58  ;;  %v20359_v3 = vpop.f32.mrb[180].mxu1  ;;  %v17908_v32 = vld [vmem:[%s23678_s2] sm:$0xff]  ;;  %v16368_v18 = vpack.c.bf16 %v10625_v29, %v10624_v13  ;;  %v10642_v58 = vld [vmem:[%s23679_s3 + $0x650] sm:$0xff] }
 0x5a5   :  { %16361 = vmatprep.subr.bf16.mxu0 %v16360_v15  ;;  %v20361_v4 = vpop.f32.mrb[181].mxu1  ;;  %13894 = vmatmul.mubr.f32.gmra.mrb[30].mxu1 %v17907_v24  ;;  %v10649_v24 = vld [vmem:[%s23679_s3 + $0x688] sm:$0xff] }
 0x5a6   :  { %14432 = vmatprep.mubr.f32.mxu1 %v17908_v32 }
 0x5a7   :  { %13991 = vmatmul.mubr.f32.gmra.mrb[36].mxu0 %v20159_v49 }
 0x5a8   :  { %13993 = vmatprep.mubr.f32.mxu0 %v20171_v36  ;;  %16363 = vmatpush3.bf16.msra.mxu0 %v16360_v15  ;;  %v20377_v16 = vpop.f32.mrb[182].mxu1  ;;  %v16372_v36 = vpack.c.bf16 %v10627_v28, %v10626_v21 }
 0x5a9   :  { %16365 = vmatprep.subr.bf16.mxu0 %v16364_v20  ;;  %v20379_v23 = vpop.f32.mrb[183].mxu1 }
 0x5ab   :  { %13994 = vmatmul.mubr.f32.gmra.mrb[38].mxu0 %v20169_v57 }
 0x5ac   :  { %13996 = vmatprep.mubr.f32.mxu0 %v20181_v14  ;;  %16367 = vmatpush3.bf16.msra.mxu0 %v16364_v20  ;;  %v20389_v49 = vpop.f32.mrb[184].mxu1  ;;  %v16376_v14 = vpack.c.bf16 %v10629_v41, %v10628_v50 }
 0x5ad   :  { %16369 = vmatprep.subr.bf16.mxu0 %v16368_v18  ;;  %v20391_v11 = vpop.f32.mrb[185].mxu1 }
 0x5af   :  { %13997 = vmatmul.mubr.f32.gmra.mrb[40].mxu0 %v20179_v1 }
 0x5b0   :  { %13999 = vmatprep.mubr.f32.mxu0 %v20191_v40  ;;  %16371 = vmatpush3.bf16.msra.mxu0 %v16368_v18  ;;  %v20401_v57 = vpop.f32.mrb[186].mxu1  ;;  %v16380_v40 = vpack.c.bf16 %v10631_v37, %v10630_v33  ;;  %v10651_v18 = vld [vmem:[%s23679_s3 + $0x698] sm:$0xff] }
 0x5b1   :  { %16373 = vmatprep.subr.bf16.mxu0 %v16372_v36  ;;  %v20403_v62 = vpop.f32.mrb[187].mxu1 }
 0x5b3   :  { %14000 = vmatmul.mubr.f32.gmra.mrb[42].mxu0 %v20189_v43 }
 0x5b4   :  { %14002 = vmatprep.mubr.f32.mxu0 %v20201_v63  ;;  %16375 = vmatpush3.bf16.msra.mxu0 %v16372_v36  ;;  %v20413_v1 = vpop.f32.mrb[188].mxu1  ;;  %v16384_v63 = vpack.c.bf16 %v10633_v0, %v10632_v45  ;;  %v10653_v36 = vld [vmem:[%s23679_s3 + $0x6a8] sm:$0xff] }
 0x5b5   :  { %16377 = vmatprep.subr.bf16.mxu0 %v16376_v14  ;;  %v20415_v38 = vpop.f32.mrb[189].mxu1 }
 0x5b7   :  { %14003 = vmatmul.mubr.f32.gmra.mrb[44].mxu0 %v20199_v44 }
 0x5b8   :  { %14005 = vmatprep.mubr.f32.mxu0 %v20211_v35  ;;  %16379 = vmatpush3.bf16.msra.mxu0 %v16376_v14  ;;  %v20425_v43 = vpop.f32.mrb[190].mxu1  ;;  %v16388_v35 = vpack.c.bf16 %v10635_v6, %v10634_v10  ;;  %v10655_v14 = vld [vmem:[%s23679_s3 + $0x6b8] sm:$0xff] }
 0x5b9   :  { %16381 = vmatprep.subr.bf16.mxu0 %v16380_v40  ;;  %v20427_v61 = vpop.f32.mrb[191].mxu1 }
 0x5bb   :  { %14006 = vmatmul.mubr.f32.gmra.mrb[46].mxu0 %v20209_v46 }
 0x5bc   :  { %16383 = vmatpush3.bf16.msra.mxu0 %v16380_v40  ;;  %14040 = vmatprep.mubr.f32.mxu0 %v20325_v59  ;;  %v20437_v44 = vpop.f32.mrb[192].mxu1  ;;  %v10643_v59 = vld [vmem:[%s23679_s3 + $0x658] sm:$0xff]  ;;  %v10657_v40 = vld [vmem:[%s23679_s3 + $0x6c8] sm:$0xff] }
 0x5bd   :  { %16385 = vmatprep.subr.bf16.mxu0 %v16384_v63  ;;  %v20439_v39 = vpop.f32.mrb[193].mxu1  ;;  %v16404_v56 = vpack.c.bf16 %v10643_v59, %v10642_v58 }
 0x5bf   :  { %14041 = vmatmul.mubr.f32.vlgmr.msra.gmra.mrb[32].mxu0 %v20323_v55 }
 0x5c0   :  { %16387 = vmatpush3.bf16.msra.mxu0 %v16384_v63  ;;  %14043 = vmatprep.mubr.f32.mxu0 %v20343_v2  ;;  %v20449_v46 = vpop.f32.mrb[194].mxu1  ;;  %v10659_v63 = vld [vmem:[%s23679_s3 + $0x6d8] sm:$0xff] }
 0x5c1   :  { %16389 = vmatprep.subr.bf16.mxu0 %v16388_v35  ;;  %v20451_v52 = vpop.f32.mrb[195].mxu1 }
 0x5c3   :  { %14044 = vmatmul.mubr.f32.gmra.mrb[34].mxu0 %v20341_v30  ;;  %v10645_v30 = vld [vmem:[%s23679_s3 + $0x668] sm:$0xff] }
 0x5c4   :  { %16391 = vmatpush3.bf16.msra.mxu0 %v16388_v35  ;;  %14046 = vmatprep.mubr.f32.mxu0 %v20361_v4  ;;  %v20461_v60 = vpop.f32.mrb[196].mxu1  ;;  %v16408_v2 = vpack.c.bf16 %v10645_v30, %v10644_v27  ;;  %v10648_v4 = vld [vmem:[%s23679_s3 + $0x680] sm:$0xff]  ;;  %v10661_v35 = vld [vmem:[%s23679_s3 + $0x6e8] sm:$0xff] }
 0x5c5   :  { %16393 = vmatprep.subr.bf16.mxu0 %v16392_v48  ;;  %v20463_v26 = vpop.f32.mrb[197].mxu1  ;;  %v16416_v29 = vpack.c.bf16 %v10649_v24, %v10648_v4 }
 0x5c7   :  { %14047 = vmatmul.mubr.f32.gmra.mrb[36].mxu0 %v20359_v3  ;;  %v16412_v3 = vpack.c.bf16 %v10647_v25, %v10646_v47 }
 0x5c8   :  { %16395 = vmatpush3.bf16.msra.mxu0 %v16392_v48  ;;  %14049 = vmatprep.mubr.f32.mxu0 %v20379_v23  ;;  %v20473_v54 = vpop.f32.mrb[198].mxu1  ;;  %v10663_v48 = vld [vmem:[%s23679_s3 + $0x6f8] sm:$0xff] }
 0x5c9   :  { %16397 = vmatprep.subr.bf16.mxu0 %v16396_v12  ;;  %v20475_v55 = vpop.f32.mrb[199].mxu1 }
 0x5cb   :  { %14050 = vmatmul.mubr.f32.gmra.mrb[38].mxu0 %v20377_v16  ;;  %v10650_v16 = vld [vmem:[%s23679_s3 + $0x690] sm:$0xff] }
 0x5cc   :  { %16399 = vmatpush3.bf16.msra.mxu0 %v16396_v12  ;;  %14052 = vmatprep.mubr.f32.mxu0 %v20391_v11  ;;  %v20485_v17 = vpop.f32.mrb[200].mxu1  ;;  %v16420_v21 = vpack.c.bf16 %v10651_v18, %v10650_v16  ;;  %v10665_v12 = vld [vmem:[%s23679_s3 + $0x708] sm:$0xff] }
 0x5cd   :  { %16401 = vmatprep.subr.bf16.mxu0 %v16400_v22  ;;  %v20487_v8 = vpop.f32.mrb[201].mxu1 }
 0x5cf   :  { %14053 = vmatmul.mubr.f32.gmra.mrb[40].mxu0 %v20389_v49  ;;  %v10652_v49 = vld [vmem:[%s23679_s3 + $0x6a0] sm:$0xff] }
 0x5d0   :  { %16403 = vmatpush3.bf16.msra.mxu0 %v16400_v22  ;;  %14055 = vmatprep.mubr.f32.mxu0 %v20403_v62  ;;  %v20497_v15 = vpop.f32.mrb[202].mxu1  ;;  %v16424_v50 = vpack.c.bf16 %v10653_v36, %v10652_v49  ;;  %v10667_v22 = vld [vmem:[%s23679_s3 + $0x718] sm:$0xff] }
 0x5d1   :  { %16405 = vmatprep.subr.bf16.mxu0 %v16404_v56  ;;  %v20499_v34 = vpop.f32.mrb[203].mxu1 }
 0x5d3   :  { %14056 = vmatmul.mubr.f32.gmra.mrb[42].mxu0 %v20401_v57  ;;  %v10654_v57 = vld [vmem:[%s23679_s3 + $0x6b0] sm:$0xff] }
 0x5d4   :  { %16407 = vmatpush3.bf16.msra.mxu0 %v16404_v56  ;;  %14058 = vmatprep.mubr.f32.mxu0 %v20415_v38  ;;  %v20509_v31 = vpop.f32.mrb[204].mxu1  ;;  %v16428_v33 = vpack.c.bf16 %v10655_v14, %v10654_v57  ;;  %v10669_v56 = vld [vmem:[%s23679_s3 + $0x728] sm:$0xff] }
 0x5d5   :  { %16409 = vmatprep.subr.bf16.mxu0 %v16408_v2  ;;  %v20511_v20 = vpop.f32.mrb[205].mxu1 }
 0x5d7   :  { %14059 = vmatmul.mubr.f32.gmra.mrb[44].mxu0 %v20413_v1  ;;  %v10656_v1 = vld [vmem:[%s23679_s3 + $0x6c0] sm:$0xff] }
 0x5d8   :  { %16411 = vmatpush3.bf16.msra.mxu0 %v16408_v2  ;;  %14061 = vmatprep.mubr.f32.mxu0 %v20427_v61  ;;  %v20521_v13 = vpop.f32.mrb[206].mxu1  ;;  %v16432_v45 = vpack.c.bf16 %v10657_v40, %v10656_v1  ;;  %v10671_v2 = vld [vmem:[%s23679_s3 + $0x738] sm:$0xff] }
 0x5d9   :  { %16413 = vmatprep.subr.bf16.mxu0 %v16412_v3  ;;  %v20523_v32 = vpop.f32.mrb[207].mxu1 }
 0x5db   :  { %14062 = vmatmul.mubr.f32.gmra.mrb[46].mxu0 %v20425_v43  ;;  %v10658_v43 = vld [vmem:[%s23679_s3 + $0x6d0] sm:$0xff] }
 0x5dc   :  { %16415 = vmatpush3.bf16.msra.mxu0 %v16412_v3  ;;  %14096 = vmatprep.mubr.f32.mxu0 %v20439_v39  ;;  %v20533_v23 = vpop.f32.mrb[208].mxu1  ;;  %v16436_v10 = vpack.c.bf16 %v10659_v63, %v10658_v43  ;;  %v10673_v3 = vld [vmem:[%s23679_s3 + $0x748] sm:$0xff] }
 0x5dd   :  { %16417 = vmatprep.subr.bf16.mxu0 %v16416_v29  ;;  %v20535_v28 = vpop.f32.mrb[209].mxu1 }
 0x5df   :  { %14097 = vmatmul.mubr.f32.vlgmr.msra.gmra.mrb[32].mxu0 %v20437_v44  ;;  %v10660_v44 = vld [vmem:[%s23679_s3 + $0x6e0] sm:$0xff] }
 0x5e0   :  { %16419 = vmatpush3.bf16.msra.mxu0 %v16416_v29  ;;  %14099 = vmatprep.mubr.f32.mxu0 %v20451_v52  ;;  %v20545_v11 = vpop.f32.mrb[210].mxu1  ;;  %v16440_v51 = vpack.c.bf16 %v10661_v35, %v10660_v44  ;;  %v10675_v29 = vld [vmem:[%s23679_s3 + $0x758] sm:$0xff] }
 0x5e1   :  { %16421 = vmatprep.subr.bf16.mxu0 %v16420_v21  ;;  %v20547_v41 = vpop.f32.mrb[211].mxu1 }
 0x5e3   :  { %14100 = vmatmul.mubr.f32.gmra.mrb[34].mxu0 %v20449_v46  ;;  %v10662_v46 = vld [vmem:[%s23679_s3 + $0x6f0] sm:$0xff] }
 0x5e4   :  { %16423 = vmatpush3.bf16.msra.mxu0 %v16420_v21  ;;  %14102 = vmatprep.mubr.f32.mxu0 %v20463_v26  ;;  %v20557_v62 = vpop.f32.mrb[212].mxu1  ;;  %v16444_v53 = vpack.c.bf16 %v10663_v48, %v10662_v46  ;;  %v10677_v21 = vld [vmem:[%s23679_s3 + $0x768] sm:$0xff] }
 0x5e5   :  { %16425 = vmatprep.subr.bf16.mxu0 %v16424_v50  ;;  %v20559_v37 = vpop.f32.mrb[213].mxu1 }
 0x5e7   :  { %14103 = vmatmul.mubr.f32.gmra.mrb[36].mxu0 %v20461_v60  ;;  %v10664_v60 = vld [vmem:[%s23679_s3 + $0x700] sm:$0xff] }
 0x5e8   :  { %16427 = vmatpush3.bf16.msra.mxu0 %v16424_v50  ;;  %14105 = vmatprep.mubr.f32.mxu0 %v20475_v55  ;;  %v20569_v38 = vpop.f32.mrb[214].mxu1  ;;  %v16448_v5 = vpack.c.bf16 %v10665_v12, %v10664_v60  ;;  %v10679_v50 = vld [vmem:[%s23679_s3 + $0x778] sm:$0xff] }
 0x5e9   :  { %16429 = vmatprep.subr.bf16.mxu0 %v16428_v33  ;;  %v20571_v0 = vpop.f32.mrb[215].mxu1 }
 0x5eb   :  { %14106 = vmatmul.mubr.f32.gmra.mrb[38].mxu0 %v20473_v54  ;;  %v10666_v54 = vld [vmem:[%s23679_s3 + $0x710] sm:$0xff] }
 0x5ec   :  { %16431 = vmatpush3.bf16.msra.mxu0 %v16428_v33  ;;  %14108 = vmatprep.mubr.f32.mxu0 %v20487_v8  ;;  %v20581_v61 = vpop.f32.mrb[216].mxu1  ;;  %v16452_v58 = vpack.c.bf16 %v10667_v22, %v10666_v54  ;;  %v10681_v33 = vld [vmem:[%s23679_s3 + $0x788] sm:$0xff] }
 0x5ed   :  { %16433 = vmatprep.subr.bf16.mxu0 %v16432_v45  ;;  %v20583_v6 = vpop.f32.mrb[217].mxu1 }
 0x5ef   :  { %14109 = vmatmul.mubr.f32.gmra.mrb[40].mxu0 %v20485_v17  ;;  %v10668_v17 = vld [vmem:[%s23679_s3 + $0x720] sm:$0xff] }
 0x5f0   :  { %16435 = vmatpush3.bf16.msra.mxu0 %v16432_v45  ;;  %14111 = vmatprep.mubr.f32.mxu0 %v20499_v34  ;;  %v20593_v39 = vpop.f32.mrb[218].mxu1  ;;  %v16456_v27 = vpack.c.bf16 %v10669_v56, %v10668_v17  ;;  %v10683_v45 = vld [vmem:[%s23679_s3 + $0x798] sm:$0xff] }
 0x5f1   :  { %16437 = vmatprep.subr.bf16.mxu0 %v16436_v10  ;;  %v20595_v9 = vpop.f32.mrb[219].mxu1 }
 0x5f3   :  { %14112 = vmatmul.mubr.f32.gmra.mrb[42].mxu0 %v20497_v15  ;;  %v10670_v15 = vld [vmem:[%s23679_s3 + $0x730] sm:$0xff] }
 0x5f4   :  { %16439 = vmatpush3.bf16.msra.mxu0 %v16436_v10  ;;  %14114 = vmatprep.mubr.f32.mxu0 %v20511_v20  ;;  %v20605_v52 = vpop.f32.mrb[220].mxu1  ;;  %v16460_v47 = vpack.c.bf16 %v10671_v2, %v10670_v15  ;;  %v10685_v10 = vld [vmem:[%s23679_s3 + $0x7a8] sm:$0xff] }
 0x5f5   :  { %16441 = vmatprep.subr.bf16.mxu0 %v16440_v51  ;;  %v20607_v19 = vpop.f32.mrb[221].mxu1 }
 0x5f7   :  { %14115 = vmatmul.mubr.f32.gmra.mrb[44].mxu0 %v20509_v31  ;;  %v10672_v31 = vld [vmem:[%s23679_s3 + $0x740] sm:$0xff] }
 0x5f8   :  { %16443 = vmatpush3.bf16.msra.mxu0 %v16440_v51  ;;  %14117 = vmatprep.mubr.f32.mxu0 %v20523_v32  ;;  %v20617_v26 = vpop.f32.mrb[222].mxu1  ;;  %v16464_v4 = vpack.c.bf16 %v10673_v3, %v10672_v31  ;;  %v10687_v51 = vld [vmem:[%s23679_s3 + $0x7b8] sm:$0xff] }
 0x5f9   :  { %16445 = vmatprep.subr.bf16.mxu0 %v16444_v53  ;;  %v20619_v7 = vpop.f32.mrb[223].mxu1 }
 0x5fb   :  { %14118 = vmatmul.mubr.f32.gmra.mrb[46].mxu0 %v20521_v13  ;;  %v10674_v13 = vld [vmem:[%s23679_s3 + $0x750] sm:$0xff] }
 0x5fc   :  { %16447 = vmatpush3.bf16.msra.mxu0 %v16444_v53  ;;  %14152 = vmatprep.mubr.f32.mxu0 %v20535_v28  ;;  %v20629_v55 = vpop.f32.mrb[224].mxu1  ;;  %v16468_v16 = vpack.c.bf16 %v10675_v29, %v10674_v13  ;;  %v10689_v53 = vld [vmem:[%s23679_s3 + $0x7c8] sm:$0xff] }
 0x5fd   :  { %16449 = vmatprep.subr.bf16.mxu0 %v16448_v5  ;;  %v20631_v59 = vpop.f32.mrb[225].mxu1 }
 0x5ff   :  { %14153 = vmatmul.mubr.f32.vlgmr.msra.gmra.mrb[32].mxu0 %v20533_v23  ;;  %v10676_v23 = vld [vmem:[%s23679_s3 + $0x760] sm:$0xff] }
 0x600   :  { %16451 = vmatpush3.bf16.msra.mxu0 %v16448_v5  ;;  %14155 = vmatprep.mubr.f32.mxu0 %v20547_v41  ;;  %v20641_v8 = vpop.f32.mrb[226].mxu1  ;;  %v16472_v49 = vpack.c.bf16 %v10677_v21, %v10676_v23  ;;  %v10691_v5 = vld [vmem:[%s23679_s3 + $0x7d8] sm:$0xff] }
 0x601   :  { %16453 = vmatprep.subr.bf16.mxu0 %v16452_v58  ;;  %v20643_v30 = vpop.f32.mrb[227].mxu1 }
 0x603   :  { %14156 = vmatmul.mubr.f32.gmra.mrb[34].mxu0 %v20545_v11  ;;  %v10678_v11 = vld [vmem:[%s23679_s3 + $0x770] sm:$0xff] }
 0x604   :  { %16455 = vmatpush3.bf16.msra.mxu0 %v16452_v58  ;;  %14158 = vmatprep.mubr.f32.mxu0 %v20559_v37  ;;  %v20653_v34 = vpop.f32.mrb[228].mxu1  ;;  %v16476_v57 = vpack.c.bf16 %v10679_v50, %v10678_v11  ;;  %v10693_v58 = vld [vmem:[%s23679_s3 + $0x7e8] sm:$0xff] }
 0x605   :  { %16457 = vmatprep.subr.bf16.mxu0 %v16456_v27  ;;  %v20655_v25 = vpop.f32.mrb[229].mxu1 }
 0x607   :  { %14159 = vmatmul.mubr.f32.gmra.mrb[36].mxu0 %v20557_v62  ;;  %v10680_v62 = vld [vmem:[%s23679_s3 + $0x780] sm:$0xff] }
 0x608   :  { %16459 = vmatpush3.bf16.msra.mxu0 %v16456_v27  ;;  %14161 = vmatprep.mubr.f32.mxu0 %v20571_v0  ;;  %v20665_v20 = vpop.f32.mrb[230].mxu1  ;;  %v16480_v1 = vpack.c.bf16 %v10681_v33, %v10680_v62  ;;  %v10695_v27 = vld [vmem:[%s23679_s3 + $0x7f8] sm:$0xff] }
 0x609   :  { %16461 = vmatprep.subr.bf16.mxu0 %v16460_v47  ;;  %v20667_v24 = vpop.f32.mrb[231].mxu1 }
 0x60b   :  { %14162 = vmatmul.mubr.f32.gmra.mrb[38].mxu0 %v20569_v38  ;;  %v10682_v38 = vld [vmem:[%s23679_s3 + $0x790] sm:$0xff] }
 0x60c   :  { %16463 = vmatpush3.bf16.msra.mxu0 %v16460_v47  ;;  %14164 = vmatprep.mubr.f32.mxu0 %v20583_v6  ;;  %v20677_v32 = vpop.f32.mrb[232].mxu1  ;;  %v16484_v43 = vpack.c.bf16 %v10683_v45, %v10682_v38  ;;  %v10697_v47 = vld [vmem:[%s23679_s3 + $0x808] sm:$0xff] }
 0x60d   :  { %16465 = vmatprep.subr.bf16.mxu0 %v16464_v4  ;;  %v20679_v18 = vpop.f32.mrb[233].mxu1 }
 0x60f   :  { %14165 = vmatmul.mubr.f32.gmra.mrb[40].mxu0 %v20581_v61  ;;  %v10684_v61 = vld [vmem:[%s23679_s3 + $0x7a0] sm:$0xff] }
 0x610   :  { %16467 = vmatpush3.bf16.msra.mxu0 %v16464_v4  ;;  %14167 = vmatprep.mubr.f32.mxu0 %v20595_v9  ;;  %v20689_v28 = vpop.f32.mrb[234].mxu1  ;;  %v16488_v44 = vpack.c.bf16 %v10685_v10, %v10684_v61  ;;  %v10699_v4 = vld [vmem:[%s23679_s3 + $0x818] sm:$0xff] }
 0x611   :  { %16469 = vmatprep.subr.bf16.mxu0 %v16468_v16  ;;  %v20691_v36 = vpop.f32.mrb[235].mxu1 }
 0x613   :  { %14168 = vmatmul.mubr.f32.gmra.mrb[42].mxu0 %v20593_v39  ;;  %v10686_v39 = vld [vmem:[%s23679_s3 + $0x7b0] sm:$0xff] }
 0x614   :  { %16471 = vmatpush3.bf16.msra.mxu0 %v16468_v16  ;;  %14170 = vmatprep.mubr.f32.mxu0 %v20607_v19  ;;  %v20701_v41 = vpop.f32.mrb[236].mxu1  ;;  %v16492_v46 = vpack.c.bf16 %v10687_v51, %v10686_v39  ;;  %v10701_v16 = vld [vmem:[%s23679_s3 + $0x828] sm:$0xff] }
 0x615   :  { %16473 = vmatprep.subr.bf16.mxu0 %v16472_v49  ;;  %v20703_v14 = vpop.f32.mrb[237].mxu1 }
 0x617   :  { %14171 = vmatmul.mubr.f32.gmra.mrb[44].mxu0 %v20605_v52  ;;  %v10688_v52 = vld [vmem:[%s23679_s3 + $0x7c0] sm:$0xff] }
 0x618   :  { %16475 = vmatpush3.bf16.msra.mxu0 %v16472_v49  ;;  %14173 = vmatprep.mubr.f32.mxu0 %v20619_v7  ;;  %v20713_v37 = vpop.f32.mrb[238].mxu1  ;;  %v16496_v60 = vpack.c.bf16 %v10689_v53, %v10688_v52  ;;  %v10703_v49 = vld [vmem:[%s23679_s3 + $0x838] sm:$0xff] }
 0x619   :  { %16477 = vmatprep.subr.bf16.mxu0 %v16476_v57  ;;  %v20715_v40 = vpop.f32.mrb[239].mxu1 }
 0x61b   :  { %14174 = vmatmul.mubr.f32.gmra.mrb[46].mxu0 %v20617_v26  ;;  %v10690_v26 = vld [vmem:[%s23679_s3 + $0x7d0] sm:$0xff] }
 0x61c   :  { %16479 = vmatpush3.bf16.msra.mxu0 %v16476_v57  ;;  %14208 = vmatprep.mubr.f32.mxu0 %v20631_v59  ;;  %v20725_v0 = vpop.f32.mrb[240].mxu1  ;;  %v16500_v54 = vpack.c.bf16 %v10691_v5, %v10690_v26  ;;  %v10705_v57 = vld [vmem:[%s23679_s3 + $0x848] sm:$0xff] }
 0x61d   :  { %16481 = vmatprep.subr.bf16.mxu0 %v16480_v1  ;;  %v20727_v63 = vpop.f32.mrb[241].mxu1 }
 0x61f   :  { %14209 = vmatmul.mubr.f32.vlgmr.msra.gmra.mrb[32].mxu0 %v20629_v55  ;;  %v10692_v55 = vld [vmem:[%s23679_s3 + $0x7e0] sm:$0xff] }
 0x620   :  { %16483 = vmatpush3.bf16.msra.mxu0 %v16480_v1  ;;  %14211 = vmatprep.mubr.f32.mxu0 %v20643_v30  ;;  %v20737_v6 = vpop.f32.mrb[242].mxu1  ;;  %v16504_v17 = vpack.c.bf16 %v10693_v58, %v10692_v55  ;;  %v10707_v1 = vld [vmem:[%s23679_s3 + $0x858] sm:$0xff] }
 0x621   :  { %16485 = vmatprep.subr.bf16.mxu0 %v16484_v43  ;;  %v20739_v35 = vpop.f32.mrb[243].mxu1 }
 0x623   :  { %14212 = vmatmul.mubr.f32.gmra.mrb[34].mxu0 %v20641_v8  ;;  %v10694_v8 = vld [vmem:[%s23679_s3 + $0x7f0] sm:$0xff] }
 0x624   :  { %16487 = vmatpush3.bf16.msra.mxu0 %v16484_v43  ;;  %14214 = vmatprep.mubr.f32.mxu0 %v20655_v25  ;;  %v20749_v9 = vpop.f32.mrb[244].mxu1  ;;  %v16508_v15 = vpack.c.bf16 %v10695_v27, %v10694_v8  ;;  %v10709_v43 = vld [vmem:[%s23679_s3 + $0x868] sm:$0xff] }
 0x625   :  { %16489 = vmatprep.subr.bf16.mxu0 %v16488_v44  ;;  %v20751_v48 = vpop.f32.mrb[245].mxu1 }
 0x627   :  { %14215 = vmatmul.mubr.f32.gmra.mrb[36].mxu0 %v20653_v34  ;;  %v10696_v34 = vld [vmem:[%s23679_s3 + $0x800] sm:$0xff] }
 0x628   :  { %16491 = vmatpush3.bf16.msra.mxu0 %v16488_v44  ;;  %14217 = vmatprep.mubr.f32.mxu0 %v20667_v24  ;;  %v20761_v19 = vpop.f32.mrb[246].mxu1  ;;  %v16512_v31 = vpack.c.bf16 %v10697_v47, %v10696_v34  ;;  %v10711_v44 = vld [vmem:[%s23679_s3 + $0x878] sm:$0xff] }
 0x629   :  { %16493 = vmatprep.subr.bf16.mxu0 %v16492_v46  ;;  %v20763_v12 = vpop.f32.mrb[247].mxu1 }
 0x62b   :  { %14218 = vmatmul.mubr.f32.gmra.mrb[38].mxu0 %v20665_v20  ;;  %v10698_v20 = vld [vmem:[%s23679_s3 + $0x810] sm:$0xff] }
 0x62c   :  { %16495 = vmatpush3.bf16.msra.mxu0 %v16492_v46  ;;  %14220 = vmatprep.mubr.f32.mxu0 %v20679_v18  ;;  %v20773_v7 = vpop.f32.mrb[248].mxu1  ;;  %v16516_v13 = vpack.c.bf16 %v10699_v4, %v10698_v20  ;;  %v10713_v46 = vld [vmem:[%s23679_s3 + $0x888] sm:$0xff] }
 0x62d   :  { %16497 = vmatprep.subr.bf16.mxu0 %v16496_v60  ;;  %v20775_v22 = vpop.f32.mrb[249].mxu1 }
 0x62f   :  { %14221 = vmatmul.mubr.f32.gmra.mrb[40].mxu0 %v20677_v32  ;;  %v10700_v32 = vld [vmem:[%s23679_s3 + $0x820] sm:$0xff] }
 0x630   :  { %16499 = vmatpush3.bf16.msra.mxu0 %v16496_v60  ;;  %14223 = vmatprep.mubr.f32.mxu0 %v20691_v36  ;;  %v20785_v59 = vpop.f32.mrb[250].mxu1  ;;  %v16520_v23 = vpack.c.bf16 %v10701_v16, %v10700_v32  ;;  %v10715_v60 = vld [vmem:[%s23679_s3 + $0x898] sm:$0xff] }
 0x631   :  { %16501 = vmatprep.subr.bf16.mxu0 %v16500_v54  ;;  %v20787_v56 = vpop.f32.mrb[251].mxu1 }
 0x633   :  { %14224 = vmatmul.mubr.f32.gmra.mrb[42].mxu0 %v20689_v28  ;;  %v10702_v28 = vld [vmem:[%s23679_s3 + $0x830] sm:$0xff] }
 0x634   :  { %16503 = vmatpush3.bf16.msra.mxu0 %v16500_v54  ;;  %14226 = vmatprep.mubr.f32.mxu0 %v20703_v14  ;;  %v20797_v30 = vpop.f32.mrb[252].mxu1  ;;  %v16524_v11 = vpack.c.bf16 %v10703_v49, %v10702_v28  ;;  %v10717_v54 = vld [vmem:[%s23679_s3 + $0x8a8] sm:$0xff] }
 0x635   :  { %16505 = vmatprep.subr.bf16.mxu0 %v16504_v17  ;;  %v20799_v2 = vpop.f32.mrb[253].mxu1 }
 0x637   :  { %14227 = vmatmul.mubr.f32.gmra.mrb[44].mxu0 %v20701_v41  ;;  %v10704_v41 = vld [vmem:[%s23679_s3 + $0x840] sm:$0xff] }
 0x638   :  { %16507 = vmatpush3.bf16.msra.mxu0 %v16504_v17  ;;  %14229 = vmatprep.mubr.f32.mxu0 %v20715_v40  ;;  %v20809_v25 = vpop.f32.mrb[254].mxu1  ;;  %v16528_v62 = vpack.c.bf16 %v10705_v57, %v10704_v41  ;;  %v10719_v17 = vld [vmem:[%s23679_s3 + $0x8b8] sm:$0xff]  ;;  %v17909_v41 = vld [vmem:[%s23680_s4] sm:$0xff] }
 0x639   :  { %16509 = vmatprep.subr.bf16.mxu0 %v16508_v15  ;;  %v20811_v3 = vpop.f32.mrb[255].mxu1 }
 0x63b   :  { %14230 = vmatmul.mubr.f32.gmra.mrb[46].mxu0 %v20713_v37  ;;  %v10706_v37 = vld [vmem:[%s23679_s3 + $0x850] sm:$0xff] }
 0x63c   :  { %16511 = vmatpush3.bf16.msra.mxu0 %v16508_v15  ;;  %14264 = vmatprep.mubr.f32.mxu0 %v20727_v63  ;;  %v20821_v24 = vpop.f32.mrb[0].mxu1  ;;  %v16532_v38 = vpack.c.bf16 %v10707_v1, %v10706_v37  ;;  %v10721_v15 = vld [vmem:[%s23679_s3 + $0x8c8] sm:$0xff] }
 0x63d   :  { %16513 = vmatprep.subr.bf16.mxu0 %v16512_v31  ;;  %v20823_v29 = vpop.f32.mrb[1].mxu1 }
 0x63f   :  { %14265 = vmatmul.mubr.f32.vlgmr.msra.gmra.mrb[32].mxu0 %v20725_v0  ;;  %v10708_v0 = vld [vmem:[%s23679_s3 + $0x860] sm:$0xff] }
 0x640   :  { %16515 = vmatpush3.bf16.msra.mxu0 %v16512_v31  ;;  %14267 = vmatprep.mubr.f32.mxu0 %v20739_v35  ;;  %v20833_v18 = vpop.f32.mrb[2].mxu1  ;;  %v16536_v61 = vpack.c.bf16 %v10709_v43, %v10708_v0  ;;  %v10723_v31 = vld [vmem:[%s23679_s3 + $0x8d8] sm:$0xff] }
 0x641   :  { %16517 = vmatprep.subr.bf16.mxu0 %v16516_v13  ;;  %v20835_v21 = vpop.f32.mrb[3].mxu1 }
 0x643   :  { %14268 = vmatmul.mubr.f32.gmra.mrb[34].mxu0 %v20737_v6  ;;  %v10710_v6 = vld [vmem:[%s23679_s3 + $0x870] sm:$0xff] }
 0x644   :  { %16519 = vmatpush3.bf16.msra.mxu0 %v16516_v13  ;;  %14270 = vmatprep.mubr.f32.mxu0 %v20751_v48  ;;  %v20845_v36 = vpop.f32.mrb[4].mxu1  ;;  %v16540_v39 = vpack.c.bf16 %v10711_v44, %v10710_v6  ;;  %v10725_v13 = vld [vmem:[%s23679_s3 + $0x8e8] sm:$0xff] }
 0x645   :  { %16521 = vmatprep.subr.bf16.mxu0 %v16520_v23  ;;  %v20847_v50 = vpop.f32.mrb[5].mxu1 }
 0x647   :  { %14271 = vmatmul.mubr.f32.gmra.mrb[36].mxu0 %v20749_v9  ;;  %v10712_v9 = vld [vmem:[%s23679_s3 + $0x880] sm:$0xff] }
 0x648   :  { %16523 = vmatpush3.bf16.msra.mxu0 %v16520_v23  ;;  %14273 = vmatprep.mubr.f32.mxu0 %v20763_v12  ;;  %v20857_v14 = vpop.f32.mrb[6].mxu1  ;;  %v16544_v52 = vpack.c.bf16 %v10713_v46, %v10712_v9  ;;  %v10727_v23 = vld [vmem:[%s23679_s3 + $0x8f8] sm:$0xff] }
 0x649   :  { %16525 = vmatprep.subr.bf16.mxu0 %v16524_v11  ;;  %v20859_v33 = vpop.f32.mrb[7].mxu1 }
 0x64b   :  { %14274 = vmatmul.mubr.f32.gmra.mrb[38].mxu0 %v20761_v19  ;;  %v10714_v19 = vld [vmem:[%s23679_s3 + $0x890] sm:$0xff] }
 0x64c   :  { %16527 = vmatpush3.bf16.msra.mxu0 %v16524_v11  ;;  %14276 = vmatprep.mubr.f32.mxu0 %v20775_v22  ;;  %v20869_v40 = vpop.f32.mrb[8].mxu1  ;;  %v16548_v26 = vpack.c.bf16 %v10715_v60, %v10714_v19 }
 0x64d   :  { %16529 = vmatprep.subr.bf16.mxu0 %v16528_v62  ;;  %v20871_v45 = vpop.f32.mrb[9].mxu1 }
 0x64f   :  { %14277 = vmatmul.mubr.f32.gmra.mrb[40].mxu0 %v20773_v7  ;;  %v10716_v7 = vld [vmem:[%s23679_s3 + $0x8a0] sm:$0xff] }
 0x650   :  { %16531 = vmatpush3.bf16.msra.mxu0 %v16528_v62  ;;  %14279 = vmatprep.mubr.f32.mxu0 %v20787_v56  ;;  %v20881_v63 = vpop.f32.mrb[10].mxu1  ;;  %v16552_v55 = vpack.c.bf16 %v10717_v54, %v10716_v7 }
 0x651   :  { %16533 = vmatprep.subr.bf16.mxu0 %v16532_v38  ;;  %v20883_v10 = vpop.f32.mrb[11].mxu1 }
 0x653   :  { %14280 = vmatmul.mubr.f32.gmra.mrb[42].mxu0 %v20785_v59  ;;  %v10718_v59 = vld [vmem:[%s23679_s3 + $0x8b0] sm:$0xff] }
 0x654   :  { %16535 = vmatpush3.bf16.msra.mxu0 %v16532_v38  ;;  %14282 = vmatprep.mubr.f32.mxu0 %v20799_v2  ;;  %v20893_v35 = vpop.f32.mrb[12].mxu1  ;;  %v16556_v8 = vpack.c.bf16 %v10719_v17, %v10718_v59 }
 0x655   :  { %16537 = vmatprep.subr.bf16.mxu0 %v16536_v61  ;;  %v20895_v51 = vpop.f32.mrb[13].mxu1 }
 0x657   :  { %14283 = vmatmul.mubr.f32.gmra.mrb[44].mxu0 %v20797_v30  ;;  %v10720_v30 = vld [vmem:[%s23679_s3 + $0x8c0] sm:$0xff] }
 0x658   :  { %16539 = vmatpush3.bf16.msra.mxu0 %v16536_v61  ;;  %14285 = vmatprep.mubr.f32.mxu0 %v20811_v3  ;;  %v20905_v48 = vpop.f32.mrb[14].mxu1  ;;  %v16560_v34 = vpack.c.bf16 %v10721_v15, %v10720_v30 }
 0x659   :  { %16541 = vmatprep.subr.bf16.mxu0 %v16540_v39  ;;  %v20907_v53 = vpop.f32.mrb[15].mxu1 }
 0x65b   :  { %14286 = vmatmul.mubr.f32.gmra.mrb[46].mxu0 %v20809_v25  ;;  %v10722_v25 = vld [vmem:[%s23679_s3 + $0x8d0] sm:$0xff] }
 0x65c   :  { %16543 = vmatpush3.bf16.msra.mxu0 %v16540_v39  ;;  %14320 = vmatprep.mubr.f32.mxu0 %v20823_v29  ;;  %v20917_v12 = vpop.f32.mrb[16].mxu1  ;;  %v16564_v20 = vpack.c.bf16 %v10723_v31, %v10722_v25 }
 0x65d   :  { %16545 = vmatprep.subr.bf16.mxu0 %v16544_v52  ;;  %v3728_v5 = vpop.f32.mrb[17].mxu1 }
 0x65f   :  { %14321 = vmatmul.mubr.f32.vlgmr.msra.gmra.mrb[32].mxu0 %v20821_v24  ;;  %v10724_v24 = vld [vmem:[%s23679_s3 + $0x8e0] sm:$0xff] }
 0x660   :  { %16547 = vmatpush3.bf16.msra.mxu0 %v16544_v52  ;;  %14323 = vmatprep.mubr.f32.mxu0 %v20835_v21  ;;  %v13877_v22 = vpop.f32.mrb[18].mxu1  ;;  %v16568_v32 = vpack.c.bf16 %v10725_v13, %v10724_v24 }
 0x661   :  { %16549 = vmatprep.subr.bf16.mxu0 %v16548_v26  ;;  %v3738_v58 = vpop.f32.mrb[19].mxu1 }
 0x663   :  { %14324 = vmatmul.mubr.f32.gmra.mrb[34].mxu0 %v20833_v18  ;;  %v10726_v18 = vld [vmem:[%s23679_s3 + $0x8f0] sm:$0xff] }
 0x664   :  { %16551 = vmatpush3.bf16.msra.mxu0 %v16548_v26  ;;  %14326 = vmatprep.mubr.f32.mxu0 %v20847_v50  ;;  %v13880_v56 = vpop.f32.mrb[20].mxu1  ;;  %v16572_v28 = vpack.c.bf16 %v10727_v23, %v10726_v18  ;;  %v5379_v50 = vsub.s32 2, %v18319_v42 }
 0x665   :  { %16553 = vmatprep.subr.bf16.mxu0 %v16552_v55  ;;  %v3748_v27 = vpop.f32.mrb[21].mxu1 }
 0x666   :  { %v20975_v57 = vrot.slane %v17909_v41, %v5379_v50 }
 0x667   :  { %14327 = vmatmul.mubr.f32.gmra.mrb[36].mxu0 %v20845_v36 }
 0x668   :  { %16555 = vmatpush3.bf16.msra.mxu0 %v16552_v55  ;;  %14329 = vmatprep.mubr.f32.mxu0 %v20859_v33  ;;  %v13883_v2 = vpop.f32.mrb[22].mxu1 }
 0x669   :  { %16557 = vmatprep.subr.bf16.mxu0 %v16556_v8  ;;  %v3758_v47 = vpop.f32.mrb[23].mxu1 }
 0x66b   :  { %14330 = vmatmul.mubr.f32.gmra.mrb[38].mxu0 %v20857_v14 }
 0x66c   :  { %16559 = vmatpush3.bf16.msra.mxu0 %v16556_v8  ;;  %14332 = vmatprep.mubr.f32.mxu0 %v20871_v45  ;;  %v13886_v3 = vpop.f32.mrb[24].mxu1 }
 0x66d   :  { %16561 = vmatprep.subr.bf16.mxu0 %v16560_v34  ;;  %v3768_v4 = vpop.f32.mrb[25].mxu1 }
 0x66f   :  { %14333 = vmatmul.mubr.f32.gmra.mrb[40].mxu0 %v20869_v40 }
 0x670   :  { %16563 = vmatpush3.bf16.msra.mxu0 %v16560_v34  ;;  %14335 = vmatprep.mubr.f32.mxu0 %v20883_v10  ;;  %v13889_v29 = vpop.f32.mrb[26].mxu1 }
 0x671   :  { %16565 = vmatprep.subr.bf16.mxu0 %v16564_v20  ;;  %v3778_v16 = vpop.f32.mrb[27].mxu1 }
 0x673   :  { %14336 = vmatmul.mubr.f32.gmra.mrb[42].mxu0 %v20881_v63 }
 0x674   :  { %16567 = vmatpush3.bf16.msra.mxu0 %v16564_v20  ;;  %14338 = vmatprep.mubr.f32.mxu0 %v20895_v51  ;;  %v13892_v21 = vpop.f32.mrb[28].mxu1 }
 0x675   :  { %16569 = vmatprep.subr.bf16.mxu0 %v16568_v32  ;;  %v3788_v49 = vpop.f32.mrb[29].mxu1 }
 0x677   :  { %14339 = vmatmul.mubr.f32.gmra.mrb[44].mxu0 %v20893_v35 }
 0x678   :  { %16571 = vmatpush3.bf16.msra.mxu0 %v16568_v32  ;;  %14341 = vmatprep.mubr.f32.mxu0 %v20907_v53  ;;  %v13895_v36 = vpop.f32.mrb[30].mxu1 }
 0x679   :  { %16573 = vmatprep.subr.bf16.mxu0 %v16572_v28  ;;  %v3798_v11 = vpop.f32.mrb[31].mxu1 }
 0x67b   :  { %14342 = vmatmul.mubr.f32.gmra.mrb[46].mxu0 %v20905_v48 }
 0x67c   :  { %16575 = vmatpush3.bf16.msra.mxu0 %v16572_v28  ;;  %14376 = vmatprep.mubr.f32.mxu0 %v3728_v5 }
 0x67f   :  { %14377 = vmatmul.mubr.f32.vlgmr.msra.gmra.mrb[32].mxu0 %v20917_v12 }
 0x680   :  { %14379 = vmatprep.mubr.f32.mxu0 %v3738_v58 }
 0x683   :  { %14380 = vmatmul.mubr.f32.gmra.mrb[34].mxu0 %v13877_v22 }
 0x684   :  { %14382 = vmatprep.mubr.f32.mxu0 %v3748_v27 }
 0x687   :  { %14383 = vmatmul.mubr.f32.gmra.mrb[36].mxu0 %v13880_v56 }
 0x688   :  { %14385 = vmatprep.mubr.f32.mxu0 %v3758_v47 }
 0x68b   :  { %14386 = vmatmul.mubr.f32.gmra.mrb[38].mxu0 %v13883_v2 }
 0x68c   :  { %14388 = vmatprep.mubr.f32.mxu0 %v3768_v4 }
 0x68f   :  { %14389 = vmatmul.mubr.f32.gmra.mrb[40].mxu0 %v13886_v3 }
 0x690   :  { %14391 = vmatprep.mubr.f32.mxu0 %v3778_v16 }
 0x693   :  { %14392 = vmatmul.mubr.f32.gmra.mrb[42].mxu0 %v13889_v29 }
 0x694   :  { %14394 = vmatprep.mubr.f32.mxu0 %v3788_v49 }
 0x697   :  { %14395 = vmatmul.mubr.f32.gmra.mrb[44].mxu0 %v13892_v21 }
 0x698   :  { %14397 = vmatprep.mubr.f32.mxu0 %v3798_v11 }
 0x69b   :  { %14398 = vmatmul.mubr.f32.gmra.mrb[46].mxu0 %v13895_v36 }
 0x752   :  { %v14378_v14 = vpop.f32.mrb[32].mxu0 }
 0x753   :  { %v20978_v62 = vadd.f32 %v14378_v14, %v20975_v57  ;;  %v5282_v33 = vpop.f32.mrb[33].mxu0 }
 0x754   :  { %v20981_v37 = vadd.f32 %v20975_v57, %v5282_v33 }
 0x755   :  { %v5424_v1 = vmul.f32 %v20978_v62, %v20978_v62 }
 0x756   :  { %v5397_v40 = vadd.f32 %v20978_v62, %v20981_v37  ;;  %v5423_v38 = vmul.f32 %v20981_v37, %v20981_v37  ;;  %v14381_v45 = vpop.f32.mrb[34].mxu0 }
 0x757   :  { %v5292_v0 = vpop.f32.mrb[35].mxu0  ;;  %v20990_v63 = vadd.f32 %v14381_v45, %v20975_v57 }
 0x758   :  { %v5439_v43 = vadd.f32 %v5424_v1, %v5423_v38  ;;  %v20993_v61 = vadd.f32 %v20975_v57, %v5292_v0 }
 0x759   :  { %v5426_v51 = vmul.f32 %v20990_v63, %v20990_v63 }
 0x75a   :  { %v5398_v10 = vadd.f32 %v5397_v40, %v20993_v61  ;;  %v5425_v6 = vmul.f32 %v20993_v61, %v20993_v61  ;;  %v14384_v44 = vpop.f32.mrb[36].mxu0 }
 0x75b   :  { %v20999_v35 = vadd.f32 %v14384_v44, %v20975_v57  ;;  %v5302_v39 = vpop.f32.mrb[37].mxu0 }
 0x75c   :  { %v5440_v9 = vadd.f32 %v5439_v43, %v5425_v6  ;;  %v21004_v46 = vadd.f32 %v20975_v57, %v5302_v39  ;;  %v5399_v48 = vadd.f32 %v5398_v10, %v20990_v63 }
 0x75d   :  { %v5428_v12 = vmul.f32 %v20999_v35, %v20999_v35 }
 0x75e   :  { %v5400_v52 = vadd.f32 %v5399_v48, %v21004_v46  ;;  %v5427_v53 = vmul.f32 %v21004_v46, %v21004_v46  ;;  %v5441_v19 = vadd.f32 %v5440_v9, %v5426_v51  ;;  %v14387_v60 = vpop.f32.mrb[38].mxu0 }
 0x75f   :  { %v5312_v26 = vpop.f32.mrb[39].mxu0  ;;  %v21013_v7 = vadd.f32 %v14387_v60, %v20975_v57 }
 0x760   :  { %v5442_v5 = vadd.f32 %v5441_v19, %v5427_v53  ;;  %v21016_v54 = vadd.f32 %v20975_v57, %v5312_v26  ;;  %v5401_v22 = vadd.f32 %v5400_v52, %v20999_v35 }
 0x761   :  { %v5430_v27 = vmul.f32 %v21013_v7, %v21013_v7 }
 0x762   :  { %v5402_v55 = vadd.f32 %v5401_v22, %v21016_v54  ;;  %v5429_v58 = vmul.f32 %v21016_v54, %v21016_v54  ;;  %v5443_v59 = vadd.f32 %v5442_v5, %v5428_v12  ;;  %v14390_v17 = vpop.f32.mrb[40].mxu0 }
 0x763   :  { %v21023_v56 = vadd.f32 %v14390_v17, %v20975_v57  ;;  %v5322_v8 = vpop.f32.mrb[41].mxu0 }
 0x764   :  { %v5403_v30 = vadd.f32 %v5402_v55, %v21013_v7  ;;  %v5444_v15 = vadd.f32 %v5443_v59, %v5429_v58  ;;  %v21029_v2 = vadd.f32 %v20975_v57, %v5322_v8 }
 0x765   :  { %v5432_v34 = vmul.f32 %v21023_v56, %v21023_v56 }
 0x766   :  { %v5404_v47 = vrot.slane %v5403_v30, 4  ;;  %v5445_v25 = vadd.f32 %v5444_v15, %v5430_v27  ;;  %v5410_v31 = vadd.f32 %v21023_v56, %v21029_v2  ;;  %v5431_v3 = vmul.f32 %v21029_v2, %v21029_v2  ;;  %v14393_v20 = vpop.f32.mrb[42].mxu0 }
 0x767   :  { %v21038_v4 = vadd.f32 %v14393_v20, %v20975_v57  ;;  %v5332_v24 = vpop.f32.mrb[43].mxu0 }
 0x768   :  { %v5405_v13 = vadd.f32 %v5404_v47, %v5403_v30  ;;  %v5446_v29 = vrot.slane %v5445_v25, 4  ;;  %v5452_v32 = vadd.f32 %v5432_v34, %v5431_v3  ;;  %v21041_v16 = vadd.f32 %v20975_v57, %v5332_v24 }
 0x769   :  { %v5434_v36 = vmul.f32 %v21038_v4, %v21038_v4 }
 0x76a   :  { %v5406_v18 = vrot.slane %v5405_v13, 2  ;;  %v5447_v23 = vadd.f32 %v5446_v29, %v5445_v25  ;;  %v5411_v21 = vadd.f32 %v5410_v31, %v21041_v16  ;;  %v5433_v28 = vmul.f32 %v21041_v16, %v21041_v16  ;;  %v14396_v49 = vpop.f32.mrb[44].mxu0 }
 0x76b   :  { %v21049_v11 = vadd.f32 %v14396_v49, %v20975_v57  ;;  %v5342_v50 = vpop.f32.mrb[45].mxu0 }
 0x76c   :  { %v5407_v41 = vadd.f32 %v5406_v18, %v5405_v13  ;;  %v5448_v14 = vrot.slane %v5447_v23, 2  ;;  %v5453_v33 = vadd.f32 %v5452_v32, %v5433_v28  ;;  %v21052_v1 = vadd.f32 %v20975_v57, %v5342_v50 }
 0x76d   :  { %v5412_v40 = vadd.f32 %v5411_v21, %v21038_v4  ;;  %v5436_v6 = vmul.f32 %v21049_v11, %v21049_v11 }
 0x76e   :  { %v5408_v38 = vrot.slane %v5407_v41, 1  ;;  %v5449_v45 = vadd.f32 %v5448_v14, %v5447_v23  ;;  %v5435_v0 = vmul.f32 %v21052_v1, %v21052_v1  ;;  %v5454_v43 = vadd.f32 %v5453_v33, %v5434_v36  ;;  %v14399_v10 = vpop.f32.mrb[46].mxu0 }
 0x76f   :  { %v5413_v44 = vadd.f32 %v5412_v40, %v21052_v1  ;;  %v21061_v39 = vadd.f32 %v14399_v10, %v20975_v57  ;;  %v5352_v51 = vpop.f32.mrb[47].mxu0 }
 0x770   :  { %v5409_v9 = vadd.f32 %v5408_v38, %v5407_v41  ;;  %v5450_v48 = vrot.slane %v5449_v45, 1  ;;  %v5455_v52 = vadd.f32 %v5454_v43, %v5435_v0  ;;  %v21064_v53 = vadd.f32 %v20975_v57, %v5352_v51 }
 0x771   :  { %v5414_v19 = vadd.f32 %v5413_v44, %v21049_v11  ;;  %v5438_v22 = vmul.f32 %v21061_v39, %v21061_v39 }
 0x772   :  { %v5451_v60 = vadd.f32 %v5450_v48, %v5449_v45  ;;  %v5465_v12 = vmul.f32 0.015625, %v5409_v9  ;;  %v5437_v26 = vmul.f32 %v21064_v53, %v21064_v53  ;;  %v5456_v5 = vadd.f32 %v5455_v52, %v5436_v6 }
 0x773   :  { %v5415_v55 = vadd.f32 %v5414_v19, %v21064_v53 }
 0x774   :  { %v5467_v58 = vmul.f32 0.015625, %v5451_v60  ;;  %v5469_v59 = vmul.f32 %v5465_v12, %v5465_v12  ;;  %v5479_v17 = vsub.f32 %v21016_v54, %v5465_v12  ;;  %v5457_v8 = vadd.f32 %v5456_v5, %v5437_v26 }
 0x775   :  { %v5416_v57 = vadd.f32 %v5415_v55, %v21061_v39  ;;  %v5473_v27 = vsub.f32 %v20981_v37, %v5465_v12  ;;  %v5474_v30 = vsub.f32 %v20978_v62, %v5465_v12  ;;  %v5475_v15 = vsub.f32 %v20993_v61, %v5465_v12 }
 0x776   :  { %v5471_v34 = vsub.f32 %v5467_v58, %v5469_v59  ;;  %v5458_v47 = vadd.f32 %v5457_v8, %v5438_v22  ;;  %v5476_v25 = vsub.f32 %v20990_v63, %v5465_v12  ;;  %v5477_v31 = vsub.f32 %v21004_v46, %v5465_v12 }
 0x777   :  { %v5417_v3 = vrot.slane %v5416_v57, 4  ;;  %v5478_v20 = vsub.f32 %v20999_v35, %v5465_v12  ;;  %v5480_v54 = vsub.f32 %v21013_v7, %v5465_v12 }
 0x778   :  { %v5489_v24 = vadd.f32 1e-05, %v5471_v34  ;;  %v5459_v13 = vrot.slane %v5458_v47, 4 }
 0x779   :  { %v5418_v29 = vadd.f32 %v5417_v3, %v5416_v57 }
 0x77a   :  { %17755 = vrsqrt.f32 %v5489_v24  ;;  %v5460_v37 = vadd.f32 %v5459_v13, %v5458_v47 }
 0x77b   :  { %v5419_v32 = vrot.slane %v5418_v29, 2 }
 0x77c   :  { %v5461_v62 = vrot.slane %v5460_v37, 2 }
 0x77d   :  { %v5420_v18 = vadd.f32 %v5419_v32, %v5418_v29 }
 0x77e   :  { %v5462_v61 = vadd.f32 %v5461_v62, %v5460_v37 }
 0x77f   :  { %v5421_v23 = vrot.slane %v5420_v18, 1 }
 0x780   :  { %v5463_v21 = vrot.slane %v5462_v61, 1 }
 0x781   :  { %v5422_v28 = vadd.f32 %v5421_v23, %v5420_v18 }
 0x782   :  { %v5464_v63 = vadd.f32 %v5463_v21, %v5462_v61 }
 0x783   :  { %v5466_v49 = vmul.f32 0.015625, %v5422_v28 }
 0x784   :  { %v17756_v46 = vpop.eup %17755  ;;  %v5468_v36 = vmul.f32 0.015625, %v5464_v63 }
 0x785   :  { %v5499_v50 = vmul.f32 %v17756_v46, %v5479_v17  ;;  %v5470_v35 = vmul.f32 %v5466_v49, %v5466_v49  ;;  %v5487_v7 = vsub.f32 %v21064_v53, %v5466_v49  ;;  %v5493_v41 = vmul.f32 %v17756_v46, %v5473_v27 }
 0x786   :  { %v5494_v14 = vmul.f32 %v17756_v46, %v5474_v30  ;;  %v5495_v33 = vmul.f32 %v17756_v46, %v5475_v15  ;;  %v5496_v40 = vmul.f32 %v17756_v46, %v5476_v25  ;;  %v5497_v38 = vmul.f32 %v17756_v46, %v5477_v31 }
 0x787   :  { %v5472_v45 = vsub.f32 %v5468_v36, %v5470_v35  ;;  %v5509_v0 = vmul.f32 0.01, %v5493_v41  ;;  %v5498_v43 = vmul.f32 %v17756_v46, %v5478_v20  ;;  %v5500_v10 = vmul.f32 %v17756_v46, %v5480_v54 }
 0x788   :  { %v5510_v6 = vmul.f32 0.01, %v5494_v14  ;;  %v5511_v44 = vmul.f32 0.01, %v5495_v33  ;;  %v5512_v51 = vmul.f32 0.01, %v5496_v40  ;;  %v5481_v9 = vsub.f32 %v21029_v2, %v5466_v49 }
 0x789   :  { %v5490_v48 = vadd.f32 1e-05, %v5472_v45  ;;  %v5525_v52 = vmax.f32 %v5493_v41, %v5509_v0  ;;  %v5513_v19 = vmul.f32 0.01, %v5497_v38  ;;  %v5514_v60 = vmul.f32 0.01, %v5498_v43 }
 0x78a   :  { %v5526_v12 = vmax.f32 %v5494_v14, %v5510_v6  ;;  %v5527_v53 = vmax.f32 %v5495_v33, %v5511_v44  ;;  %v5528_v26 = vmax.f32 %v5496_v40, %v5512_v51  ;;  %v5515_v5 = vmul.f32 0.01, %v5499_v50  ;;  %v17910_v33 = vld [vmem:[%s23678_s2 + $0x8] sm:$0xff]  ;;  %v17911_v40 = vld [vmem:[%s23678_s2 + $0x10] sm:$0xff]  ;;  %v17913_v45 = vld [vmem:[%s23678_s2 + $0x20] sm:$0xff] }
 0x78b   :  { %17757 = vrsqrt.f32 %v5490_v48  ;;  %v5529_v22 = vmax.f32 %v5497_v38, %v5513_v19  ;;  %v5530_v55 = vmax.f32 %v5498_v43, %v5514_v60  ;;  %v5516_v58 = vmul.f32 0.01, %v5500_v10  ;;  %v17912_v38 = vld [vmem:[%s23678_s2 + $0x18] sm:$0xff]  ;;  %v17914_v0 = vld [vmem:[%s23678_s2 + $0x28] sm:$0xff]  ;;  %v17915_v43 = vld [vmem:[%s23678_s2 + $0x30] sm:$0xff] }
 0x78c   :  { %v16576_v59 = vpack.c.bf16 %v5526_v12, %v5525_v52  ;;  %v16580_v17 = vpack.c.bf16 %v5528_v26, %v5527_v53  ;;  %v5531_v8 = vmax.f32 %v5499_v50, %v5515_v5  ;;  %v5482_v57 = vsub.f32 %v21023_v56, %v5466_v49  ;;  %v17917_v6 = vld [vmem:[%s23678_s2 + $0x40] sm:$0xff]  ;;  %v17918_v44 = vld [vmem:[%s23678_s2 + $0x48] sm:$0xff]  ;;  %v17919_v51 = vld [vmem:[%s23678_s2 + $0x50] sm:$0xff] }
 0x78d   :  { %v16584_v27 = vpack.c.bf16 %v5530_v55, %v5529_v22  ;;  %v5532_v30 = vmax.f32 %v5500_v10, %v5516_v58  ;;  %v5483_v2 = vsub.f32 %v21041_v16, %v5466_v49  ;;  %v5484_v15 = vsub.f32 %v21038_v4, %v5466_v49  ;;  %v17916_v10 = vld [vmem:[%s23678_s2 + $0x38] sm:$0xff]  ;;  %v17921_v48 = vld [vmem:[%s23678_s2 + $0x60] sm:$0xff]  ;;  %v17922_v52 = vld [vmem:[%s23678_s2 + $0x68] sm:$0xff] }
 0x78e   :  { %16577 = vmatprep.subr.bf16.mxu1 %v16576_v59  ;;  %v5485_v34 = vsub.f32 %v21052_v1, %v5466_v49  ;;  %v5486_v47 = vsub.f32 %v21049_v11, %v5466_v49  ;;  %v5488_v25 = vsub.f32 %v21061_v39, %v5466_v49  ;;  %v17923_v19 = vld [vmem:[%s23678_s2 + $0x70] sm:$0xff]  ;;  %v17924_v60 = vld [vmem:[%s23678_s2 + $0x78] sm:$0xff]  ;;  %v17925_v12 = vld [vmem:[%s23678_s2 + $0x80] sm:$0xff] }
 0x78f   :  { %16579 = vmatpush3.bf16.msra.mxu1 %v16576_v59  ;;  %v16588_v31 = vpack.c.bf16 %v5532_v30, %v5531_v8  ;;  %v17926_v53 = vld [vmem:[%s23678_s2 + $0x88] sm:$0xff]  ;;  %v17927_v26 = vld [vmem:[%s23678_s2 + $0x90] sm:$0xff]  ;;  %v17928_v5 = vld [vmem:[%s23678_s2 + $0x98] sm:$0xff] }
 0x790   :  { %16581 = vmatprep.subr.bf16.mxu1 %v16580_v17  ;;  %v17929_v22 = vld [vmem:[%s23678_s2 + $0xa0] sm:$0xff]  ;;  %v17930_v55 = vld [vmem:[%s23678_s2 + $0xa8] sm:$0xff]  ;;  %v17931_v58 = vld [vmem:[%s23678_s2 + $0xb0] sm:$0xff] }
 0x791   :  { %v17932_v59 = vld [vmem:[%s23678_s2 + $0xb8] sm:$0xff]  ;;  %v17934_v8 = vld [vmem:[%s23678_s2 + $0xc8] sm:$0xff]  ;;  %v17937_v30 = vld [vmem:[%s23678_s2 + $0xe0] sm:$0xff] }
 0x793   :  { %16583 = vmatpush3.bf16.msra.mxu1 %v16580_v17  ;;  %v17933_v17 = vld [vmem:[%s23678_s2 + $0xc0] sm:$0xff] }
 0x794   :  { %16585 = vmatprep.subr.bf16.mxu1 %v16584_v27 }
 0x795   :  { %v17758_v3 = vpop.eup %17757 }
 0x796   :  { %v5507_v56 = vmul.f32 %v17758_v3, %v5487_v7  ;;  %v5501_v20 = vmul.f32 %v17758_v3, %v5481_v9  ;;  %v5502_v54 = vmul.f32 %v17758_v3, %v5482_v57  ;;  %v5503_v24 = vmul.f32 %v17758_v3, %v5483_v2  ;;  %v17920_v9 = vld [vmem:[%s23678_s2 + $0x58] sm:$0xff]  ;;  %v17935_v57 = vld [vmem:[%s23678_s2 + $0xd0] sm:$0xff]  ;;  %v17938_v2 = vld [vmem:[%s23678_s2 + $0xe8] sm:$0xff] }
 0x797   :  { %16587 = vmatpush3.bf16.msra.mxu1 %v16584_v27  ;;  %v5504_v16 = vmul.f32 %v17758_v3, %v5484_v15  ;;  %v5505_v4 = vmul.f32 %v17758_v3, %v5485_v34  ;;  %v5506_v13 = vmul.f32 %v17758_v3, %v5486_v47  ;;  %v5508_v29 = vmul.f32 %v17758_v3, %v5488_v25  ;;  %v17936_v27 = vld [vmem:[%s23678_s2 + $0xd8] sm:$0xff]  ;;  %v17939_v15 = vld [vmem:[%s23678_s2 + $0xf0] sm:$0xff]  ;;  %v17941_v47 = vld [vmem:[%s23678_s2 + $0x100] sm:$0xff] }
 0x798   :  { %16589 = vmatprep.subr.bf16.mxu1 %v16588_v31  ;;  %v5517_v1 = vmul.f32 0.01, %v5501_v20  ;;  %v5518_v11 = vmul.f32 0.01, %v5502_v54  ;;  %v5519_v37 = vmul.f32 0.01, %v5503_v24 }
 0x799   :  { %v5520_v39 = vmul.f32 0.01, %v5504_v16  ;;  %v5521_v32 = vmul.f32 0.01, %v5505_v4  ;;  %v5522_v62 = vmul.f32 0.01, %v5506_v13 }
 0x79a   :  { %v5533_v18 = vmax.f32 %v5501_v20, %v5517_v1  ;;  %v5534_v61 = vmax.f32 %v5502_v54, %v5518_v11  ;;  %v5535_v23 = vmax.f32 %v5503_v24, %v5519_v37  ;;  %v5523_v21 = vmul.f32 0.01, %v5507_v56  ;;  %v17940_v34 = vld [vmem:[%s23678_s2 + $0xf8] sm:$0xff]  ;;  %v17942_v25 = vld [vmem:[%s23678_s2 + $0x108] sm:$0xff]  ;;  %v17947_v54 = vld [vmem:[%s23678_s2 + $0x130] sm:$0xff] }
 0x79b   :  { %16591 = vmatpush3.bf16.msra.mxu1 %v16588_v31  ;;  %v5536_v28 = vmax.f32 %v5504_v16, %v5520_v39  ;;  %v5537_v63 = vmax.f32 %v5505_v4, %v5521_v32  ;;  %v5538_v49 = vmax.f32 %v5506_v13, %v5522_v62  ;;  %v5524_v46 = vmul.f32 0.01, %v5508_v29  ;;  %v17943_v31 = vld [vmem:[%s23678_s2 + $0x110] sm:$0xff]  ;;  %v17944_v3 = vld [vmem:[%s23678_s2 + $0x118] sm:$0xff]  ;;  %v17946_v20 = vld [vmem:[%s23678_s2 + $0x128] sm:$0xff] }
 0x79c   :  { %v16592_v36 = vpack.c.bf16 %v5534_v61, %v5533_v18  ;;  %v5539_v50 = vmax.f32 %v5507_v56, %v5523_v21  ;;  %v17945_v56 = vld [vmem:[%s23678_s2 + $0x120] sm:$0xff]  ;;  %v17948_v24 = vld [vmem:[%s23678_s2 + $0x138] sm:$0xff]  ;;  %v17950_v4 = vld [vmem:[%s23678_s2 + $0x148] sm:$0xff] }
 0x79d   :  { %v16596_v35 = vpack.c.bf16 %v5536_v28, %v5535_v23  ;;  %v16600_v7 = vpack.c.bf16 %v5538_v49, %v5537_v63  ;;  %v5540_v41 = vmax.f32 %v5508_v29, %v5524_v46  ;;  %v17949_v16 = vld [vmem:[%s23678_s2 + $0x140] sm:$0xff]  ;;  %v17951_v13 = vld [vmem:[%s23678_s2 + $0x150] sm:$0xff]  ;;  %v17952_v29 = vld [vmem:[%s23678_s2 + $0x158] sm:$0xff] }
 0x79e   :  { %16593 = vmatprep.subr.bf16.mxu1 %v16592_v36  ;;  %v10744_v1 = vld [vmem:[%s23679_s3 + $0x980] sm:$0xff]  ;;  %v10745_v11 = vld [vmem:[%s23679_s3 + $0x988] sm:$0xff]  ;;  %v10746_v62 = vld [vmem:[%s23679_s3 + $0x990] sm:$0xff] }
 0x79f   :  { %16595 = vmatpush3.bf16.msra.mxu1 %v16592_v36  ;;  %v16604_v14 = vpack.c.bf16 %v5540_v41, %v5539_v50  ;;  %v17953_v37 = vld [vmem:[%s23678_s2 + $0x160] sm:$0xff]  ;;  %v16608_v39 = vpack.c.bf16 %v10745_v11, %v10744_v1  ;;  %v17954_v32 = vld [vmem:[%s23678_s2 + $0x168] sm:$0xff]  ;;  %v10747_v18 = vld [vmem:[%s23679_s3 + $0x998] sm:$0xff] }
 0x7a0   :  { %16597 = vmatprep.subr.bf16.mxu1 %v16596_v35  ;;  %v17955_v61 = vld [vmem:[%s23678_s2 + $0x170] sm:$0xff]  ;;  %v16612_v23 = vpack.c.bf16 %v10747_v18, %v10746_v62  ;;  %v17956_v21 = vld [vmem:[%s23678_s2 + $0x178] sm:$0xff]  ;;  %v10748_v28 = vld [vmem:[%s23679_s3 + $0x9a0] sm:$0xff] }
 0x7a1   :  { %16609 = vmatprep.subr.bf16.mxu0 %v16608_v39  ;;  %v10749_v63 = vld [vmem:[%s23679_s3 + $0x9a8] sm:$0xff]  ;;  %v17957_v49 = vld [vmem:[%s23678_s2 + $0x180] sm:$0xff]  ;;  %v10750_v50 = vld [vmem:[%s23679_s3 + $0x9b0] sm:$0xff] }
 0x7a2   :  { %16611 = vmatpush3.bf16.msra.mxu0 %v16608_v39  ;;  %v16616_v46 = vpack.c.bf16 %v10749_v63, %v10748_v28  ;;  %v17958_v36 = vld [vmem:[%s23678_s2 + $0x188] sm:$0xff]  ;;  %v17989_v1 = vld [vmem:[%s23678_s2 + $0x280] sm:$0xff]  ;;  %v17992_v39 = vld [vmem:[%s23678_s2 + $0x298] sm:$0xff] }
 0x7a3   :  { %16599 = vmatpush3.bf16.msra.mxu1 %v16596_v35  ;;  %16613 = vmatprep.subr.bf16.mxu0 %v16612_v23  ;;  %v10751_v35 = vld [vmem:[%s23679_s3 + $0x9b8] sm:$0xff]  ;;  %v17990_v11 = vld [vmem:[%s23678_s2 + $0x288] sm:$0xff]  ;;  %v17995_v18 = vld [vmem:[%s23678_s2 + $0x2b0] sm:$0xff] }
 0x7a4   :  { %16601 = vmatprep.subr.bf16.mxu1 %v16600_v7  ;;  %v16620_v41 = vpack.c.bf16 %v10751_v35, %v10750_v50  ;;  %v17994_v62 = vld [vmem:[%s23678_s2 + $0x2a8] sm:$0xff]  ;;  %v17999_v28 = vld [vmem:[%s23678_s2 + $0x2d0] sm:$0xff]  ;;  %v18000_v63 = vld [vmem:[%s23678_s2 + $0x2d8] sm:$0xff] }
 0x7a5   :  { %v18004_v50 = vld [vmem:[%s23678_s2 + $0x2f8] sm:$0xff]  ;;  %v18005_v35 = vld [vmem:[%s23678_s2 + $0x300] sm:$0xff] }
 0x7a6   :  { %16615 = vmatpush3.bf16.msra.mxu0 %v16612_v23  ;;  %v17997_v23 = vld [vmem:[%s23678_s2 + $0x2c0] sm:$0xff] }
 0x7a7   :  { %16603 = vmatpush3.bf16.msra.mxu1 %v16600_v7  ;;  %16617 = vmatprep.subr.bf16.mxu0 %v16616_v46  ;;  %v17959_v7 = vld [vmem:[%s23678_s2 + $0x190] sm:$0xff] }
 0x7a8   :  { %16605 = vmatprep.subr.bf16.mxu1 %v16604_v14 }
 0x7aa   :  { %16619 = vmatpush3.bf16.msra.mxu0 %v16616_v46  ;;  %v18002_v46 = vld [vmem:[%s23678_s2 + $0x2e8] sm:$0xff] }
 0x7ab   :  { %16607 = vmatpush3.bf16.msra.mxu1 %v16604_v14  ;;  %16621 = vmatprep.subr.bf16.mxu0 %v16620_v41  ;;  %v17960_v14 = vld [vmem:[%s23678_s2 + $0x198] sm:$0xff] }
 0x7ae   :  { %14433 = vmatmul.mubr.f32.vlgmr.msra.gmra.mrb[32].mxu1 %v17910_v33  ;;  %16623 = vmatpush3.bf16.msra.mxu0 %v16620_v41  ;;  %v10752_v33 = vld [vmem:[%s23679_s3 + $0x9c0] sm:$0xff]  ;;  %v18007_v41 = vld [vmem:[%s23678_s2 + $0x310] sm:$0xff] }
 0x7af   :  { %14435 = vmatprep.mubr.f32.mxu1 %v17911_v40  ;;  %v10753_v40 = vld [vmem:[%s23679_s3 + $0x9c8] sm:$0xff] }
 0x7b2   :  { %14436 = vmatmul.mubr.f32.gmra.mrb[34].mxu1 %v17912_v38  ;;  %v17961_v38 = vld [vmem:[%s23678_s2 + $0x1a0] sm:$0xff] }
 0x7b3   :  { %14438 = vmatprep.mubr.f32.mxu1 %v17913_v45  ;;  %v16624_v45 = vpack.c.bf16 %v10753_v40, %v10752_v33  ;;  %v18009_v33 = vld [vmem:[%s23678_s2 + $0x320] sm:$0xff]  ;;  %v18010_v40 = vld [vmem:[%s23678_s2 + $0x328] sm:$0xff] }
 0x7b5   :  { %16625 = vmatprep.subr.bf16.mxu0 %v16624_v45 }
 0x7b6   :  { %14439 = vmatmul.mubr.f32.gmra.mrb[36].mxu1 %v17914_v0  ;;  %v17962_v0 = vld [vmem:[%s23678_s2 + $0x1a8] sm:$0xff]  ;;  %16627 = vmatpush3.bf16.msra.mxu0 %v16624_v45  ;;  %v18012_v45 = vld [vmem:[%s23678_s2 + $0x338] sm:$0xff] }
 0x7b7   :  { %14441 = vmatprep.mubr.f32.mxu1 %v17915_v43  ;;  %v10754_v43 = vld [vmem:[%s23679_s3 + $0x9d0] sm:$0xff] }
 0x7ba   :  { %14442 = vmatmul.mubr.f32.gmra.mrb[38].mxu1 %v17916_v10  ;;  %v10755_v10 = vld [vmem:[%s23679_s3 + $0x9d8] sm:$0xff] }
 0x7bb   :  { %14444 = vmatprep.mubr.f32.mxu1 %v17917_v6  ;;  %v17963_v6 = vld [vmem:[%s23678_s2 + $0x1b0] sm:$0xff] }
 0x7be   :  { %14445 = vmatmul.mubr.f32.gmra.mrb[40].mxu1 %v17918_v44  ;;  %v16628_v44 = vpack.c.bf16 %v10755_v10, %v10754_v43  ;;  %v18014_v43 = vld [vmem:[%s23678_s2 + $0x348] sm:$0xff]  ;;  %v18015_v10 = vld [vmem:[%s23678_s2 + $0x350] sm:$0xff] }
 0x7bf   :  { %14447 = vmatprep.mubr.f32.mxu1 %v17919_v51  ;;  %v17964_v51 = vld [vmem:[%s23678_s2 + $0x1b8] sm:$0xff] }
 0x7c0   :  { %16629 = vmatprep.subr.bf16.mxu0 %v16628_v44 }
 0x7c1   :  { %16631 = vmatpush3.bf16.msra.mxu0 %v16628_v44 }
 0x7c2   :  { %14448 = vmatmul.mubr.f32.gmra.mrb[42].mxu1 %v17920_v9  ;;  %v10756_v9 = vld [vmem:[%s23679_s3 + $0x9e0] sm:$0xff] }
 0x7c3   :  { %14450 = vmatprep.mubr.f32.mxu1 %v17921_v48  ;;  %v10757_v48 = vld [vmem:[%s23679_s3 + $0x9e8] sm:$0xff] }
 0x7c6   :  { %14451 = vmatmul.mubr.f32.gmra.mrb[44].mxu1 %v17922_v52  ;;  %v17965_v52 = vld [vmem:[%s23678_s2 + $0x1c0] sm:$0xff] }
 0x7c7   :  { %14453 = vmatprep.mubr.f32.mxu1 %v17923_v19  ;;  %v16632_v19 = vpack.c.bf16 %v10757_v48, %v10756_v9  ;;  %v18017_v9 = vld [vmem:[%s23678_s2 + $0x360] sm:$0xff] }
 0x7c9   :  { %16633 = vmatprep.subr.bf16.mxu0 %v16632_v19 }
 0x7ca   :  { %14454 = vmatmul.mubr.f32.gmra.mrb[46].mxu1 %v17924_v60  ;;  %v17966_v60 = vld [vmem:[%s23678_s2 + $0x1c8] sm:$0xff]  ;;  %16635 = vmatpush3.bf16.msra.mxu0 %v16632_v19 }
 0x7cb   :  { %14456 = vmatprep.mubr.f32.mxu1 %v17925_v12  ;;  %v10758_v12 = vld [vmem:[%s23679_s3 + $0x9f0] sm:$0xff]  ;;  %v18018_v19 = vld [vmem:[%s23678_s2 + $0x368] sm:$0xff] }
 0x7ce   :  { %14457 = vmatmul.mubr.f32.gmra.mrb[48].mxu1 %v17926_v53  ;;  %v10759_v53 = vld [vmem:[%s23679_s3 + $0x9f8] sm:$0xff] }
 0x7cf   :  { %14459 = vmatprep.mubr.f32.mxu1 %v17927_v26  ;;  %v17967_v26 = vld [vmem:[%s23678_s2 + $0x1d0] sm:$0xff] }
 0x7d2   :  { %14460 = vmatmul.mubr.f32.gmra.mrb[50].mxu1 %v17928_v5  ;;  %v16636_v5 = vpack.c.bf16 %v10759_v53, %v10758_v12 }
 0x7d3   :  { %14462 = vmatprep.mubr.f32.mxu1 %v17929_v22  ;;  %v17968_v22 = vld [vmem:[%s23678_s2 + $0x1d8] sm:$0xff] }
 0x7d4   :  { %16637 = vmatprep.subr.bf16.mxu0 %v16636_v5 }
 0x7d5   :  { %16639 = vmatpush3.bf16.msra.mxu0 %v16636_v5  ;;  %v18021_v5 = vld [vmem:[%s23678_s2 + $0x380] sm:$0xff] }
 0x7d6   :  { %14463 = vmatmul.mubr.f32.gmra.mrb[52].mxu1 %v17930_v55  ;;  %v17969_v55 = vld [vmem:[%s23678_s2 + $0x1e0] sm:$0xff] }
 0x7d7   :  { %14465 = vmatprep.mubr.f32.mxu1 %v17931_v58  ;;  %v10728_v58 = vld [vmem:[%s23679_s3 + $0x900] sm:$0xff] }
 0x7da   :  { %14466 = vmatmul.mubr.f32.gmra.mrb[54].mxu1 %v17932_v59  ;;  %v10729_v59 = vld [vmem:[%s23679_s3 + $0x908] sm:$0xff] }
 0x7db   :  { %14468 = vmatprep.mubr.f32.mxu1 %v17933_v17  ;;  %v21323_v17 = vpack.c.bf16 %v10729_v59, %v10728_v58  ;;  %v18022_v58 = vld [vmem:[%s23678_s2 + $0x388] sm:$0xff]  ;;  %v18023_v59 = vld [vmem:[%s23678_s2 + $0x390] sm:$0xff] }
 0x7dd   :  { %16641 = vmatprep.subr.bf16.mxu0 %v21323_v17 }
 0x7de   :  { %14469 = vmatmul.mubr.f32.gmra.mrb[56].mxu1 %v17934_v8  ;;  %v17970_v8 = vld [vmem:[%s23678_s2 + $0x1e8] sm:$0xff] }
 0x7df   :  { %14471 = vmatprep.mubr.f32.mxu1 %v17935_v57  ;;  %v17971_v57 = vld [vmem:[%s23678_s2 + $0x1f0] sm:$0xff] }
 0x7e2   :  { %14472 = vmatmul.mubr.f32.gmra.mrb[58].mxu1 %v17936_v27  ;;  %v17972_v27 = vld [vmem:[%s23678_s2 + $0x1f8] sm:$0xff] }
 0x7e3   :  { %14474 = vmatprep.mubr.f32.mxu1 %v17937_v30  ;;  %v17973_v30 = vld [vmem:[%s23678_s2 + $0x200] sm:$0xff] }
 0x7e6   :  { %14475 = vmatmul.mubr.f32.gmra.mrb[60].mxu1 %v17938_v2  ;;  %v17974_v2 = vld [vmem:[%s23678_s2 + $0x208] sm:$0xff] }
 0x7e7   :  { %14477 = vmatprep.mubr.f32.mxu1 %v17939_v15  ;;  %v17975_v15 = vld [vmem:[%s23678_s2 + $0x210] sm:$0xff] }
 0x7ea   :  { %14478 = vmatmul.mubr.f32.gmra.mrb[62].mxu1 %v17940_v34  ;;  %v17976_v34 = vld [vmem:[%s23678_s2 + $0x218] sm:$0xff] }
 0x7eb   :  { %14480 = vmatprep.mubr.f32.mxu1 %v17941_v47  ;;  %v17977_v47 = vld [vmem:[%s23678_s2 + $0x220] sm:$0xff] }
 0x7ee   :  { %14481 = vmatmul.mubr.f32.gmra.mrb[64].mxu1 %v17942_v25  ;;  %v17978_v25 = vld [vmem:[%s23678_s2 + $0x228] sm:$0xff] }
 0x7ef   :  { %14483 = vmatprep.mubr.f32.mxu1 %v17943_v31  ;;  %v17979_v31 = vld [vmem:[%s23678_s2 + $0x230] sm:$0xff] }
 0x7f2   :  { %14484 = vmatmul.mubr.f32.gmra.mrb[66].mxu1 %v17944_v3  ;;  %v17980_v3 = vld [vmem:[%s23678_s2 + $0x238] sm:$0xff] }
 0x7f3   :  { %14486 = vmatprep.mubr.f32.mxu1 %v17945_v56  ;;  %v17981_v56 = vld [vmem:[%s23678_s2 + $0x240] sm:$0xff] }
 0x7f6   :  { %14487 = vmatmul.mubr.f32.gmra.mrb[68].mxu1 %v17946_v20  ;;  %v17982_v20 = vld [vmem:[%s23678_s2 + $0x248] sm:$0xff] }
 0x7f7   :  { %14489 = vmatprep.mubr.f32.mxu1 %v17947_v54  ;;  %v17983_v54 = vld [vmem:[%s23678_s2 + $0x250] sm:$0xff] }
 0x7fa   :  { %14490 = vmatmul.mubr.f32.gmra.mrb[70].mxu1 %v17948_v24  ;;  %v17984_v24 = vld [vmem:[%s23678_s2 + $0x258] sm:$0xff] }
 0x7fb   :  { %14492 = vmatprep.mubr.f32.mxu1 %v17949_v16  ;;  %v17985_v16 = vld [vmem:[%s23678_s2 + $0x260] sm:$0xff] }
 0x7fe   :  { %14493 = vmatmul.mubr.f32.gmra.mrb[72].mxu1 %v17950_v4  ;;  %v17986_v4 = vld [vmem:[%s23678_s2 + $0x268] sm:$0xff] }
 0x7ff   :  { %14495 = vmatprep.mubr.f32.mxu1 %v17951_v13  ;;  %v17987_v13 = vld [vmem:[%s23678_s2 + $0x270] sm:$0xff] }
 0x802   :  { %14496 = vmatmul.mubr.f32.gmra.mrb[74].mxu1 %v17952_v29  ;;  %v17988_v29 = vld [vmem:[%s23678_s2 + $0x278] sm:$0xff] }
 0x803   :  { %14498 = vmatprep.mubr.f32.mxu1 %v17953_v37  ;;  %v17991_v37 = vld [vmem:[%s23678_s2 + $0x290] sm:$0xff] }
 0x806   :  { %14499 = vmatmul.mubr.f32.gmra.mrb[76].mxu1 %v17954_v32  ;;  %v17993_v32 = vld [vmem:[%s23678_s2 + $0x2a0] sm:$0xff] }
 0x807   :  { %14501 = vmatprep.mubr.f32.mxu1 %v17955_v61  ;;  %v17996_v61 = vld [vmem:[%s23678_s2 + $0x2b8] sm:$0xff] }
 0x80a   :  { %14502 = vmatmul.mubr.f32.gmra.mrb[78].mxu1 %v17956_v21  ;;  %v17998_v21 = vld [vmem:[%s23678_s2 + $0x2c8] sm:$0xff] }
 0x80b   :  { %14504 = vmatprep.mubr.f32.mxu1 %v17957_v49  ;;  %v18001_v49 = vld [vmem:[%s23678_s2 + $0x2e0] sm:$0xff] }
 0x80e   :  { %14505 = vmatmul.mubr.f32.gmra.mrb[80].mxu1 %v17958_v36  ;;  %v18003_v36 = vld [vmem:[%s23678_s2 + $0x2f0] sm:$0xff] }
 0x80f   :  { %14507 = vmatprep.mubr.f32.mxu1 %v17959_v7  ;;  %v18006_v7 = vld [vmem:[%s23678_s2 + $0x308] sm:$0xff] }
 0x812   :  { %14508 = vmatmul.mubr.f32.gmra.mrb[82].mxu1 %v17960_v14  ;;  %v18008_v14 = vld [vmem:[%s23678_s2 + $0x318] sm:$0xff] }
 0x813   :  { %14510 = vmatprep.mubr.f32.mxu1 %v17961_v38  ;;  %v18011_v38 = vld [vmem:[%s23678_s2 + $0x330] sm:$0xff] }
 0x816   :  { %14511 = vmatmul.mubr.f32.gmra.mrb[84].mxu1 %v17962_v0  ;;  %v18013_v0 = vld [vmem:[%s23678_s2 + $0x340] sm:$0xff] }
 0x817   :  { %14513 = vmatprep.mubr.f32.mxu1 %v17963_v6 }
 0x81a   :  { %14514 = vmatmul.mubr.f32.gmra.mrb[86].mxu1 %v17964_v51  ;;  %v18016_v51 = vld [vmem:[%s23678_s2 + $0x358] sm:$0xff] }
 0x81b   :  { %14516 = vmatprep.mubr.f32.mxu1 %v17965_v52 }
 0x81e   :  { %14517 = vmatmul.mubr.f32.gmra.mrb[88].mxu1 %v17966_v60  ;;  %v18019_v60 = vld [vmem:[%s23678_s2 + $0x370] sm:$0xff] }
 0x81f   :  { %14519 = vmatprep.mubr.f32.mxu1 %v17967_v26  ;;  %v18020_v26 = vld [vmem:[%s23678_s2 + $0x378] sm:$0xff] }
 0x822   :  { %14520 = vmatmul.mubr.f32.gmra.mrb[90].mxu1 %v17968_v22 }
 0x823   :  { %14522 = vmatprep.mubr.f32.mxu1 %v17969_v55 }
 0x826   :  { %14523 = vmatmul.mubr.f32.gmra.mrb[92].mxu1 %v17970_v8 }
 0x827   :  { %14525 = vmatprep.mubr.f32.mxu1 %v17971_v57 }
 0x82a   :  { %14526 = vmatmul.mubr.f32.gmra.mrb[94].mxu1 %v17972_v27  ;;  %v18024_v27 = vld [vmem:[%s23678_s2 + $0x398] sm:$0xff] }
 0x82b   :  { %14528 = vmatprep.mubr.f32.mxu1 %v17973_v30  ;;  %v18025_v30 = vld [vmem:[%s23678_s2 + $0x3a0] sm:$0xff] }
 0x82e   :  { %14529 = vmatmul.mubr.f32.gmra.mrb[96].mxu1 %v17974_v2 }
 0x82f   :  { %14531 = vmatprep.mubr.f32.mxu1 %v17975_v15 }
 0x832   :  { %14532 = vmatmul.mubr.f32.gmra.mrb[98].mxu1 %v17976_v34  ;;  %v18026_v34 = vld [vmem:[%s23678_s2 + $0x3a8] sm:$0xff] }
 0x833   :  { %14534 = vmatprep.mubr.f32.mxu1 %v17977_v47  ;;  %v18027_v47 = vld [vmem:[%s23678_s2 + $0x3b0] sm:$0xff] }
 0x836   :  { %14535 = vmatmul.mubr.f32.gmra.mrb[100].mxu1 %v17978_v25 }
 0x837   :  { %14537 = vmatprep.mubr.f32.mxu1 %v17979_v31 }
 0x83a   :  { %14538 = vmatmul.mubr.f32.gmra.mrb[102].mxu1 %v17980_v3  ;;  %v18028_v3 = vld [vmem:[%s23678_s2 + $0x3b8] sm:$0xff] }
 0x83b   :  { %14540 = vmatprep.mubr.f32.mxu1 %v17981_v56  ;;  %v18029_v56 = vld [vmem:[%s23678_s2 + $0x3c0] sm:$0xff] }
 0x83e   :  { %14541 = vmatmul.mubr.f32.gmra.mrb[104].mxu1 %v17982_v20 }
 0x83f   :  { %14543 = vmatprep.mubr.f32.mxu1 %v17983_v54 }
 0x842   :  { %14544 = vmatmul.mubr.f32.gmra.mrb[106].mxu1 %v17984_v24  ;;  %v18030_v24 = vld [vmem:[%s23678_s2 + $0x3c8] sm:$0xff] }
 0x843   :  { %14546 = vmatprep.mubr.f32.mxu1 %v17985_v16  ;;  %v10730_v16 = vld [vmem:[%s23679_s3 + $0x910] sm:$0xff] }
 0x846   :  { %14547 = vmatmul.mubr.f32.gmra.mrb[108].mxu1 %v17986_v4  ;;  %v10731_v4 = vld [vmem:[%s23679_s3 + $0x918] sm:$0xff] }
 0x847   :  { %14549 = vmatprep.mubr.f32.mxu1 %v17987_v13  ;;  %v18031_v13 = vld [vmem:[%s23678_s2 + $0x3d0] sm:$0xff] }
 0x84a   :  { %14550 = vmatmul.mubr.f32.gmra.mrb[110].mxu1 %v17988_v29 }
 0x84b   :  { %14552 = vmatprep.mubr.f32.mxu1 %v17989_v1 }
 0x84e   :  { %14553 = vmatmul.mubr.f32.gmra.mrb[112].mxu1 %v17990_v11  ;;  %v16644_v11 = vpack.c.bf16 %v10731_v4, %v10730_v16  ;;  %v18044_v4 = vld [vmem:[%s23678_s2 + $0x438] sm:$0xff] }
 0x84f   :  { %14555 = vmatprep.mubr.f32.mxu1 %v17991_v37  ;;  %v18032_v37 = vld [vmem:[%s23678_s2 + $0x3d8] sm:$0xff] }
 0x852   :  { %14556 = vmatmul.mubr.f32.gmra.mrb[114].mxu1 %v17992_v39  ;;  %v10732_v39 = vld [vmem:[%s23679_s3 + $0x920] sm:$0xff] }
 0x853   :  { %14558 = vmatprep.mubr.f32.mxu1 %v17993_v32  ;;  %v10733_v32 = vld [vmem:[%s23679_s3 + $0x928] sm:$0xff] }
 0x856   :  { %14559 = vmatmul.mubr.f32.gmra.mrb[116].mxu1 %v17994_v62  ;;  %v18033_v62 = vld [vmem:[%s23678_s2 + $0x3e0] sm:$0xff] }
 0x857   :  { %14561 = vmatprep.mubr.f32.mxu1 %v17995_v18 }
 0x85a   :  { %14562 = vmatmul.mubr.f32.gmra.mrb[118].mxu1 %v17996_v61 }
 0x85b   :  { %14564 = vmatprep.mubr.f32.mxu1 %v17997_v23  ;;  %v16648_v23 = vpack.c.bf16 %v10733_v32, %v10732_v39  ;;  %v18046_v32 = vld [vmem:[%s23678_s2 + $0x448] sm:$0xff] }
 0x85e   :  { %14565 = vmatmul.mubr.f32.gmra.mrb[120].mxu1 %v17998_v21  ;;  %v18034_v21 = vld [vmem:[%s23678_s2 + $0x3e8] sm:$0xff] }
 0x85f   :  { %14567 = vmatprep.mubr.f32.mxu1 %v17999_v28  ;;  %v10734_v28 = vld [vmem:[%s23679_s3 + $0x930] sm:$0xff] }
 0x862   :  { %14568 = vmatmul.mubr.f32.gmra.mrb[122].mxu1 %v18000_v63  ;;  %v10735_v63 = vld [vmem:[%s23679_s3 + $0x938] sm:$0xff] }
 0x863   :  { %14570 = vmatprep.mubr.f32.mxu1 %v18001_v49 }
 0x866   :  { %14571 = vmatmul.mubr.f32.gmra.mrb[124].mxu1 %v18002_v46 }
 0x867   :  { %14573 = vmatprep.mubr.f32.mxu1 %v18003_v36  ;;  %v16652_v36 = vpack.c.bf16 %v10735_v63, %v10734_v28  ;;  %v18048_v63 = vld [vmem:[%s23678_s2 + $0x458] sm:$0xff] }
 0x86a   :  { %14574 = vmatmul.mubr.f32.gmra.mrb[126].mxu1 %v18004_v50  ;;  %v18036_v50 = vld [vmem:[%s23678_s2 + $0x3f8] sm:$0xff] }
 0x86b   :  { %14576 = vmatprep.mubr.f32.mxu1 %v18005_v35  ;;  %v10736_v35 = vld [vmem:[%s23679_s3 + $0x940] sm:$0xff] }
 0x86e   :  { %14577 = vmatmul.mubr.f32.gmra.mrb[128].mxu1 %v18006_v7  ;;  %v10737_v7 = vld [vmem:[%s23679_s3 + $0x948] sm:$0xff] }
 0x86f   :  { %14579 = vmatprep.mubr.f32.mxu1 %v18007_v41  ;;  %v18037_v41 = vld [vmem:[%s23678_s2 + $0x400] sm:$0xff] }
 0x872   :  { %14580 = vmatmul.mubr.f32.gmra.mrb[130].mxu1 %v18008_v14 }
 0x873   :  { %14582 = vmatprep.mubr.f32.mxu1 %v18009_v33 }
 0x876   :  { %14583 = vmatmul.mubr.f32.gmra.mrb[132].mxu1 %v18010_v40  ;;  %v16656_v40 = vpack.c.bf16 %v10737_v7, %v10736_v35  ;;  %v18050_v35 = vld [vmem:[%s23678_s2 + $0x468] sm:$0xff]  ;;  %v10766_v7 = vld [vmem:[%s23679_s3 + $0xa30] sm:$0xff] }
 0x877   :  { %14585 = vmatprep.mubr.f32.mxu1 %v18011_v38  ;;  %v18038_v38 = vld [vmem:[%s23678_s2 + $0x408] sm:$0xff] }
 0x87a   :  { %14586 = vmatmul.mubr.f32.gmra.mrb[134].mxu1 %v18012_v45  ;;  %v10738_v45 = vld [vmem:[%s23679_s3 + $0x950] sm:$0xff] }
 0x87b   :  { %14588 = vmatprep.mubr.f32.mxu1 %v18013_v0  ;;  %v10739_v0 = vld [vmem:[%s23679_s3 + $0x958] sm:$0xff] }
 0x87e   :  { %14589 = vmatmul.mubr.f32.gmra.mrb[136].mxu1 %v18014_v43  ;;  %v18039_v43 = vld [vmem:[%s23678_s2 + $0x410] sm:$0xff] }
 0x87f   :  { %14591 = vmatprep.mubr.f32.mxu1 %v18015_v10 }
 0x881   :  { %v21464_v6 = vpop.f32.mrb[32].mxu1 }
 0x882   :  { %v21466_v44 = vpop.f32.mrb[33].mxu1  ;;  %14592 = vmatmul.mubr.f32.gmra.mrb[138].mxu1 %v18016_v51 }
 0x883   :  { %14594 = vmatprep.mubr.f32.mxu1 %v18017_v9  ;;  %v16660_v9 = vpack.c.bf16 %v10739_v0, %v10738_v45 }
 0x885   :  { %v21474_v48 = vpop.f32.mrb[34].mxu1 }
 0x886   :  { %v21476_v52 = vpop.f32.mrb[35].mxu1  ;;  %14595 = vmatmul.mubr.f32.gmra.mrb[140].mxu1 %v18018_v19  ;;  %v18040_v19 = vld [vmem:[%s23678_s2 + $0x418] sm:$0xff] }
 0x887   :  { %14597 = vmatprep.mubr.f32.mxu1 %v18019_v60  ;;  %v10740_v60 = vld [vmem:[%s23679_s3 + $0x960] sm:$0xff] }
 0x889   :  { %v21484_v12 = vpop.f32.mrb[36].mxu1 }
 0x88a   :  { %v21486_v53 = vpop.f32.mrb[37].mxu1  ;;  %14598 = vmatmul.mubr.f32.gmra.mrb[142].mxu1 %v18020_v26  ;;  %v10741_v26 = vld [vmem:[%s23679_s3 + $0x968] sm:$0xff] }
 0x88b   :  { %14600 = vmatprep.mubr.f32.mxu1 %v18021_v5  ;;  %v18041_v5 = vld [vmem:[%s23678_s2 + $0x420] sm:$0xff] }
 0x88d   :  { %v21494_v22 = vpop.f32.mrb[38].mxu1 }
 0x88e   :  { %v21496_v55 = vpop.f32.mrb[39].mxu1  ;;  %14601 = vmatmul.mubr.f32.gmra.mrb[144].mxu1 %v18022_v58 }
 0x88f   :  { %14603 = vmatprep.mubr.f32.mxu1 %v18023_v59 }
 0x891   :  { %v21504_v8 = vpop.f32.mrb[40].mxu1 }
 0x892   :  { %v21506_v57 = vpop.f32.mrb[41].mxu1  ;;  %14604 = vmatmul.mubr.f32.gmra.mrb[146].mxu1 %v18024_v27  ;;  %v16664_v27 = vpack.c.bf16 %v10741_v26, %v10740_v60  ;;  %v10773_v60 = vld [vmem:[%s23679_s3 + $0xa68] sm:$0xff] }
 0x893   :  { %14606 = vmatprep.mubr.f32.mxu1 %v18025_v30  ;;  %v18042_v30 = vld [vmem:[%s23678_s2 + $0x428] sm:$0xff] }
 0x895   :  { %v21514_v2 = vpop.f32.mrb[42].mxu1 }
 0x896   :  { %v21516_v15 = vpop.f32.mrb[43].mxu1  ;;  %14607 = vmatmul.mubr.f32.gmra.mrb[148].mxu1 %v18026_v34  ;;  %v10742_v34 = vld [vmem:[%s23679_s3 + $0x970] sm:$0xff] }
 0x897   :  { %14609 = vmatprep.mubr.f32.mxu1 %v18027_v47  ;;  %v10743_v47 = vld [vmem:[%s23679_s3 + $0x978] sm:$0xff] }
 0x898   :  { %v16668_v16 = vpack.c.bf16 %v10743_v47, %v10742_v34  ;;  %v10778_v47 = vld [vmem:[%s23679_s3 + $0xa90] sm:$0xff] }
 0x899   :  { %v21524_v25 = vpop.f32.mrb[44].mxu1 }
 0x89a   :  { %v21526_v31 = vpop.f32.mrb[45].mxu1  ;;  %14610 = vmatmul.mubr.f32.gmra.mrb[150].mxu1 %v18028_v3  ;;  %v18043_v3 = vld [vmem:[%s23678_s2 + $0x430] sm:$0xff] }
 0x89b   :  { %14612 = vmatprep.mubr.f32.mxu1 %v18029_v56 }
 0x89d   :  { %v21534_v20 = vpop.f32.mrb[46].mxu1 }
 0x89e   :  { %v21536_v54 = vpop.f32.mrb[47].mxu1  ;;  %14613 = vmatmul.mubr.f32.gmra.mrb[152].mxu1 %v18030_v24 }
 0x89f   :  { %14615 = vmatprep.mubr.f32.mxu1 %v18031_v13  ;;  %v10760_v13 = vld [vmem:[%s23679_s3 + $0xa00] sm:$0xff] }
 0x8a1   :  { %v14458_v29 = vpop.f32.mrb[48].mxu1 }
 0x8a2   :  { %v5687_v1 = vpop.f32.mrb[49].mxu1  ;;  %14616 = vmatmul.mubr.f32.gmra.mrb[154].mxu1 %v18032_v37 }
 0x8a3   :  { %14680 = vmatprep.mubr.f32.mxu0 %v5687_v1  ;;  %14618 = vmatprep.mubr.f32.mxu1 %v18033_v62  ;;  %v18045_v1 = vld [vmem:[%s23678_s2 + $0x440] sm:$0xff]  ;;  %v10762_v62 = vld [vmem:[%s23679_s3 + $0xa10] sm:$0xff] }
 0x8a4   :  { %14681 = vmatmul.mubr.f32.vlgmr.msra.gmra.mrb[48].mxu0 %v14458_v29  ;;  %v10761_v29 = vld [vmem:[%s23679_s3 + $0xa08] sm:$0xff] }
 0x8a5   :  { %v14461_v18 = vpop.f32.mrb[50].mxu1  ;;  %16643 = vmatpush3.bf16.msra.mxu0 %v21323_v17  ;;  %v18035_v17 = vld [vmem:[%s23678_s2 + $0x3f0] sm:$0xff]  ;;  %v16672_v39 = vpack.c.bf16 %v10761_v29, %v10760_v13 }
 0x8a6   :  { %v5697_v61 = vpop.f32.mrb[51].mxu1  ;;  %16645 = vmatprep.subr.bf16.mxu0 %v16644_v11  ;;  %14619 = vmatmul.mubr.f32.gmra.mrb[156].mxu1 %v18034_v21  ;;  %v10782_v29 = vld [vmem:[%s23679_s3 + $0xab0] sm:$0xff] }
 0x8a7   :  { %14683 = vmatprep.mubr.f32.mxu0 %v5697_v61  ;;  %14621 = vmatprep.mubr.f32.mxu1 %v18035_v17  ;;  %v18047_v61 = vld [vmem:[%s23678_s2 + $0x450] sm:$0xff]  ;;  %v10764_v17 = vld [vmem:[%s23679_s3 + $0xa20] sm:$0xff] }
 0x8a8   :  { %14684 = vmatmul.mubr.f32.gmra.mrb[50].mxu0 %v14461_v18  ;;  %v10763_v18 = vld [vmem:[%s23679_s3 + $0xa18] sm:$0xff] }
 0x8a9   :  { %v14464_v49 = vpop.f32.mrb[52].mxu1  ;;  %16647 = vmatpush3.bf16.msra.mxu0 %v16644_v11  ;;  %v16676_v21 = vpack.c.bf16 %v10763_v18, %v10762_v62  ;;  %v10785_v62 = vld [vmem:[%s23679_s3 + $0xac8] sm:$0xff] }
 0x8aa   :  { %v5707_v46 = vpop.f32.mrb[53].mxu1  ;;  %16649 = vmatprep.subr.bf16.mxu0 %v16648_v23  ;;  %14622 = vmatmul.mubr.f32.gmra.mrb[158].mxu1 %v18036_v50 }
 0x8ab   :  { %14686 = vmatprep.mubr.f32.mxu0 %v5707_v46  ;;  %14624 = vmatprep.mubr.f32.mxu1 %v18037_v41 }
 0x8ac   :  { %14687 = vmatmul.mubr.f32.gmra.mrb[52].mxu0 %v14464_v49  ;;  %v10765_v49 = vld [vmem:[%s23679_s3 + $0xa28] sm:$0xff] }
 0x8ad   :  { %v14467_v14 = vpop.f32.mrb[54].mxu1  ;;  %16651 = vmatpush3.bf16.msra.mxu0 %v16648_v23 }
 0x8ae   :  { %v5717_v33 = vpop.f32.mrb[55].mxu1  ;;  %16653 = vmatprep.subr.bf16.mxu0 %v16652_v36  ;;  %14625 = vmatmul.mubr.f32.gmra.mrb[160].mxu1 %v18038_v38  ;;  %v10768_v38 = vld [vmem:[%s23679_s3 + $0xa40] sm:$0xff] }
 0x8af   :  { %14689 = vmatprep.mubr.f32.mxu0 %v5717_v33  ;;  %14627 = vmatprep.mubr.f32.mxu1 %v18039_v43 }
 0x8b0   :  { %14690 = vmatmul.mubr.f32.gmra.mrb[54].mxu0 %v14467_v14 }
 0x8b1   :  { %v14470_v10 = vpop.f32.mrb[56].mxu1  ;;  %16655 = vmatpush3.bf16.msra.mxu0 %v16652_v36  ;;  %v16680_v36 = vpack.c.bf16 %v10765_v49, %v10764_v17 }
 0x8b2   :  { %v5727_v51 = vpop.f32.mrb[57].mxu1  ;;  %16657 = vmatprep.subr.bf16.mxu0 %v16656_v40  ;;  %14628 = vmatmul.mubr.f32.gmra.mrb[162].mxu1 %v18040_v19  ;;  %v10772_v19 = vld [vmem:[%s23679_s3 + $0xa60] sm:$0xff] }
 0x8b3   :  { %14692 = vmatprep.mubr.f32.mxu0 %v5727_v51  ;;  %14630 = vmatprep.mubr.f32.mxu1 %v18041_v5  ;;  %v10771_v51 = vld [vmem:[%s23679_s3 + $0xa58] sm:$0xff]  ;;  %v10774_v5 = vld [vmem:[%s23679_s3 + $0xa70] sm:$0xff] }
 0x8b4   :  { %14693 = vmatmul.mubr.f32.gmra.mrb[56].mxu0 %v14470_v10  ;;  %v10770_v10 = vld [vmem:[%s23679_s3 + $0xa50] sm:$0xff] }
 0x8b5   :  { %v14473_v58 = vpop.f32.mrb[58].mxu1  ;;  %16659 = vmatpush3.bf16.msra.mxu0 %v16656_v40  ;;  %v18052_v40 = vld [vmem:[%s23678_s2 + $0x478] sm:$0xff] }
 0x8b6   :  { %v5737_v59 = vpop.f32.mrb[59].mxu1  ;;  %16661 = vmatprep.subr.bf16.mxu0 %v16660_v9  ;;  %14631 = vmatmul.mubr.f32.gmra.mrb[164].mxu1 %v18042_v30  ;;  %v10777_v30 = vld [vmem:[%s23679_s3 + $0xa88] sm:$0xff] }
 0x8b7   :  { %14695 = vmatprep.mubr.f32.mxu0 %v5737_v59  ;;  %14633 = vmatprep.mubr.f32.mxu1 %v18043_v3  ;;  %v10779_v3 = vld [vmem:[%s23679_s3 + $0xa98] sm:$0xff] }
 0x8b8   :  { %14696 = vmatmul.mubr.f32.gmra.mrb[58].mxu0 %v14473_v58  ;;  %v10775_v58 = vld [vmem:[%s23679_s3 + $0xa78] sm:$0xff] }
 0x8b9   :  { %v14476_v56 = vpop.f32.mrb[60].mxu1  ;;  %16663 = vmatpush3.bf16.msra.mxu0 %v16660_v9 }
 0x8ba   :  { %v5747_v24 = vpop.f32.mrb[61].mxu1  ;;  %16665 = vmatprep.subr.bf16.mxu0 %v16664_v27  ;;  %14634 = vmatmul.mubr.f32.gmra.mrb[166].mxu1 %v18044_v4 }
 0x8bb   :  { %14698 = vmatprep.mubr.f32.mxu0 %v5747_v24  ;;  %14636 = vmatprep.mubr.f32.mxu1 %v18045_v1  ;;  %v10780_v24 = vld [vmem:[%s23679_s3 + $0xaa0] sm:$0xff]  ;;  %v10783_v1 = vld [vmem:[%s23679_s3 + $0xab8] sm:$0xff] }
 0x8bc   :  { %14699 = vmatmul.mubr.f32.gmra.mrb[60].mxu0 %v14476_v56 }
 0x8bd   :  { %v14479_v11 = vpop.f32.mrb[62].mxu1  ;;  %16667 = vmatpush3.bf16.msra.mxu0 %v16664_v27  ;;  %v10776_v27 = vld [vmem:[%s23679_s3 + $0xa80] sm:$0xff] }
 0x8be   :  { %v5757_v37 = vpop.f32.mrb[63].mxu1  ;;  %16669 = vmatprep.subr.bf16.mxu0 %v16668_v16  ;;  %14637 = vmatmul.mubr.f32.gmra.mrb[168].mxu1 %v18046_v32  ;;  %v10784_v32 = vld [vmem:[%s23679_s3 + $0xac0] sm:$0xff] }
 0x8bf   :  { %14701 = vmatprep.mubr.f32.mxu0 %v5757_v37  ;;  %14639 = vmatprep.mubr.f32.mxu1 %v18047_v61  ;;  %v16716_v37 = vpack.c.bf16 %v10783_v1, %v10782_v29  ;;  %v16720_v61 = vpack.c.bf16 %v10785_v62, %v10784_v32 }
 0x8c0   :  { %14702 = vmatmul.mubr.f32.gmra.mrb[62].mxu0 %v14479_v11 }
 0x8c1   :  { %16671 = vmatpush3.bf16.msra.mxu0 %v16668_v16  ;;  %14736 = vmatprep.mubr.f32.mxu0 %v21466_v44  ;;  %v21648_v23 = vpop.f32.mrb[64].mxu1  ;;  %v18049_v44 = vld [vmem:[%s23678_s2 + $0x460] sm:$0xff]  ;;  %v10781_v16 = vld [vmem:[%s23679_s3 + $0xaa8] sm:$0xff] }
 0x8c2   :  { %16673 = vmatprep.subr.bf16.mxu0 %v16672_v39  ;;  %v21650_v28 = vpop.f32.mrb[65].mxu1  ;;  %14640 = vmatmul.mubr.f32.gmra.mrb[170].mxu1 %v18048_v63  ;;  %v16712_v4 = vpack.c.bf16 %v10781_v16, %v10780_v24 }
 0x8c3   :  { %14642 = vmatprep.mubr.f32.mxu1 %v18049_v44  ;;  %v10788_v44 = vld [vmem:[%s23679_s3 + $0xae0] sm:$0xff] }
 0x8c4   :  { %14737 = vmatmul.mubr.f32.vlgmr.msra.gmra.mrb[48].mxu0 %v21464_v6  ;;  %v10767_v6 = vld [vmem:[%s23679_s3 + $0xa38] sm:$0xff] }
 0x8c5   :  { %14739 = vmatprep.mubr.f32.mxu0 %v21476_v52  ;;  %16675 = vmatpush3.bf16.msra.mxu0 %v16672_v39  ;;  %v21666_v46 = vpop.f32.mrb[66].mxu1  ;;  %v18051_v52 = vld [vmem:[%s23678_s2 + $0x470] sm:$0xff]  ;;  %v16684_v14 = vpack.c.bf16 %v10767_v6, %v10766_v7  ;;  %v10791_v6 = vld [vmem:[%s23679_s3 + $0xaf8] sm:$0xff] }
 0x8c6   :  { %16677 = vmatprep.subr.bf16.mxu0 %v16676_v21  ;;  %v21668_v50 = vpop.f32.mrb[67].mxu1  ;;  %14643 = vmatmul.mubr.f32.gmra.mrb[172].mxu1 %v18050_v35  ;;  %v10790_v7 = vld [vmem:[%s23679_s3 + $0xaf0] sm:$0xff] }
 0x8c7   :  { %14645 = vmatprep.mubr.f32.mxu1 %v18051_v52 }
 0x8c8   :  { %14740 = vmatmul.mubr.f32.gmra.mrb[50].mxu0 %v21474_v48  ;;  %v10769_v48 = vld [vmem:[%s23679_s3 + $0xa48] sm:$0xff] }
 0x8c9   :  { %14742 = vmatprep.mubr.f32.mxu0 %v21486_v53  ;;  %16679 = vmatpush3.bf16.msra.mxu0 %v16676_v21  ;;  %v21684_v41 = vpop.f32.mrb[68].mxu1  ;;  %v18053_v53 = vld [vmem:[%s23678_s2] sm:$0xff]  ;;  %v16688_v0 = vpack.c.bf16 %v10769_v48, %v10768_v38  ;;  %v10786_v21 = vld [vmem:[%s23679_s3 + $0xad0] sm:$0xff] }
 0x8ca   :  { %16681 = vmatprep.subr.bf16.mxu0 %v16680_v36  ;;  %v21686_v33 = vpop.f32.mrb[69].mxu1  ;;  %14646 = vmatmul.mubr.f32.gmra.mrb[174].mxu1 %v18052_v40  ;;  %v10793_v40 = vld [vmem:[%s23679_s3 + $0xb08] sm:$0xff] }
 0x8cb   :  { %15184 = vmatprep.mubr.f32.mxu1 %v18053_v53 }
 0x8cc   :  { %14743 = vmatmul.mubr.f32.gmra.mrb[52].mxu0 %v21484_v12 }
 0x8cd   :  { %14745 = vmatprep.mubr.f32.mxu0 %v21496_v55  ;;  %16683 = vmatpush3.bf16.msra.mxu0 %v16680_v36  ;;  %v21702_v45 = vpop.f32.mrb[70].mxu1  ;;  %v16692_v55 = vpack.c.bf16 %v10771_v51, %v10770_v10 }
 0x8ce   :  { %16685 = vmatprep.subr.bf16.mxu0 %v16684_v14  ;;  %v21704_v43 = vpop.f32.mrb[71].mxu1 }
 0x8d0   :  { %14746 = vmatmul.mubr.f32.gmra.mrb[54].mxu0 %v21494_v22 }
 0x8d1   :  { %14748 = vmatprep.mubr.f32.mxu0 %v21506_v57  ;;  %16687 = vmatpush3.bf16.msra.mxu0 %v16684_v14  ;;  %v21714_v12 = vpop.f32.mrb[72].mxu1  ;;  %v16696_v57 = vpack.c.bf16 %v10773_v60, %v10772_v19 }
 0x8d2   :  { %16689 = vmatprep.subr.bf16.mxu0 %v16688_v0  ;;  %v21716_v9 = vpop.f32.mrb[73].mxu1 }
 0x8d4   :  { %14749 = vmatmul.mubr.f32.gmra.mrb[56].mxu0 %v21504_v8 }
 0x8d5   :  { %14751 = vmatprep.mubr.f32.mxu0 %v21516_v15  ;;  %16691 = vmatpush3.bf16.msra.mxu0 %v16688_v0  ;;  %v21726_v22 = vpop.f32.mrb[74].mxu1  ;;  %v16700_v15 = vpack.c.bf16 %v10775_v58, %v10774_v5  ;;  %v10795_v0 = vld [vmem:[%s23679_s3 + $0xb18] sm:$0xff] }
 0x8d6   :  { %16693 = vmatprep.subr.bf16.mxu0 %v16692_v55  ;;  %v21728_v26 = vpop.f32.mrb[75].mxu1 }
 0x8d8   :  { %14752 = vmatmul.mubr.f32.gmra.mrb[58].mxu0 %v21514_v2 }
 0x8d9   :  { %14754 = vmatprep.mubr.f32.mxu0 %v21526_v31  ;;  %16695 = vmatpush3.bf16.msra.mxu0 %v16692_v55  ;;  %v21738_v8 = vpop.f32.mrb[76].mxu1  ;;  %v16704_v31 = vpack.c.bf16 %v10777_v30, %v10776_v27  ;;  %v10797_v55 = vld [vmem:[%s23679_s3 + $0xb28] sm:$0xff] }
 0x8da   :  { %16697 = vmatprep.subr.bf16.mxu0 %v16696_v57  ;;  %v21740_v59 = vpop.f32.mrb[77].mxu1 }
 0x8dc   :  { %14755 = vmatmul.mubr.f32.gmra.mrb[60].mxu0 %v21524_v25 }
 0x8dd   :  { %14757 = vmatprep.mubr.f32.mxu0 %v21536_v54  ;;  %16699 = vmatpush3.bf16.msra.mxu0 %v16696_v57  ;;  %v21750_v2 = vpop.f32.mrb[78].mxu1  ;;  %v16708_v54 = vpack.c.bf16 %v10779_v3, %v10778_v47  ;;  %v10799_v57 = vld [vmem:[%s23679_s3 + $0xb38] sm:$0xff] }
 0x8de   :  { %16701 = vmatprep.subr.bf16.mxu0 %v16700_v15  ;;  %v21752_v34 = vpop.f32.mrb[79].mxu1 }
 0x8e0   :  { %14758 = vmatmul.mubr.f32.gmra.mrb[62].mxu0 %v21534_v20 }
 0x8e1   :  { %16703 = vmatpush3.bf16.msra.mxu0 %v16700_v15  ;;  %14792 = vmatprep.mubr.f32.mxu0 %v21650_v28  ;;  %v21762_v25 = vpop.f32.mrb[80].mxu1  ;;  %v10787_v28 = vld [vmem:[%s23679_s3 + $0xad8] sm:$0xff]  ;;  %v10801_v15 = vld [vmem:[%s23679_s3 + $0xb48] sm:$0xff] }
 0x8e2   :  { %16705 = vmatprep.subr.bf16.mxu0 %v16704_v31  ;;  %v21764_v56 = vpop.f32.mrb[81].mxu1  ;;  %v16724_v17 = vpack.c.bf16 %v10787_v28, %v10786_v21 }
 0x8e4   :  { %14793 = vmatmul.mubr.f32.vlgmr.msra.gmra.mrb[48].mxu0 %v21648_v23 }
 0x8e5   :  { %16707 = vmatpush3.bf16.msra.mxu0 %v16704_v31  ;;  %14795 = vmatprep.mubr.f32.mxu0 %v21668_v50  ;;  %v21774_v20 = vpop.f32.mrb[82].mxu1  ;;  %v10803_v31 = vld [vmem:[%s23679_s3 + $0xb58] sm:$0xff] }
 0x8e6   :  { %16709 = vmatprep.subr.bf16.mxu0 %v16708_v54  ;;  %v21776_v13 = vpop.f32.mrb[83].mxu1 }
 0x8e8   :  { %14796 = vmatmul.mubr.f32.gmra.mrb[50].mxu0 %v21666_v46  ;;  %v10789_v46 = vld [vmem:[%s23679_s3 + $0xae8] sm:$0xff] }
 0x8e9   :  { %16711 = vmatpush3.bf16.msra.mxu0 %v16708_v54  ;;  %14798 = vmatprep.mubr.f32.mxu0 %v21686_v33  ;;  %v21786_v11 = vpop.f32.mrb[84].mxu1  ;;  %v16728_v50 = vpack.c.bf16 %v10789_v46, %v10788_v44  ;;  %v10792_v33 = vld [vmem:[%s23679_s3 + $0xb00] sm:$0xff]  ;;  %v10805_v54 = vld [vmem:[%s23679_s3 + $0xb68] sm:$0xff] }
 0x8ea   :  { %16713 = vmatprep.subr.bf16.mxu0 %v16712_v4  ;;  %v21788_v39 = vpop.f32.mrb[85].mxu1  ;;  %v16736_v48 = vpack.c.bf16 %v10793_v40, %v10792_v33 }
 0x8ec   :  { %14799 = vmatmul.mubr.f32.gmra.mrb[52].mxu0 %v21684_v41  ;;  %v16732_v41 = vpack.c.bf16 %v10791_v6, %v10790_v7 }
 0x8ed   :  { %16715 = vmatpush3.bf16.msra.mxu0 %v16712_v4  ;;  %14801 = vmatprep.mubr.f32.mxu0 %v21704_v43  ;;  %v21798_v18 = vpop.f32.mrb[86].mxu1  ;;  %v10807_v4 = vld [vmem:[%s23679_s3 + $0xb78] sm:$0xff] }
 0x8ee   :  { %16717 = vmatprep.subr.bf16.mxu0 %v16716_v37  ;;  %v21800_v23 = vpop.f32.mrb[87].mxu1 }
 0x8f0   :  { %14802 = vmatmul.mubr.f32.gmra.mrb[54].mxu0 %v21702_v45  ;;  %v10794_v45 = vld [vmem:[%s23679_s3 + $0xb10] sm:$0xff] }
 0x8f1   :  { %16719 = vmatpush3.bf16.msra.mxu0 %v16716_v37  ;;  %14804 = vmatprep.mubr.f32.mxu0 %v21716_v9  ;;  %v21810_v63 = vpop.f32.mrb[88].mxu1  ;;  %v16740_v10 = vpack.c.bf16 %v10795_v0, %v10794_v45  ;;  %v10809_v37 = vld [vmem:[%s23679_s3 + $0xb88] sm:$0xff] }
 0x8f2   :  { %16721 = vmatprep.subr.bf16.mxu0 %v16720_v61  ;;  %v21812_v49 = vpop.f32.mrb[89].mxu1 }
 0x8f4   :  { %14805 = vmatmul.mubr.f32.gmra.mrb[56].mxu0 %v21714_v12  ;;  %v10796_v12 = vld [vmem:[%s23679_s3 + $0xb20] sm:$0xff] }
 0x8f5   :  { %16723 = vmatpush3.bf16.msra.mxu0 %v16720_v61  ;;  %14807 = vmatprep.mubr.f32.mxu0 %v21728_v26  ;;  %v21822_v36 = vpop.f32.mrb[90].mxu1  ;;  %v16744_v19 = vpack.c.bf16 %v10797_v55, %v10796_v12  ;;  %v10811_v61 = vld [vmem:[%s23679_s3 + $0xb98] sm:$0xff] }
 0x8f6   :  { %16725 = vmatprep.subr.bf16.mxu0 %v16724_v17  ;;  %v21824_v35 = vpop.f32.mrb[91].mxu1 }
 0x8f8   :  { %14808 = vmatmul.mubr.f32.gmra.mrb[58].mxu0 %v21726_v22  ;;  %v10798_v22 = vld [vmem:[%s23679_s3 + $0xb30] sm:$0xff] }
 0x8f9   :  { %16727 = vmatpush3.bf16.msra.mxu0 %v16724_v17  ;;  %14810 = vmatprep.mubr.f32.mxu0 %v21740_v59  ;;  %v21834_v52 = vpop.f32.mrb[92].mxu1  ;;  %v16748_v5 = vpack.c.bf16 %v10799_v57, %v10798_v22  ;;  %v10813_v17 = vld [vmem:[%s23679_s3 + $0xba8] sm:$0xff] }
 0x8fa   :  { %16729 = vmatprep.subr.bf16.mxu0 %v16728_v50  ;;  %v21836_v14 = vpop.f32.mrb[93].mxu1 }
 0x8fc   :  { %14811 = vmatmul.mubr.f32.gmra.mrb[60].mxu0 %v21738_v8  ;;  %v10800_v8 = vld [vmem:[%s23679_s3 + $0xb40] sm:$0xff] }
 0x8fd   :  { %16731 = vmatpush3.bf16.msra.mxu0 %v16728_v50  ;;  %14813 = vmatprep.mubr.f32.mxu0 %v21752_v34  ;;  %v21846_v38 = vpop.f32.mrb[94].mxu1  ;;  %v16752_v27 = vpack.c.bf16 %v10801_v15, %v10800_v8  ;;  %v10815_v50 = vld [vmem:[%s23679_s3 + $0xbb8] sm:$0xff] }
 0x8fe   :  { %16733 = vmatprep.subr.bf16.mxu0 %v16732_v41  ;;  %v21848_v53 = vpop.f32.mrb[95].mxu1 }
 0x900   :  { %14814 = vmatmul.mubr.f32.gmra.mrb[62].mxu0 %v21750_v2  ;;  %v10802_v2 = vld [vmem:[%s23679_s3 + $0xb50] sm:$0xff] }
 0x901   :  { %16735 = vmatpush3.bf16.msra.mxu0 %v16732_v41  ;;  %14848 = vmatprep.mubr.f32.mxu0 %v21764_v56  ;;  %v21858_v43 = vpop.f32.mrb[96].mxu1  ;;  %v16756_v47 = vpack.c.bf16 %v10803_v31, %v10802_v2  ;;  %v10817_v41 = vld [vmem:[%s23679_s3 + $0xbc8] sm:$0xff] }
 0x902   :  { %16737 = vmatprep.subr.bf16.mxu0 %v16736_v48  ;;  %v21860_v51 = vpop.f32.mrb[97].mxu1 }
 0x904   :  { %14849 = vmatmul.mubr.f32.vlgmr.msra.gmra.mrb[48].mxu0 %v21762_v25  ;;  %v10804_v25 = vld [vmem:[%s23679_s3 + $0xb60] sm:$0xff] }
 0x905   :  { %16739 = vmatpush3.bf16.msra.mxu0 %v16736_v48  ;;  %14851 = vmatprep.mubr.f32.mxu0 %v21776_v13  ;;  %v21870_v9 = vpop.f32.mrb[98].mxu1  ;;  %v16760_v24 = vpack.c.bf16 %v10805_v54, %v10804_v25  ;;  %v10819_v48 = vld [vmem:[%s23679_s3 + $0xbd8] sm:$0xff] }
 0x906   :  { %16741 = vmatprep.subr.bf16.mxu0 %v16740_v10  ;;  %v21872_v60 = vpop.f32.mrb[99].mxu1 }
 0x908   :  { %14852 = vmatmul.mubr.f32.gmra.mrb[50].mxu0 %v21774_v20  ;;  %v10806_v20 = vld [vmem:[%s23679_s3 + $0xb70] sm:$0xff] }
 0x909   :  { %16743 = vmatpush3.bf16.msra.mxu0 %v16740_v10  ;;  %14854 = vmatprep.mubr.f32.mxu0 %v21788_v39  ;;  %v21882_v26 = vpop.f32.mrb[100].mxu1  ;;  %v16764_v29 = vpack.c.bf16 %v10807_v4, %v10806_v20  ;;  %v10821_v10 = vld [vmem:[%s23679_s3 + $0xbe8] sm:$0xff] }
 0x90a   :  { %16745 = vmatprep.subr.bf16.mxu0 %v16744_v19  ;;  %v21884_v58 = vpop.f32.mrb[101].mxu1 }
 0x90c   :  { %14855 = vmatmul.mubr.f32.gmra.mrb[52].mxu0 %v21786_v11  ;;  %v10808_v11 = vld [vmem:[%s23679_s3 + $0xb80] sm:$0xff] }
 0x90d   :  { %16747 = vmatpush3.bf16.msra.mxu0 %v16744_v19  ;;  %14857 = vmatprep.mubr.f32.mxu0 %v21800_v23  ;;  %v21894_v59 = vpop.f32.mrb[102].mxu1  ;;  %v16768_v32 = vpack.c.bf16 %v10809_v37, %v10808_v11  ;;  %v10823_v19 = vld [vmem:[%s23679_s3 + $0xbf8] sm:$0xff] }
 0x90e   :  { %16749 = vmatprep.subr.bf16.mxu0 %v16748_v5  ;;  %v21896_v30 = vpop.f32.mrb[103].mxu1 }
 0x910   :  { %14858 = vmatmul.mubr.f32.gmra.mrb[54].mxu0 %v21798_v18  ;;  %v10810_v18 = vld [vmem:[%s23679_s3 + $0xb90] sm:$0xff] }
 0x911   :  { %16751 = vmatpush3.bf16.msra.mxu0 %v16748_v5  ;;  %14860 = vmatprep.mubr.f32.mxu0 %v21812_v49  ;;  %v21906_v34 = vpop.f32.mrb[104].mxu1  ;;  %v16772_v21 = vpack.c.bf16 %v10811_v61, %v10810_v18  ;;  %v10825_v5 = vld [vmem:[%s23679_s3 + $0xc08] sm:$0xff] }
 0x912   :  { %16753 = vmatprep.subr.bf16.mxu0 %v16752_v27  ;;  %v21908_v3 = vpop.f32.mrb[105].mxu1 }
 0x914   :  { %14861 = vmatmul.mubr.f32.gmra.mrb[56].mxu0 %v21810_v63  ;;  %v10812_v63 = vld [vmem:[%s23679_s3 + $0xba0] sm:$0xff] }
 0x915   :  { %16755 = vmatpush3.bf16.msra.mxu0 %v16752_v27  ;;  %14863 = vmatprep.mubr.f32.mxu0 %v21824_v35  ;;  %v21918_v56 = vpop.f32.mrb[106].mxu1  ;;  %v16776_v44 = vpack.c.bf16 %v10813_v17, %v10812_v63  ;;  %v10827_v27 = vld [vmem:[%s23679_s3 + $0xc18] sm:$0xff] }
 0x916   :  { %16757 = vmatprep.subr.bf16.mxu0 %v16756_v47  ;;  %v21920_v16 = vpop.f32.mrb[107].mxu1 }
 0x918   :  { %14864 = vmatmul.mubr.f32.gmra.mrb[58].mxu0 %v21822_v36  ;;  %v10814_v36 = vld [vmem:[%s23679_s3 + $0xbb0] sm:$0xff] }
 0x919   :  { %16759 = vmatpush3.bf16.msra.mxu0 %v16756_v47  ;;  %14866 = vmatprep.mubr.f32.mxu0 %v21836_v14  ;;  %v21930_v13 = vpop.f32.mrb[108].mxu1  ;;  %v16780_v7 = vpack.c.bf16 %v10815_v50, %v10814_v36  ;;  %v10829_v47 = vld [vmem:[%s23679_s3 + $0xc28] sm:$0xff] }
 0x91a   :  { %16761 = vmatprep.subr.bf16.mxu0 %v16760_v24  ;;  %v21932_v1 = vpop.f32.mrb[109].mxu1 }
 0x91c   :  { %14867 = vmatmul.mubr.f32.gmra.mrb[60].mxu0 %v21834_v52  ;;  %v10816_v52 = vld [vmem:[%s23679_s3 + $0xbc0] sm:$0xff] }
 0x91d   :  { %16763 = vmatpush3.bf16.msra.mxu0 %v16760_v24  ;;  %14869 = vmatprep.mubr.f32.mxu0 %v21848_v53  ;;  %v21942_v39 = vpop.f32.mrb[110].mxu1  ;;  %v16784_v33 = vpack.c.bf16 %v10817_v41, %v10816_v52  ;;  %v10831_v24 = vld [vmem:[%s23679_s3 + $0xc38] sm:$0xff] }
 0x91e   :  { %16765 = vmatprep.subr.bf16.mxu0 %v16764_v29  ;;  %v21944_v62 = vpop.f32.mrb[111].mxu1 }
 0x920   :  { %14870 = vmatmul.mubr.f32.gmra.mrb[62].mxu0 %v21846_v38  ;;  %v10818_v38 = vld [vmem:[%s23679_s3 + $0xbd0] sm:$0xff] }
 0x921   :  { %16767 = vmatpush3.bf16.msra.mxu0 %v16764_v29  ;;  %14904 = vmatprep.mubr.f32.mxu0 %v21860_v51  ;;  %v21954_v23 = vpop.f32.mrb[112].mxu1  ;;  %v16788_v45 = vpack.c.bf16 %v10819_v48, %v10818_v38  ;;  %v10833_v29 = vld [vmem:[%s23679_s3 + $0xc48] sm:$0xff] }
 0x922   :  { %16769 = vmatprep.subr.bf16.mxu0 %v16768_v32  ;;  %v21956_v28 = vpop.f32.mrb[113].mxu1 }
 0x924   :  { %14905 = vmatmul.mubr.f32.vlgmr.msra.gmra.mrb[48].mxu0 %v21858_v43  ;;  %v10820_v43 = vld [vmem:[%s23679_s3 + $0xbe0] sm:$0xff] }
 0x925   :  { %16771 = vmatpush3.bf16.msra.mxu0 %v16768_v32  ;;  %14907 = vmatprep.mubr.f32.mxu0 %v21872_v60  ;;  %v21966_v49 = vpop.f32.mrb[114].mxu1  ;;  %v16792_v12 = vpack.c.bf16 %v10821_v10, %v10820_v43  ;;  %v10835_v32 = vld [vmem:[%s23679_s3 + $0xc58] sm:$0xff] }
 0x926   :  { %16773 = vmatprep.subr.bf16.mxu0 %v16772_v21  ;;  %v21968_v46 = vpop.f32.mrb[115].mxu1 }
 0x928   :  { %14908 = vmatmul.mubr.f32.gmra.mrb[50].mxu0 %v21870_v9  ;;  %v10822_v9 = vld [vmem:[%s23679_s3 + $0xbf0] sm:$0xff] }
 0x929   :  { %16775 = vmatpush3.bf16.msra.mxu0 %v16772_v21  ;;  %14910 = vmatprep.mubr.f32.mxu0 %v21884_v58  ;;  %v21978_v35 = vpop.f32.mrb[116].mxu1  ;;  %v16796_v22 = vpack.c.bf16 %v10823_v19, %v10822_v9  ;;  %v10837_v21 = vld [vmem:[%s23679_s3 + $0xc68] sm:$0xff] }
 0x92a   :  { %16777 = vmatprep.subr.bf16.mxu0 %v16776_v44  ;;  %v21980_v6 = vpop.f32.mrb[117].mxu1 }
 0x92c   :  { %14911 = vmatmul.mubr.f32.gmra.mrb[52].mxu0 %v21882_v26  ;;  %v10824_v26 = vld [vmem:[%s23679_s3 + $0xc00] sm:$0xff] }
 0x92d   :  { %16779 = vmatpush3.bf16.msra.mxu0 %v16776_v44  ;;  %14913 = vmatprep.mubr.f32.mxu0 %v21896_v30  ;;  %v21990_v14 = vpop.f32.mrb[118].mxu1  ;;  %v16800_v8 = vpack.c.bf16 %v10825_v5, %v10824_v26  ;;  %v10839_v44 = vld [vmem:[%s23679_s3 + $0xc78] sm:$0xff] }
 0x92e   :  { %16781 = vmatprep.subr.bf16.mxu0 %v16780_v7  ;;  %v21992_v40 = vpop.f32.mrb[119].mxu1 }
 0x930   :  { %14914 = vmatmul.mubr.f32.gmra.mrb[54].mxu0 %v21894_v59  ;;  %v10826_v59 = vld [vmem:[%s23679_s3 + $0xc10] sm:$0xff] }
 0x931   :  { %16783 = vmatpush3.bf16.msra.mxu0 %v16780_v7  ;;  %14916 = vmatprep.mubr.f32.mxu0 %v21908_v3  ;;  %v22002_v53 = vpop.f32.mrb[120].mxu1  ;;  %v16804_v2 = vpack.c.bf16 %v10827_v27, %v10826_v59  ;;  %v10841_v7 = vld [vmem:[%s23679_s3 + $0xc88] sm:$0xff] }
 0x932   :  { %16785 = vmatprep.subr.bf16.mxu0 %v16784_v33  ;;  %v22004_v0 = vpop.f32.mrb[121].mxu1 }
 0x934   :  { %14917 = vmatmul.mubr.f32.gmra.mrb[56].mxu0 %v21906_v34  ;;  %v10828_v34 = vld [vmem:[%s23679_s3 + $0xc20] sm:$0xff] }
 0x935   :  { %16787 = vmatpush3.bf16.msra.mxu0 %v16784_v33  ;;  %14919 = vmatprep.mubr.f32.mxu0 %v21920_v16  ;;  %v22014_v51 = vpop.f32.mrb[122].mxu1  ;;  %v16808_v25 = vpack.c.bf16 %v10829_v47, %v10828_v34  ;;  %v10843_v33 = vld [vmem:[%s23679_s3 + $0xc98] sm:$0xff] }
 0x936   :  { %16789 = vmatprep.subr.bf16.mxu0 %v16788_v45  ;;  %v22016_v55 = vpop.f32.mrb[123].mxu1 }
 0x938   :  { %14920 = vmatmul.mubr.f32.gmra.mrb[58].mxu0 %v21918_v56  ;;  %v10830_v56 = vld [vmem:[%s23679_s3 + $0xc30] sm:$0xff] }
 0x939   :  { %16791 = vmatpush3.bf16.msra.mxu0 %v16788_v45  ;;  %14922 = vmatprep.mubr.f32.mxu0 %v21932_v1  ;;  %v22026_v60 = vpop.f32.mrb[124].mxu1  ;;  %v16812_v20 = vpack.c.bf16 %v10831_v24, %v10830_v56  ;;  %v10845_v45 = vld [vmem:[%s23679_s3 + $0xca8] sm:$0xff] }
 0x93a   :  { %16793 = vmatprep.subr.bf16.mxu0 %v16792_v12  ;;  %v22028_v57 = vpop.f32.mrb[125].mxu1 }
 0x93c   :  { %14923 = vmatmul.mubr.f32.gmra.mrb[60].mxu0 %v21930_v13  ;;  %v10832_v13 = vld [vmem:[%s23679_s3 + $0xc40] sm:$0xff] }
 0x93d   :  { %16795 = vmatpush3.bf16.msra.mxu0 %v16792_v12  ;;  %14925 = vmatprep.mubr.f32.mxu0 %v21944_v62  ;;  %v22038_v58 = vpop.f32.mrb[126].mxu1  ;;  %v16816_v11 = vpack.c.bf16 %v10833_v29, %v10832_v13  ;;  %v10847_v12 = vld [vmem:[%s23679_s3 + $0xcb8] sm:$0xff] }
 0x93e   :  { %16797 = vmatprep.subr.bf16.mxu0 %v16796_v22  ;;  %v22040_v15 = vpop.f32.mrb[127].mxu1 }
 0x940   :  { %14926 = vmatmul.mubr.f32.gmra.mrb[62].mxu0 %v21942_v39  ;;  %v10834_v39 = vld [vmem:[%s23679_s3 + $0xc50] sm:$0xff] }
 0x941   :  { %16799 = vmatpush3.bf16.msra.mxu0 %v16796_v22  ;;  %14960 = vmatprep.mubr.f32.mxu0 %v21956_v28  ;;  %v22050_v30 = vpop.f32.mrb[128].mxu1  ;;  %v16820_v18 = vpack.c.bf16 %v10835_v32, %v10834_v39  ;;  %v10849_v22 = vld [vmem:[%s23679_s3 + $0xcc8] sm:$0xff] }
 0x942   :  { %16801 = vmatprep.subr.bf16.mxu0 %v16800_v8  ;;  %v22052_v31 = vpop.f32.mrb[129].mxu1 }
 0x944   :  { %14961 = vmatmul.mubr.f32.vlgmr.msra.gmra.mrb[48].mxu0 %v21954_v23  ;;  %v10836_v23 = vld [vmem:[%s23679_s3 + $0xc60] sm:$0xff] }
 0x945   :  { %16803 = vmatpush3.bf16.msra.mxu0 %v16800_v8  ;;  %14963 = vmatprep.mubr.f32.mxu0 %v21968_v46  ;;  %v22062_v3 = vpop.f32.mrb[130].mxu1  ;;  %v16824_v63 = vpack.c.bf16 %v10837_v21, %v10836_v23  ;;  %v10851_v8 = vld [vmem:[%s23679_s3 + $0xcd8] sm:$0xff] }
 0x946   :  { %16805 = vmatprep.subr.bf16.mxu0 %v16804_v2  ;;  %v22064_v54 = vpop.f32.mrb[131].mxu1 }
 0x948   :  { %14964 = vmatmul.mubr.f32.gmra.mrb[50].mxu0 %v21966_v49  ;;  %v10838_v49 = vld [vmem:[%s23679_s3 + $0xc70] sm:$0xff] }
 0x949   :  { %16807 = vmatpush3.bf16.msra.mxu0 %v16804_v2  ;;  %14966 = vmatprep.mubr.f32.mxu0 %v21980_v6  ;;  %v22074_v16 = vpop.f32.mrb[132].mxu1  ;;  %v16828_v36 = vpack.c.bf16 %v10839_v44, %v10838_v49  ;;  %v10853_v2 = vld [vmem:[%s23679_s3 + $0xce8] sm:$0xff] }
 0x94a   :  { %16809 = vmatprep.subr.bf16.mxu0 %v16808_v25  ;;  %v22076_v4 = vpop.f32.mrb[133].mxu1 }
 0x94c   :  { %14967 = vmatmul.mubr.f32.gmra.mrb[52].mxu0 %v21978_v35  ;;  %v10840_v35 = vld [vmem:[%s23679_s3 + $0xc80] sm:$0xff] }
 0x94d   :  { %16811 = vmatpush3.bf16.msra.mxu0 %v16808_v25  ;;  %14969 = vmatprep.mubr.f32.mxu0 %v21992_v40  ;;  %v22086_v1 = vpop.f32.mrb[134].mxu1  ;;  %v16832_v52 = vpack.c.bf16 %v10841_v7, %v10840_v35  ;;  %v10855_v25 = vld [vmem:[%s23679_s3 + $0xcf8] sm:$0xff] }
 0x94e   :  { %16813 = vmatprep.subr.bf16.mxu0 %v16812_v20  ;;  %v22088_v37 = vpop.f32.mrb[135].mxu1 }
 0x950   :  { %14970 = vmatmul.mubr.f32.gmra.mrb[54].mxu0 %v21990_v14  ;;  %v10842_v14 = vld [vmem:[%s23679_s3 + $0xc90] sm:$0xff] }
 0x951   :  { %16815 = vmatpush3.bf16.msra.mxu0 %v16812_v20  ;;  %14972 = vmatprep.mubr.f32.mxu0 %v22004_v0  ;;  %v22098_v62 = vpop.f32.mrb[136].mxu1  ;;  %v16836_v38 = vpack.c.bf16 %v10843_v33, %v10842_v14  ;;  %v10857_v20 = vld [vmem:[%s23679_s3 + $0xd08] sm:$0xff] }
 0x952   :  { %16817 = vmatprep.subr.bf16.mxu0 %v16816_v11  ;;  %v22100_v61 = vpop.f32.mrb[137].mxu1 }
 0x954   :  { %14973 = vmatmul.mubr.f32.gmra.mrb[56].mxu0 %v22002_v53  ;;  %v10844_v53 = vld [vmem:[%s23679_s3 + $0xca0] sm:$0xff] }
 0x955   :  { %16819 = vmatpush3.bf16.msra.mxu0 %v16816_v11  ;;  %14975 = vmatprep.mubr.f32.mxu0 %v22016_v55  ;;  %v22110_v28 = vpop.f32.mrb[138].mxu1  ;;  %v16840_v43 = vpack.c.bf16 %v10845_v45, %v10844_v53  ;;  %v10859_v11 = vld [vmem:[%s23679_s3 + $0xd18] sm:$0xff] }
 0x956   :  { %16821 = vmatprep.subr.bf16.mxu0 %v16820_v18  ;;  %v22112_v17 = vpop.f32.mrb[139].mxu1 }
 0x958   :  { %14976 = vmatmul.mubr.f32.gmra.mrb[58].mxu0 %v22014_v51  ;;  %v10846_v51 = vld [vmem:[%s23679_s3 + $0xcb0] sm:$0xff] }
 0x959   :  { %16823 = vmatpush3.bf16.msra.mxu0 %v16820_v18  ;;  %14978 = vmatprep.mubr.f32.mxu0 %v22028_v57  ;;  %v22122_v46 = vpop.f32.mrb[140].mxu1  ;;  %v16844_v9 = vpack.c.bf16 %v10847_v12, %v10846_v51  ;;  %v10861_v18 = vld [vmem:[%s23679_s3 + $0xd28] sm:$0xff] }
 0x95a   :  { %16825 = vmatprep.subr.bf16.mxu0 %v16824_v63  ;;  %v22124_v50 = vpop.f32.mrb[141].mxu1 }
 0x95c   :  { %14979 = vmatmul.mubr.f32.gmra.mrb[60].mxu0 %v22026_v60  ;;  %v10848_v60 = vld [vmem:[%s23679_s3 + $0xcc0] sm:$0xff] }
 0x95d   :  { %16827 = vmatpush3.bf16.msra.mxu0 %v16824_v63  ;;  %14981 = vmatprep.mubr.f32.mxu0 %v22040_v15  ;;  %v22134_v6 = vpop.f32.mrb[142].mxu1  ;;  %v16848_v26 = vpack.c.bf16 %v10849_v22, %v10848_v60  ;;  %v10863_v63 = vld [vmem:[%s23679_s3 + $0xd38] sm:$0xff]  ;;  %v18054_v60 = vld [vmem:[%s23680_s4] sm:$0xff] }
 0x95e   :  { %16829 = vmatprep.subr.bf16.mxu0 %v16828_v36  ;;  %v22136_v41 = vpop.f32.mrb[143].mxu1 }
 0x960   :  { %14982 = vmatmul.mubr.f32.gmra.mrb[62].mxu0 %v22038_v58  ;;  %v10850_v58 = vld [vmem:[%s23679_s3 + $0xcd0] sm:$0xff] }
 0x961   :  { %16831 = vmatpush3.bf16.msra.mxu0 %v16828_v36  ;;  %15016 = vmatprep.mubr.f32.mxu0 %v22052_v31  ;;  %v22146_v40 = vpop.f32.mrb[144].mxu1  ;;  %v16852_v59 = vpack.c.bf16 %v10851_v8, %v10850_v58  ;;  %v10865_v36 = vld [vmem:[%s23679_s3 + $0xd48] sm:$0xff] }
 0x962   :  { %16833 = vmatprep.subr.bf16.mxu0 %v16832_v52  ;;  %v22148_v48 = vpop.f32.mrb[145].mxu1 }
 0x964   :  { %15017 = vmatmul.mubr.f32.vlgmr.msra.gmra.mrb[48].mxu0 %v22050_v30  ;;  %v10852_v30 = vld [vmem:[%s23679_s3 + $0xce0] sm:$0xff] }
 0x965   :  { %16835 = vmatpush3.bf16.msra.mxu0 %v16832_v52  ;;  %15019 = vmatprep.mubr.f32.mxu0 %v22064_v54  ;;  %v22158_v0 = vpop.f32.mrb[146].mxu1  ;;  %v16856_v34 = vpack.c.bf16 %v10853_v2, %v10852_v30  ;;  %v10867_v52 = vld [vmem:[%s23679_s3 + $0xd58] sm:$0xff] }
 0x966   :  { %16837 = vmatprep.subr.bf16.mxu0 %v16836_v38  ;;  %v22160_v10 = vpop.f32.mrb[147].mxu1 }
 0x968   :  { %15020 = vmatmul.mubr.f32.gmra.mrb[50].mxu0 %v22062_v3  ;;  %v10854_v3 = vld [vmem:[%s23679_s3 + $0xcf0] sm:$0xff] }
 0x969   :  { %16839 = vmatpush3.bf16.msra.mxu0 %v16836_v38  ;;  %15022 = vmatprep.mubr.f32.mxu0 %v22076_v4  ;;  %v22170_v55 = vpop.f32.mrb[148].mxu1  ;;  %v16860_v56 = vpack.c.bf16 %v10855_v25, %v10854_v3  ;;  %v10869_v38 = vld [vmem:[%s23679_s3 + $0xd68] sm:$0xff] }
 0x96a   :  { %16841 = vmatprep.subr.bf16.mxu0 %v16840_v43  ;;  %v22172_v19 = vpop.f32.mrb[149].mxu1 }
 0x96c   :  { %15023 = vmatmul.mubr.f32.gmra.mrb[52].mxu0 %v22074_v16  ;;  %v10856_v16 = vld [vmem:[%s23679_s3 + $0xd00] sm:$0xff] }
 0x96d   :  { %16843 = vmatpush3.bf16.msra.mxu0 %v16840_v43  ;;  %15025 = vmatprep.mubr.f32.mxu0 %v22088_v37  ;;  %v22182_v57 = vpop.f32.mrb[150].mxu1  ;;  %v16864_v13 = vpack.c.bf16 %v10857_v20, %v10856_v16  ;;  %v10871_v43 = vld [vmem:[%s23679_s3 + $0xd78] sm:$0xff] }
 0x96e   :  { %16845 = vmatprep.subr.bf16.mxu0 %v16844_v9  ;;  %v22184_v5 = vpop.f32.mrb[151].mxu1 }
 0x970   :  { %15026 = vmatmul.mubr.f32.gmra.mrb[54].mxu0 %v22086_v1  ;;  %v10858_v1 = vld [vmem:[%s23679_s3 + $0xd10] sm:$0xff] }
 0x971   :  { %16847 = vmatpush3.bf16.msra.mxu0 %v16844_v9  ;;  %15028 = vmatprep.mubr.f32.mxu0 %v22100_v61  ;;  %v22194_v15 = vpop.f32.mrb[152].mxu1  ;;  %v16868_v39 = vpack.c.bf16 %v10859_v11, %v10858_v1 }
 0x972   :  { %16849 = vmatprep.subr.bf16.mxu0 %v16848_v26  ;;  %v22196_v27 = vpop.f32.mrb[153].mxu1 }
 0x974   :  { %15029 = vmatmul.mubr.f32.gmra.mrb[56].mxu0 %v22098_v62  ;;  %v10860_v62 = vld [vmem:[%s23679_s3 + $0xd20] sm:$0xff] }
 0x975   :  { %16851 = vmatpush3.bf16.msra.mxu0 %v16848_v26  ;;  %15031 = vmatprep.mubr.f32.mxu0 %v22112_v17  ;;  %v22206_v31 = vpop.f32.mrb[154].mxu1  ;;  %v16872_v23 = vpack.c.bf16 %v10861_v18, %v10860_v62 }
 0x976   :  { %16853 = vmatprep.subr.bf16.mxu0 %v16852_v59  ;;  %v22208_v47 = vpop.f32.mrb[155].mxu1 }
 0x978   :  { %15032 = vmatmul.mubr.f32.gmra.mrb[58].mxu0 %v22110_v28  ;;  %v10862_v28 = vld [vmem:[%s23679_s3 + $0xd30] sm:$0xff] }
 0x979   :  { %16855 = vmatpush3.bf16.msra.mxu0 %v16852_v59  ;;  %15034 = vmatprep.mubr.f32.mxu0 %v22124_v50  ;;  %v22218_v54 = vpop.f32.mrb[156].mxu1  ;;  %v16876_v49 = vpack.c.bf16 %v10863_v63, %v10862_v28 }
 0x97a   :  { %16857 = vmatprep.subr.bf16.mxu0 %v16856_v34  ;;  %v22220_v24 = vpop.f32.mrb[157].mxu1 }
 0x97c   :  { %15035 = vmatmul.mubr.f32.gmra.mrb[60].mxu0 %v22122_v46  ;;  %v10864_v46 = vld [vmem:[%s23679_s3 + $0xd40] sm:$0xff] }
 0x97d   :  { %16859 = vmatpush3.bf16.msra.mxu0 %v16856_v34  ;;  %15037 = vmatprep.mubr.f32.mxu0 %v22136_v41  ;;  %v22230_v4 = vpop.f32.mrb[158].mxu1  ;;  %v16880_v35 = vpack.c.bf16 %v10865_v36, %v10864_v46 }
 0x97e   :  { %16861 = vmatprep.subr.bf16.mxu0 %v16860_v56  ;;  %v22232_v29 = vpop.f32.mrb[159].mxu1 }
 0x980   :  { %15038 = vmatmul.mubr.f32.gmra.mrb[62].mxu0 %v22134_v6  ;;  %v10866_v6 = vld [vmem:[%s23679_s3 + $0xd50] sm:$0xff] }
 0x981   :  { %16863 = vmatpush3.bf16.msra.mxu0 %v16860_v56  ;;  %15072 = vmatprep.mubr.f32.mxu0 %v22148_v48  ;;  %v22242_v37 = vpop.f32.mrb[160].mxu1  ;;  %v16884_v14 = vpack.c.bf16 %v10867_v52, %v10866_v6 }
 0x982   :  { %16865 = vmatprep.subr.bf16.mxu0 %v16864_v13  ;;  %v6247_v32 = vpop.f32.mrb[161].mxu1 }
 0x984   :  { %15073 = vmatmul.mubr.f32.vlgmr.msra.gmra.mrb[48].mxu0 %v22146_v40  ;;  %v10868_v40 = vld [vmem:[%s23679_s3 + $0xd60] sm:$0xff] }
 0x985   :  { %16867 = vmatpush3.bf16.msra.mxu0 %v16864_v13  ;;  %15075 = vmatprep.mubr.f32.mxu0 %v22160_v10  ;;  %v14629_v61 = vpop.f32.mrb[162].mxu1  ;;  %v16888_v53 = vpack.c.bf16 %v10869_v38, %v10868_v40 }
 0x986   :  { %16869 = vmatprep.subr.bf16.mxu0 %v16868_v39  ;;  %v6257_v21 = vpop.f32.mrb[163].mxu1 }
 0x988   :  { %15076 = vmatmul.mubr.f32.gmra.mrb[50].mxu0 %v22158_v0  ;;  %v10870_v0 = vld [vmem:[%s23679_s3 + $0xd70] sm:$0xff] }
 0x989   :  { %16871 = vmatpush3.bf16.msra.mxu0 %v16868_v39  ;;  %15078 = vmatprep.mubr.f32.mxu0 %v22172_v19  ;;  %v14632_v17 = vpop.f32.mrb[164].mxu1  ;;  %v16892_v51 = vpack.c.bf16 %v10871_v43, %v10870_v0  ;;  %v7898_v19 = vsub.s32 3, %v18319_v42 }
 0x98a   :  { %16873 = vmatprep.subr.bf16.mxu0 %v16872_v23  ;;  %v6267_v44 = vpop.f32.mrb[165].mxu1 }
 0x98b   :  { %v22300_v22 = vrot.slane %v18054_v60, %v7898_v19 }
 0x98c   :  { %15079 = vmatmul.mubr.f32.gmra.mrb[52].mxu0 %v22170_v55 }
 0x98d   :  { %16875 = vmatpush3.bf16.msra.mxu0 %v16872_v23  ;;  %15081 = vmatprep.mubr.f32.mxu0 %v22184_v5  ;;  %v14635_v50 = vpop.f32.mrb[166].mxu1 }
 0x98e   :  { %16877 = vmatprep.subr.bf16.mxu0 %v16876_v49  ;;  %v6277_v7 = vpop.f32.mrb[167].mxu1 }
 0x990   :  { %15082 = vmatmul.mubr.f32.gmra.mrb[54].mxu0 %v22182_v57 }
 0x991   :  { %16879 = vmatpush3.bf16.msra.mxu0 %v16876_v49  ;;  %15084 = vmatprep.mubr.f32.mxu0 %v22196_v27  ;;  %v14638_v41 = vpop.f32.mrb[168].mxu1 }
 0x992   :  { %16881 = vmatprep.subr.bf16.mxu0 %v16880_v35  ;;  %v6287_v33 = vpop.f32.mrb[169].mxu1 }
 0x994   :  { %15085 = vmatmul.mubr.f32.gmra.mrb[56].mxu0 %v22194_v15 }
 0x995   :  { %16883 = vmatpush3.bf16.msra.mxu0 %v16880_v35  ;;  %15087 = vmatprep.mubr.f32.mxu0 %v22208_v47  ;;  %v14641_v48 = vpop.f32.mrb[170].mxu1 }
 0x996   :  { %16885 = vmatprep.subr.bf16.mxu0 %v16884_v14  ;;  %v6297_v45 = vpop.f32.mrb[171].mxu1 }
 0x998   :  { %15088 = vmatmul.mubr.f32.gmra.mrb[58].mxu0 %v22206_v31 }
 0x999   :  { %16887 = vmatpush3.bf16.msra.mxu0 %v16884_v14  ;;  %15090 = vmatprep.mubr.f32.mxu0 %v22220_v24  ;;  %v14644_v10 = vpop.f32.mrb[172].mxu1 }
 0x99a   :  { %16889 = vmatprep.subr.bf16.mxu0 %v16888_v53  ;;  %v6307_v12 = vpop.f32.mrb[173].mxu1 }
 0x99c   :  { %15091 = vmatmul.mubr.f32.gmra.mrb[60].mxu0 %v22218_v54 }
 0x99d   :  { %16891 = vmatpush3.bf16.msra.mxu0 %v16888_v53  ;;  %15093 = vmatprep.mubr.f32.mxu0 %v22232_v29  ;;  %v14647_v55 = vpop.f32.mrb[174].mxu1 }
 0x99e   :  { %16893 = vmatprep.subr.bf16.mxu0 %v16892_v51  ;;  %v6317_v9 = vpop.f32.mrb[175].mxu1 }
 0x9a0   :  { %15094 = vmatmul.mubr.f32.gmra.mrb[62].mxu0 %v22230_v4 }
 0x9a1   :  { %16895 = vmatpush3.bf16.msra.mxu0 %v16892_v51  ;;  %15128 = vmatprep.mubr.f32.mxu0 %v6247_v32 }
 0x9a4   :  { %15129 = vmatmul.mubr.f32.vlgmr.msra.gmra.mrb[48].mxu0 %v22242_v37 }
 0x9a5   :  { %15131 = vmatprep.mubr.f32.mxu0 %v6257_v21 }
 0x9a8   :  { %15132 = vmatmul.mubr.f32.gmra.mrb[50].mxu0 %v14629_v61 }
 0x9a9   :  { %15134 = vmatprep.mubr.f32.mxu0 %v6267_v44 }
 0x9ac   :  { %15135 = vmatmul.mubr.f32.gmra.mrb[52].mxu0 %v14632_v17 }
 0x9ad   :  { %15137 = vmatprep.mubr.f32.mxu0 %v6277_v7 }
 0x9b0   :  { %15138 = vmatmul.mubr.f32.gmra.mrb[54].mxu0 %v14635_v50 }
 0x9b1   :  { %15140 = vmatprep.mubr.f32.mxu0 %v6287_v33 }
 0x9b4   :  { %15141 = vmatmul.mubr.f32.gmra.mrb[56].mxu0 %v14638_v41 }
 0x9b5   :  { %15143 = vmatprep.mubr.f32.mxu0 %v6297_v45 }
 0x9b8   :  { %15144 = vmatmul.mubr.f32.gmra.mrb[58].mxu0 %v14641_v48 }
 0x9b9   :  { %15146 = vmatprep.mubr.f32.mxu0 %v6307_v12 }
 0x9bc   :  { %15147 = vmatmul.mubr.f32.gmra.mrb[60].mxu0 %v14644_v10 }
 0x9bd   :  { %15149 = vmatprep.mubr.f32.mxu0 %v6317_v9 }
 0x9c0   :  { %15150 = vmatmul.mubr.f32.gmra.mrb[62].mxu0 %v14647_v55 }
 0xa77   :  { %v15130_v57 = vpop.f32.mrb[48].mxu0 }
 0xa78   :  { %v22303_v26 = vadd.f32 %v15130_v57, %v22300_v22  ;;  %v7801_v5 = vpop.f32.mrb[49].mxu0 }
 0xa79   :  { %v22306_v58 = vadd.f32 %v22300_v22, %v7801_v5 }
 0xa7a   :  { %v7943_v8 = vmul.f32 %v22303_v26, %v22303_v26 }
 0xa7b   :  { %v7916_v15 = vadd.f32 %v22303_v26, %v22306_v58  ;;  %v7942_v59 = vmul.f32 %v22306_v58, %v22306_v58  ;;  %v15133_v27 = vpop.f32.mrb[50].mxu0 }
 0xa7c   :  { %v7811_v30 = vpop.f32.mrb[51].mxu0  ;;  %v22315_v31 = vadd.f32 %v15133_v27, %v22300_v22 }
 0xa7d   :  { %v7958_v2 = vadd.f32 %v7943_v8, %v7942_v59  ;;  %v22318_v34 = vadd.f32 %v22300_v22, %v7811_v30 }
 0xa7e   :  { %v7945_v24 = vmul.f32 %v22315_v31, %v22315_v31 }
 0xa7f   :  { %v7917_v47 = vadd.f32 %v7916_v15, %v22318_v34  ;;  %v7944_v3 = vmul.f32 %v22318_v34, %v22318_v34  ;;  %v15136_v25 = vpop.f32.mrb[52].mxu0 }
 0xa80   :  { %v22324_v54 = vadd.f32 %v15136_v25, %v22300_v22  ;;  %v7821_v56 = vpop.f32.mrb[53].mxu0 }
 0xa81   :  { %v7959_v16 = vadd.f32 %v7958_v2, %v7944_v3  ;;  %v22329_v20 = vadd.f32 %v22300_v22, %v7821_v56  ;;  %v7918_v4 = vadd.f32 %v7917_v47, %v22315_v31 }
 0xa82   :  { %v7947_v37 = vmul.f32 %v22324_v54, %v22324_v54 }
 0xa83   :  { %v7919_v13 = vadd.f32 %v7918_v4, %v22329_v20  ;;  %v7946_v29 = vmul.f32 %v22329_v20, %v22329_v20  ;;  %v7960_v1 = vadd.f32 %v7959_v16, %v7945_v24  ;;  %v15139_v11 = vpop.f32.mrb[54].mxu0 }
 0xa84   :  { %v7831_v39 = vpop.f32.mrb[55].mxu0  ;;  %v22338_v62 = vadd.f32 %v15139_v11, %v22300_v22 }
 0xa85   :  { %v7961_v32 = vadd.f32 %v7960_v1, %v7946_v29  ;;  %v22341_v18 = vadd.f32 %v22300_v22, %v7831_v39  ;;  %v7920_v61 = vadd.f32 %v7919_v13, %v22324_v54 }
 0xa86   :  { %v7949_v44 = vmul.f32 %v22338_v62, %v22338_v62 }
 0xa87   :  { %v7921_v23 = vadd.f32 %v7920_v61, %v22341_v18  ;;  %v7948_v21 = vmul.f32 %v22341_v18, %v22341_v18  ;;  %v7962_v28 = vadd.f32 %v7961_v32, %v7947_v37  ;;  %v15142_v63 = vpop.f32.mrb[56].mxu0 }
 0xa88   :  { %v22348_v17 = vadd.f32 %v15142_v63, %v22300_v22  ;;  %v7841_v49 = vpop.f32.mrb[57].mxu0 }
 0xa89   :  { %v7922_v46 = vadd.f32 %v7921_v23, %v22338_v62  ;;  %v7963_v36 = vadd.f32 %v7962_v28, %v7948_v21  ;;  %v22354_v50 = vadd.f32 %v22300_v22, %v7841_v49 }
 0xa8a   :  { %v7951_v35 = vmul.f32 %v22348_v17, %v22348_v17 }
 0xa8b   :  { %v7923_v7 = vrot.slane %v7922_v46, 4  ;;  %v7964_v6 = vadd.f32 %v7963_v36, %v7949_v44  ;;  %v7929_v52 = vadd.f32 %v22348_v17, %v22354_v50  ;;  %v7950_v41 = vmul.f32 %v22354_v50, %v22354_v50  ;;  %v15145_v14 = vpop.f32.mrb[58].mxu0 }
 0xa8c   :  { %v22363_v33 = vadd.f32 %v15145_v14, %v22300_v22  ;;  %v7851_v40 = vpop.f32.mrb[59].mxu0 }
 0xa8d   :  { %v7924_v38 = vadd.f32 %v7923_v7, %v7922_v46  ;;  %v7965_v48 = vrot.slane %v7964_v6, 4  ;;  %v7971_v53 = vadd.f32 %v7951_v35, %v7950_v41  ;;  %v22366_v45 = vadd.f32 %v22300_v22, %v7851_v40 }
 0xa8e   :  { %v7953_v55 = vmul.f32 %v22363_v33, %v22363_v33 }
 0xa8f   :  { %v7925_v0 = vrot.slane %v7924_v38, 2  ;;  %v7966_v43 = vadd.f32 %v7965_v48, %v7964_v6  ;;  %v7930_v10 = vadd.f32 %v7929_v52, %v22366_v45  ;;  %v7952_v51 = vmul.f32 %v22366_v45, %v22366_v45  ;;  %v15148_v12 = vpop.f32.mrb[60].mxu0 }
 0xa90   :  { %v22374_v9 = vadd.f32 %v15148_v12, %v22300_v22  ;;  %v7861_v19 = vpop.f32.mrb[61].mxu0 }
 0xa91   :  { %v7926_v60 = vadd.f32 %v7925_v0, %v7924_v38  ;;  %v7967_v57 = vrot.slane %v7966_v43, 2  ;;  %v7972_v5 = vadd.f32 %v7971_v53, %v7952_v51  ;;  %v22377_v8 = vadd.f32 %v22300_v22, %v7861_v19 }
 0xa92   :  { %v7931_v15 = vadd.f32 %v7930_v10, %v22363_v33  ;;  %v7955_v3 = vmul.f32 %v22374_v9, %v22374_v9 }
 0xa93   :  { %v7927_v59 = vrot.slane %v7926_v60, 1  ;;  %v7968_v27 = vadd.f32 %v7967_v57, %v7966_v43  ;;  %v7954_v30 = vmul.f32 %v22377_v8, %v22377_v8  ;;  %v7973_v2 = vadd.f32 %v7972_v5, %v7953_v55  ;;  %v15151_v47 = vpop.f32.mrb[62].mxu0 }
 0xa94   :  { %v7932_v25 = vadd.f32 %v7931_v15, %v22377_v8  ;;  %v22386_v56 = vadd.f32 %v15151_v47, %v22300_v22  ;;  %v7871_v24 = vpop.f32.mrb[63].mxu0 }
 0xa95   :  { %v7928_v16 = vadd.f32 %v7927_v59, %v7926_v60  ;;  %v7969_v4 = vrot.slane %v7968_v27, 1  ;;  %v7974_v13 = vadd.f32 %v7973_v2, %v7954_v30  ;;  %v22389_v29 = vadd.f32 %v22300_v22, %v7871_v24 }
 0xa96   :  { %v7933_v1 = vadd.f32 %v7932_v25, %v22374_v9  ;;  %v7957_v61 = vmul.f32 %v22386_v56, %v22386_v56 }
 0xa97   :  { %v7970_v11 = vadd.f32 %v7969_v4, %v7968_v27  ;;  %v7984_v37 = vmul.f32 0.015625, %v7928_v16  ;;  %v7956_v39 = vmul.f32 %v22389_v29, %v22389_v29  ;;  %v7975_v32 = vadd.f32 %v7974_v13, %v7955_v3 }
 0xa98   :  { %v7934_v23 = vadd.f32 %v7933_v1, %v22389_v29 }
 0xa99   :  { %v7986_v21 = vmul.f32 0.015625, %v7970_v11  ;;  %v7988_v28 = vmul.f32 %v7984_v37, %v7984_v37  ;;  %v7998_v63 = vsub.f32 %v22341_v18, %v7984_v37  ;;  %v7976_v49 = vadd.f32 %v7975_v32, %v7956_v39 }
 0xa9a   :  { %v7935_v22 = vadd.f32 %v7934_v23, %v22386_v56  ;;  %v7992_v44 = vsub.f32 %v22306_v58, %v7984_v37  ;;  %v7993_v46 = vsub.f32 %v22303_v26, %v7984_v37  ;;  %v7994_v36 = vsub.f32 %v22318_v34, %v7984_v37 }
 0xa9b   :  { %v7990_v35 = vsub.f32 %v7986_v21, %v7988_v28  ;;  %v7977_v7 = vadd.f32 %v7976_v49, %v7957_v61  ;;  %v7995_v6 = vsub.f32 %v22315_v31, %v7984_v37  ;;  %v7996_v52 = vsub.f32 %v22329_v20, %v7984_v37 }
 0xa9c   :  { %v7936_v41 = vrot.slane %v7935_v22, 4  ;;  %v7997_v14 = vsub.f32 %v22324_v54, %v7984_v37  ;;  %v7999_v18 = vsub.f32 %v22338_v62, %v7984_v37 }
 0xa9d   :  { %v8008_v40 = vadd.f32 1e-05, %v7990_v35  ;;  %v7978_v38 = vrot.slane %v7977_v7, 4 }
 0xa9e   :  { %v7937_v48 = vadd.f32 %v7936_v41, %v7935_v22 }
 0xa9f   :  { %17759 = vrsqrt.f32 %v8008_v40  ;;  %v7979_v58 = vadd.f32 %v7978_v38, %v7977_v7 }
 0xaa0   :  { %v7938_v53 = vrot.slane %v7937_v48, 2 }
 0xaa1   :  { %v7980_v26 = vrot.slane %v7979_v58, 2 }
 0xaa2   :  { %v7939_v0 = vadd.f32 %v7938_v53, %v7937_v48 }
 0xaa3   :  { %v7981_v34 = vadd.f32 %v7980_v26, %v7979_v58 }
 0xaa4   :  { %v7940_v43 = vrot.slane %v7939_v0, 1 }
 0xaa5   :  { %v7982_v10 = vrot.slane %v7981_v34, 1 }
 0xaa6   :  { %v7941_v51 = vadd.f32 %v7940_v43, %v7939_v0 }
 0xaa7   :  { %v7983_v31 = vadd.f32 %v7982_v10, %v7981_v34 }
 0xaa8   :  { %v7985_v12 = vmul.f32 0.015625, %v7941_v51 }
 0xaa9   :  { %v17760_v20 = vpop.eup %17759  ;;  %v7987_v55 = vmul.f32 0.015625, %v7983_v31 }
 0xaaa   :  { %v8018_v19 = vmul.f32 %v17760_v20, %v7998_v63  ;;  %v7989_v54 = vmul.f32 %v7985_v12, %v7985_v12  ;;  %v8006_v62 = vsub.f32 %v22389_v29, %v7985_v12  ;;  %v8012_v60 = vmul.f32 %v17760_v20, %v7992_v44 }
 0xaab   :  { %v8013_v57 = vmul.f32 %v17760_v20, %v7993_v46  ;;  %v8014_v5 = vmul.f32 %v17760_v20, %v7994_v36  ;;  %v8015_v15 = vmul.f32 %v17760_v20, %v7995_v6  ;;  %v8016_v59 = vmul.f32 %v17760_v20, %v7996_v52 }
 0xaac   :  { %v7991_v27 = vsub.f32 %v7987_v55, %v7989_v54  ;;  %v8028_v30 = vmul.f32 0.01, %v8012_v60  ;;  %v8017_v2 = vmul.f32 %v17760_v20, %v7997_v14  ;;  %v8019_v47 = vmul.f32 %v17760_v20, %v7999_v18 }
 0xaad   :  { %v8029_v3 = vmul.f32 0.01, %v8013_v57  ;;  %v8030_v25 = vmul.f32 0.01, %v8014_v5  ;;  %v8031_v24 = vmul.f32 0.01, %v8015_v15  ;;  %v8000_v16 = vsub.f32 %v22354_v50, %v7985_v12 }
 0xaae   :  { %v8009_v4 = vadd.f32 1e-05, %v7991_v27  ;;  %v8044_v13 = vmax.f32 %v8012_v60, %v8028_v30  ;;  %v8032_v1 = vmul.f32 0.01, %v8016_v59  ;;  %v8033_v11 = vmul.f32 0.01, %v8017_v2 }
 0xaaf   :  { %v8045_v37 = vmax.f32 %v8013_v57, %v8029_v3  ;;  %v8046_v29 = vmax.f32 %v8014_v5, %v8030_v25  ;;  %v8047_v39 = vmax.f32 %v8015_v15, %v8031_v24  ;;  %v8034_v32 = vmul.f32 0.01, %v8018_v19  ;;  %v18055_v5 = vld [vmem:[%s23678_s2 + $0x8] sm:$0xff]  ;;  %v18056_v15 = vld [vmem:[%s23678_s2 + $0x10] sm:$0xff]  ;;  %v18058_v27 = vld [vmem:[%s23678_s2 + $0x20] sm:$0xff] }
 0xab0   :  { %17761 = vrsqrt.f32 %v8009_v4  ;;  %v8048_v61 = vmax.f32 %v8016_v59, %v8032_v1  ;;  %v8049_v23 = vmax.f32 %v8017_v2, %v8033_v11  ;;  %v8035_v21 = vmul.f32 0.01, %v8019_v47  ;;  %v18057_v59 = vld [vmem:[%s23678_s2 + $0x18] sm:$0xff]  ;;  %v18059_v30 = vld [vmem:[%s23678_s2 + $0x28] sm:$0xff]  ;;  %v18060_v2 = vld [vmem:[%s23678_s2 + $0x30] sm:$0xff] }
 0xab1   :  { %v16896_v28 = vpack.c.bf16 %v8045_v37, %v8044_v13  ;;  %v16900_v63 = vpack.c.bf16 %v8047_v39, %v8046_v29  ;;  %v8050_v49 = vmax.f32 %v8018_v19, %v8034_v32  ;;  %v8001_v22 = vsub.f32 %v22348_v17, %v7985_v12  ;;  %v18062_v3 = vld [vmem:[%s23678_s2 + $0x40] sm:$0xff]  ;;  %v18063_v25 = vld [vmem:[%s23678_s2 + $0x48] sm:$0xff]  ;;  %v18064_v24 = vld [vmem:[%s23678_s2 + $0x50] sm:$0xff] }
 0xab2   :  { %v16904_v44 = vpack.c.bf16 %v8049_v23, %v8048_v61  ;;  %v8051_v46 = vmax.f32 %v8019_v47, %v8035_v21  ;;  %v8002_v50 = vsub.f32 %v22366_v45, %v7985_v12  ;;  %v8003_v36 = vsub.f32 %v22363_v33, %v7985_v12  ;;  %v18061_v47 = vld [vmem:[%s23678_s2 + $0x38] sm:$0xff]  ;;  %v18066_v4 = vld [vmem:[%s23678_s2 + $0x60] sm:$0xff]  ;;  %v18067_v13 = vld [vmem:[%s23678_s2 + $0x68] sm:$0xff] }
 0xab3   :  { %16897 = vmatprep.subr.bf16.mxu1 %v16896_v28  ;;  %v8004_v35 = vsub.f32 %v22377_v8, %v7985_v12  ;;  %v8005_v7 = vsub.f32 %v22374_v9, %v7985_v12  ;;  %v8007_v6 = vsub.f32 %v22386_v56, %v7985_v12  ;;  %v18068_v1 = vld [vmem:[%s23678_s2 + $0x70] sm:$0xff]  ;;  %v18069_v11 = vld [vmem:[%s23678_s2 + $0x78] sm:$0xff]  ;;  %v18070_v37 = vld [vmem:[%s23678_s2 + $0x80] sm:$0xff] }
 0xab4   :  { %16899 = vmatpush3.bf16.msra.mxu1 %v16896_v28  ;;  %v16908_v52 = vpack.c.bf16 %v8051_v46, %v8050_v49  ;;  %v18071_v29 = vld [vmem:[%s23678_s2 + $0x88] sm:$0xff]  ;;  %v18072_v39 = vld [vmem:[%s23678_s2 + $0x90] sm:$0xff]  ;;  %v18073_v32 = vld [vmem:[%s23678_s2 + $0x98] sm:$0xff] }
 0xab5   :  { %16901 = vmatprep.subr.bf16.mxu1 %v16900_v63  ;;  %v18074_v61 = vld [vmem:[%s23678_s2 + $0xa0] sm:$0xff]  ;;  %v18075_v23 = vld [vmem:[%s23678_s2 + $0xa8] sm:$0xff]  ;;  %v18076_v21 = vld [vmem:[%s23678_s2 + $0xb0] sm:$0xff] }
 0xab6   :  { %v18077_v28 = vld [vmem:[%s23678_s2 + $0xb8] sm:$0xff]  ;;  %v18079_v49 = vld [vmem:[%s23678_s2 + $0xc8] sm:$0xff]  ;;  %v18082_v46 = vld [vmem:[%s23678_s2 + $0xe0] sm:$0xff] }
 0xab8   :  { %16903 = vmatpush3.bf16.msra.mxu1 %v16900_v63  ;;  %v18078_v63 = vld [vmem:[%s23678_s2 + $0xc0] sm:$0xff] }
 0xab9   :  { %16905 = vmatprep.subr.bf16.mxu1 %v16904_v44 }
 0xaba   :  { %v17762_v41 = vpop.eup %17761 }
 0xabb   :  { %v8026_v17 = vmul.f32 %v17762_v41, %v8006_v62  ;;  %v8020_v14 = vmul.f32 %v17762_v41, %v8000_v16  ;;  %v8021_v18 = vmul.f32 %v17762_v41, %v8001_v22  ;;  %v8022_v40 = vmul.f32 %v17762_v41, %v8002_v50  ;;  %v18065_v16 = vld [vmem:[%s23678_s2 + $0x58] sm:$0xff]  ;;  %v18080_v22 = vld [vmem:[%s23678_s2 + $0xd0] sm:$0xff]  ;;  %v18083_v50 = vld [vmem:[%s23678_s2 + $0xe8] sm:$0xff] }
 0xabc   :  { %16907 = vmatpush3.bf16.msra.mxu1 %v16904_v44  ;;  %v8023_v45 = vmul.f32 %v17762_v41, %v8003_v36  ;;  %v8024_v33 = vmul.f32 %v17762_v41, %v8004_v35  ;;  %v8025_v38 = vmul.f32 %v17762_v41, %v8005_v7  ;;  %v8027_v48 = vmul.f32 %v17762_v41, %v8007_v6  ;;  %v18081_v44 = vld [vmem:[%s23678_s2 + $0xd8] sm:$0xff]  ;;  %v18084_v36 = vld [vmem:[%s23678_s2 + $0xf0] sm:$0xff]  ;;  %v18086_v7 = vld [vmem:[%s23678_s2 + $0x100] sm:$0xff] }
 0xabd   :  { %16909 = vmatprep.subr.bf16.mxu1 %v16908_v52  ;;  %v8036_v8 = vmul.f32 0.01, %v8020_v14  ;;  %v8037_v9 = vmul.f32 0.01, %v8021_v18  ;;  %v8038_v58 = vmul.f32 0.01, %v8022_v40 }
 0xabe   :  { %v8039_v56 = vmul.f32 0.01, %v8023_v45  ;;  %v8040_v53 = vmul.f32 0.01, %v8024_v33  ;;  %v8041_v26 = vmul.f32 0.01, %v8025_v38 }
 0xabf   :  { %v8052_v0 = vmax.f32 %v8020_v14, %v8036_v8  ;;  %v8053_v34 = vmax.f32 %v8021_v18, %v8037_v9  ;;  %v8054_v43 = vmax.f32 %v8022_v40, %v8038_v58  ;;  %v8042_v10 = vmul.f32 0.01, %v8026_v17  ;;  %v18085_v35 = vld [vmem:[%s23678_s2 + $0xf8] sm:$0xff]  ;;  %v18087_v6 = vld [vmem:[%s23678_s2 + $0x108] sm:$0xff]  ;;  %v18092_v18 = vld [vmem:[%s23678_s2 + $0x130] sm:$0xff] }
 0xac0   :  { %16911 = vmatpush3.bf16.msra.mxu1 %v16908_v52  ;;  %v8055_v51 = vmax.f32 %v8023_v45, %v8039_v56  ;;  %v8056_v31 = vmax.f32 %v8024_v33, %v8040_v53  ;;  %v8057_v12 = vmax.f32 %v8025_v38, %v8041_v26  ;;  %v8043_v20 = vmul.f32 0.01, %v8027_v48  ;;  %v18088_v52 = vld [vmem:[%s23678_s2 + $0x110] sm:$0xff]  ;;  %v18089_v41 = vld [vmem:[%s23678_s2 + $0x118] sm:$0xff]  ;;  %v18091_v14 = vld [vmem:[%s23678_s2 + $0x128] sm:$0xff] }
 0xac1   :  { %v16912_v55 = vpack.c.bf16 %v8053_v34, %v8052_v0  ;;  %v8058_v19 = vmax.f32 %v8026_v17, %v8042_v10  ;;  %v18090_v17 = vld [vmem:[%s23678_s2 + $0x120] sm:$0xff]  ;;  %v18093_v40 = vld [vmem:[%s23678_s2 + $0x138] sm:$0xff]  ;;  %v18095_v33 = vld [vmem:[%s23678_s2 + $0x148] sm:$0xff] }
 0xac2   :  { %v16916_v54 = vpack.c.bf16 %v8055_v51, %v8054_v43  ;;  %v16920_v62 = vpack.c.bf16 %v8057_v12, %v8056_v31  ;;  %v8059_v60 = vmax.f32 %v8027_v48, %v8043_v20  ;;  %v18094_v45 = vld [vmem:[%s23678_s2 + $0x140] sm:$0xff]  ;;  %v18096_v38 = vld [vmem:[%s23678_s2 + $0x150] sm:$0xff]  ;;  %v18097_v48 = vld [vmem:[%s23678_s2 + $0x158] sm:$0xff] }
 0xac3   :  { %16913 = vmatprep.subr.bf16.mxu1 %v16912_v55  ;;  %v10888_v8 = vld [vmem:[%s23679_s3 + $0xe00] sm:$0xff]  ;;  %v10889_v9 = vld [vmem:[%s23679_s3 + $0xe08] sm:$0xff]  ;;  %v10890_v26 = vld [vmem:[%s23679_s3 + $0xe10] sm:$0xff] }
 0xac4   :  { %16915 = vmatpush3.bf16.msra.mxu1 %v16912_v55  ;;  %v16924_v57 = vpack.c.bf16 %v8059_v60, %v8058_v19  ;;  %v18098_v58 = vld [vmem:[%s23678_s2 + $0x160] sm:$0xff]  ;;  %v16928_v56 = vpack.c.bf16 %v10889_v9, %v10888_v8  ;;  %v18099_v53 = vld [vmem:[%s23678_s2 + $0x168] sm:$0xff]  ;;  %v10891_v0 = vld [vmem:[%s23679_s3 + $0xe18] sm:$0xff] }
 0xac5   :  { %16917 = vmatprep.subr.bf16.mxu1 %v16916_v54  ;;  %v18100_v34 = vld [vmem:[%s23678_s2 + $0x170] sm:$0xff]  ;;  %v16932_v43 = vpack.c.bf16 %v10891_v0, %v10890_v26  ;;  %v18101_v10 = vld [vmem:[%s23678_s2 + $0x178] sm:$0xff]  ;;  %v10892_v51 = vld [vmem:[%s23679_s3 + $0xe20] sm:$0xff] }
 0xac6   :  { %16929 = vmatprep.subr.bf16.mxu0 %v16928_v56  ;;  %v10893_v31 = vld [vmem:[%s23679_s3 + $0xe28] sm:$0xff]  ;;  %v18102_v12 = vld [vmem:[%s23678_s2 + $0x180] sm:$0xff]  ;;  %v10894_v19 = vld [vmem:[%s23679_s3 + $0xe30] sm:$0xff] }
 0xac7   :  { %16931 = vmatpush3.bf16.msra.mxu0 %v16928_v56  ;;  %v16936_v20 = vpack.c.bf16 %v10893_v31, %v10892_v51  ;;  %v18103_v55 = vld [vmem:[%s23678_s2 + $0x188] sm:$0xff]  ;;  %v18134_v8 = vld [vmem:[%s23678_s2 + $0x280] sm:$0xff]  ;;  %v18137_v56 = vld [vmem:[%s23678_s2 + $0x298] sm:$0xff] }
 0xac8   :  { %16919 = vmatpush3.bf16.msra.mxu1 %v16916_v54  ;;  %16933 = vmatprep.subr.bf16.mxu0 %v16932_v43  ;;  %v10895_v54 = vld [vmem:[%s23679_s3 + $0xe38] sm:$0xff]  ;;  %v18135_v9 = vld [vmem:[%s23678_s2 + $0x288] sm:$0xff]  ;;  %v18140_v0 = vld [vmem:[%s23678_s2 + $0x2b0] sm:$0xff] }
 0xac9   :  { %16921 = vmatprep.subr.bf16.mxu1 %v16920_v62  ;;  %v16940_v60 = vpack.c.bf16 %v10895_v54, %v10894_v19  ;;  %v18139_v26 = vld [vmem:[%s23678_s2 + $0x2a8] sm:$0xff]  ;;  %v18144_v51 = vld [vmem:[%s23678_s2 + $0x2d0] sm:$0xff]  ;;  %v18145_v31 = vld [vmem:[%s23678_s2 + $0x2d8] sm:$0xff] }
 0xaca   :  { %v18149_v19 = vld [vmem:[%s23678_s2 + $0x2f8] sm:$0xff]  ;;  %v18150_v54 = vld [vmem:[%s23678_s2 + $0x300] sm:$0xff] }
 0xacb   :  { %16935 = vmatpush3.bf16.msra.mxu0 %v16932_v43  ;;  %v18142_v43 = vld [vmem:[%s23678_s2 + $0x2c0] sm:$0xff] }
 0xacc   :  { %16923 = vmatpush3.bf16.msra.mxu1 %v16920_v62  ;;  %16937 = vmatprep.subr.bf16.mxu0 %v16936_v20  ;;  %v18104_v62 = vld [vmem:[%s23678_s2 + $0x190] sm:$0xff] }
 0xacd   :  { %16925 = vmatprep.subr.bf16.mxu1 %v16924_v57 }
 0xacf   :  { %16939 = vmatpush3.bf16.msra.mxu0 %v16936_v20  ;;  %v18147_v20 = vld [vmem:[%s23678_s2 + $0x2e8] sm:$0xff] }
 0xad0   :  { %16927 = vmatpush3.bf16.msra.mxu1 %v16924_v57  ;;  %16941 = vmatprep.subr.bf16.mxu0 %v16940_v60  ;;  %v18105_v57 = vld [vmem:[%s23678_s2 + $0x198] sm:$0xff] }
 0xad3   :  { %15185 = vmatmul.mubr.f32.vlgmr.msra.gmra.mrb[176].mxu1 %v18055_v5  ;;  %16943 = vmatpush3.bf16.msra.mxu0 %v16940_v60  ;;  %v10896_v5 = vld [vmem:[%s23679_s3 + $0xe40] sm:$0xff]  ;;  %v18152_v60 = vld [vmem:[%s23678_s2 + $0x310] sm:$0xff] }
 0xad4   :  { %15187 = vmatprep.mubr.f32.mxu1 %v18056_v15  ;;  %v10897_v15 = vld [vmem:[%s23679_s3 + $0xe48] sm:$0xff] }
 0xad7   :  { %15188 = vmatmul.mubr.f32.gmra.mrb[178].mxu1 %v18057_v59  ;;  %v18106_v59 = vld [vmem:[%s23678_s2 + $0x1a0] sm:$0xff] }
 0xad8   :  { %15190 = vmatprep.mubr.f32.mxu1 %v18058_v27  ;;  %v16944_v27 = vpack.c.bf16 %v10897_v15, %v10896_v5  ;;  %v18154_v5 = vld [vmem:[%s23678_s2 + $0x320] sm:$0xff]  ;;  %v18155_v15 = vld [vmem:[%s23678_s2 + $0x328] sm:$0xff] }
 0xada   :  { %16945 = vmatprep.subr.bf16.mxu0 %v16944_v27 }
 0xadb   :  { %15191 = vmatmul.mubr.f32.gmra.mrb[180].mxu1 %v18059_v30  ;;  %v18107_v30 = vld [vmem:[%s23678_s2 + $0x1a8] sm:$0xff]  ;;  %16947 = vmatpush3.bf16.msra.mxu0 %v16944_v27  ;;  %v18157_v27 = vld [vmem:[%s23678_s2 + $0x338] sm:$0xff] }
 0xadc   :  { %15193 = vmatprep.mubr.f32.mxu1 %v18060_v2  ;;  %v10898_v2 = vld [vmem:[%s23679_s3 + $0xe50] sm:$0xff] }
 0xadf   :  { %15194 = vmatmul.mubr.f32.gmra.mrb[182].mxu1 %v18061_v47  ;;  %v10899_v47 = vld [vmem:[%s23679_s3 + $0xe58] sm:$0xff] }
 0xae0   :  { %15196 = vmatprep.mubr.f32.mxu1 %v18062_v3  ;;  %v18108_v3 = vld [vmem:[%s23678_s2 + $0x1b0] sm:$0xff] }
 0xae3   :  { %15197 = vmatmul.mubr.f32.gmra.mrb[184].mxu1 %v18063_v25  ;;  %v16948_v25 = vpack.c.bf16 %v10899_v47, %v10898_v2  ;;  %v18159_v2 = vld [vmem:[%s23678_s2 + $0x348] sm:$0xff]  ;;  %v18160_v47 = vld [vmem:[%s23678_s2 + $0x350] sm:$0xff] }
 0xae4   :  { %15199 = vmatprep.mubr.f32.mxu1 %v18064_v24  ;;  %v18109_v24 = vld [vmem:[%s23678_s2 + $0x1b8] sm:$0xff] }
 0xae5   :  { %16949 = vmatprep.subr.bf16.mxu0 %v16948_v25 }
 0xae6   :  { %16951 = vmatpush3.bf16.msra.mxu0 %v16948_v25  ;;  %v18161_v25 = vld [vmem:[%s23678_s2 + $0x358] sm:$0xff] }
 0xae7   :  { %15200 = vmatmul.mubr.f32.gmra.mrb[186].mxu1 %v18065_v16  ;;  %v10900_v16 = vld [vmem:[%s23679_s3 + $0xe60] sm:$0xff] }
 0xae8   :  { %15202 = vmatprep.mubr.f32.mxu1 %v18066_v4  ;;  %v10901_v4 = vld [vmem:[%s23679_s3 + $0xe68] sm:$0xff] }
 0xaeb   :  { %15203 = vmatmul.mubr.f32.gmra.mrb[188].mxu1 %v18067_v13  ;;  %v18110_v13 = vld [vmem:[%s23678_s2 + $0x1c0] sm:$0xff] }
 0xaec   :  { %15205 = vmatprep.mubr.f32.mxu1 %v18068_v1  ;;  %v16952_v1 = vpack.c.bf16 %v10901_v4, %v10900_v16  ;;  %v18162_v16 = vld [vmem:[%s23678_s2 + $0x360] sm:$0xff] }
 0xaee   :  { %16953 = vmatprep.subr.bf16.mxu0 %v16952_v1 }
 0xaef   :  { %15206 = vmatmul.mubr.f32.gmra.mrb[190].mxu1 %v18069_v11  ;;  %v18111_v11 = vld [vmem:[%s23678_s2 + $0x1c8] sm:$0xff]  ;;  %16955 = vmatpush3.bf16.msra.mxu0 %v16952_v1 }
 0xaf0   :  { %15208 = vmatprep.mubr.f32.mxu1 %v18070_v37  ;;  %v10902_v37 = vld [vmem:[%s23679_s3 + $0xe70] sm:$0xff] }
 0xaf3   :  { %15209 = vmatmul.mubr.f32.gmra.mrb[192].mxu1 %v18071_v29  ;;  %v10903_v29 = vld [vmem:[%s23679_s3 + $0xe78] sm:$0xff] }
 0xaf4   :  { %15211 = vmatprep.mubr.f32.mxu1 %v18072_v39  ;;  %v18112_v39 = vld [vmem:[%s23678_s2 + $0x1d0] sm:$0xff] }
 0xaf7   :  { %15212 = vmatmul.mubr.f32.gmra.mrb[194].mxu1 %v18073_v32  ;;  %v16956_v32 = vpack.c.bf16 %v10903_v29, %v10902_v37  ;;  %v18165_v29 = vld [vmem:[%s23678_s2 + $0x378] sm:$0xff] }
 0xaf8   :  { %15214 = vmatprep.mubr.f32.mxu1 %v18074_v61  ;;  %v18113_v61 = vld [vmem:[%s23678_s2 + $0x1d8] sm:$0xff] }
 0xaf9   :  { %16957 = vmatprep.subr.bf16.mxu0 %v16956_v32 }
 0xafa   :  { %16959 = vmatpush3.bf16.msra.mxu0 %v16956_v32  ;;  %v18166_v32 = vld [vmem:[%s23678_s2 + $0x380] sm:$0xff] }
 0xafb   :  { %15215 = vmatmul.mubr.f32.gmra.mrb[196].mxu1 %v18075_v23  ;;  %v18114_v23 = vld [vmem:[%s23678_s2 + $0x1e0] sm:$0xff] }
 0xafc   :  { %15217 = vmatprep.mubr.f32.mxu1 %v18076_v21  ;;  %v10872_v21 = vld [vmem:[%s23679_s3 + $0xd80] sm:$0xff] }
 0xaff   :  { %15218 = vmatmul.mubr.f32.gmra.mrb[198].mxu1 %v18077_v28  ;;  %v10873_v28 = vld [vmem:[%s23679_s3 + $0xd88] sm:$0xff] }
 0xb00   :  { %15220 = vmatprep.mubr.f32.mxu1 %v18078_v63  ;;  %v22648_v63 = vpack.c.bf16 %v10873_v28, %v10872_v21  ;;  %v18168_v28 = vld [vmem:[%s23678_s2 + $0x390] sm:$0xff] }
 0xb02   :  { %16961 = vmatprep.subr.bf16.mxu0 %v22648_v63 }
 0xb03   :  { %15221 = vmatmul.mubr.f32.gmra.mrb[200].mxu1 %v18079_v49  ;;  %v18115_v49 = vld [vmem:[%s23678_s2 + $0x1e8] sm:$0xff] }
 0xb04   :  { %15223 = vmatprep.mubr.f32.mxu1 %v18080_v22  ;;  %v18116_v22 = vld [vmem:[%s23678_s2 + $0x1f0] sm:$0xff] }
 0xb07   :  { %15224 = vmatmul.mubr.f32.gmra.mrb[202].mxu1 %v18081_v44  ;;  %v18117_v44 = vld [vmem:[%s23678_s2 + $0x1f8] sm:$0xff] }
 0xb08   :  { %15226 = vmatprep.mubr.f32.mxu1 %v18082_v46  ;;  %v18118_v46 = vld [vmem:[%s23678_s2 + $0x200] sm:$0xff] }
 0xb0b   :  { %15227 = vmatmul.mubr.f32.gmra.mrb[204].mxu1 %v18083_v50  ;;  %v18119_v50 = vld [vmem:[%s23678_s2 + $0x208] sm:$0xff] }
 0xb0c   :  { %15229 = vmatprep.mubr.f32.mxu1 %v18084_v36  ;;  %v18120_v36 = vld [vmem:[%s23678_s2 + $0x210] sm:$0xff] }
 0xb0f   :  { %15230 = vmatmul.mubr.f32.gmra.mrb[206].mxu1 %v18085_v35  ;;  %v18121_v35 = vld [vmem:[%s23678_s2 + $0x218] sm:$0xff] }
 0xb10   :  { %15232 = vmatprep.mubr.f32.mxu1 %v18086_v7  ;;  %v18122_v7 = vld [vmem:[%s23678_s2 + $0x220] sm:$0xff] }
 0xb13   :  { %15233 = vmatmul.mubr.f32.gmra.mrb[208].mxu1 %v18087_v6  ;;  %v18123_v6 = vld [vmem:[%s23678_s2 + $0x228] sm:$0xff] }
 0xb14   :  { %15235 = vmatprep.mubr.f32.mxu1 %v18088_v52  ;;  %v18124_v52 = vld [vmem:[%s23678_s2 + $0x230] sm:$0xff] }
 0xb17   :  { %15236 = vmatmul.mubr.f32.gmra.mrb[210].mxu1 %v18089_v41  ;;  %v18125_v41 = vld [vmem:[%s23678_s2 + $0x238] sm:$0xff] }
 0xb18   :  { %15238 = vmatprep.mubr.f32.mxu1 %v18090_v17  ;;  %v18126_v17 = vld [vmem:[%s23678_s2 + $0x240] sm:$0xff] }
 0xb1b   :  { %15239 = vmatmul.mubr.f32.gmra.mrb[212].mxu1 %v18091_v14  ;;  %v18127_v14 = vld [vmem:[%s23678_s2 + $0x248] sm:$0xff] }
 0xb1c   :  { %15241 = vmatprep.mubr.f32.mxu1 %v18092_v18  ;;  %v18128_v18 = vld [vmem:[%s23678_s2 + $0x250] sm:$0xff] }
 0xb1f   :  { %15242 = vmatmul.mubr.f32.gmra.mrb[214].mxu1 %v18093_v40  ;;  %v18129_v40 = vld [vmem:[%s23678_s2 + $0x258] sm:$0xff] }
 0xb20   :  { %15244 = vmatprep.mubr.f32.mxu1 %v18094_v45  ;;  %v18130_v45 = vld [vmem:[%s23678_s2 + $0x260] sm:$0xff] }
 0xb23   :  { %15245 = vmatmul.mubr.f32.gmra.mrb[216].mxu1 %v18095_v33  ;;  %v18131_v33 = vld [vmem:[%s23678_s2 + $0x268] sm:$0xff] }
 0xb24   :  { %15247 = vmatprep.mubr.f32.mxu1 %v18096_v38  ;;  %v18132_v38 = vld [vmem:[%s23678_s2 + $0x270] sm:$0xff] }
 0xb27   :  { %15248 = vmatmul.mubr.f32.gmra.mrb[218].mxu1 %v18097_v48  ;;  %v18133_v48 = vld [vmem:[%s23678_s2 + $0x278] sm:$0xff] }
 0xb28   :  { %15250 = vmatprep.mubr.f32.mxu1 %v18098_v58  ;;  %v18136_v58 = vld [vmem:[%s23678_s2 + $0x290] sm:$0xff] }
 0xb2b   :  { %15251 = vmatmul.mubr.f32.gmra.mrb[220].mxu1 %v18099_v53  ;;  %v18138_v53 = vld [vmem:[%s23678_s2 + $0x2a0] sm:$0xff] }
 0xb2c   :  { %15253 = vmatprep.mubr.f32.mxu1 %v18100_v34  ;;  %v18141_v34 = vld [vmem:[%s23678_s2 + $0x2b8] sm:$0xff] }
 0xb2f   :  { %15254 = vmatmul.mubr.f32.gmra.mrb[222].mxu1 %v18101_v10  ;;  %v18143_v10 = vld [vmem:[%s23678_s2 + $0x2c8] sm:$0xff] }
 0xb30   :  { %15256 = vmatprep.mubr.f32.mxu1 %v18102_v12  ;;  %v18146_v12 = vld [vmem:[%s23678_s2 + $0x2e0] sm:$0xff] }
 0xb33   :  { %15257 = vmatmul.mubr.f32.gmra.mrb[224].mxu1 %v18103_v55  ;;  %v18148_v55 = vld [vmem:[%s23678_s2 + $0x2f0] sm:$0xff] }
 0xb34   :  { %15259 = vmatprep.mubr.f32.mxu1 %v18104_v62  ;;  %v18151_v62 = vld [vmem:[%s23678_s2 + $0x308] sm:$0xff] }
 0xb37   :  { %15260 = vmatmul.mubr.f32.gmra.mrb[226].mxu1 %v18105_v57  ;;  %v18153_v57 = vld [vmem:[%s23678_s2 + $0x318] sm:$0xff] }
 0xb38   :  { %15262 = vmatprep.mubr.f32.mxu1 %v18106_v59  ;;  %v18156_v59 = vld [vmem:[%s23678_s2 + $0x330] sm:$0xff] }
 0xb3b   :  { %15263 = vmatmul.mubr.f32.gmra.mrb[228].mxu1 %v18107_v30  ;;  %v18158_v30 = vld [vmem:[%s23678_s2 + $0x340] sm:$0xff] }
 0xb3c   :  { %15265 = vmatprep.mubr.f32.mxu1 %v18108_v3 }
 0xb3f   :  { %15266 = vmatmul.mubr.f32.gmra.mrb[230].mxu1 %v18109_v24 }
 0xb40   :  { %15268 = vmatprep.mubr.f32.mxu1 %v18110_v13  ;;  %v18163_v13 = vld [vmem:[%s23678_s2 + $0x368] sm:$0xff] }
 0xb43   :  { %15269 = vmatmul.mubr.f32.gmra.mrb[232].mxu1 %v18111_v11  ;;  %v18164_v11 = vld [vmem:[%s23678_s2 + $0x370] sm:$0xff] }
 0xb44   :  { %15271 = vmatprep.mubr.f32.mxu1 %v18112_v39 }
 0xb47   :  { %15272 = vmatmul.mubr.f32.gmra.mrb[234].mxu1 %v18113_v61 }
 0xb48   :  { %15274 = vmatprep.mubr.f32.mxu1 %v18114_v23  ;;  %v18167_v23 = vld [vmem:[%s23678_s2 + $0x388] sm:$0xff] }
 0xb4b   :  { %15275 = vmatmul.mubr.f32.gmra.mrb[236].mxu1 %v18115_v49 }
 0xb4c   :  { %15277 = vmatprep.mubr.f32.mxu1 %v18116_v22  ;;  %v18169_v22 = vld [vmem:[%s23678_s2 + $0x398] sm:$0xff] }
 0xb4f   :  { %15278 = vmatmul.mubr.f32.gmra.mrb[238].mxu1 %v18117_v44 }
 0xb50   :  { %15280 = vmatprep.mubr.f32.mxu1 %v18118_v46  ;;  %v18170_v46 = vld [vmem:[%s23678_s2 + $0x3a0] sm:$0xff] }
 0xb53   :  { %15281 = vmatmul.mubr.f32.gmra.mrb[240].mxu1 %v18119_v50 }
 0xb54   :  { %15283 = vmatprep.mubr.f32.mxu1 %v18120_v36  ;;  %v18171_v36 = vld [vmem:[%s23678_s2 + $0x3a8] sm:$0xff] }
 0xb57   :  { %15284 = vmatmul.mubr.f32.gmra.mrb[242].mxu1 %v18121_v35 }
 0xb58   :  { %15286 = vmatprep.mubr.f32.mxu1 %v18122_v7  ;;  %v18172_v7 = vld [vmem:[%s23678_s2 + $0x3b0] sm:$0xff] }
 0xb5b   :  { %15287 = vmatmul.mubr.f32.gmra.mrb[244].mxu1 %v18123_v6 }
 0xb5c   :  { %15289 = vmatprep.mubr.f32.mxu1 %v18124_v52  ;;  %v18173_v52 = vld [vmem:[%s23678_s2 + $0x3b8] sm:$0xff] }
 0xb5f   :  { %15290 = vmatmul.mubr.f32.gmra.mrb[246].mxu1 %v18125_v41 }
 0xb60   :  { %15292 = vmatprep.mubr.f32.mxu1 %v18126_v17  ;;  %v18174_v17 = vld [vmem:[%s23678_s2 + $0x3c0] sm:$0xff] }
 0xb63   :  { %15293 = vmatmul.mubr.f32.gmra.mrb[248].mxu1 %v18127_v14 }
 0xb64   :  { %15295 = vmatprep.mubr.f32.mxu1 %v18128_v18  ;;  %v18175_v18 = vld [vmem:[%s23678_s2 + $0x3c8] sm:$0xff] }
 0xb67   :  { %15296 = vmatmul.mubr.f32.gmra.mrb[250].mxu1 %v18129_v40 }
 0xb68   :  { %15298 = vmatprep.mubr.f32.mxu1 %v18130_v45  ;;  %v18176_v45 = vld [vmem:[%s23678_s2 + $0x3d0] sm:$0xff] }
 0xb6b   :  { %15299 = vmatmul.mubr.f32.gmra.mrb[252].mxu1 %v18131_v33  ;;  %v10874_v33 = vld [vmem:[%s23679_s3 + $0xd90] sm:$0xff] }
 0xb6c   :  { %15301 = vmatprep.mubr.f32.mxu1 %v18132_v38  ;;  %v10875_v38 = vld [vmem:[%s23679_s3 + $0xd98] sm:$0xff] }
 0xb6f   :  { %15302 = vmatmul.mubr.f32.gmra.mrb[254].mxu1 %v18133_v48 }
 0xb70   :  { %15304 = vmatprep.mubr.f32.mxu1 %v18134_v8 }
 0xb73   :  { %15305 = vmatmul.mubr.f32.gmra.mrb[0].mxu1 %v18135_v9  ;;  %v18177_v9 = vld [vmem:[%s23678_s2 + $0x3d8] sm:$0xff] }
 0xb74   :  { %15307 = vmatprep.mubr.f32.mxu1 %v18136_v58  ;;  %v16964_v58 = vpack.c.bf16 %v10875_v38, %v10874_v33  ;;  %v18190_v38 = vld [vmem:[%s23678_s2 + $0x440] sm:$0xff] }
 0xb77   :  { %15308 = vmatmul.mubr.f32.gmra.mrb[2].mxu1 %v18137_v56  ;;  %v18178_v56 = vld [vmem:[%s23678_s2 + $0x3e0] sm:$0xff] }
 0xb78   :  { %15310 = vmatprep.mubr.f32.mxu1 %v18138_v53  ;;  %v10876_v53 = vld [vmem:[%s23679_s3 + $0xda0] sm:$0xff] }
 0xb7b   :  { %15311 = vmatmul.mubr.f32.gmra.mrb[4].mxu1 %v18139_v26  ;;  %v10877_v26 = vld [vmem:[%s23679_s3 + $0xda8] sm:$0xff] }
 0xb7c   :  { %15313 = vmatprep.mubr.f32.mxu1 %v18140_v0 }
 0xb7f   :  { %15314 = vmatmul.mubr.f32.gmra.mrb[6].mxu1 %v18141_v34 }
 0xb80   :  { %15316 = vmatprep.mubr.f32.mxu1 %v18142_v43  ;;  %v18179_v43 = vld [vmem:[%s23678_s2 + $0x3e8] sm:$0xff] }
 0xb83   :  { %15317 = vmatmul.mubr.f32.gmra.mrb[8].mxu1 %v18143_v10  ;;  %v16968_v10 = vpack.c.bf16 %v10877_v26, %v10876_v53  ;;  %v18192_v26 = vld [vmem:[%s23678_s2 + $0x450] sm:$0xff] }
 0xb84   :  { %15319 = vmatprep.mubr.f32.mxu1 %v18144_v51  ;;  %v18180_v51 = vld [vmem:[%s23678_s2 + $0x3f0] sm:$0xff] }
 0xb87   :  { %15320 = vmatmul.mubr.f32.gmra.mrb[10].mxu1 %v18145_v31  ;;  %v10878_v31 = vld [vmem:[%s23679_s3 + $0xdb0] sm:$0xff] }
 0xb88   :  { %15322 = vmatprep.mubr.f32.mxu1 %v18146_v12 }
 0xb8b   :  { %15323 = vmatmul.mubr.f32.gmra.mrb[12].mxu1 %v18147_v20 }
 0xb8c   :  { %15325 = vmatprep.mubr.f32.mxu1 %v18148_v55  ;;  %v18181_v55 = vld [vmem:[%s23678_s2 + $0x3f8] sm:$0xff] }
 0xb8f   :  { %15326 = vmatmul.mubr.f32.gmra.mrb[14].mxu1 %v18149_v19 }
 0xb90   :  { %15328 = vmatprep.mubr.f32.mxu1 %v18150_v54  ;;  %v18182_v54 = vld [vmem:[%s23678_s2 + $0x400] sm:$0xff] }
 0xb93   :  { %15329 = vmatmul.mubr.f32.gmra.mrb[16].mxu1 %v18151_v62  ;;  %v10880_v62 = vld [vmem:[%s23679_s3 + $0xdc0] sm:$0xff] }
 0xb94   :  { %15331 = vmatprep.mubr.f32.mxu1 %v18152_v60  ;;  %v10881_v60 = vld [vmem:[%s23679_s3 + $0xdc8] sm:$0xff] }
 0xb97   :  { %15332 = vmatmul.mubr.f32.gmra.mrb[18].mxu1 %v18153_v57 }
 0xb98   :  { %15334 = vmatprep.mubr.f32.mxu1 %v18154_v5 }
 0xb9b   :  { %15335 = vmatmul.mubr.f32.gmra.mrb[20].mxu1 %v18155_v15  ;;  %v18183_v15 = vld [vmem:[%s23678_s2 + $0x408] sm:$0xff] }
 0xb9c   :  { %15337 = vmatprep.mubr.f32.mxu1 %v18156_v59  ;;  %v16976_v59 = vpack.c.bf16 %v10881_v60, %v10880_v62  ;;  %v18196_v62 = vld [vmem:[%s23678_s2 + $0x470] sm:$0xff] }
 0xb9f   :  { %15338 = vmatmul.mubr.f32.gmra.mrb[22].mxu1 %v18157_v27  ;;  %v18184_v27 = vld [vmem:[%s23678_s2 + $0x410] sm:$0xff] }
 0xba0   :  { %15340 = vmatprep.mubr.f32.mxu1 %v18158_v30  ;;  %v10882_v30 = vld [vmem:[%s23679_s3 + $0xdd0] sm:$0xff] }
 0xba3   :  { %15341 = vmatmul.mubr.f32.gmra.mrb[24].mxu1 %v18159_v2  ;;  %v10883_v2 = vld [vmem:[%s23679_s3 + $0xdd8] sm:$0xff] }
 0xba4   :  { %15343 = vmatprep.mubr.f32.mxu1 %v18160_v47 }
 0xba6   :  { %v22789_v3 = vpop.f32.mrb[176].mxu1 }
 0xba7   :  { %15344 = vmatmul.mubr.f32.gmra.mrb[26].mxu1 %v18161_v25  ;;  %v22794_v24 = vpop.f32.mrb[177].mxu1 }
 0xba8   :  { %15346 = vmatprep.mubr.f32.mxu1 %v18162_v16  ;;  %v18185_v16 = vld [vmem:[%s23678_s2 + $0x418] sm:$0xff] }
 0xbaa   :  { %v22799_v4 = vpop.f32.mrb[178].mxu1 }
 0xbab   :  { %15347 = vmatmul.mubr.f32.gmra.mrb[28].mxu1 %v18163_v13  ;;  %v22804_v1 = vpop.f32.mrb[179].mxu1  ;;  %v16980_v13 = vpack.c.bf16 %v10883_v2, %v10882_v30  ;;  %v10914_v2 = vld [vmem:[%s23679_s3 + $0xed0] sm:$0xff] }
 0xbac   :  { %15349 = vmatprep.mubr.f32.mxu1 %v18164_v11  ;;  %v18186_v11 = vld [vmem:[%s23678_s2 + $0x420] sm:$0xff] }
 0xbae   :  { %v22809_v37 = vpop.f32.mrb[180].mxu1 }
 0xbaf   :  { %15350 = vmatmul.mubr.f32.gmra.mrb[30].mxu1 %v18165_v29  ;;  %v22814_v39 = vpop.f32.mrb[181].mxu1  ;;  %v10884_v29 = vld [vmem:[%s23679_s3 + $0xde0] sm:$0xff] }
 0xbb0   :  { %15352 = vmatprep.mubr.f32.mxu1 %v18166_v32  ;;  %v10885_v32 = vld [vmem:[%s23679_s3 + $0xde8] sm:$0xff] }
 0xbb2   :  { %v22819_v61 = vpop.f32.mrb[182].mxu1 }
 0xbb3   :  { %15353 = vmatmul.mubr.f32.gmra.mrb[32].mxu1 %v18167_v23  ;;  %v22824_v21 = vpop.f32.mrb[183].mxu1 }
 0xbb4   :  { %15355 = vmatprep.mubr.f32.mxu1 %v18168_v28 }
 0xbb6   :  { %v22829_v49 = vpop.f32.mrb[184].mxu1 }
 0xbb7   :  { %15356 = vmatmul.mubr.f32.gmra.mrb[34].mxu1 %v18169_v22  ;;  %v22834_v44 = vpop.f32.mrb[185].mxu1  ;;  %v18187_v22 = vld [vmem:[%s23678_s2 + $0x428] sm:$0xff] }
 0xbb8   :  { %15358 = vmatprep.mubr.f32.mxu1 %v18170_v46  ;;  %v16984_v46 = vpack.c.bf16 %v10885_v32, %v10884_v29  ;;  %v10918_v29 = vld [vmem:[%s23679_s3 + $0xef0] sm:$0xff]  ;;  %v10919_v32 = vld [vmem:[%s23679_s3 + $0xef8] sm:$0xff] }
 0xbba   :  { %v22839_v50 = vpop.f32.mrb[186].mxu1 }
 0xbbb   :  { %15359 = vmatmul.mubr.f32.gmra.mrb[36].mxu1 %v18171_v36  ;;  %v22844_v35 = vpop.f32.mrb[187].mxu1  ;;  %v18188_v36 = vld [vmem:[%s23678_s2 + $0x430] sm:$0xff] }
 0xbbc   :  { %15361 = vmatprep.mubr.f32.mxu1 %v18172_v7  ;;  %v10886_v7 = vld [vmem:[%s23679_s3 + $0xdf0] sm:$0xff] }
 0xbbe   :  { %v22849_v6 = vpop.f32.mrb[188].mxu1 }
 0xbbf   :  { %15362 = vmatmul.mubr.f32.gmra.mrb[38].mxu1 %v18173_v52  ;;  %v22854_v41 = vpop.f32.mrb[189].mxu1  ;;  %v10887_v52 = vld [vmem:[%s23679_s3 + $0xdf8] sm:$0xff] }
 0xbc0   :  { %15364 = vmatprep.mubr.f32.mxu1 %v18174_v17  ;;  %v16988_v33 = vpack.c.bf16 %v10887_v52, %v10886_v7  ;;  %v10923_v7 = vld [vmem:[%s23679_s3 + $0xf18] sm:$0xff] }
 0xbc2   :  { %v22859_v14 = vpop.f32.mrb[190].mxu1 }
 0xbc3   :  { %15365 = vmatmul.mubr.f32.gmra.mrb[40].mxu1 %v18175_v18  ;;  %v22864_v40 = vpop.f32.mrb[191].mxu1 }
 0xbc4   :  { %15367 = vmatprep.mubr.f32.mxu1 %v18176_v45  ;;  %v18189_v45 = vld [vmem:[%s23678_s2 + $0x438] sm:$0xff] }
 0xbc6   :  { %v15210_v48 = vpop.f32.mrb[192].mxu1 }
 0xbc7   :  { %v8206_v8 = vpop.f32.mrb[193].mxu1  ;;  %15368 = vmatmul.mubr.f32.gmra.mrb[42].mxu1 %v18177_v9 }
 0xbc8   :  { %15432 = vmatprep.mubr.f32.mxu0 %v8206_v8  ;;  %15370 = vmatprep.mubr.f32.mxu1 %v18178_v56  ;;  %v10905_v8 = vld [vmem:[%s23679_s3 + $0xe88] sm:$0xff] }
 0xbc9   :  { %15433 = vmatmul.mubr.f32.vlgmr.msra.gmra.mrb[64].mxu0 %v15210_v48  ;;  %v10904_v48 = vld [vmem:[%s23679_s3 + $0xe80] sm:$0xff]  ;;  %v18191_v56 = vld [vmem:[%s23678_s2 + $0x448] sm:$0xff] }
 0xbca   :  { %v15213_v0 = vpop.f32.mrb[194].mxu1  ;;  %16963 = vmatpush3.bf16.msra.mxu0 %v22648_v63  ;;  %v10879_v63 = vld [vmem:[%s23679_s3 + $0xdb8] sm:$0xff]  ;;  %v16992_v53 = vpack.c.bf16 %v10905_v8, %v10904_v48 }
 0xbcb   :  { %v8216_v34 = vpop.f32.mrb[195].mxu1  ;;  %15371 = vmatmul.mubr.f32.gmra.mrb[44].mxu1 %v18179_v43  ;;  %16965 = vmatprep.subr.bf16.mxu0 %v16964_v58  ;;  %v16972_v19 = vpack.c.bf16 %v10879_v63, %v10878_v31  ;;  %v18194_v63 = vld [vmem:[%s23678_s2 + $0x460] sm:$0xff]  ;;  %v10927_v48 = vld [vmem:[%s23679_s3 + $0xf38] sm:$0xff] }
 0xbcc   :  { %15435 = vmatprep.mubr.f32.mxu0 %v8216_v34  ;;  %15373 = vmatprep.mubr.f32.mxu1 %v18180_v51  ;;  %v10907_v34 = vld [vmem:[%s23679_s3 + $0xe98] sm:$0xff] }
 0xbcd   :  { %15436 = vmatmul.mubr.f32.gmra.mrb[66].mxu0 %v15213_v0  ;;  %v10906_v0 = vld [vmem:[%s23679_s3 + $0xe90] sm:$0xff] }
 0xbce   :  { %v15216_v12 = vpop.f32.mrb[196].mxu1  ;;  %16967 = vmatpush3.bf16.msra.mxu0 %v16964_v58  ;;  %v16996_v51 = vpack.c.bf16 %v10907_v34, %v10906_v0 }
 0xbcf   :  { %v8226_v20 = vpop.f32.mrb[197].mxu1  ;;  %15374 = vmatmul.mubr.f32.gmra.mrb[46].mxu1 %v18181_v55  ;;  %16969 = vmatprep.subr.bf16.mxu0 %v16968_v10  ;;  %v18195_v55 = vld [vmem:[%s23678_s2 + $0x468] sm:$0xff] }
 0xbd0   :  { %15438 = vmatprep.mubr.f32.mxu0 %v8226_v20  ;;  %15376 = vmatprep.mubr.f32.mxu1 %v18182_v54 }
 0xbd1   :  { %15439 = vmatmul.mubr.f32.gmra.mrb[68].mxu0 %v15216_v12  ;;  %v10909_v12 = vld [vmem:[%s23679_s3 + $0xea8] sm:$0xff] }
 0xbd2   :  { %v15219_v57 = vpop.f32.mrb[198].mxu1  ;;  %16971 = vmatpush3.bf16.msra.mxu0 %v16968_v10  ;;  %v18193_v10 = vld [vmem:[%s23678_s2 + $0x458] sm:$0xff] }
 0xbd3   :  { %v8236_v5 = vpop.f32.mrb[199].mxu1  ;;  %15377 = vmatmul.mubr.f32.gmra.mrb[48].mxu1 %v18183_v15  ;;  %16973 = vmatprep.subr.bf16.mxu0 %v16972_v19 }
 0xbd4   :  { %15441 = vmatprep.mubr.f32.mxu0 %v8236_v5  ;;  %15379 = vmatprep.mubr.f32.mxu1 %v18184_v27 }
 0xbd5   :  { %15442 = vmatmul.mubr.f32.gmra.mrb[70].mxu0 %v15219_v57  ;;  %v18197_v57 = vld [vmem:[%s23678_s2 + $0x478] sm:$0xff] }
 0xbd6   :  { %v15222_v47 = vpop.f32.mrb[200].mxu1  ;;  %16975 = vmatpush3.bf16.msra.mxu0 %v16972_v19 }
 0xbd7   :  { %v8246_v25 = vpop.f32.mrb[201].mxu1  ;;  %15380 = vmatmul.mubr.f32.gmra.mrb[50].mxu1 %v18185_v16  ;;  %16977 = vmatprep.subr.bf16.mxu0 %v16976_v59  ;;  %v10916_v16 = vld [vmem:[%s23679_s3 + $0xee0] sm:$0xff] }
 0xbd8   :  { %15444 = vmatprep.mubr.f32.mxu0 %v8246_v25  ;;  %15382 = vmatprep.mubr.f32.mxu1 %v18186_v11 }
 0xbd9   :  { %15445 = vmatmul.mubr.f32.gmra.mrb[72].mxu0 %v15222_v47  ;;  %v10915_v47 = vld [vmem:[%s23679_s3 + $0xed8] sm:$0xff] }
 0xbda   :  { %v15225_v23 = vpop.f32.mrb[202].mxu1  ;;  %16979 = vmatpush3.bf16.msra.mxu0 %v16976_v59  ;;  %v10912_v59 = vld [vmem:[%s23679_s3 + $0xec0] sm:$0xff] }
 0xbdb   :  { %v8256_v28 = vpop.f32.mrb[203].mxu1  ;;  %15383 = vmatmul.mubr.f32.gmra.mrb[52].mxu1 %v18187_v22  ;;  %16981 = vmatprep.subr.bf16.mxu0 %v16980_v13  ;;  %v10921_v22 = vld [vmem:[%s23679_s3 + $0xf08] sm:$0xff] }
 0xbdc   :  { %15447 = vmatprep.mubr.f32.mxu0 %v8256_v28  ;;  %15385 = vmatprep.mubr.f32.mxu1 %v18188_v36  ;;  %v10920_v28 = vld [vmem:[%s23679_s3 + $0xf00] sm:$0xff]  ;;  %v10922_v36 = vld [vmem:[%s23679_s3 + $0xf10] sm:$0xff] }
 0xbdd   :  { %15448 = vmatmul.mubr.f32.gmra.mrb[74].mxu0 %v15225_v23 }
 0xbde   :  { %v15228_v17 = vpop.f32.mrb[204].mxu1  ;;  %16983 = vmatpush3.bf16.msra.mxu0 %v16980_v13  ;;  %v10917_v13 = vld [vmem:[%s23679_s3 + $0xee8] sm:$0xff] }
 0xbdf   :  { %v8266_v18 = vpop.f32.mrb[205].mxu1  ;;  %15386 = vmatmul.mubr.f32.gmra.mrb[54].mxu1 %v18189_v45  ;;  %16985 = vmatprep.subr.bf16.mxu0 %v16984_v46 }
 0xbe0   :  { %15450 = vmatprep.mubr.f32.mxu0 %v8266_v18  ;;  %15388 = vmatprep.mubr.f32.mxu1 %v18190_v38  ;;  %v10925_v18 = vld [vmem:[%s23679_s3 + $0xf28] sm:$0xff]  ;;  %v10926_v38 = vld [vmem:[%s23679_s3 + $0xf30] sm:$0xff] }
 0xbe1   :  { %15451 = vmatmul.mubr.f32.gmra.mrb[76].mxu0 %v15228_v17  ;;  %v10924_v17 = vld [vmem:[%s23679_s3 + $0xf20] sm:$0xff] }
 0xbe2   :  { %v15231_v9 = vpop.f32.mrb[206].mxu1  ;;  %16987 = vmatpush3.bf16.msra.mxu0 %v16984_v46  ;;  %v17032_v45 = vpack.c.bf16 %v10925_v18, %v10924_v17  ;;  %v11011_v17 = vld [vmem:[%s23679_s3 + $0x11d8] sm:$0xff] }
 0xbe3   :  { %v8276_v58 = vpop.f32.mrb[207].mxu1  ;;  %15389 = vmatmul.mubr.f32.gmra.mrb[56].mxu1 %v18191_v56  ;;  %16989 = vmatprep.subr.bf16.mxu0 %v16988_v33  ;;  %v10928_v56 = vld [vmem:[%s23679_s3 + $0xf40] sm:$0xff] }
 0xbe4   :  { %15453 = vmatprep.mubr.f32.mxu0 %v8276_v58  ;;  %15391 = vmatprep.mubr.f32.mxu1 %v18192_v26 }
 0xbe5   :  { %15454 = vmatmul.mubr.f32.gmra.mrb[78].mxu0 %v15231_v9  ;;  %v17036_v9 = vpack.c.bf16 %v10927_v48, %v10926_v38  ;;  %v10945_v48 = vld [vmem:[%s23679_s3 + $0xfc8] sm:$0xff] }
 0xbe6   :  { %16991 = vmatpush3.bf16.msra.mxu0 %v16988_v33  ;;  %15488 = vmatprep.mubr.f32.mxu0 %v22794_v24  ;;  %v22973_v43 = vpop.f32.mrb[208].mxu1  ;;  %v10908_v24 = vld [vmem:[%s23679_s3 + $0xea0] sm:$0xff] }
 0xbe7   :  { %15392 = vmatmul.mubr.f32.gmra.mrb[58].mxu1 %v18193_v10  ;;  %16993 = vmatprep.subr.bf16.mxu0 %v16992_v53  ;;  %v22978_v31 = vpop.f32.mrb[209].mxu1  ;;  %v17000_v19 = vpack.c.bf16 %v10909_v12, %v10908_v24  ;;  %v10931_v10 = vld [vmem:[%s23679_s3 + $0xf58] sm:$0xff]  ;;  %v10932_v24 = vld [vmem:[%s23679_s3 + $0xf60] sm:$0xff]  ;;  %v10933_v12 = vld [vmem:[%s23679_s3 + $0xf68] sm:$0xff] }
 0xbe8   :  { %15394 = vmatprep.mubr.f32.mxu1 %v18194_v63 }
 0xbe9   :  { %15489 = vmatmul.mubr.f32.vlgmr.msra.gmra.mrb[64].mxu0 %v22789_v3  ;;  %v10910_v3 = vld [vmem:[%s23679_s3 + $0xeb0] sm:$0xff] }
 0xbea   :  { %16995 = vmatpush3.bf16.msra.mxu0 %v16992_v53  ;;  %15491 = vmatprep.mubr.f32.mxu0 %v22804_v1  ;;  %v22991_v20 = vpop.f32.mrb[210].mxu1  ;;  %v10911_v1 = vld [vmem:[%s23679_s3 + $0xeb8] sm:$0xff]  ;;  %v10929_v53 = vld [vmem:[%s23679_s3 + $0xf48] sm:$0xff] }
 0xbeb   :  { %15395 = vmatmul.mubr.f32.gmra.mrb[60].mxu1 %v18195_v55  ;;  %16997 = vmatprep.subr.bf16.mxu0 %v16996_v51  ;;  %v22996_v54 = vpop.f32.mrb[211].mxu1  ;;  %v17004_v5 = vpack.c.bf16 %v10911_v1, %v10910_v3  ;;  %v17040_v0 = vpack.c.bf16 %v10929_v53, %v10928_v56  ;;  %v10934_v1 = vld [vmem:[%s23679_s3 + $0xf70] sm:$0xff] }
 0xbec   :  { %15397 = vmatprep.mubr.f32.mxu1 %v18196_v62 }
 0xbed   :  { %15492 = vmatmul.mubr.f32.gmra.mrb[66].mxu0 %v22799_v4  ;;  %v10913_v4 = vld [vmem:[%s23679_s3 + $0xec8] sm:$0xff] }
 0xbee   :  { %16999 = vmatpush3.bf16.msra.mxu0 %v16996_v51  ;;  %15494 = vmatprep.mubr.f32.mxu0 %v22814_v39  ;;  %v23009_v60 = vpop.f32.mrb[212].mxu1  ;;  %v17008_v27 = vpack.c.bf16 %v10913_v4, %v10912_v59 }
 0xbef   :  { %15398 = vmatmul.mubr.f32.gmra.mrb[62].mxu1 %v18197_v57  ;;  %17001 = vmatprep.subr.bf16.mxu0 %v17000_v19  ;;  %v23014_v15 = vpop.f32.mrb[213].mxu1  ;;  %v11002_v57 = vld [vmem:[%s23679_s3 + $0x1190] sm:$0xff] }
 0xbf1   :  { %15495 = vmatmul.mubr.f32.gmra.mrb[68].mxu0 %v22809_v37 }
 0xbf2   :  { %17003 = vmatpush3.bf16.msra.mxu0 %v17000_v19  ;;  %15497 = vmatprep.mubr.f32.mxu0 %v22824_v21  ;;  %v23024_v39 = vpop.f32.mrb[214].mxu1  ;;  %v17012_v21 = vpack.c.bf16 %v10915_v47, %v10914_v2  ;;  %v11001_v19 = vld [vmem:[%s23679_s3 + $0x1188] sm:$0xff]  ;;  %v11004_v2 = vld [vmem:[%s23679_s3 + $0x11a0] sm:$0xff] }
 0xbf3   :  { %17005 = vmatprep.subr.bf16.mxu0 %v17004_v5  ;;  %v23026_v30 = vpop.f32.mrb[215].mxu1 }
 0xbf5   :  { %15498 = vmatmul.mubr.f32.gmra.mrb[70].mxu0 %v22819_v61 }
 0xbf6   :  { %17007 = vmatpush3.bf16.msra.mxu0 %v17004_v5  ;;  %15500 = vmatprep.mubr.f32.mxu0 %v22834_v44  ;;  %v23036_v37 = vpop.f32.mrb[216].mxu1  ;;  %v17016_v44 = vpack.c.bf16 %v10917_v13, %v10916_v16  ;;  %v10938_v13 = vld [vmem:[%s23679_s3 + $0xf90] sm:$0xff] }
 0xbf7   :  { %17009 = vmatprep.subr.bf16.mxu0 %v17008_v27  ;;  %v23038_v25 = vpop.f32.mrb[217].mxu1 }
 0xbf9   :  { %15501 = vmatmul.mubr.f32.gmra.mrb[72].mxu0 %v22829_v49 }
 0xbfa   :  { %17011 = vmatpush3.bf16.msra.mxu0 %v17008_v27  ;;  %15503 = vmatprep.mubr.f32.mxu0 %v22844_v35  ;;  %v23048_v61 = vpop.f32.mrb[218].mxu1  ;;  %v17020_v35 = vpack.c.bf16 %v10919_v32, %v10918_v29  ;;  %v10936_v27 = vld [vmem:[%s23679_s3 + $0xf80] sm:$0xff]  ;;  %v11007_v29 = vld [vmem:[%s23679_s3 + $0x11b8] sm:$0xff] }
 0xbfb   :  { %17013 = vmatprep.subr.bf16.mxu0 %v17012_v21  ;;  %v23050_v11 = vpop.f32.mrb[219].mxu1 }
 0xbfd   :  { %15504 = vmatmul.mubr.f32.gmra.mrb[74].mxu0 %v22839_v50 }
 0xbfe   :  { %17015 = vmatpush3.bf16.msra.mxu0 %v17012_v21  ;;  %15506 = vmatprep.mubr.f32.mxu0 %v22854_v41  ;;  %v23060_v49 = vpop.f32.mrb[220].mxu1  ;;  %v17024_v41 = vpack.c.bf16 %v10921_v22, %v10920_v28  ;;  %v10941_v28 = vld [vmem:[%s23679_s3 + $0xfa8] sm:$0xff]  ;;  %v11008_v22 = vld [vmem:[%s23679_s3 + $0x11c0] sm:$0xff] }
 0xbff   :  { %17017 = vmatprep.subr.bf16.mxu0 %v17016_v44  ;;  %v23062_v23 = vpop.f32.mrb[221].mxu1 }
 0xc01   :  { %15507 = vmatmul.mubr.f32.gmra.mrb[76].mxu0 %v22849_v6 }
 0xc02   :  { %17019 = vmatpush3.bf16.msra.mxu0 %v17016_v44  ;;  %15509 = vmatprep.mubr.f32.mxu0 %v22864_v40  ;;  %v23072_v50 = vpop.f32.mrb[222].mxu1  ;;  %v17028_v40 = vpack.c.bf16 %v10923_v7, %v10922_v36  ;;  %v11006_v44 = vld [vmem:[%s23679_s3 + $0x11b0] sm:$0xff] }
 0xc03   :  { %17021 = vmatprep.subr.bf16.mxu0 %v17020_v35  ;;  %v23074_v46 = vpop.f32.mrb[223].mxu1 }
 0xc05   :  { %15510 = vmatmul.mubr.f32.gmra.mrb[78].mxu0 %v22859_v14 }
 0xc06   :  { %17023 = vmatpush3.bf16.msra.mxu0 %v17020_v35  ;;  %15544 = vmatprep.mubr.f32.mxu0 %v22978_v31  ;;  %v23084_v6 = vpop.f32.mrb[224].mxu1  ;;  %v23220_v35 = vpack.c.bf16 %v11007_v29, %v11006_v44  ;;  %v10957_v44 = vld [vmem:[%s23679_s3 + $0x1028] sm:$0xff] }
 0xc07   :  { %17025 = vmatprep.subr.bf16.mxu0 %v17024_v41  ;;  %v23086_v52 = vpop.f32.mrb[225].mxu1 }
 0xc09   :  { %15545 = vmatmul.mubr.f32.vlgmr.msra.gmra.mrb[64].mxu0 %v22973_v43  ;;  %v10930_v43 = vld [vmem:[%s23679_s3 + $0xf50] sm:$0xff] }
 0xc0a   :  { %17027 = vmatpush3.bf16.msra.mxu0 %v17024_v41  ;;  %15547 = vmatprep.mubr.f32.mxu0 %v22996_v54  ;;  %v23096_v14 = vpop.f32.mrb[226].mxu1  ;;  %v17044_v31 = vpack.c.bf16 %v10931_v10, %v10930_v43  ;;  %v17048_v54 = vpack.c.bf16 %v10933_v12, %v10932_v24  ;;  %v10947_v10 = vld [vmem:[%s23679_s3 + $0xfd8] sm:$0xff] }
 0xc0b   :  { %17029 = vmatprep.subr.bf16.mxu0 %v17028_v40  ;;  %v23098_v33 = vpop.f32.mrb[227].mxu1 }
 0xc0d   :  { %15548 = vmatmul.mubr.f32.gmra.mrb[66].mxu0 %v22991_v20  ;;  %v11000_v20 = vld [vmem:[%s23679_s3 + $0x1180] sm:$0xff] }
 0xc0e   :  { %17031 = vmatpush3.bf16.msra.mxu0 %v17028_v40  ;;  %15550 = vmatprep.mubr.f32.mxu0 %v23014_v15  ;;  %v23108_v8 = vpop.f32.mrb[228].mxu1  ;;  %v23154_v3 = vpack.c.bf16 %v11001_v19, %v11000_v20  ;;  %v11003_v15 = vld [vmem:[%s23679_s3 + $0x1198] sm:$0xff] }
 0xc0f   :  { %17033 = vmatprep.subr.bf16.mxu0 %v17032_v45  ;;  %v23110_v58 = vpop.f32.mrb[229].mxu1  ;;  %v10943_v40 = vld [vmem:[%s23679_s3 + $0xfb8] sm:$0xff] }
 0xc10   :  { %17216 = vmatprep.subr.bf16.mxu1 %v23154_v3 }
 0xc11   :  { %15551 = vmatmul.mubr.f32.gmra.mrb[68].mxu0 %v23009_v60  ;;  %v10935_v60 = vld [vmem:[%s23679_s3 + $0xf78] sm:$0xff]  ;;  %17224 = vmatpush3.bf16.msra.mxu1 %v23154_v3 }
 0xc12   :  { %17035 = vmatpush3.bf16.msra.mxu0 %v17032_v45  ;;  %15553 = vmatprep.mubr.f32.mxu0 %v23026_v30  ;;  %v23120_v26 = vpop.f32.mrb[230].mxu1  ;;  %v17052_v59 = vpack.c.bf16 %v10935_v60, %v10934_v1  ;;  %v10937_v30 = vld [vmem:[%s23679_s3 + $0xf88] sm:$0xff] }
 0xc13   :  { %17037 = vmatprep.subr.bf16.mxu0 %v17036_v9  ;;  %v23122_v34 = vpop.f32.mrb[231].mxu1  ;;  %v17056_v21 = vpack.c.bf16 %v10937_v30, %v10936_v27  ;;  %v10952_v27 = vld [vmem:[%s23679_s3 + $0x1000] sm:$0xff]  ;;  %v10953_v30 = vld [vmem:[%s23679_s3 + $0x1008] sm:$0xff] }
 0xc15   :  { %15554 = vmatmul.mubr.f32.gmra.mrb[70].mxu0 %v23024_v39  ;;  %v23176_v39 = vpack.c.bf16 %v11003_v15, %v11002_v57  ;;  %v10950_v57 = vld [vmem:[%s23679_s3 + $0xff0] sm:$0xff]  ;;  %v10951_v15 = vld [vmem:[%s23679_s3 + $0xff8] sm:$0xff] }
 0xc16   :  { %17039 = vmatpush3.bf16.msra.mxu0 %v17036_v9  ;;  %15556 = vmatprep.mubr.f32.mxu0 %v23038_v25  ;;  %v23132_v51 = vpop.f32.mrb[232].mxu1  ;;  %v11012_v9 = vld [vmem:[%s23679_s3 + $0x11e0] sm:$0xff] }
 0xc17   :  { %17041 = vmatprep.subr.bf16.mxu0 %v17040_v0  ;;  %v23134_v63 = vpop.f32.mrb[233].mxu1  ;;  %17217 = vmatprep.subr.bf16.mxu1 %v23176_v39 }
 0xc18   :  { %17225 = vmatpush3.bf16.msra.mxu1 %v23176_v39 }
 0xc19   :  { %15557 = vmatmul.mubr.f32.gmra.mrb[72].mxu0 %v23036_v37  ;;  %v11005_v37 = vld [vmem:[%s23679_s3 + $0x11a8] sm:$0xff] }
 0xc1a   :  { %17043 = vmatpush3.bf16.msra.mxu0 %v17040_v0  ;;  %15559 = vmatprep.mubr.f32.mxu0 %v23050_v11  ;;  %v23147_v55 = vpop.f32.mrb[234].mxu1  ;;  %v23198_v16 = vpack.c.bf16 %v11005_v37, %v11004_v2  ;;  %v10954_v37 = vld [vmem:[%s23679_s3 + $0x1010] sm:$0xff] }
 0xc1b   :  { %17045 = vmatprep.subr.bf16.mxu0 %v17044_v31  ;;  %v23152_v62 = vpop.f32.mrb[235].mxu1 }
 0xc1c   :  { %17218 = vmatprep.subr.bf16.mxu1 %v23198_v16 }
 0xc1d   :  { %15560 = vmatmul.mubr.f32.gmra.mrb[74].mxu0 %v23048_v61  ;;  %v10939_v61 = vld [vmem:[%s23679_s3 + $0xf98] sm:$0xff]  ;;  %17226 = vmatpush3.bf16.msra.mxu1 %v23198_v16 }
 0xc1e   :  { %17047 = vmatpush3.bf16.msra.mxu0 %v17044_v31  ;;  %15562 = vmatprep.mubr.f32.mxu0 %v23062_v23  ;;  %v23168_v5 = vpop.f32.mrb[236].mxu1  ;;  %v17060_v32 = vpack.c.bf16 %v10939_v61, %v10938_v13  ;;  %v10940_v23 = vld [vmem:[%s23679_s3 + $0xfa0] sm:$0xff]  ;;  %v11015_v31 = vld [vmem:[%s23679_s3 + $0x11f8] sm:$0xff] }
 0xc1f   :  { %17049 = vmatprep.subr.bf16.mxu0 %v17048_v54  ;;  %v23173_v4 = vpop.f32.mrb[237].mxu1  ;;  %17219 = vmatprep.subr.bf16.mxu1 %v23220_v35  ;;  %v17064_v36 = vpack.c.bf16 %v10941_v28, %v10940_v23  ;;  %v10956_v61 = vld [vmem:[%s23679_s3 + $0x1020] sm:$0xff]  ;;  %v10959_v23 = vld [vmem:[%s23679_s3 + $0x1038] sm:$0xff] }
 0xc20   :  { %v17096_v29 = vpack.c.bf16 %v10957_v44, %v10956_v61  ;;  %v10978_v61 = vld [vmem:[%s23679_s3 + $0x10d0] sm:$0xff]  ;;  %v10979_v44 = vld [vmem:[%s23679_s3 + $0x10d8] sm:$0xff] }
 0xc21   :  { %15563 = vmatmul.mubr.f32.gmra.mrb[76].mxu0 %v23060_v49  ;;  %17227 = vmatpush3.bf16.msra.mxu1 %v23220_v35 }
 0xc22   :  { %17051 = vmatpush3.bf16.msra.mxu0 %v17048_v54  ;;  %15565 = vmatprep.mubr.f32.mxu0 %v23074_v46  ;;  %v23190_v47 = vpop.f32.mrb[238].mxu1  ;;  %v10949_v54 = vld [vmem:[%s23679_s3 + $0xfe8] sm:$0xff] }
 0xc23   :  { %17053 = vmatprep.subr.bf16.mxu0 %v17052_v59  ;;  %v23195_v25 = vpop.f32.mrb[239].mxu1 }
 0xc25   :  { %15566 = vmatmul.mubr.f32.gmra.mrb[78].mxu0 %v23072_v50  ;;  %v11009_v50 = vld [vmem:[%s23679_s3 + $0x11c8] sm:$0xff] }
 0xc26   :  { %17055 = vmatpush3.bf16.msra.mxu0 %v17052_v59  ;;  %15600 = vmatprep.mubr.f32.mxu0 %v23086_v52  ;;  %v23212_v11 = vpop.f32.mrb[240].mxu1  ;;  %v23239_v46 = vpack.c.bf16 %v11009_v50, %v11008_v22  ;;  %v11010_v52 = vld [vmem:[%s23679_s3 + $0x11d0] sm:$0xff]  ;;  %v10960_v50 = vld [vmem:[%s23679_s3 + $0x1040] sm:$0xff] }
 0xc27   :  { %17057 = vmatprep.subr.bf16.mxu0 %v17056_v21  ;;  %v23217_v49 = vpop.f32.mrb[241].mxu1  ;;  %v23261_v45 = vpack.c.bf16 %v11011_v17, %v11010_v52  ;;  %v10963_v52 = vld [vmem:[%s23679_s3 + $0x1058] sm:$0xff] }
 0xc28   :  { %17220 = vmatprep.subr.bf16.mxu1 %v23239_v46 }
 0xc29   :  { %15601 = vmatmul.mubr.f32.vlgmr.msra.gmra.mrb[64].mxu0 %v23084_v6  ;;  %v10942_v6 = vld [vmem:[%s23679_s3 + $0xfb0] sm:$0xff]  ;;  %17228 = vmatpush3.bf16.msra.mxu1 %v23239_v46 }
 0xc2a   :  { %17059 = vmatpush3.bf16.msra.mxu0 %v17056_v21  ;;  %15603 = vmatprep.mubr.f32.mxu0 %v23098_v33  ;;  %v23237_v41 = vpop.f32.mrb[242].mxu1  ;;  %v17068_v33 = vpack.c.bf16 %v10943_v40, %v10942_v6  ;;  %v10955_v21 = vld [vmem:[%s23679_s3 + $0x1018] sm:$0xff]  ;;  %v10962_v40 = vld [vmem:[%s23679_s3 + $0x1050] sm:$0xff] }
 0xc2b   :  { %17061 = vmatprep.subr.bf16.mxu0 %v17060_v32  ;;  %v23241_v7 = vpop.f32.mrb[243].mxu1  ;;  %17221 = vmatprep.subr.bf16.mxu1 %v23261_v45 }
 0xc2d   :  { %15604 = vmatmul.mubr.f32.gmra.mrb[66].mxu0 %v23096_v14  ;;  %v10944_v14 = vld [vmem:[%s23679_s3 + $0xfc0] sm:$0xff]  ;;  %17229 = vmatpush3.bf16.msra.mxu1 %v23261_v45 }
 0xc2e   :  { %17063 = vmatpush3.bf16.msra.mxu0 %v17060_v32  ;;  %15606 = vmatprep.mubr.f32.mxu0 %v23110_v58  ;;  %v23259_v18 = vpop.f32.mrb[244].mxu1  ;;  %v11013_v58 = vld [vmem:[%s23679_s3 + $0x11e8] sm:$0xff]  ;;  %v17072_v0 = vpack.c.bf16 %v10945_v48, %v10944_v14 }
 0xc2f   :  { %17065 = vmatprep.subr.bf16.mxu0 %v17064_v36  ;;  %v23263_v38 = vpop.f32.mrb[245].mxu1  ;;  %v23283_v53 = vpack.c.bf16 %v11013_v58, %v11012_v9  ;;  %v10965_v14 = vld [vmem:[%s23679_s3 + $0x1068] sm:$0xff] }
 0xc31   :  { %15607 = vmatmul.mubr.f32.gmra.mrb[68].mxu0 %v23108_v8  ;;  %v10946_v8 = vld [vmem:[%s23679_s3 + $0xfd0] sm:$0xff]  ;;  %17222 = vmatprep.subr.bf16.mxu1 %v23283_v53 }
 0xc32   :  { %17067 = vmatpush3.bf16.msra.mxu0 %v17064_v36  ;;  %15609 = vmatprep.mubr.f32.mxu0 %v23122_v34  ;;  %v23281_v56 = vpop.f32.mrb[246].mxu1  ;;  %v11014_v34 = vld [vmem:[%s23679_s3 + $0x11f0] sm:$0xff]  ;;  %v17076_v20 = vpack.c.bf16 %v10947_v10, %v10946_v8  ;;  %v10961_v36 = vld [vmem:[%s23679_s3 + $0x1048] sm:$0xff] }
 0xc33   :  { %17069 = vmatprep.subr.bf16.mxu0 %v17068_v33  ;;  %v23285_v43 = vpop.f32.mrb[247].mxu1  ;;  %v23305_v12 = vpack.c.bf16 %v11015_v31, %v11014_v34  ;;  %17230 = vmatpush3.bf16.msra.mxu1 %v23283_v53  ;;  %v10968_v34 = vld [vmem:[%s23679_s3 + $0x1080] sm:$0xff]  ;;  %v10969_v31 = vld [vmem:[%s23679_s3 + $0x1088] sm:$0xff] }
 0xc35   :  { %15610 = vmatmul.mubr.f32.gmra.mrb[70].mxu0 %v23120_v26  ;;  %v10948_v26 = vld [vmem:[%s23679_s3 + $0xfe0] sm:$0xff]  ;;  %17223 = vmatprep.subr.bf16.mxu1 %v23305_v12 }
 0xc36   :  { %17071 = vmatpush3.bf16.msra.mxu0 %v17068_v33  ;;  %15612 = vmatprep.mubr.f32.mxu0 %v23134_v63  ;;  %v23303_v24 = vpop.f32.mrb[248].mxu1  ;;  %v17080_v1 = vpack.c.bf16 %v10949_v54, %v10948_v26  ;;  %v10970_v26 = vld [vmem:[%s23679_s3 + $0x1090] sm:$0xff]  ;;  %v10971_v54 = vld [vmem:[%s23679_s3 + $0x1098] sm:$0xff] }
 0xc37   :  { %17073 = vmatprep.subr.bf16.mxu0 %v17072_v0  ;;  %v23307_v19 = vpop.f32.mrb[249].mxu1  ;;  %17231 = vmatpush3.bf16.msra.mxu1 %v23305_v12 }
 0xc39   :  { %15613 = vmatmul.mubr.f32.gmra.mrb[72].mxu0 %v23132_v51 }
 0xc3a   :  { %17075 = vmatpush3.bf16.msra.mxu0 %v17072_v0  ;;  %15615 = vmatprep.mubr.f32.mxu0 %v23152_v62  ;;  %v23319_v63 = vpop.f32.mrb[250].mxu1  ;;  %v17084_v62 = vpack.c.bf16 %v10951_v15, %v10950_v57  ;;  %v10967_v0 = vld [vmem:[%s23679_s3 + $0x1078] sm:$0xff]  ;;  %v10972_v57 = vld [vmem:[%s23679_s3 + $0x10a0] sm:$0xff]  ;;  %v10973_v15 = vld [vmem:[%s23679_s3 + $0x10a8] sm:$0xff] }
 0xc3b   :  { %17077 = vmatprep.subr.bf16.mxu0 %v17076_v20  ;;  %v23321_v60 = vpop.f32.mrb[251].mxu1 }
 0xc3d   :  { %15616 = vmatmul.mubr.f32.gmra.mrb[74].mxu0 %v23147_v55 }
 0xc3e   :  { %17079 = vmatpush3.bf16.msra.mxu0 %v17076_v20  ;;  %15618 = vmatprep.mubr.f32.mxu0 %v23173_v4  ;;  %v23332_v51 = vpop.f32.mrb[252].mxu1  ;;  %v17088_v4 = vpack.c.bf16 %v10953_v30, %v10952_v27  ;;  %v17120_v20 = vpack.c.bf16 %v10969_v31, %v10968_v34  ;;  %v10974_v27 = vld [vmem:[%s23679_s3 + $0x10b0] sm:$0xff]  ;;  %v10975_v30 = vld [vmem:[%s23679_s3 + $0x10b8] sm:$0xff] }
 0xc3f   :  { %17081 = vmatprep.subr.bf16.mxu0 %v17080_v1  ;;  %v23334_v59 = vpop.f32.mrb[253].mxu1  ;;  %v10990_v34 = vld [vmem:[%s23679_s3 + $0x1130] sm:$0xff]  ;;  %v10991_v31 = vld [vmem:[%s23679_s3 + $0x1138] sm:$0xff] }
 0xc41   :  { %15619 = vmatmul.mubr.f32.gmra.mrb[76].mxu0 %v23168_v5 }
 0xc42   :  { %17083 = vmatpush3.bf16.msra.mxu0 %v17080_v1  ;;  %15621 = vmatprep.mubr.f32.mxu0 %v23195_v25  ;;  %v23344_v55 = vpop.f32.mrb[254].mxu1  ;;  %v17092_v25 = vpack.c.bf16 %v10955_v21, %v10954_v37  ;;  %v17124_v1 = vpack.c.bf16 %v10971_v54, %v10970_v26  ;;  %v10976_v37 = vld [vmem:[%s23679_s3 + $0x10c0] sm:$0xff]  ;;  %v10977_v21 = vld [vmem:[%s23679_s3 + $0x10c8] sm:$0xff] }
 0xc43   :  { %17085 = vmatprep.subr.bf16.mxu0 %v17084_v62  ;;  %v23346_v2 = vpop.f32.mrb[255].mxu1  ;;  %v10992_v26 = vld [vmem:[%s23679_s3 + $0x1140] sm:$0xff]  ;;  %v10993_v54 = vld [vmem:[%s23679_s3 + $0x1148] sm:$0xff] }
 0xc45   :  { %15622 = vmatmul.mubr.f32.gmra.mrb[78].mxu0 %v23190_v47 }
 0xc46   :  { %17087 = vmatpush3.bf16.msra.mxu0 %v17084_v62  ;;  %15656 = vmatprep.mubr.f32.mxu0 %v23217_v49  ;;  %v23356_v5 = vpop.f32.mrb[0].mxu1  ;;  %v10958_v49 = vld [vmem:[%s23679_s3 + $0x1030] sm:$0xff]  ;;  %v17128_v62 = vpack.c.bf16 %v10973_v15, %v10972_v57  ;;  %v10995_v15 = vld [vmem:[%s23679_s3 + $0x1158] sm:$0xff] }
 0xc47   :  { %17089 = vmatprep.subr.bf16.mxu0 %v17088_v4  ;;  %v23358_v13 = vpop.f32.mrb[1].mxu1  ;;  %v17100_v28 = vpack.c.bf16 %v10959_v23, %v10958_v49  ;;  %v10980_v49 = vld [vmem:[%s23679_s3 + $0x10e0] sm:$0xff]  ;;  %v10981_v23 = vld [vmem:[%s23679_s3 + $0x10e8] sm:$0xff]  ;;  %v10994_v57 = vld [vmem:[%s23679_s3 + $0x1150] sm:$0xff] }
 0xc49   :  { %15657 = vmatmul.mubr.f32.vlgmr.msra.gmra.mrb[64].mxu0 %v23212_v11 }
 0xc4a   :  { %17091 = vmatpush3.bf16.msra.mxu0 %v17088_v4  ;;  %15659 = vmatprep.mubr.f32.mxu0 %v23241_v7  ;;  %v23368_v47 = vpop.f32.mrb[2].mxu1  ;;  %v17104_v7 = vpack.c.bf16 %v10961_v36, %v10960_v50  ;;  %v17132_v4 = vpack.c.bf16 %v10975_v30, %v10974_v27  ;;  %v10982_v50 = vld [vmem:[%s23679_s3 + $0x10f0] sm:$0xff]  ;;  %v10983_v36 = vld [vmem:[%s23679_s3 + $0x10f8] sm:$0xff]  ;;  %v10996_v27 = vld [vmem:[%s23679_s3 + $0x1160] sm:$0xff] }
 0xc4b   :  { %17093 = vmatprep.subr.bf16.mxu0 %v17092_v25  ;;  %v23370_v32 = vpop.f32.mrb[3].mxu1  ;;  %v10997_v30 = vld [vmem:[%s23679_s3 + $0x1168] sm:$0xff] }
 0xc4d   :  { %15660 = vmatmul.mubr.f32.gmra.mrb[66].mxu0 %v23237_v41 }
 0xc4e   :  { %17095 = vmatpush3.bf16.msra.mxu0 %v17092_v25  ;;  %15662 = vmatprep.mubr.f32.mxu0 %v23263_v38  ;;  %v23380_v11 = vpop.f32.mrb[4].mxu1  ;;  %v10964_v38 = vld [vmem:[%s23679_s3 + $0x1060] sm:$0xff]  ;;  %v17136_v25 = vpack.c.bf16 %v10977_v21, %v10976_v37  ;;  %v10998_v37 = vld [vmem:[%s23679_s3 + $0x1170] sm:$0xff]  ;;  %v10999_v21 = vld [vmem:[%s23679_s3 + $0x1178] sm:$0xff] }
 0xc4f   :  { %17097 = vmatprep.subr.bf16.mxu0 %v17096_v29  ;;  %v23382_v22 = vpop.f32.mrb[5].mxu1  ;;  %v17112_v9 = vpack.c.bf16 %v10965_v14, %v10964_v38  ;;  %v10986_v38 = vld [vmem:[%s23679_s3 + $0x1110] sm:$0xff]  ;;  %v10987_v14 = vld [vmem:[%s23679_s3 + $0x1118] sm:$0xff] }
 0xc51   :  { %15663 = vmatmul.mubr.f32.gmra.mrb[68].mxu0 %v23259_v18  ;;  %v17108_v18 = vpack.c.bf16 %v10963_v52, %v10962_v40  ;;  %v10984_v40 = vld [vmem:[%s23679_s3 + $0x1100] sm:$0xff]  ;;  %v10985_v52 = vld [vmem:[%s23679_s3 + $0x1108] sm:$0xff] }
 0xc52   :  { %17099 = vmatpush3.bf16.msra.mxu0 %v17096_v29  ;;  %15665 = vmatprep.mubr.f32.mxu0 %v23285_v43  ;;  %v23392_v41 = vpop.f32.mrb[6].mxu1  ;;  %v17140_v29 = vpack.c.bf16 %v10979_v44, %v10978_v61 }
 0xc53   :  { %17101 = vmatprep.subr.bf16.mxu0 %v17100_v28  ;;  %v23394_v6 = vpop.f32.mrb[7].mxu1 }
 0xc55   :  { %15666 = vmatmul.mubr.f32.gmra.mrb[70].mxu0 %v23281_v56  ;;  %v10966_v56 = vld [vmem:[%s23679_s3 + $0x1070] sm:$0xff] }
 0xc56   :  { %17103 = vmatpush3.bf16.msra.mxu0 %v17100_v28  ;;  %15668 = vmatprep.mubr.f32.mxu0 %v23307_v19  ;;  %v23404_v17 = vpop.f32.mrb[8].mxu1  ;;  %v17116_v8 = vpack.c.bf16 %v10967_v0, %v10966_v56  ;;  %v17144_v28 = vpack.c.bf16 %v10981_v23, %v10980_v49  ;;  %v10988_v56 = vld [vmem:[%s23679_s3 + $0x1120] sm:$0xff]  ;;  %v10989_v0 = vld [vmem:[%s23679_s3 + $0x1128] sm:$0xff] }
 0xc57   :  { %17105 = vmatprep.subr.bf16.mxu0 %v17104_v7  ;;  %v23406_v33 = vpop.f32.mrb[9].mxu1 }
 0xc59   :  { %15669 = vmatmul.mubr.f32.gmra.mrb[72].mxu0 %v23303_v24 }
 0xc5a   :  { %17107 = vmatpush3.bf16.msra.mxu0 %v17104_v7  ;;  %15671 = vmatprep.mubr.f32.mxu0 %v23321_v60  ;;  %v23416_v48 = vpop.f32.mrb[10].mxu1  ;;  %v17148_v7 = vpack.c.bf16 %v10983_v36, %v10982_v50 }
 0xc5b   :  { %17109 = vmatprep.subr.bf16.mxu0 %v17108_v18  ;;  %v23418_v58 = vpop.f32.mrb[11].mxu1 }
 0xc5d   :  { %15672 = vmatmul.mubr.f32.gmra.mrb[74].mxu0 %v23319_v63 }
 0xc5e   :  { %17111 = vmatpush3.bf16.msra.mxu0 %v17108_v18  ;;  %15674 = vmatprep.mubr.f32.mxu0 %v23334_v59  ;;  %v23428_v43 = vpop.f32.mrb[12].mxu1  ;;  %v17152_v18 = vpack.c.bf16 %v10985_v52, %v10984_v40 }
 0xc5f   :  { %17113 = vmatprep.subr.bf16.mxu0 %v17112_v9  ;;  %v23430_v10 = vpop.f32.mrb[13].mxu1 }
 0xc61   :  { %15675 = vmatmul.mubr.f32.gmra.mrb[76].mxu0 %v23332_v51 }
 0xc62   :  { %17115 = vmatpush3.bf16.msra.mxu0 %v17112_v9  ;;  %15677 = vmatprep.mubr.f32.mxu0 %v23346_v2  ;;  %v23440_v24 = vpop.f32.mrb[14].mxu1  ;;  %v17156_v9 = vpack.c.bf16 %v10987_v14, %v10986_v38 }
 0xc63   :  { %17117 = vmatprep.subr.bf16.mxu0 %v17116_v8  ;;  %v23442_v19 = vpop.f32.mrb[15].mxu1 }
 0xc65   :  { %15678 = vmatmul.mubr.f32.gmra.mrb[78].mxu0 %v23344_v55 }
 0xc66   :  { %17119 = vmatpush3.bf16.msra.mxu0 %v17116_v8  ;;  %15712 = vmatprep.mubr.f32.mxu0 %v23358_v13  ;;  %v23452_v63 = vpop.f32.mrb[16].mxu1  ;;  %v17160_v8 = vpack.c.bf16 %v10989_v0, %v10988_v56 }
 0xc67   :  { %17121 = vmatprep.subr.bf16.mxu0 %v17120_v20  ;;  %v23454_v60 = vpop.f32.mrb[17].mxu1 }
 0xc69   :  { %15713 = vmatmul.mubr.f32.vlgmr.msra.gmra.mrb[64].mxu0 %v23356_v5 }
 0xc6a   :  { %17123 = vmatpush3.bf16.msra.mxu0 %v17120_v20  ;;  %15715 = vmatprep.mubr.f32.mxu0 %v23370_v32  ;;  %v23464_v51 = vpop.f32.mrb[18].mxu1  ;;  %v17164_v20 = vpack.c.bf16 %v10991_v31, %v10990_v34 }
 0xc6b   :  { %17125 = vmatprep.subr.bf16.mxu0 %v17124_v1  ;;  %v23466_v59 = vpop.f32.mrb[19].mxu1 }
 0xc6d   :  { %15716 = vmatmul.mubr.f32.gmra.mrb[66].mxu0 %v23368_v47 }
 0xc6e   :  { %17127 = vmatpush3.bf16.msra.mxu0 %v17124_v1  ;;  %15718 = vmatprep.mubr.f32.mxu0 %v23382_v22  ;;  %v23476_v55 = vpop.f32.mrb[20].mxu1  ;;  %v17168_v1 = vpack.c.bf16 %v10993_v54, %v10992_v26 }
 0xc6f   :  { %17129 = vmatprep.subr.bf16.mxu0 %v17128_v62  ;;  %v23478_v2 = vpop.f32.mrb[21].mxu1 }
 0xc71   :  { %15719 = vmatmul.mubr.f32.gmra.mrb[68].mxu0 %v23380_v11 }
 0xc72   :  { %17131 = vmatpush3.bf16.msra.mxu0 %v17128_v62  ;;  %15721 = vmatprep.mubr.f32.mxu0 %v23394_v6  ;;  %v23488_v5 = vpop.f32.mrb[22].mxu1  ;;  %v17172_v62 = vpack.c.bf16 %v10995_v15, %v10994_v57 }
 0xc73   :  { %17133 = vmatprep.subr.bf16.mxu0 %v17132_v4  ;;  %v23490_v13 = vpop.f32.mrb[23].mxu1 }
 0xc75   :  { %15722 = vmatmul.mubr.f32.gmra.mrb[70].mxu0 %v23392_v41 }
 0xc76   :  { %17135 = vmatpush3.bf16.msra.mxu0 %v17132_v4  ;;  %15724 = vmatprep.mubr.f32.mxu0 %v23406_v33  ;;  %v23500_v47 = vpop.f32.mrb[24].mxu1  ;;  %v17176_v4 = vpack.c.bf16 %v10997_v30, %v10996_v27 }
 0xc77   :  { %17137 = vmatprep.subr.bf16.mxu0 %v17136_v25  ;;  %v23502_v32 = vpop.f32.mrb[25].mxu1 }
 0xc79   :  { %15725 = vmatmul.mubr.f32.gmra.mrb[72].mxu0 %v23404_v17 }
 0xc7a   :  { %17139 = vmatpush3.bf16.msra.mxu0 %v17136_v25  ;;  %15727 = vmatprep.mubr.f32.mxu0 %v23418_v58  ;;  %v23512_v11 = vpop.f32.mrb[26].mxu1  ;;  %v17180_v25 = vpack.c.bf16 %v10999_v21, %v10998_v37 }
 0xc7b   :  { %17141 = vmatprep.subr.bf16.mxu0 %v17140_v29  ;;  %v23514_v22 = vpop.f32.mrb[27].mxu1 }
 0xc7d   :  { %15728 = vmatmul.mubr.f32.gmra.mrb[74].mxu0 %v23416_v48 }
 0xc7e   :  { %17143 = vmatpush3.bf16.msra.mxu0 %v17140_v29  ;;  %15730 = vmatprep.mubr.f32.mxu0 %v23430_v10  ;;  %v23524_v41 = vpop.f32.mrb[28].mxu1 }
 0xc7f   :  { %17145 = vmatprep.subr.bf16.mxu0 %v17144_v28  ;;  %v23526_v6 = vpop.f32.mrb[29].mxu1 }
 0xc81   :  { %15731 = vmatmul.mubr.f32.gmra.mrb[76].mxu0 %v23428_v43 }
 0xc82   :  { %17147 = vmatpush3.bf16.msra.mxu0 %v17144_v28  ;;  %15733 = vmatprep.mubr.f32.mxu0 %v23442_v19  ;;  %v23536_v17 = vpop.f32.mrb[30].mxu1 }
 0xc83   :  { %17149 = vmatprep.subr.bf16.mxu0 %v17148_v7  ;;  %v23538_v33 = vpop.f32.mrb[31].mxu1 }
 0xc85   :  { %15734 = vmatmul.mubr.f32.gmra.mrb[78].mxu0 %v23440_v24 }
 0xc86   :  { %17151 = vmatpush3.bf16.msra.mxu0 %v17148_v7  ;;  %15768 = vmatprep.mubr.f32.mxu0 %v23454_v60  ;;  %v23548_v48 = vpop.f32.mrb[32].mxu1 }
 0xc87   :  { %17153 = vmatprep.subr.bf16.mxu0 %v17152_v18  ;;  %v8686_v58 = vpop.f32.mrb[33].mxu1 }
 0xc89   :  { %15769 = vmatmul.mubr.f32.vlgmr.msra.gmra.mrb[64].mxu0 %v23452_v63 }
 0xc8a   :  { %17155 = vmatpush3.bf16.msra.mxu0 %v17152_v18  ;;  %15771 = vmatprep.mubr.f32.mxu0 %v23466_v59  ;;  %v23558_v43 = vpop.f32.mrb[34].mxu1 }
 0xc8b   :  { %17157 = vmatprep.subr.bf16.mxu0 %v17156_v9  ;;  %v8696_v10 = vpop.f32.mrb[35].mxu1 }
 0xc8d   :  { %15772 = vmatmul.mubr.f32.gmra.mrb[66].mxu0 %v23464_v51 }
 0xc8e   :  { %17159 = vmatpush3.bf16.msra.mxu0 %v17156_v9  ;;  %15774 = vmatprep.mubr.f32.mxu0 %v23478_v2  ;;  %v23568_v24 = vpop.f32.mrb[36].mxu1 }
 0xc8f   :  { %17161 = vmatprep.subr.bf16.mxu0 %v17160_v8  ;;  %v8706_v19 = vpop.f32.mrb[37].mxu1 }
 0xc91   :  { %15775 = vmatmul.mubr.f32.gmra.mrb[68].mxu0 %v23476_v55 }
 0xc92   :  { %17163 = vmatpush3.bf16.msra.mxu0 %v17160_v8  ;;  %15777 = vmatprep.mubr.f32.mxu0 %v23490_v13  ;;  %v15363_v63 = vpop.f32.mrb[38].mxu1 }
 0xc93   :  { %17165 = vmatprep.subr.bf16.mxu0 %v17164_v20  ;;  %v8716_v60 = vpop.f32.mrb[39].mxu1 }
 0xc95   :  { %15778 = vmatmul.mubr.f32.gmra.mrb[70].mxu0 %v23488_v5 }
 0xc96   :  { %17167 = vmatpush3.bf16.msra.mxu0 %v17164_v20  ;;  %15780 = vmatprep.mubr.f32.mxu0 %v23502_v32  ;;  %v15366_v51 = vpop.f32.mrb[40].mxu1 }
 0xc97   :  { %17169 = vmatprep.subr.bf16.mxu0 %v17168_v1  ;;  %v8726_v59 = vpop.f32.mrb[41].mxu1 }
 0xc99   :  { %15781 = vmatmul.mubr.f32.gmra.mrb[72].mxu0 %v23500_v47 }
 0xc9a   :  { %17171 = vmatpush3.bf16.msra.mxu0 %v17168_v1  ;;  %15783 = vmatprep.mubr.f32.mxu0 %v23514_v22  ;;  %v15369_v55 = vpop.f32.mrb[42].mxu1 }
 0xc9b   :  { %17173 = vmatprep.subr.bf16.mxu0 %v17172_v62  ;;  %v8736_v2 = vpop.f32.mrb[43].mxu1 }
 0xc9d   :  { %15784 = vmatmul.mubr.f32.gmra.mrb[74].mxu0 %v23512_v11 }
 0xc9e   :  { %17175 = vmatpush3.bf16.msra.mxu0 %v17172_v62  ;;  %15786 = vmatprep.mubr.f32.mxu0 %v23526_v6  ;;  %v15372_v5 = vpop.f32.mrb[44].mxu1 }
 0xc9f   :  { %17177 = vmatprep.subr.bf16.mxu0 %v17176_v4  ;;  %v8746_v13 = vpop.f32.mrb[45].mxu1 }
 0xca1   :  { %15787 = vmatmul.mubr.f32.gmra.mrb[76].mxu0 %v23524_v41 }
 0xca2   :  { %17179 = vmatpush3.bf16.msra.mxu0 %v17176_v4  ;;  %15789 = vmatprep.mubr.f32.mxu0 %v23538_v33  ;;  %v15375_v61 = vpop.f32.mrb[46].mxu1 }
 0xca3   :  { %17181 = vmatprep.subr.bf16.mxu0 %v17180_v25  ;;  %v8756_v44 = vpop.f32.mrb[47].mxu1 }
 0xca5   :  { %15790 = vmatmul.mubr.f32.gmra.mrb[78].mxu0 %v23536_v17 }
 0xca6   :  { %17183 = vmatpush3.bf16.msra.mxu0 %v17180_v25  ;;  %15824 = vmatprep.mubr.f32.mxu0 %v8686_v58  ;;  %v15378_v47 = vpop.f32.mrb[48].mxu1 }
 0xca7   :  { %17185 = vmatprep.subr.bf16.mxu0 %v23154_v3  ;;  %v8766_v29 = vpop.f32.mrb[49].mxu1 }
 0xca9   :  { %15825 = vmatmul.mubr.f32.vlgmr.msra.gmra.mrb[64].mxu0 %v23548_v48 }
 0xcaa   :  { %17187 = vmatpush3.bf16.msra.mxu0 %v23154_v3  ;;  %15827 = vmatprep.mubr.f32.mxu0 %v8696_v10  ;;  %v15381_v32 = vpop.f32.mrb[50].mxu1 }
 0xcab   :  { %17189 = vmatprep.subr.bf16.mxu0 %v23176_v39  ;;  %v8776_v49 = vpop.f32.mrb[51].mxu1 }
 0xcad   :  { %15828 = vmatmul.mubr.f32.gmra.mrb[66].mxu0 %v23558_v43 }
 0xcae   :  { %17191 = vmatpush3.bf16.msra.mxu0 %v23176_v39  ;;  %15830 = vmatprep.mubr.f32.mxu0 %v8706_v19  ;;  %v15384_v23 = vpop.f32.mrb[52].mxu1 }
 0xcaf   :  { %17193 = vmatprep.subr.bf16.mxu0 %v23198_v16  ;;  %v8786_v11 = vpop.f32.mrb[53].mxu1 }
 0xcb1   :  { %15831 = vmatmul.mubr.f32.gmra.mrb[68].mxu0 %v23568_v24 }
 0xcb2   :  { %17195 = vmatpush3.bf16.msra.mxu0 %v23198_v16  ;;  %v15387_v28 = vpop.f32.mrb[54].mxu1  ;;  %15833 = vmatprep.mubr.f32.mxu0 %v8716_v60 }
 0xcb3   :  { %v8796_v3 = vpop.f32.mrb[55].mxu1  ;;  %17197 = vmatprep.subr.bf16.mxu0 %v23220_v35 }
 0xcb5   :  { %15834 = vmatmul.mubr.f32.gmra.mrb[70].mxu0 %v15363_v63 }
 0xcb6   :  { %v15390_v22 = vpop.f32.mrb[56].mxu1  ;;  %17199 = vmatpush3.bf16.msra.mxu0 %v23220_v35  ;;  %15836 = vmatprep.mubr.f32.mxu0 %v8726_v59 }
 0xcb7   :  { %v8806_v39 = vpop.f32.mrb[57].mxu1  ;;  %17201 = vmatprep.subr.bf16.mxu0 %v23239_v46 }
 0xcb8   :  { %15892 = vmatprep.mubr.f32.mxu1 %v8806_v39 }
 0xcb9   :  { %15837 = vmatmul.mubr.f32.gmra.mrb[72].mxu0 %v15366_v51  ;;  %15893 = vmatmul.mubr.f32.vlgmr.msra.gmra.mrb[64].mxu1 %v15390_v22 }
 0xcba   :  { %v15393_v50 = vpop.f32.mrb[58].mxu1  ;;  %17203 = vmatpush3.bf16.msra.mxu0 %v23239_v46  ;;  %15839 = vmatprep.mubr.f32.mxu0 %v8736_v2 }
 0xcbb   :  { %v8816_v16 = vpop.f32.mrb[59].mxu1  ;;  %17205 = vmatprep.subr.bf16.mxu0 %v23261_v45 }
 0xcbc   :  { %15895 = vmatprep.mubr.f32.mxu1 %v8816_v16 }
 0xcbd   :  { %15840 = vmatmul.mubr.f32.gmra.mrb[74].mxu0 %v15369_v55  ;;  %15896 = vmatmul.mubr.f32.gmra.mrb[66].mxu1 %v15393_v50 }
 0xcbe   :  { %v15396_v36 = vpop.f32.mrb[60].mxu1  ;;  %17207 = vmatpush3.bf16.msra.mxu0 %v23261_v45  ;;  %15842 = vmatprep.mubr.f32.mxu0 %v8746_v13  ;;  %v10417_v45 = vsub.s32 4, %v18319_v42 }
 0xcbf   :  { %v8826_v35 = vpop.f32.mrb[61].mxu1  ;;  %17209 = vmatprep.subr.bf16.mxu0 %v23283_v53 }
 0xcc0   :  { %15898 = vmatprep.mubr.f32.mxu1 %v8826_v35 }
 0xcc1   :  { %15843 = vmatmul.mubr.f32.gmra.mrb[76].mxu0 %v15372_v5  ;;  %15899 = vmatmul.mubr.f32.gmra.mrb[68].mxu1 %v15396_v36 }
 0xcc2   :  { %v15399_v41 = vpop.f32.mrb[62].mxu1  ;;  %17211 = vmatpush3.bf16.msra.mxu0 %v23283_v53  ;;  %15845 = vmatprep.mubr.f32.mxu0 %v8756_v44  ;;  %v18198_v53 = vld [vmem:[%s23680_s4] sm:$0xff] }
 0xcc3   :  { %v8836_v46 = vpop.f32.mrb[63].mxu1  ;;  %17213 = vmatprep.subr.bf16.mxu0 %v23305_v12  ;;  %v10418_v7 = vrot.slane %v18198_v53, %v10417_v45 }
 0xcc4   :  { %15901 = vmatprep.mubr.f32.mxu1 %v8836_v46 }
 0xcc5   :  { %15846 = vmatmul.mubr.f32.gmra.mrb[78].mxu0 %v15375_v61  ;;  %15902 = vmatmul.mubr.f32.gmra.mrb[70].mxu1 %v15399_v41 }
 0xcc6   :  { %17215 = vmatpush3.bf16.msra.mxu0 %v23305_v12  ;;  %15880 = vmatprep.mubr.f32.mxu0 %v8766_v29 }
 0xcc9   :  { %15881 = vmatmul.mubr.f32.vlgmr.msra.gmra.mrb[64].mxu0 %v15378_v47 }
 0xcca   :  { %15883 = vmatprep.mubr.f32.mxu0 %v8776_v49 }
 0xccd   :  { %15884 = vmatmul.mubr.f32.gmra.mrb[66].mxu0 %v15381_v32 }
 0xcce   :  { %15886 = vmatprep.mubr.f32.mxu0 %v8786_v11 }
 0xcd1   :  { %15887 = vmatmul.mubr.f32.gmra.mrb[68].mxu0 %v15384_v23 }
 0xcd2   :  { %15889 = vmatprep.mubr.f32.mxu0 %v8796_v3 }
 0xcd5   :  { %15890 = vmatmul.mubr.f32.gmra.mrb[70].mxu0 %v15387_v28 }
 0xd8c   :  { %v15838_v6 = vpop.f32.mrb[72].mxu0  ;;  %v15894_v40 = vpop.f32.mrb[64].mxu1 }
 0xd8d   :  { %v17232_v52 = vadd.f32 %v15894_v40, %v15838_v6  ;;  %v10182_v17 = vpop.f32.mrb[73].mxu0  ;;  %v10360_v12 = vpop.f32.mrb[65].mxu1 }
 0xd8e   :  { %v17233_v18 = vadd.f32 %v10360_v12, %v10182_v17 }
 0xd8f   :  { %v10428_v33 = vadd.f32 %v17232_v52, %v10418_v7 }
 0xd90   :  { %v10427_v38 = vadd.f32 %v17233_v18, %v10418_v7  ;;  %v15841_v14 = vpop.f32.mrb[74].mxu0  ;;  %v15897_v48 = vpop.f32.mrb[66].mxu1 }
 0xd91   :  { %10444 = vst [vmem:[%s23681_s5 + $0x48] sm:$0xff] %v10428_v33  ;;  %v17234_v42 = vadd.f32 %v15897_v48, %v15841_v14  ;;  %v10192_v9 = vpop.f32.mrb[75].mxu0  ;;  %v10370_v58 = vpop.f32.mrb[67].mxu1 }
 0xd92   :  { %10443 = vst [vmem:[%s23681_s5 + $0x40] sm:$0xff] %v10427_v38  ;;  %v17235_v56 = vadd.f32 %v10370_v58, %v10192_v9 }
 0xd93   :  { %v10430_v0 = vadd.f32 %v17234_v42, %v10418_v7 }
 0xd94   :  { %v10429_v43 = vadd.f32 %v17235_v56, %v10418_v7  ;;  %v15844_v8 = vpop.f32.mrb[76].mxu0  ;;  %v15900_v10 = vpop.f32.mrb[68].mxu1 }
 0xd95   :  { %10446 = vst [vmem:[%s23681_s5 + $0x58] sm:$0xff] %v10430_v0  ;;  %v17236_v34 = vadd.f32 %v15900_v10, %v15844_v8  ;;  %v10202_v31 = vpop.f32.mrb[77].mxu0  ;;  %v10380_v24 = vpop.f32.mrb[69].mxu1 }
 0xd96   :  { %10445 = vst [vmem:[%s23681_s5 + $0x50] sm:$0xff] %v10429_v43  ;;  %v17237_v20 = vadd.f32 %v10380_v24, %v10202_v31 }
 0xd97   :  { %v10432_v19 = vadd.f32 %v17236_v34, %v10418_v7 }
 0xd98   :  { %v10431_v26 = vadd.f32 %v17237_v20, %v10418_v7  ;;  %v15847_v54 = vpop.f32.mrb[78].mxu0  ;;  %v15903_v63 = vpop.f32.mrb[70].mxu1 }
 0xd99   :  { %10448 = vst [vmem:[%s23681_s5 + $0x68] sm:$0xff] %v10432_v19  ;;  %v17238_v1 = vadd.f32 %v15903_v63, %v15847_v54  ;;  %v10212_v60 = vpop.f32.mrb[79].mxu0  ;;  %v10390_v57 = vpop.f32.mrb[71].mxu1 }
 0xd9a   :  { %10447 = vst [vmem:[%s23681_s5 + $0x60] sm:$0xff] %v10431_v26  ;;  %v17239_v15 = vadd.f32 %v10390_v57, %v10212_v60 }
 0xd9b   :  { %v10434_v51 = vadd.f32 %v17238_v1, %v10418_v7 }
 0xd9c   :  { %v10433_v62 = vadd.f32 %v17239_v15, %v10418_v7  ;;  %v15882_v59 = vpop.f32.mrb[64].mxu0 }
 0xd9d   :  { %10450 = vst [vmem:[%s23681_s5 + $0x78] sm:$0xff] %v10434_v51  ;;  %v10420_v27 = vadd.f32 %v15882_v59, %v10418_v7  ;;  %v10320_v30 = vpop.f32.mrb[65].mxu0 }
 0xd9e   :  { %10449 = vst [vmem:[%s23681_s5 + $0x70] sm:$0xff] %v10433_v62  ;;  %v10419_v55 = vadd.f32 %v10418_v7, %v10320_v30 }
 0xd9f   :  { %10436 = vst [vmem:[%s23681_s5 + $0x8] sm:$0xff] %v10420_v27 }
 0xda0   :  { %10435 = vst [vmem:[%s23681_s5] sm:$0xff] %v10419_v55  ;;  %v15885_v4 = vpop.f32.mrb[66].mxu0 }
 0xda1   :  { %v10422_v2 = vadd.f32 %v15885_v4, %v10418_v7  ;;  %v10330_v37 = vpop.f32.mrb[67].mxu0 }
 0xda2   :  { %v10421_v21 = vadd.f32 %v10418_v7, %v10330_v37 }
 0xda3   :  { %10438 = vst [vmem:[%s23681_s5 + $0x18] sm:$0xff] %v10422_v2 }
 0xda4   :  { %10437 = vst [vmem:[%s23681_s5 + $0x10] sm:$0xff] %v10421_v21  ;;  %v15888_v5 = vpop.f32.mrb[68].mxu0 }
 0xda5   :  { %v10424_v25 = vadd.f32 %v15888_v5, %v10418_v7  ;;  %v10340_v13 = vpop.f32.mrb[69].mxu0 }
 0xda6   :  { %v10423_v61 = vadd.f32 %v10418_v7, %v10340_v13 }
 0xda7   :  { %10440 = vst [vmem:[%s23681_s5 + $0x28] sm:$0xff] %v10424_v25 }
 0xda8   :  { %10439 = vst [vmem:[%s23681_s5 + $0x20] sm:$0xff] %v10423_v61  ;;  %v15891_v44 = vpop.f32.mrb[70].mxu0 }
 0xda9   :  { %v10426_v47 = vadd.f32 %v15891_v44, %v10418_v7  ;;  %v10350_v29 = vpop.f32.mrb[71].mxu0 }
 0xdaa   :  { %v10425_v32 = vadd.f32 %v10418_v7, %v10350_v29 }
 0xdab   :  { %10442 = vst [vmem:[%s23681_s5 + $0x38] sm:$0xff] %v10426_v47 }
 0xdac   :  { %10441 = vst [vmem:[%s23681_s5 + $0x30] sm:$0xff] %v10425_v32 }
 0xdad   :  { %10455 = vsyncpa [#allocation3], 1 }

</bundles_post_ra>
